<compile_context>
chip_gen: v7x
topology: tpu7x:2x2x1
jax: 0.10.0
libtpu: 0.0.40
codegen_flags: <defaults>
</compile_context>

<pallas_src>
import functools

import jax
import jax.numpy as jnp
from jax.experimental import pallas as pl
from jax.experimental.pallas import tpu as pltpu

NEG_SLOPE = 0.01   # nn.LeakyReLU() default
BN_EPS = 1e-5      # nn.BatchNorm2d default
LN_EPS = 1e-5      # nn.LayerNorm default
LANE = 128         # TPU lane width; channel dims are padded to a multiple of this


def _round_up(x, m):
    return (x + m - 1) // m * m


# ---------------------------------------------------------------------------
# Pallas kernels
# ---------------------------------------------------------------------------
def _linear_ln_kernel(x_ref, w_ref, b_ref, g_ref, beta_ref, o_ref):
    """o = leaky_relu(layernorm(x @ w + b) * gamma + beta)."""
    h = jnp.dot(x_ref[...], w_ref[...], preferred_element_type=jnp.float32) + b_ref[...]
    mu = jnp.mean(h, axis=-1, keepdims=True)
    var = jnp.mean(jnp.square(h - mu), axis=-1, keepdims=True)
    hn = (h - mu) * jax.lax.rsqrt(var + LN_EPS)
    y = hn * g_ref[...] + beta_ref[...]
    o_ref[...] = jnp.where(y >= 0, y, NEG_SLOPE * y).astype(o_ref.dtype)


def _conv_kernel(x_ref, w_ref, scale_ref, shift_ref, o_ref, *, kh, kw,
                 apply_act, add_residual):
    """Direct kh x kw conv (in-VMEM im2col) + folded-BN affine [+ LeakyReLU] [+ residual].

    x_ref : (1, H + kh - 1, W8 + kw - 1, C)   spatially padded, width aligned to 8
    w_ref : (kh * kw, C, N)                   regular-conv taps (bf16)
    o_ref : (1, H, W, N)
    """
    _, _, Wp, C = x_ref.shape
    _, H, Wout, N = o_ref.shape
    W8 = Wp - (kw - 1)                         # multiple of 8 by construction

    acc = jnp.zeros((H * W8, N), jnp.float32)
    for dh in range(kh):
        for dw in range(kw):
            patch = x_ref[0, dh:dh + H, dw:dw + W8, :]          # (H, W8, C)
            acc = acc + jnp.dot(patch.reshape(H * W8, C),
                                w_ref[dh * kw + dw],
                                preferred_element_type=jnp.float32)

    y = acc * scale_ref[...] + shift_ref[...]
    if apply_act:
        y = jnp.where(y >= 0, y, NEG_SLOPE * y)
    y = y.reshape(H, W8, N)[:, :Wout, :]
    if add_residual:
        ph, pw = (kh - 1) // 2, (kw - 1) // 2
        y = y + x_ref[0, ph:ph + H, pw:pw + Wout, :].astype(jnp.float32)
    o_ref[0] = y.astype(o_ref.dtype)


def _upscale_kernel(x_ref, w_ref, scale_ref, shift_ref, o_ref):
    """Sub-pixel decomposition of ConvTranspose2d(k=4, s=2, p=1) + BN + LeakyReLU.

    x_ref : (1, H + 2, W8 + 2, C)   input padded by 1 on each spatial side (+W align)
    w_ref : (16, C, N)              [phase(pr,pc) x tap(dh,dw)] 1x1 tap matrices
    o_ref : (1, 4, H, W, N)         4 sub-pixel phases, interleaved by the wrapper
    """
    _, _, Wp, C = x_ref.shape
    _, _, H, Wout, N = o_ref.shape
    W8 = Wp - 2

    for pr in range(2):
        for pc in range(2):
            p = pr * 2 + pc
            acc = jnp.zeros((H * W8, N), jnp.float32)
            for dh in range(2):
                for dw in range(2):
                    patch = x_ref[0, pr + dh:pr + dh + H, pc + dw:pc + dw + W8, :]
                    acc = acc + jnp.dot(patch.reshape(H * W8, C),
                                        w_ref[p * 4 + dh * 2 + dw],
                                        preferred_element_type=jnp.float32)
            y = acc * scale_ref[...] + shift_ref[...]
            y = jnp.where(y >= 0, y, NEG_SLOPE * y)
            o_ref[0, p] = y.reshape(H, W8, N)[:, :Wout, :].astype(o_ref.dtype)


# ---------------------------------------------------------------------------
# Wrappers (pallas_call plumbing + XLA glue)
# ---------------------------------------------------------------------------
def linear_layernorm_lrelu(x, w_t, b, gamma, beta):
    B, K = x.shape
    _, N = w_t.shape
    # TODO(synk): for large n0 this single-block design should be tiled over N
    #             with a two-pass LayerNorm to stay within VMEM.
    return pl.pallas_call(
        _linear_ln_kernel,
        out_shape=jax.ShapeDtypeStruct((B, N), jnp.float32),
        grid=(1,),
        in_specs=[
            pl.BlockSpec((B, K), lambda i: (0, 0)),
            pl.BlockSpec((K, N), lambda i: (0, 0)),
            pl.BlockSpec((1, N), lambda i: (0, 0)),
            pl.BlockSpec((1, N), lambda i: (0, 0)),
            pl.BlockSpec((1, N), lambda i: (0, 0)),
        ],
        out_specs=pl.BlockSpec((B, N), lambda i: (0, 0)),
    )(x, w_t, b.reshape(1, N), gamma.reshape(1, N), beta.reshape(1, N))


def conv_bn_act(x, w_taps, scale, shift, *, kh, kw, apply_act, add_residual,
                out_dtype=jnp.bfloat16):
    """Same-size conv (stride 1) + folded BN [+ LeakyReLU] [+ residual]. NHWC in/out."""
    B, H, W, C = x.shape
    N = w_taps.shape[-1]
    W8 = _round_up(W, 8)
    ph, pw = (kh - 1) // 2, (kw - 1) // 2
    xp = jnp.pad(x, ((0, 0), (ph, kh - 1 - ph), (pw, kw - 1 - pw + W8 - W), (0, 0)))
    Hp, Wp = xp.shape[1], xp.shape[2]
    kernel = functools.partial(_conv_kernel, kh=kh, kw=kw,
                               apply_act=apply_act, add_residual=add_residual)
    return pl.pallas_call(
        kernel,
        out_shape=jax.ShapeDtypeStruct((B, H, W, N), out_dtype),
        grid=(B,),
        in_specs=[
            pl.BlockSpec((1, Hp, Wp, C), lambda b: (b, 0, 0, 0)),
            pl.BlockSpec((kh * kw, C, N), lambda b: (0, 0, 0)),
            pl.BlockSpec((1, N), lambda b: (0, 0)),
            pl.BlockSpec((1, N), lambda b: (0, 0)),
        ],
        out_specs=pl.BlockSpec((1, H, W, N), lambda b: (b, 0, 0, 0)),
        compiler_params=pltpu.CompilerParams(dimension_semantics=("parallel",)),
    )(xp, w_taps, scale, shift)


def upscale_bn_act(x, w_phases, scale, shift, out_dtype=jnp.bfloat16):
    """ConvTranspose2d(4, stride=2, pad=1, bias=False) + BN + LeakyReLU, sub-pixel form."""
    B, H, W, C = x.shape
    N = w_phases.shape[-1]
    W8 = _round_up(W, 8)
    xp = jnp.pad(x, ((0, 0), (1, 1), (1, 1 + W8 - W), (0, 0)))
    Hp, Wp = xp.shape[1], xp.shape[2]
    phases = pl.pallas_call(
        _upscale_kernel,
        out_shape=jax.ShapeDtypeStruct((B, 4, H, W, N), out_dtype),
        grid=(B,),
        in_specs=[
            pl.BlockSpec((1, Hp, Wp, C), lambda b: (b, 0, 0, 0)),
            pl.BlockSpec((16, C, N), lambda b: (0, 0, 0)),
            pl.BlockSpec((1, N), lambda b: (0, 0)),
            pl.BlockSpec((1, N), lambda b: (0, 0)),
        ],
        out_specs=pl.BlockSpec((1, 4, H, W, N), lambda b: (b, 0, 0, 0, 0)),
        compiler_params=pltpu.CompilerParams(dimension_semantics=("parallel",)),
    )(xp, w_phases, scale, shift)
    # Interleave the 4 sub-pixel phases: out[b, 2i+pr, 2j+pc] = phases[b, 2*pr+pc, i, j]
    out = phases.reshape(B, 2, 2, H, W, N).transpose(0, 3, 1, 4, 2, 5)
    return out.reshape(B, 2 * H, 2 * W, N)


# ---------------------------------------------------------------------------
# Weight / BN preparation (small XLA glue)
# ---------------------------------------------------------------------------
def prep_conv_weight(w, c_pad, n_pad):
    """PyTorch ConvTranspose2d weight [C_in, C_out, kh, kw] (stride 1) ->
    equivalent regular-conv taps [kh*kw, c_pad, n_pad] (flipped, channels swapped)."""
    C_in, C_out, kh, kw = w.shape
    w_eq = jnp.flip(w, (2, 3)).transpose(2, 3, 0, 1)                   # [kh, kw, Ci, Co]
    w_eq = jnp.pad(w_eq, ((0, 0), (0, 0), (0, c_pad - C_in), (0, n_pad - C_out)))
    return w_eq.reshape(kh * kw, c_pad, n_pad).astype(jnp.bfloat16)


_KH_TAPS = ((3, 1), (2, 0))   # output phase (even, odd) -> ConvTranspose kernel taps


def prep_upscale_weight(w, c_pad, n_pad):
    """ConvTranspose2d(k=4, s=2, p=1) weight [C_in, C_out, 4, 4] -> 4 sub-pixel
    phases x (2x2) taps, flattened to [16, c_pad, n_pad]."""
    C_in, C_out = w.shape[:2]
    mats = []
    for pr in range(2):
        for pc in range(2):
            for dh in range(2):
                for dw in range(2):
                    mats.append(w[:, :, _KH_TAPS[pr][dh], _KH_TAPS[pc][dw]])
    wp = jnp.stack(mats, 0)                                            # [16, Ci, Co]
    wp = jnp.pad(wp, ((0, 0), (0, c_pad - C_in), (0, n_pad - C_out)))
    return wp.astype(jnp.bfloat16)


def fold_bn(bn, n_pad):
    scale = bn["gamma"] * jax.lax.rsqrt(bn["var"] + BN_EPS)
    shift = bn["beta"] - bn["mean"] * scale
    c = scale.shape[0]
    scale = jnp.pad(scale, (0, n_pad - c), constant_values=1.0)
    shift = jnp.pad(shift, (0, n_pad - c))
    return (scale.reshape(1, n_pad).astype(jnp.float32),
            shift.reshape(1, n_pad).astype(jnp.float32))


# ---------------------------------------------------------------------------
# Parameters (deterministic, synthetic) + forward pass
# ---------------------------------------------------------------------------
def _init_bn(key, c):
    k1, k2, k3, k4 = jax.random.split(key, 4)
    return {
        "gamma": 1.0 + 0.1 * jax.random.normal(k1, (c,), jnp.float32),
        "beta": 0.1 * jax.random.normal(k2, (c,), jnp.float32),
        "mean": 0.1 * jax.random.normal(k3, (c,), jnp.float32),
        "var": jax.random.uniform(k4, (c,), jnp.float32, minval=0.5, maxval=1.5),
    }


def init_decoder_params(key, nc, nfilters, latent_size, nlayers, res_layers, output_size):
    scale_factor = 1 << nlayers
    start_nfilters = nfilters * scale_factor
    start_size = output_size // scale_factor
    n0 = start_size * start_size * start_nfilters
    keys = iter(jax.random.split(key, 128))

    p = {}
    p["lin_w"] = 0.1 * jax.random.normal(next(keys), (latent_size, n0), jnp.float32)  # transposed
    p["lin_b"] = 0.1 * jax.random.normal(next(keys), (n0,), jnp.float32)
    p["ln_g"] = 1.0 + 0.1 * jax.random.normal(next(keys), (n0,), jnp.float32)
    p["ln_b"] = 0.1 * jax.random.normal(next(keys), (n0,), jnp.float32)

    layers = []
    for i in range(nlayers):
        nf = nfilters * (1 << (nlayers - i))
        layer = {
            "up_w": 0.1 * jax.random.normal(next(keys), (nf, nf // 2, 4, 4), jnp.float32),
            "up_bn": _init_bn(next(keys), nf // 2),
            "res": [{
                "w": 0.1 * jax.random.normal(next(keys), (nf // 2, nf // 2, 3, 3), jnp.float32),
                "bn": _init_bn(next(keys), nf // 2),
            } for _ in range(res_layers)],
        }
        layers.append(layer)
    p["layers"] = layers

    p["bot_w"] = 0.1 * jax.random.normal(next(keys), (nfilters, nc, 1, 1), jnp.float32)
    p["bot_b"] = 0.1 * jax.random.normal(next(keys), (nc,), jnp.float32)
    return p


def decoder_forward(params, x, cfg):
    nc, nfilters, latent_size, nlayers, res_layers, output_size = cfg
    B = x.shape[0]
    scale_factor = 1 << nlayers
    f = nfilters * scale_factor
    s = output_size // scale_factor

    # self.start: Linear + LayerNorm + LeakyReLU + Rearrange 'b (f h w) -> b f h w'
    h = linear_layernorm_lrelu(x, params["lin_w"], params["lin_b"],
                               params["ln_g"], params["ln_b"])
    h = h.reshape(B, f, s, s).transpose(0, 2, 3, 1)                 # NCHW -> NHWC
    cpad = _round_up(f, LANE)
    h = jnp.pad(h, ((0, 0), (0, 0), (0, 0), (0, cpad - f))).astype(jnp.bfloat16)

    # DecoderLayers
    for layer in params["layers"]:
        c_in, c_out = layer["up_w"].shape[0], layer["up_w"].shape[1]
        cp_in, cp_out = _round_up(c_in, LANE), _round_up(c_out, LANE)
        wq = prep_upscale_weight(layer["up_w"], cp_in, cp_out)
        sc, sh = fold_bn(layer["up_bn"], cp_out)
        h = upscale_bn_act(h, wq, sc, sh)
        for res in layer["res"]:
            wr = prep_conv_weight(res["w"], cp_out, cp_out)
            sc, sh = fold_bn(res["bn"], cp_out)
            h = conv_bn_act(h, wr, sc, sh, kh=3, kw=3,
                            apply_act=True, add_residual=True)      # x + lrelu(bn(conv(x)))

    # bottleneck: ConvTranspose2d(nfilters, nc, 1, bias=True) == pointwise linear.
    # TODO(synk): could be fused into the last residual conv's epilogue to save
    #             one pass over the largest activation.
    cp_in, cp_out = _round_up(nfilters, LANE), _round_up(nc, LANE)
    wb = prep_conv_weight(params["bot_w"], cp_in, cp_out)
    ones = jnp.ones((1, cp_out), jnp.float32)
    bias = jnp.pad(params["bot_b"], (0, cp_out - nc)).reshape(1, cp_out).astype(jnp.float32)
    out = conv_bn_act(h, wb, ones, bias, kh=1, kw=1, apply_act=False,
                      add_residual=False, out_dtype=jnp.float32)
    return out[..., :nc].transpose(0, 3, 1, 2)                      # NHWC -> NCHW


if __name__ == "__main__":
    # Small, self-consistent config: output 16x16, 2 DecoderLayers, 1 res layer each.
    nc, nfilters, latent_size, nlayers, res_layers, output_size = 3, 4, 32, 2, 1, 16
    batch = 2
    cfg = (nc, nfilters, latent_size, nlayers, res_layers, output_size)

    key = jax.random.PRNGKey(0)
    pkey, xkey = jax.random.split(key)
    params = init_decoder_params(pkey, nc, nfilters, latent_size, nlayers,
                                 res_layers, output_size)
    x = jax.random.normal(xkey, (batch, latent_size), jnp.float32)

    fwd = jax.jit(lambda p, xin: decoder_forward(p, xin, cfg))
    images = jax.block_until_ready(fwd(params, x))

    assert images.shape == (batch, nc, output_size, output_size), images.shape
    assert bool(jnp.all(jnp.isfinite(images)))
    print("KERNEL_OK")
</pallas_src>

<mosaic_0001>
module attributes {stable_mosaic.version = 11 : i64} {
  func.func @_linear_ln_kernel(%arg0: i32, %arg1: memref<2x32xf32, #tpu.memory_space<vmem>>, %arg2: memref<32x256xf32, #tpu.memory_space<vmem>>, %arg3: memref<1x256xf32, #tpu.memory_space<vmem>>, %arg4: memref<1x256xf32, #tpu.memory_space<vmem>>, %arg5: memref<1x256xf32, #tpu.memory_space<vmem>>, %arg6: memref<2x256xf32, #tpu.memory_space<vmem>>) attributes {dimension_semantics = [#tpu.dimension_semantics<arbitrary>], iteration_bounds = array<i64: 1>, scalar_prefetch = 0 : i64, scratch_operands = 0 : i64, tpu.core_type = #tpu.core_type<tc>, window_params = [{pipeline_mode = #tpu.pipeline_mode<synchronous>, transform_indices = @transform_0, window_bounds = array<i64: 2, 32>}, {pipeline_mode = #tpu.pipeline_mode<synchronous>, transform_indices = @transform_1, window_bounds = array<i64: 32, 256>}, {pipeline_mode = #tpu.pipeline_mode<synchronous>, transform_indices = @transform_2, window_bounds = array<i64: 1, 256>}, {pipeline_mode = #tpu.pipeline_mode<synchronous>, transform_indices = @transform_3, window_bounds = array<i64: 1, 256>}, {pipeline_mode = #tpu.pipeline_mode<synchronous>, transform_indices = @transform_4, window_bounds = array<i64: 1, 256>}, {pipeline_mode = #tpu.pipeline_mode<synchronous>, transform_indices = @transform_5, window_bounds = array<i64: 2, 256>}]} {
    %c0 = arith.constant 0 : index
    %c0_0 = arith.constant 0 : index
    %0 = vector.load %arg1[%c0, %c0_0] : memref<2x32xf32, #tpu.memory_space<vmem>>, vector<2x32xf32>
    %c0_1 = arith.constant 0 : index
    %c0_2 = arith.constant 0 : index
    %1 = vector.load %arg2[%c0_1, %c0_2] : memref<32x256xf32, #tpu.memory_space<vmem>>, vector<32x256xf32>
    %cst = arith.constant dense<0.000000e+00> : vector<2x256xf32>
    %2 = tpu.matmul %0, %1, %cst {dimension_numbers = #tpu.dot_dimension_numbers<[1], [0], [0], [1], [0, 0, 1, 1], [], []>} : vector<2x32xf32>, vector<32x256xf32>, vector<2x256xf32> -> vector<2x256xf32>
    %c0_3 = arith.constant 0 : index
    %c0_4 = arith.constant 0 : index
    %3 = vector.load %arg3[%c0_3, %c0_4] : memref<1x256xf32, #tpu.memory_space<vmem>>, vector<1x256xf32>
    %4 = vector.broadcast %3 : vector<1x256xf32> to vector<2x256xf32>
    %5 = arith.addf %2, %4 : vector<2x256xf32>
    %cst_5 = arith.constant dense<0.000000e+00> : vector<2xf32>
    %6 = vector.multi_reduction <add>, %5, %cst_5 [1] : vector<2x256xf32> to vector<2xf32>
    %7 = vector.shape_cast %6 : vector<2xf32> to vector<2x1xf32>
    %cst_6 = arith.constant 2.560000e+02 : f32
    %8 = vector.broadcast %cst_6 : f32 to vector<2x1xf32>
    %9 = arith.divf %7, %8 : vector<2x1xf32>
    %10 = vector.broadcast %9 : vector<2x1xf32> to vector<2x256xf32>
    %11 = arith.subf %5, %10 : vector<2x256xf32>
    %12 = arith.mulf %11, %11 : vector<2x256xf32>
    %cst_7 = arith.constant dense<0.000000e+00> : vector<2xf32>
    %13 = vector.multi_reduction <add>, %12, %cst_7 [1] : vector<2x256xf32> to vector<2xf32>
    %14 = vector.shape_cast %13 : vector<2xf32> to vector<2x1xf32>
    %cst_8 = arith.constant 2.560000e+02 : f32
    %15 = vector.broadcast %cst_8 : f32 to vector<2x1xf32>
    %16 = arith.divf %14, %15 : vector<2x1xf32>
    %17 = vector.broadcast %9 : vector<2x1xf32> to vector<2x256xf32>
    %18 = arith.subf %5, %17 : vector<2x256xf32>
    %cst_9 = arith.constant 9.99999974E-6 : f32
    %19 = vector.broadcast %cst_9 : f32 to vector<2x1xf32>
    %20 = arith.addf %16, %19 : vector<2x1xf32>
    %21 = math.rsqrt %20 : vector<2x1xf32>
    %22 = vector.broadcast %21 : vector<2x1xf32> to vector<2x256xf32>
    %23 = arith.mulf %18, %22 : vector<2x256xf32>
    %c0_10 = arith.constant 0 : index
    %c0_11 = arith.constant 0 : index
    %24 = vector.load %arg4[%c0_10, %c0_11] : memref<1x256xf32, #tpu.memory_space<vmem>>, vector<1x256xf32>
    %25 = vector.broadcast %24 : vector<1x256xf32> to vector<2x256xf32>
    %26 = arith.mulf %23, %25 : vector<2x256xf32>
    %c0_12 = arith.constant 0 : index
    %c0_13 = arith.constant 0 : index
    %27 = vector.load %arg5[%c0_12, %c0_13] : memref<1x256xf32, #tpu.memory_space<vmem>>, vector<1x256xf32>
    %28 = vector.broadcast %27 : vector<1x256xf32> to vector<2x256xf32>
    %29 = arith.addf %26, %28 : vector<2x256xf32>
    %cst_14 = arith.constant 0.000000e+00 : f32
    %30 = vector.broadcast %cst_14 : f32 to vector<2x256xf32>
    %31 = arith.cmpf oge, %29, %30 : vector<2x256xf32>
    %cst_15 = arith.constant 0.00999999977 : f32
    %32 = vector.broadcast %cst_15 : f32 to vector<2x256xf32>
    %33 = arith.mulf %32, %29 : vector<2x256xf32>
    %34 = arith.select %31, %29, %33 : vector<2x256xi1>, vector<2x256xf32>
    %c0_16 = arith.constant 0 : index
    %c0_17 = arith.constant 0 : index
    %35 = vector.load %arg6[%c0_16, %c0_17] : memref<2x256xf32, #tpu.memory_space<vmem>>, vector<2x256xf32>
    tpu.vector_store %arg6[%c0_16, %c0_17], %34 {strides = array<i32>} : memref<2x256xf32, #tpu.memory_space<vmem>>, vector<2x256xf32>,
    return
  }
  func.func @transform_0(%arg0: i32) -> (i32, i32) {
    %c0_i32 = arith.constant 0 : i32
    %c0_i32_0 = arith.constant 0 : i32
    %c0_i32_1 = arith.constant 0 : i32
    return %c0_i32, %c0_i32_0 : i32, i32
  }
  func.func @transform_1(%arg0: i32) -> (i32, i32) {
    %c0_i32 = arith.constant 0 : i32
    %c0_i32_0 = arith.constant 0 : i32
    %c0_i32_1 = arith.constant 0 : i32
    return %c0_i32, %c0_i32_0 : i32, i32
  }
  func.func @transform_2(%arg0: i32) -> (i32, i32) {
    %c0_i32 = arith.constant 0 : i32
    %c0_i32_0 = arith.constant 0 : i32
    %c0_i32_1 = arith.constant 0 : i32
    return %c0_i32, %c0_i32_0 : i32, i32
  }
  func.func @transform_3(%arg0: i32) -> (i32, i32) {
    %c0_i32 = arith.constant 0 : i32
    %c0_i32_0 = arith.constant 0 : i32
    %c0_i32_1 = arith.constant 0 : i32
    return %c0_i32, %c0_i32_0 : i32, i32
  }
  func.func @transform_4(%arg0: i32) -> (i32, i32) {
    %c0_i32 = arith.constant 0 : i32
    %c0_i32_0 = arith.constant 0 : i32
    %c0_i32_1 = arith.constant 0 : i32
    return %c0_i32, %c0_i32_0 : i32, i32
  }
  func.func @transform_5(%arg0: i32) -> (i32, i32) {
    %c0_i32 = arith.constant 0 : i32
    %c0_i32_0 = arith.constant 0 : i32
    %c0_i32_1 = arith.constant 0 : i32
    return %c0_i32, %c0_i32_0 : i32, i32
  }
}

module attributes {stable_mosaic.version = 11 : i64} {
  func.func @_upscale_kernel(%arg0: i32, %arg1: memref<1x6x10x128xbf16, #tpu.memory_space<vmem>>, %arg2: memref<16x128x128xbf16, #tpu.memory_space<vmem>>, %arg3: memref<1x128xf32, #tpu.memory_space<vmem>>, %arg4: memref<1x128xf32, #tpu.memory_space<vmem>>, %arg5: memref<1x4x4x4x128xbf16, #tpu.memory_space<vmem>>) attributes {dimension_semantics = [#tpu.dimension_semantics<parallel>], iteration_bounds = array<i64: 2>, scalar_prefetch = 0 : i64, scratch_operands = 0 : i64, tpu.core_type = #tpu.core_type<tc>, window_params = [{transform_indices = @transform_0, window_bounds = array<i64: 1, 6, 10, 128>}, {pipeline_mode = #tpu.pipeline_mode<synchronous>, transform_indices = @transform_1, window_bounds = array<i64: 16, 128, 128>}, {pipeline_mode = #tpu.pipeline_mode<synchronous>, transform_indices = @transform_2, window_bounds = array<i64: 1, 128>}, {pipeline_mode = #tpu.pipeline_mode<synchronous>, transform_indices = @transform_3, window_bounds = array<i64: 1, 128>}, {transform_indices = @transform_4, window_bounds = array<i64: 1, 4, 4, 4, 128>}]} {
    %cst = arith.constant 0.000000e+00 : f32
    %0 = vector.broadcast %cst : f32 to vector<32x128xf32>
    %c0 = arith.constant 0 : index
    %c0_0 = arith.constant 0 : index
    %c0_1 = arith.constant 0 : index
    %c0_2 = arith.constant 0 : index
    %1 = vector.load %arg1[%c0, %c0_0, %c0_1, %c0_2] : memref<1x6x10x128xbf16, #tpu.memory_space<vmem>>, vector<1x4x8x128xbf16>
    %2 = vector.shape_cast %1 : vector<1x4x8x128xbf16> to vector<4x8x128xbf16>
    %3 = vector.shape_cast %2 : vector<4x8x128xbf16> to vector<32x128xbf16>
    %c0_3 = arith.constant 0 : index
    %c0_4 = arith.constant 0 : index
    %c0_5 = arith.constant 0 : index
    %4 = vector.load %arg2[%c0_3, %c0_4, %c0_5] : memref<16x128x128xbf16, #tpu.memory_space<vmem>>, vector<1x128x128xbf16>
    %5 = vector.shape_cast %4 : vector<1x128x128xbf16> to vector<128x128xbf16>
    %cst_6 = arith.constant dense<0.000000e+00> : vector<32x128xf32>
    %6 = tpu.matmul %3, %5, %cst_6 {dimension_numbers = #tpu.dot_dimension_numbers<[1], [0], [0], [1], [0, 0, 1, 1], [], []>} : vector<32x128xbf16>, vector<128x128xbf16>, vector<32x128xf32> -> vector<32x128xf32>
    %7 = arith.addf %0, %6 : vector<32x128xf32>
    %c0_7 = arith.constant 0 : index
    %c0_8 = arith.constant 0 : index
    %c1 = arith.constant 1 : index
    %c0_9 = arith.constant 0 : index
    %8 = vector.load %arg1[%c0_7, %c0_8, %c1, %c0_9] : memref<1x6x10x128xbf16, #tpu.memory_space<vmem>>, vector<1x4x8x128xbf16>
    %9 = vector.shape_cast %8 : vector<1x4x8x128xbf16> to vector<4x8x128xbf16>
    %10 = vector.shape_cast %9 : vector<4x8x128xbf16> to vector<32x128xbf16>
    %c1_10 = arith.constant 1 : index
    %c0_11 = arith.constant 0 : index
    %c0_12 = arith.constant 0 : index
    %11 = vector.load %arg2[%c1_10, %c0_11, %c0_12] : memref<16x128x128xbf16, #tpu.memory_space<vmem>>, vector<1x128x128xbf16>
    %12 = vector.shape_cast %11 : vector<1x128x128xbf16> to vector<128x128xbf16>
    %cst_13 = arith.constant dense<0.000000e+00> : vector<32x128xf32>
    %13 = tpu.matmul %10, %12, %cst_13 {dimension_numbers = #tpu.dot_dimension_numbers<[1], [0], [0], [1], [0, 0, 1, 1], [], []>} : vector<32x128xbf16>, vector<128x128xbf16>, vector<32x128xf32> -> vector<32x128xf32>
    %14 = arith.addf %7, %13 : vector<32x128xf32>
    %c0_14 = arith.constant 0 : index
    %c1_15 = arith.constant 1 : index
    %c0_16 = arith.constant 0 : index
    %c0_17 = arith.constant 0 : index
    %15 = vector.load %arg1[%c0_14, %c1_15, %c0_16, %c0_17] : memref<1x6x10x128xbf16, #tpu.memory_space<vmem>>, vector<1x4x8x128xbf16>
    %16 = vector.shape_cast %15 : vector<1x4x8x128xbf16> to vector<4x8x128xbf16>
    %17 = vector.shape_cast %16 : vector<4x8x128xbf16> to vector<32x128xbf16>
    %c2 = arith.constant 2 : index
    %c0_18 = arith.constant 0 : index
    %c0_19 = arith.constant 0 : index
    %18 = vector.load %arg2[%c2, %c0_18, %c0_19] : memref<16x128x128xbf16, #tpu.memory_space<vmem>>, vector<1x128x128xbf16>
    %19 = vector.shape_cast %18 : vector<1x128x128xbf16> to vector<128x128xbf16>
    %cst_20 = arith.constant dense<0.000000e+00> : vector<32x128xf32>
    %20 = tpu.matmul %17, %19, %cst_20 {dimension_numbers = #tpu.dot_dimension_numbers<[1], [0], [0], [1], [0, 0, 1, 1], [], []>} : vector<32x128xbf16>, vector<128x128xbf16>, vector<32x128xf32> -> vector<32x128xf32>
    %21 = arith.addf %14, %20 : vector<32x128xf32>
    %c0_21 = arith.constant 0 : index
    %c1_22 = arith.constant 1 : index
    %c1_23 = arith.constant 1 : index
    %c0_24 = arith.constant 0 : index
    %22 = vector.load %arg1[%c0_21, %c1_22, %c1_23, %c0_24] : memref<1x6x10x128xbf16, #tpu.memory_space<vmem>>, vector<1x4x8x128xbf16>
    %23 = vector.shape_cast %22 : vector<1x4x8x128xbf16> to vector<4x8x128xbf16>
    %24 = vector.shape_cast %23 : vector<4x8x128xbf16> to vector<32x128xbf16>
    %c3 = arith.constant 3 : index
    %c0_25 = arith.constant 0 : index
    %c0_26 = arith.constant 0 : index
    %25 = vector.load %arg2[%c3, %c0_25, %c0_26] : memref<16x128x128xbf16, #tpu.memory_space<vmem>>, vector<1x128x128xbf16>
    %26 = vector.shape_cast %25 : vector<1x128x128xbf16> to vector<128x128xbf16>
    %cst_27 = arith.constant dense<0.000000e+00> : vector<32x128xf32>
    %27 = tpu.matmul %24, %26, %cst_27 {dimension_numbers = #tpu.dot_dimension_numbers<[1], [0], [0], [1], [0, 0, 1, 1], [], []>} : vector<32x128xbf16>, vector<128x128xbf16>, vector<32x128xf32> -> vector<32x128xf32>
    %28 = arith.addf %21, %27 : vector<32x128xf32>
    %c0_28 = arith.constant 0 : index
    %c0_29 = arith.constant 0 : index
    %29 = vector.load %arg3[%c0_28, %c0_29] : memref<1x128xf32, #tpu.memory_space<vmem>>, vector<1x128xf32>
    %30 = vector.broadcast %29 : vector<1x128xf32> to vector<32x128xf32>
    %31 = arith.mulf %28, %30 : vector<32x128xf32>
    %c0_30 = arith.constant 0 : index
    %c0_31 = arith.constant 0 : index
    %32 = vector.load %arg4[%c0_30, %c0_31] : memref<1x128xf32, #tpu.memory_space<vmem>>, vector<1x128xf32>
    %33 = vector.broadcast %32 : vector<1x128xf32> to vector<32x128xf32>
    %34 = arith.addf %31, %33 : vector<32x128xf32>
    %cst_32 = arith.constant 0.000000e+00 : f32
    %35 = vector.broadcast %cst_32 : f32 to vector<32x128xf32>
    %36 = arith.cmpf oge, %34, %35 : vector<32x128xf32>
    %cst_33 = arith.constant 0.00999999977 : f32
    %37 = vector.broadcast %cst_33 : f32 to vector<32x128xf32>
    %38 = arith.mulf %37, %34 : vector<32x128xf32>
    %39 = arith.select %36, %34, %38 : vector<32x128xi1>, vector<32x128xf32>
    %40 = vector.shape_cast %39 : vector<32x128xf32> to vector<4x8x128xf32>
    %41 = vector.extract_strided_slice %40 {offsets = [0, 0, 0], sizes = [4, 4, 128], strides = [1, 1, 1]} : vector<4x8x128xf32> to vector<4x4x128xf32>
    %42 = arith.truncf %41 : vector<4x4x128xf32> to vector<4x4x128xbf16>
    %c0_34 = arith.constant 0 : index
    %c0_35 = arith.constant 0 : index
    %c0_36 = arith.constant 0 : index
    %c0_37 = arith.constant 0 : index
    %c0_38 = arith.constant 0 : index
    %43 = vector.load %arg5[%c0_34, %c0_35, %c0_36, %c0_37, %c0_38] : memref<1x4x4x4x128xbf16, #tpu.memory_space<vmem>>, vector<1x1x4x4x128xbf16>
    %44 = vector.shape_cast %43 : vector<1x1x4x4x128xbf16> to vector<4x4x128xbf16>
    %45 = vector.shape_cast %42 : vector<4x4x128xbf16> to vector<1x1x4x4x128xbf16>
    tpu.vector_store %arg5[%c0_34, %c0_35, %c0_36, %c0_37, %c0_38], %45 {strides = array<i32>} : memref<1x4x4x4x128xbf16, #tpu.memory_space<vmem>>, vector<1x1x4x4x128xbf16>,
    %cst_39 = arith.constant 0.000000e+00 : f32
    %46 = vector.broadcast %cst_39 : f32 to vector<32x128xf32>
    %c0_40 = arith.constant 0 : index
    %c0_41 = arith.constant 0 : index
    %c1_42 = arith.constant 1 : index
    %c0_43 = arith.constant 0 : index
    %47 = vector.load %arg1[%c0_40, %c0_41, %c1_42, %c0_43] : memref<1x6x10x128xbf16, #tpu.memory_space<vmem>>, vector<1x4x8x128xbf16>
    %48 = vector.shape_cast %47 : vector<1x4x8x128xbf16> to vector<4x8x128xbf16>
    %49 = vector.shape_cast %48 : vector<4x8x128xbf16> to vector<32x128xbf16>
    %c4 = arith.constant 4 : index
    %c0_44 = arith.constant 0 : index
    %c0_45 = arith.constant 0 : index
    %50 = vector.load %arg2[%c4, %c0_44, %c0_45] : memref<16x128x128xbf16, #tpu.memory_space<vmem>>, vector<1x128x128xbf16>
    %51 = vector.shape_cast %50 : vector<1x128x128xbf16> to vector<128x128xbf16>
    %cst_46 = arith.constant dense<0.000000e+00> : vector<32x128xf32>
    %52 = tpu.matmul %49, %51, %cst_46 {dimension_numbers = #tpu.dot_dimension_numbers<[1], [0], [0], [1], [0, 0, 1, 1], [], []>} : vector<32x128xbf16>, vector<128x128xbf16>, vector<32x128xf32> -> vector<32x128xf32>
    %53 = arith.addf %46, %52 : vector<32x128xf32>
    %c0_47 = arith.constant 0 : index
    %c0_48 = arith.constant 0 : index
    %c2_49 = arith.constant 2 : index
    %c0_50 = arith.constant 0 : index
    %54 = vector.load %arg1[%c0_47, %c0_48, %c2_49, %c0_50] : memref<1x6x10x128xbf16, #tpu.memory_space<vmem>>, vector<1x4x8x128xbf16>
    %55 = vector.shape_cast %54 : vector<1x4x8x128xbf16> to vector<4x8x128xbf16>
    %56 = vector.shape_cast %55 : vector<4x8x128xbf16> to vector<32x128xbf16>
    %c5 = arith.constant 5 : index
    %c0_51 = arith.constant 0 : index
    %c0_52 = arith.constant 0 : index
    %57 = vector.load %arg2[%c5, %c0_51, %c0_52] : memref<16x128x128xbf16, #tpu.memory_space<vmem>>, vector<1x128x128xbf16>
    %58 = vector.shape_cast %57 : vector<1x128x128xbf16> to vector<128x128xbf16>
    %cst_53 = arith.constant dense<0.000000e+00> : vector<32x128xf32>
    %59 = tpu.matmul %56, %58, %cst_53 {dimension_numbers = #tpu.dot_dimension_numbers<[1], [0], [0], [1], [0, 0, 1, 1], [], []>} : vector<32x128xbf16>, vector<128x128xbf16>, vector<32x128xf32> -> vector<32x128xf32>
    %60 = arith.addf %53, %59 : vector<32x128xf32>
    %c0_54 = arith.constant 0 : index
    %c1_55 = arith.constant 1 : index
    %c1_56 = arith.constant 1 : index
    %c0_57 = arith.constant 0 : index
    %61 = vector.load %arg1[%c0_54, %c1_55, %c1_56, %c0_57] : memref<1x6x10x128xbf16, #tpu.memory_space<vmem>>, vector<1x4x8x128xbf16>
    %62 = vector.shape_cast %61 : vector<1x4x8x128xbf16> to vector<4x8x128xbf16>
    %63 = vector.shape_cast %62 : vector<4x8x128xbf16> to vector<32x128xbf16>
    %c6 = arith.constant 6 : index
    %c0_58 = arith.constant 0 : index
    %c0_59 = arith.constant 0 : index
    %64 = vector.load %arg2[%c6, %c0_58, %c0_59] : memref<16x128x128xbf16, #tpu.memory_space<vmem>>, vector<1x128x128xbf16>
    %65 = vector.shape_cast %64 : vector<1x128x128xbf16> to vector<128x128xbf16>
    %cst_60 = arith.constant dense<0.000000e+00> : vector<32x128xf32>
    %66 = tpu.matmul %63, %65, %cst_60 {dimension_numbers = #tpu.dot_dimension_numbers<[1], [0], [0], [1], [0, 0, 1, 1], [], []>} : vector<32x128xbf16>, vector<128x128xbf16>, vector<32x128xf32> -> vector<32x128xf32>
    %67 = arith.addf %60, %66 : vector<32x128xf32>
    %c0_61 = arith.constant 0 : index
    %c1_62 = arith.constant 1 : index
    %c2_63 = arith.constant 2 : index
    %c0_64 = arith.constant 0 : index
    %68 = vector.load %arg1[%c0_61, %c1_62, %c2_63, %c0_64] : memref<1x6x10x128xbf16, #tpu.memory_space<vmem>>, vector<1x4x8x128xbf16>
    %69 = vector.shape_cast %68 : vector<1x4x8x128xbf16> to vector<4x8x128xbf16>
    %70 = vector.shape_cast %69 : vector<4x8x128xbf16> to vector<32x128xbf16>
    %c7 = arith.constant 7 : index
    %c0_65 = arith.constant 0 : index
    %c0_66 = arith.constant 0 : index
    %71 = vector.load %arg2[%c7, %c0_65, %c0_66] : memref<16x128x128xbf16, #tpu.memory_space<vmem>>, vector<1x128x128xbf16>
    %72 = vector.shape_cast %71 : vector<1x128x128xbf16> to vector<128x128xbf16>
    %cst_67 = arith.constant dense<0.000000e+00> : vector<32x128xf32>
    %73 = tpu.matmul %70, %72, %cst_67 {dimension_numbers = #tpu.dot_dimension_numbers<[1], [0], [0], [1], [0, 0, 1, 1], [], []>} : vector<32x128xbf16>, vector<128x128xbf16>, vector<32x128xf32> -> vector<32x128xf32>
    %74 = arith.addf %67, %73 : vector<32x128xf32>
    %c0_68 = arith.constant 0 : index
    %c0_69 = arith.constant 0 : index
    %75 = vector.load %arg3[%c0_68, %c0_69] : memref<1x128xf32, #tpu.memory_space<vmem>>, vector<1x128xf32>
    %76 = vector.broadcast %75 : vector<1x128xf32> to vector<32x128xf32>
    %77 = arith.mulf %74, %76 : vector<32x128xf32>
    %c0_70 = arith.constant 0 : index
    %c0_71 = arith.constant 0 : index
    %78 = vector.load %arg4[%c0_70, %c0_71] : memref<1x128xf32, #tpu.memory_space<vmem>>, vector<1x128xf32>
    %79 = vector.broadcast %78 : vector<1x128xf32> to vector<32x128xf32>
    %80 = arith.addf %77, %79 : vector<32x128xf32>
    %cst_72 = arith.constant 0.000000e+00 : f32
    %81 = vector.broadcast %cst_72 : f32 to vector<32x128xf32>
    %82 = arith.cmpf oge, %80, %81 : vector<32x128xf32>
    %cst_73 = arith.constant 0.00999999977 : f32
    %83 = vector.broadcast %cst_73 : f32 to vector<32x128xf32>
    %84 = arith.mulf %83, %80 : vector<32x128xf32>
    %85 = arith.select %82, %80, %84 : vector<32x128xi1>, vector<32x128xf32>
    %86 = vector.shape_cast %85 : vector<32x128xf32> to vector<4x8x128xf32>
    %87 = vector.extract_strided_slice %86 {offsets = [0, 0, 0], sizes = [4, 4, 128], strides = [1, 1, 1]} : vector<4x8x128xf32> to vector<4x4x128xf32>
    %88 = arith.truncf %87 : vector<4x4x128xf32> to vector<4x4x128xbf16>
    %c0_74 = arith.constant 0 : index
    %c1_75 = arith.constant 1 : index
    %c0_76 = arith.constant 0 : index
    %c0_77 = arith.constant 0 : index
    %c0_78 = arith.constant 0 : index
    %89 = vector.load %arg5[%c0_74, %c1_75, %c0_76, %c0_77, %c0_78] : memref<1x4x4x4x128xbf16, #tpu.memory_space<vmem>>, vector<1x1x4x4x128xbf16>
    %90 = vector.shape_cast %89 : vector<1x1x4x4x128xbf16> to vector<4x4x128xbf16>
    %91 = vector.shape_cast %88 : vector<4x4x128xbf16> to vector<1x1x4x4x128xbf16>
    tpu.vector_store %arg5[%c0_74, %c1_75, %c0_76, %c0_77, %c0_78], %91 {strides = array<i32>} : memref<1x4x4x4x128xbf16, #tpu.memory_space<vmem>>, vector<1x1x4x4x128xbf16>,
    %cst_79 = arith.constant 0.000000e+00 : f32
    %92 = vector.broadcast %cst_79 : f32 to vector<32x128xf32>
    %c0_80 = arith.constant 0 : index
    %c1_81 = arith.constant 1 : index
    %c0_82 = arith.constant 0 : index
    %c0_83 = arith.constant 0 : index
    %93 = vector.load %arg1[%c0_80, %c1_81, %c0_82, %c0_83] : memref<1x6x10x128xbf16, #tpu.memory_space<vmem>>, vector<1x4x8x128xbf16>
    %94 = vector.shape_cast %93 : vector<1x4x8x128xbf16> to vector<4x8x128xbf16>
    %95 = vector.shape_cast %94 : vector<4x8x128xbf16> to vector<32x128xbf16>
    %c8 = arith.constant 8 : index
    %c0_84 = arith.constant 0 : index
    %c0_85 = arith.constant 0 : index
    %96 = vector.load %arg2[%c8, %c0_84, %c0_85] : memref<16x128x128xbf16, #tpu.memory_space<vmem>>, vector<1x128x128xbf16>
    %97 = vector.shape_cast %96 : vector<1x128x128xbf16> to vector<128x128xbf16>
    %cst_86 = arith.constant dense<0.000000e+00> : vector<32x128xf32>
    %98 = tpu.matmul %95, %97, %cst_86 {dimension_numbers = #tpu.dot_dimension_numbers<[1], [0], [0], [1], [0, 0, 1, 1], [], []>} : vector<32x128xbf16>, vector<128x128xbf16>, vector<32x128xf32> -> vector<32x128xf32>
    %99 = arith.addf %92, %98 : vector<32x128xf32>
    %c0_87 = arith.constant 0 : index
    %c1_88 = arith.constant 1 : index
    %c1_89 = arith.constant 1 : index
    %c0_90 = arith.constant 0 : index
    %100 = vector.load %arg1[%c0_87, %c1_88, %c1_89, %c0_90] : memref<1x6x10x128xbf16, #tpu.memory_space<vmem>>, vector<1x4x8x128xbf16>
    %101 = vector.shape_cast %100 : vector<1x4x8x128xbf16> to vector<4x8x128xbf16>
    %102 = vector.shape_cast %101 : vector<4x8x128xbf16> to vector<32x128xbf16>
    %c9 = arith.constant 9 : index
    %c0_91 = arith.constant 0 : index
    %c0_92 = arith.constant 0 : index
    %103 = vector.load %arg2[%c9, %c0_91, %c0_92] : memref<16x128x128xbf16, #tpu.memory_space<vmem>>, vector<1x128x128xbf16>
    %104 = vector.shape_cast %103 : vector<1x128x128xbf16> to vector<128x128xbf16>
    %cst_93 = arith.constant dense<0.000000e+00> : vector<32x128xf32>
    %105 = tpu.matmul %102, %104, %cst_93 {dimension_numbers = #tpu.dot_dimension_numbers<[1], [0], [0], [1], [0, 0, 1, 1], [], []>} : vector<32x128xbf16>, vector<128x128xbf16>, vector<32x128xf32> -> vector<32x128xf32>
    %106 = arith.addf %99, %105 : vector<32x128xf32>
    %c0_94 = arith.constant 0 : index
    %c2_95 = arith.constant 2 : index
    %c0_96 = arith.constant 0 : index
    %c0_97 = arith.constant 0 : index
    %107 = vector.load %arg1[%c0_94, %c2_95, %c0_96, %c0_97] : memref<1x6x10x128xbf16, #tpu.memory_space<vmem>>, vector<1x4x8x128xbf16>
    %108 = vector.shape_cast %107 : vector<1x4x8x128xbf16> to vector<4x8x128xbf16>
    %109 = vector.shape_cast %108 : vector<4x8x128xbf16> to vector<32x128xbf16>
    %c10 = arith.constant 10 : index
    %c0_98 = arith.constant 0 : index
    %c0_99 = arith.constant 0 : index
    %110 = vector.load %arg2[%c10, %c0_98, %c0_99] : memref<16x128x128xbf16, #tpu.memory_space<vmem>>, vector<1x128x128xbf16>
    %111 = vector.shape_cast %110 : vector<1x128x128xbf16> to vector<128x128xbf16>
    %cst_100 = arith.constant dense<0.000000e+00> : vector<32x128xf32>
    %112 = tpu.matmul %109, %111, %cst_100 {dimension_numbers = #tpu.dot_dimension_numbers<[1], [0], [0], [1], [0, 0, 1, 1], [], []>} : vector<32x128xbf16>, vector<128x128xbf16>, vector<32x128xf32> -> vector<32x128xf32>
    %113 = arith.addf %106, %112 : vector<32x128xf32>
    %c0_101 = arith.constant 0 : index
    %c2_102 = arith.constant 2 : index
    %c1_103 = arith.constant 1 : index
    %c0_104 = arith.constant 0 : index
    %114 = vector.load %arg1[%c0_101, %c2_102, %c1_103, %c0_104] : memref<1x6x10x128xbf16, #tpu.memory_space<vmem>>, vector<1x4x8x128xbf16>
    %115 = vector.shape_cast %114 : vector<1x4x8x128xbf16> to vector<4x8x128xbf16>
    %116 = vector.shape_cast %115 : vector<4x8x128xbf16> to vector<32x128xbf16>
    %c11 = arith.constant 11 : index
    %c0_105 = arith.constant 0 : index
    %c0_106 = arith.constant 0 : index
    %117 = vector.load %arg2[%c11, %c0_105, %c0_106] : memref<16x128x128xbf16, #tpu.memory_space<vmem>>, vector<1x128x128xbf16>
    %118 = vector.shape_cast %117 : vector<1x128x128xbf16> to vector<128x128xbf16>
    %cst_107 = arith.constant dense<0.000000e+00> : vector<32x128xf32>
    %119 = tpu.matmul %116, %118, %cst_107 {dimension_numbers = #tpu.dot_dimension_numbers<[1], [0], [0], [1], [0, 0, 1, 1], [], []>} : vector<32x128xbf16>, vector<128x128xbf16>, vector<32x128xf32> -> vector<32x128xf32>
    %120 = arith.addf %113, %119 : vector<32x128xf32>
    %c0_108 = arith.constant 0 : index
    %c0_109 = arith.constant 0 : index
    %121 = vector.load %arg3[%c0_108, %c0_109] : memref<1x128xf32, #tpu.memory_space<vmem>>, vector<1x128xf32>
    %122 = vector.broadcast %121 : vector<1x128xf32> to vector<32x128xf32>
    %123 = arith.mulf %120, %122 : vector<32x128xf32>
    %c0_110 = arith.constant 0 : index
    %c0_111 = arith.constant 0 : index
    %124 = vector.load %arg4[%c0_110, %c0_111] : memref<1x128xf32, #tpu.memory_space<vmem>>, vector<1x128xf32>
    %125 = vector.broadcast %124 : vector<1x128xf32> to vector<32x128xf32>
    %126 = arith.addf %123, %125 : vector<32x128xf32>
    %cst_112 = arith.constant 0.000000e+00 : f32
    %127 = vector.broadcast %cst_112 : f32 to vector<32x128xf32>
    %128 = arith.cmpf oge, %126, %127 : vector<32x128xf32>
    %cst_113 = arith.constant 0.00999999977 : f32
    %129 = vector.broadcast %cst_113 : f32 to vector<32x128xf32>
    %130 = arith.mulf %129, %126 : vector<32x128xf32>
    %131 = arith.select %128, %126, %130 : vector<32x128xi1>, vector<32x128xf32>
    %132 = vector.shape_cast %131 : vector<32x128xf32> to vector<4x8x128xf32>
    %133 = vector.extract_strided_slice %132 {offsets = [0, 0, 0], sizes = [4, 4, 128], strides = [1, 1, 1]} : vector<4x8x128xf32> to vector<4x4x128xf32>
    %134 = arith.truncf %133 : vector<4x4x128xf32> to vector<4x4x128xbf16>
    %c0_114 = arith.constant 0 : index
    %c2_115 = arith.constant 2 : index
    %c0_116 = arith.constant 0 : index
    %c0_117 = arith.constant 0 : index
    %c0_118 = arith.constant 0 : index
    %135 = vector.load %arg5[%c0_114, %c2_115, %c0_116, %c0_117, %c0_118] : memref<1x4x4x4x128xbf16, #tpu.memory_space<vmem>>, vector<1x1x4x4x128xbf16>
    %136 = vector.shape_cast %135 : vector<1x1x4x4x128xbf16> to vector<4x4x128xbf16>
    %137 = vector.shape_cast %134 : vector<4x4x128xbf16> to vector<1x1x4x4x128xbf16>
    tpu.vector_store %arg5[%c0_114, %c2_115, %c0_116, %c0_117, %c0_118], %137 {strides = array<i32>} : memref<1x4x4x4x128xbf16, #tpu.memory_space<vmem>>, vector<1x1x4x4x128xbf16>,
    %cst_119 = arith.constant 0.000000e+00 : f32
    %138 = vector.broadcast %cst_119 : f32 to vector<32x128xf32>
    %c0_120 = arith.constant 0 : index
    %c1_121 = arith.constant 1 : index
    %c1_122 = arith.constant 1 : index
    %c0_123 = arith.constant 0 : index
    %139 = vector.load %arg1[%c0_120, %c1_121, %c1_122, %c0_123] : memref<1x6x10x128xbf16, #tpu.memory_space<vmem>>, vector<1x4x8x128xbf16>
    %140 = vector.shape_cast %139 : vector<1x4x8x128xbf16> to vector<4x8x128xbf16>
    %141 = vector.shape_cast %140 : vector<4x8x128xbf16> to vector<32x128xbf16>
    %c12 = arith.constant 12 : index
    %c0_124 = arith.constant 0 : index
    %c0_125 = arith.constant 0 : index
    %142 = vector.load %arg2[%c12, %c0_124, %c0_125] : memref<16x128x128xbf16, #tpu.memory_space<vmem>>, vector<1x128x128xbf16>
    %143 = vector.shape_cast %142 : vector<1x128x128xbf16> to vector<128x128xbf16>
    %cst_126 = arith.constant dense<0.000000e+00> : vector<32x128xf32>
    %144 = tpu.matmul %141, %143, %cst_126 {dimension_numbers = #tpu.dot_dimension_numbers<[1], [0], [0], [1], [0, 0, 1, 1], [], []>} : vector<32x128xbf16>, vector<128x128xbf16>, vector<32x128xf32> -> vector<32x128xf32>
    %145 = arith.addf %138, %144 : vector<32x128xf32>
    %c0_127 = arith.constant 0 : index
    %c1_128 = arith.constant 1 : index
    %c2_129 = arith.constant 2 : index
    %c0_130 = arith.constant 0 : index
    %146 = vector.load %arg1[%c0_127, %c1_128, %c2_129, %c0_130] : memref<1x6x10x128xbf16, #tpu.memory_space<vmem>>, vector<1x4x8x128xbf16>
    %147 = vector.shape_cast %146 : vector<1x4x8x128xbf16> to vector<4x8x128xbf16>
    %148 = vector.shape_cast %147 : vector<4x8x128xbf16> to vector<32x128xbf16>
    %c13 = arith.constant 13 : index
    %c0_131 = arith.constant 0 : index
    %c0_132 = arith.constant 0 : index
    %149 = vector.load %arg2[%c13, %c0_131, %c0_132] : memref<16x128x128xbf16, #tpu.memory_space<vmem>>, vector<1x128x128xbf16>
    %150 = vector.shape_cast %149 : vector<1x128x128xbf16> to vector<128x128xbf16>
    %cst_133 = arith.constant dense<0.000000e+00> : vector<32x128xf32>
    %151 = tpu.matmul %148, %150, %cst_133 {dimension_numbers = #tpu.dot_dimension_numbers<[1], [0], [0], [1], [0, 0, 1, 1], [], []>} : vector<32x128xbf16>, vector<128x128xbf16>, vector<32x128xf32> -> vector<32x128xf32>
    %152 = arith.addf %145, %151 : vector<32x128xf32>
    %c0_134 = arith.constant 0 : index
    %c2_135 = arith.constant 2 : index
    %c1_136 = arith.constant 1 : index
    %c0_137 = arith.constant 0 : index
    %153 = vector.load %arg1[%c0_134, %c2_135, %c1_136, %c0_137] : memref<1x6x10x128xbf16, #tpu.memory_space<vmem>>, vector<1x4x8x128xbf16>
    %154 = vector.shape_cast %153 : vector<1x4x8x128xbf16> to vector<4x8x128xbf16>
    %155 = vector.shape_cast %154 : vector<4x8x128xbf16> to vector<32x128xbf16>
    %c14 = arith.constant 14 : index
    %c0_138 = arith.constant 0 : index
    %c0_139 = arith.constant 0 : index
    %156 = vector.load %arg2[%c14, %c0_138, %c0_139] : memref<16x128x128xbf16, #tpu.memory_space<vmem>>, vector<1x128x128xbf16>
    %157 = vector.shape_cast %156 : vector<1x128x128xbf16> to vector<128x128xbf16>
    %cst_140 = arith.constant dense<0.000000e+00> : vector<32x128xf32>
    %158 = tpu.matmul %155, %157, %cst_140 {dimension_numbers = #tpu.dot_dimension_numbers<[1], [0], [0], [1], [0, 0, 1, 1], [], []>} : vector<32x128xbf16>, vector<128x128xbf16>, vector<32x128xf32> -> vector<32x128xf32>
    %159 = arith.addf %152, %158 : vector<32x128xf32>
    %c0_141 = arith.constant 0 : index
    %c2_142 = arith.constant 2 : index
    %c2_143 = arith.constant 2 : index
    %c0_144 = arith.constant 0 : index
    %160 = vector.load %arg1[%c0_141, %c2_142, %c2_143, %c0_144] : memref<1x6x10x128xbf16, #tpu.memory_space<vmem>>, vector<1x4x8x128xbf16>
    %161 = vector.shape_cast %160 : vector<1x4x8x128xbf16> to vector<4x8x128xbf16>
    %162 = vector.shape_cast %161 : vector<4x8x128xbf16> to vector<32x128xbf16>
    %c15 = arith.constant 15 : index
    %c0_145 = arith.constant 0 : index
    %c0_146 = arith.constant 0 : index
    %163 = vector.load %arg2[%c15, %c0_145, %c0_146] : memref<16x128x128xbf16, #tpu.memory_space<vmem>>, vector<1x128x128xbf16>
    %164 = vector.shape_cast %163 : vector<1x128x128xbf16> to vector<128x128xbf16>
    %cst_147 = arith.constant dense<0.000000e+00> : vector<32x128xf32>
    %165 = tpu.matmul %162, %164, %cst_147 {dimension_numbers = #tpu.dot_dimension_numbers<[1], [0], [0], [1], [0, 0, 1, 1], [], []>} : vector<32x128xbf16>, vector<128x128xbf16>, vector<32x128xf32> -> vector<32x128xf32>
    %166 = arith.addf %159, %165 : vector<32x128xf32>
    %c0_148 = arith.constant 0 : index
    %c0_149 = arith.constant 0 : index
    %167 = vector.load %arg3[%c0_148, %c0_149] : memref<1x128xf32, #tpu.memory_space<vmem>>, vector<1x128xf32>
    %168 = vector.broadcast %167 : vector<1x128xf32> to vector<32x128xf32>
    %169 = arith.mulf %166, %168 : vector<32x128xf32>
    %c0_150 = arith.constant 0 : index
    %c0_151 = arith.constant 0 : index
    %170 = vector.load %arg4[%c0_150, %c0_151] : memref<1x128xf32, #tpu.memory_space<vmem>>, vector<1x128xf32>
    %171 = vector.broadcast %170 : vector<1x128xf32> to vector<32x128xf32>
    %172 = arith.addf %169, %171 : vector<32x128xf32>
    %cst_152 = arith.constant 0.000000e+00 : f32
    %173 = vector.broadcast %cst_152 : f32 to vector<32x128xf32>
    %174 = arith.cmpf oge, %172, %173 : vector<32x128xf32>
    %cst_153 = arith.constant 0.00999999977 : f32
    %175 = vector.broadcast %cst_153 : f32 to vector<32x128xf32>
    %176 = arith.mulf %175, %172 : vector<32x128xf32>
    %177 = arith.select %174, %172, %176 : vector<32x128xi1>, vector<32x128xf32>
    %178 = vector.shape_cast %177 : vector<32x128xf32> to vector<4x8x128xf32>
    %179 = vector.extract_strided_slice %178 {offsets = [0, 0, 0], sizes = [4, 4, 128], strides = [1, 1, 1]} : vector<4x8x128xf32> to vector<4x4x128xf32>
    %180 = arith.truncf %179 : vector<4x4x128xf32> to vector<4x4x128xbf16>
    %c0_154 = arith.constant 0 : index
    %c3_155 = arith.constant 3 : index
    %c0_156 = arith.constant 0 : index
    %c0_157 = arith.constant 0 : index
    %c0_158 = arith.constant 0 : index
    %181 = vector.load %arg5[%c0_154, %c3_155, %c0_156, %c0_157, %c0_158] : memref<1x4x4x4x128xbf16, #tpu.memory_space<vmem>>, vector<1x1x4x4x128xbf16>
    %182 = vector.shape_cast %181 : vector<1x1x4x4x128xbf16> to vector<4x4x128xbf16>
    %183 = vector.shape_cast %180 : vector<4x4x128xbf16> to vector<1x1x4x4x128xbf16>
    tpu.vector_store %arg5[%c0_154, %c3_155, %c0_156, %c0_157, %c0_158], %183 {strides = array<i32>} : memref<1x4x4x4x128xbf16, #tpu.memory_space<vmem>>, vector<1x1x4x4x128xbf16>,
    return
  }
  func.func @transform_0(%arg0: i32) -> (i32, i32, i32, i32) {
    %c0_i32 = arith.constant 0 : i32
    %c0_i32_0 = arith.constant 0 : i32
    %c0_i32_1 = arith.constant 0 : i32
    %c0_i32_2 = arith.constant 0 : i32
    return %arg0, %c0_i32, %c0_i32_0, %c0_i32_1 : i32, i32, i32, i32
  }
  func.func @transform_1(%arg0: i32) -> (i32, i32, i32) {
    %c0_i32 = arith.constant 0 : i32
    %c0_i32_0 = arith.constant 0 : i32
    %c0_i32_1 = arith.constant 0 : i32
    %c0_i32_2 = arith.constant 0 : i32
    return %c0_i32, %c0_i32_0, %c0_i32_1 : i32, i32, i32
  }
  func.func @transform_2(%arg0: i32) -> (i32, i32) {
    %c0_i32 = arith.constant 0 : i32
    %c0_i32_0 = arith.constant 0 : i32
    %c0_i32_1 = arith.constant 0 : i32
    return %c0_i32, %c0_i32_0 : i32, i32
  }
  func.func @transform_3(%arg0: i32) -> (i32, i32) {
    %c0_i32 = arith.constant 0 : i32
    %c0_i32_0 = arith.constant 0 : i32
    %c0_i32_1 = arith.constant 0 : i32
    return %c0_i32, %c0_i32_0 : i32, i32
  }
  func.func @transform_4(%arg0: i32) -> (i32, i32, i32, i32, i32) {
    %c0_i32 = arith.constant 0 : i32
    %c0_i32_0 = arith.constant 0 : i32
    %c0_i32_1 = arith.constant 0 : i32
    %c0_i32_2 = arith.constant 0 : i32
    %c0_i32_3 = arith.constant 0 : i32
    return %arg0, %c0_i32, %c0_i32_0, %c0_i32_1, %c0_i32_2 : i32, i32, i32, i32, i32
  }
}

module attributes {stable_mosaic.version = 11 : i64} {
  func.func @_conv_kernel(%arg0: i32, %arg1: memref<1x10x10x128xbf16, #tpu.memory_space<vmem>>, %arg2: memref<9x128x128xbf16, #tpu.memory_space<vmem>>, %arg3: memref<1x128xf32, #tpu.memory_space<vmem>>, %arg4: memref<1x128xf32, #tpu.memory_space<vmem>>, %arg5: memref<1x8x8x128xbf16, #tpu.memory_space<vmem>>) attributes {dimension_semantics = [#tpu.dimension_semantics<parallel>], iteration_bounds = array<i64: 2>, scalar_prefetch = 0 : i64, scratch_operands = 0 : i64, tpu.core_type = #tpu.core_type<tc>, window_params = [{transform_indices = @transform_0, window_bounds = array<i64: 1, 10, 10, 128>}, {pipeline_mode = #tpu.pipeline_mode<synchronous>, transform_indices = @transform_1, window_bounds = array<i64: 9, 128, 128>}, {pipeline_mode = #tpu.pipeline_mode<synchronous>, transform_indices = @transform_2, window_bounds = array<i64: 1, 128>}, {pipeline_mode = #tpu.pipeline_mode<synchronous>, transform_indices = @transform_3, window_bounds = array<i64: 1, 128>}, {transform_indices = @transform_4, window_bounds = array<i64: 1, 8, 8, 128>}]} {
    %cst = arith.constant 0.000000e+00 : f32
    %0 = vector.broadcast %cst : f32 to vector<64x128xf32>
    %c0 = arith.constant 0 : index
    %c0_0 = arith.constant 0 : index
    %c0_1 = arith.constant 0 : index
    %c0_2 = arith.constant 0 : index
    %1 = vector.load %arg1[%c0, %c0_0, %c0_1, %c0_2] : memref<1x10x10x128xbf16, #tpu.memory_space<vmem>>, vector<1x8x8x128xbf16>
    %2 = vector.shape_cast %1 : vector<1x8x8x128xbf16> to vector<8x8x128xbf16>
    %3 = vector.shape_cast %2 : vector<8x8x128xbf16> to vector<64x128xbf16>
    %c0_3 = arith.constant 0 : index
    %c0_4 = arith.constant 0 : index
    %c0_5 = arith.constant 0 : index
    %4 = vector.load %arg2[%c0_3, %c0_4, %c0_5] : memref<9x128x128xbf16, #tpu.memory_space<vmem>>, vector<1x128x128xbf16>
    %5 = vector.shape_cast %4 : vector<1x128x128xbf16> to vector<128x128xbf16>
    %cst_6 = arith.constant dense<0.000000e+00> : vector<64x128xf32>
    %6 = tpu.matmul %3, %5, %cst_6 {dimension_numbers = #tpu.dot_dimension_numbers<[1], [0], [0], [1], [0, 0, 1, 1], [], []>} : vector<64x128xbf16>, vector<128x128xbf16>, vector<64x128xf32> -> vector<64x128xf32>
    %7 = arith.addf %0, %6 : vector<64x128xf32>
    %c0_7 = arith.constant 0 : index
    %c0_8 = arith.constant 0 : index
    %c1 = arith.constant 1 : index
    %c0_9 = arith.constant 0 : index
    %8 = vector.load %arg1[%c0_7, %c0_8, %c1, %c0_9] : memref<1x10x10x128xbf16, #tpu.memory_space<vmem>>, vector<1x8x8x128xbf16>
    %9 = vector.shape_cast %8 : vector<1x8x8x128xbf16> to vector<8x8x128xbf16>
    %10 = vector.shape_cast %9 : vector<8x8x128xbf16> to vector<64x128xbf16>
    %c1_10 = arith.constant 1 : index
    %c0_11 = arith.constant 0 : index
    %c0_12 = arith.constant 0 : index
    %11 = vector.load %arg2[%c1_10, %c0_11, %c0_12] : memref<9x128x128xbf16, #tpu.memory_space<vmem>>, vector<1x128x128xbf16>
    %12 = vector.shape_cast %11 : vector<1x128x128xbf16> to vector<128x128xbf16>
    %cst_13 = arith.constant dense<0.000000e+00> : vector<64x128xf32>
    %13 = tpu.matmul %10, %12, %cst_13 {dimension_numbers = #tpu.dot_dimension_numbers<[1], [0], [0], [1], [0, 0, 1, 1], [], []>} : vector<64x128xbf16>, vector<128x128xbf16>, vector<64x128xf32> -> vector<64x128xf32>
    %14 = arith.addf %7, %13 : vector<64x128xf32>
    %c0_14 = arith.constant 0 : index
    %c0_15 = arith.constant 0 : index
    %c2 = arith.constant 2 : index
    %c0_16 = arith.constant 0 : index
    %15 = vector.load %arg1[%c0_14, %c0_15, %c2, %c0_16] : memref<1x10x10x128xbf16, #tpu.memory_space<vmem>>, vector<1x8x8x128xbf16>
    %16 = vector.shape_cast %15 : vector<1x8x8x128xbf16> to vector<8x8x128xbf16>
    %17 = vector.shape_cast %16 : vector<8x8x128xbf16> to vector<64x128xbf16>
    %c2_17 = arith.constant 2 : index
    %c0_18 = arith.constant 0 : index
    %c0_19 = arith.constant 0 : index
    %18 = vector.load %arg2[%c2_17, %c0_18, %c0_19] : memref<9x128x128xbf16, #tpu.memory_space<vmem>>, vector<1x128x128xbf16>
    %19 = vector.shape_cast %18 : vector<1x128x128xbf16> to vector<128x128xbf16>
    %cst_20 = arith.constant dense<0.000000e+00> : vector<64x128xf32>
    %20 = tpu.matmul %17, %19, %cst_20 {dimension_numbers = #tpu.dot_dimension_numbers<[1], [0], [0], [1], [0, 0, 1, 1], [], []>} : vector<64x128xbf16>, vector<128x128xbf16>, vector<64x128xf32> -> vector<64x128xf32>
    %21 = arith.addf %14, %20 : vector<64x128xf32>
    %c0_21 = arith.constant 0 : index
    %c1_22 = arith.constant 1 : index
    %c0_23 = arith.constant 0 : index
    %c0_24 = arith.constant 0 : index
    %22 = vector.load %arg1[%c0_21, %c1_22, %c0_23, %c0_24] : memref<1x10x10x128xbf16, #tpu.memory_space<vmem>>, vector<1x8x8x128xbf16>
    %23 = vector.shape_cast %22 : vector<1x8x8x128xbf16> to vector<8x8x128xbf16>
    %24 = vector.shape_cast %23 : vector<8x8x128xbf16> to vector<64x128xbf16>
    %c3 = arith.constant 3 : index
    %c0_25 = arith.constant 0 : index
    %c0_26 = arith.constant 0 : index
    %25 = vector.load %arg2[%c3, %c0_25, %c0_26] : memref<9x128x128xbf16, #tpu.memory_space<vmem>>, vector<1x128x128xbf16>
    %26 = vector.shape_cast %25 : vector<1x128x128xbf16> to vector<128x128xbf16>
    %cst_27 = arith.constant dense<0.000000e+00> : vector<64x128xf32>
    %27 = tpu.matmul %24, %26, %cst_27 {dimension_numbers = #tpu.dot_dimension_numbers<[1], [0], [0], [1], [0, 0, 1, 1], [], []>} : vector<64x128xbf16>, vector<128x128xbf16>, vector<64x128xf32> -> vector<64x128xf32>
    %28 = arith.addf %21, %27 : vector<64x128xf32>
    %c0_28 = arith.constant 0 : index
    %c1_29 = arith.constant 1 : index
    %c1_30 = arith.constant 1 : index
    %c0_31 = arith.constant 0 : index
    %29 = vector.load %arg1[%c0_28, %c1_29, %c1_30, %c0_31] : memref<1x10x10x128xbf16, #tpu.memory_space<vmem>>, vector<1x8x8x128xbf16>
    %30 = vector.shape_cast %29 : vector<1x8x8x128xbf16> to vector<8x8x128xbf16>
    %31 = vector.shape_cast %30 : vector<8x8x128xbf16> to vector<64x128xbf16>
    %c4 = arith.constant 4 : index
    %c0_32 = arith.constant 0 : index
    %c0_33 = arith.constant 0 : index
    %32 = vector.load %arg2[%c4, %c0_32, %c0_33] : memref<9x128x128xbf16, #tpu.memory_space<vmem>>, vector<1x128x128xbf16>
    %33 = vector.shape_cast %32 : vector<1x128x128xbf16> to vector<128x128xbf16>
    %cst_34 = arith.constant dense<0.000000e+00> : vector<64x128xf32>
    %34 = tpu.matmul %31, %33, %cst_34 {dimension_numbers = #tpu.dot_dimension_numbers<[1], [0], [0], [1], [0, 0, 1, 1], [], []>} : vector<64x128xbf16>, vector<128x128xbf16>, vector<64x128xf32> -> vector<64x128xf32>
    %35 = arith.addf %28, %34 : vector<64x128xf32>
    %c0_35 = arith.constant 0 : index
    %c1_36 = arith.constant 1 : index
    %c2_37 = arith.constant 2 : index
    %c0_38 = arith.constant 0 : index
    %36 = vector.load %arg1[%c0_35, %c1_36, %c2_37, %c0_38] : memref<1x10x10x128xbf16, #tpu.memory_space<vmem>>, vector<1x8x8x128xbf16>
    %37 = vector.shape_cast %36 : vector<1x8x8x128xbf16> to vector<8x8x128xbf16>
    %38 = vector.shape_cast %37 : vector<8x8x128xbf16> to vector<64x128xbf16>
    %c5 = arith.constant 5 : index
    %c0_39 = arith.constant 0 : index
    %c0_40 = arith.constant 0 : index
    %39 = vector.load %arg2[%c5, %c0_39, %c0_40] : memref<9x128x128xbf16, #tpu.memory_space<vmem>>, vector<1x128x128xbf16>
    %40 = vector.shape_cast %39 : vector<1x128x128xbf16> to vector<128x128xbf16>
    %cst_41 = arith.constant dense<0.000000e+00> : vector<64x128xf32>
    %41 = tpu.matmul %38, %40, %cst_41 {dimension_numbers = #tpu.dot_dimension_numbers<[1], [0], [0], [1], [0, 0, 1, 1], [], []>} : vector<64x128xbf16>, vector<128x128xbf16>, vector<64x128xf32> -> vector<64x128xf32>
    %42 = arith.addf %35, %41 : vector<64x128xf32>
    %c0_42 = arith.constant 0 : index
    %c2_43 = arith.constant 2 : index
    %c0_44 = arith.constant 0 : index
    %c0_45 = arith.constant 0 : index
    %43 = vector.load %arg1[%c0_42, %c2_43, %c0_44, %c0_45] : memref<1x10x10x128xbf16, #tpu.memory_space<vmem>>, vector<1x8x8x128xbf16>
    %44 = vector.shape_cast %43 : vector<1x8x8x128xbf16> to vector<8x8x128xbf16>
    %45 = vector.shape_cast %44 : vector<8x8x128xbf16> to vector<64x128xbf16>
    %c6 = arith.constant 6 : index
    %c0_46 = arith.constant 0 : index
    %c0_47 = arith.constant 0 : index
    %46 = vector.load %arg2[%c6, %c0_46, %c0_47] : memref<9x128x128xbf16, #tpu.memory_space<vmem>>, vector<1x128x128xbf16>
    %47 = vector.shape_cast %46 : vector<1x128x128xbf16> to vector<128x128xbf16>
    %cst_48 = arith.constant dense<0.000000e+00> : vector<64x128xf32>
    %48 = tpu.matmul %45, %47, %cst_48 {dimension_numbers = #tpu.dot_dimension_numbers<[1], [0], [0], [1], [0, 0, 1, 1], [], []>} : vector<64x128xbf16>, vector<128x128xbf16>, vector<64x128xf32> -> vector<64x128xf32>
    %49 = arith.addf %42, %48 : vector<64x128xf32>
    %c0_49 = arith.constant 0 : index
    %c2_50 = arith.constant 2 : index
    %c1_51 = arith.constant 1 : index
    %c0_52 = arith.constant 0 : index
    %50 = vector.load %arg1[%c0_49, %c2_50, %c1_51, %c0_52] : memref<1x10x10x128xbf16, #tpu.memory_space<vmem>>, vector<1x8x8x128xbf16>
    %51 = vector.shape_cast %50 : vector<1x8x8x128xbf16> to vector<8x8x128xbf16>
    %52 = vector.shape_cast %51 : vector<8x8x128xbf16> to vector<64x128xbf16>
    %c7 = arith.constant 7 : index
    %c0_53 = arith.constant 0 : index
    %c0_54 = arith.constant 0 : index
    %53 = vector.load %arg2[%c7, %c0_53, %c0_54] : memref<9x128x128xbf16, #tpu.memory_space<vmem>>, vector<1x128x128xbf16>
    %54 = vector.shape_cast %53 : vector<1x128x128xbf16> to vector<128x128xbf16>
    %cst_55 = arith.constant dense<0.000000e+00> : vector<64x128xf32>
    %55 = tpu.matmul %52, %54, %cst_55 {dimension_numbers = #tpu.dot_dimension_numbers<[1], [0], [0], [1], [0, 0, 1, 1], [], []>} : vector<64x128xbf16>, vector<128x128xbf16>, vector<64x128xf32> -> vector<64x128xf32>
    %56 = arith.addf %49, %55 : vector<64x128xf32>
    %c0_56 = arith.constant 0 : index
    %c2_57 = arith.constant 2 : index
    %c2_58 = arith.constant 2 : index
    %c0_59 = arith.constant 0 : index
    %57 = vector.load %arg1[%c0_56, %c2_57, %c2_58, %c0_59] : memref<1x10x10x128xbf16, #tpu.memory_space<vmem>>, vector<1x8x8x128xbf16>
    %58 = vector.shape_cast %57 : vector<1x8x8x128xbf16> to vector<8x8x128xbf16>
    %59 = vector.shape_cast %58 : vector<8x8x128xbf16> to vector<64x128xbf16>
    %c8 = arith.constant 8 : index
    %c0_60 = arith.constant 0 : index
    %c0_61 = arith.constant 0 : index
    %60 = vector.load %arg2[%c8, %c0_60, %c0_61] : memref<9x128x128xbf16, #tpu.memory_space<vmem>>, vector<1x128x128xbf16>
    %61 = vector.shape_cast %60 : vector<1x128x128xbf16> to vector<128x128xbf16>
    %cst_62 = arith.constant dense<0.000000e+00> : vector<64x128xf32>
    %62 = tpu.matmul %59, %61, %cst_62 {dimension_numbers = #tpu.dot_dimension_numbers<[1], [0], [0], [1], [0, 0, 1, 1], [], []>} : vector<64x128xbf16>, vector<128x128xbf16>, vector<64x128xf32> -> vector<64x128xf32>
    %63 = arith.addf %56, %62 : vector<64x128xf32>
    %c0_63 = arith.constant 0 : index
    %c0_64 = arith.constant 0 : index
    %64 = vector.load %arg3[%c0_63, %c0_64] : memref<1x128xf32, #tpu.memory_space<vmem>>, vector<1x128xf32>
    %65 = vector.broadcast %64 : vector<1x128xf32> to vector<64x128xf32>
    %66 = arith.mulf %63, %65 : vector<64x128xf32>
    %c0_65 = arith.constant 0 : index
    %c0_66 = arith.constant 0 : index
    %67 = vector.load %arg4[%c0_65, %c0_66] : memref<1x128xf32, #tpu.memory_space<vmem>>, vector<1x128xf32>
    %68 = vector.broadcast %67 : vector<1x128xf32> to vector<64x128xf32>
    %69 = arith.addf %66, %68 : vector<64x128xf32>
    %cst_67 = arith.constant 0.000000e+00 : f32
    %70 = vector.broadcast %cst_67 : f32 to vector<64x128xf32>
    %71 = arith.cmpf oge, %69, %70 : vector<64x128xf32>
    %cst_68 = arith.constant 0.00999999977 : f32
    %72 = vector.broadcast %cst_68 : f32 to vector<64x128xf32>
    %73 = arith.mulf %72, %69 : vector<64x128xf32>
    %74 = arith.select %71, %69, %73 : vector<64x128xi1>, vector<64x128xf32>
    %75 = vector.shape_cast %74 : vector<64x128xf32> to vector<8x8x128xf32>
    %c0_69 = arith.constant 0 : index
    %c1_70 = arith.constant 1 : index
    %c1_71 = arith.constant 1 : index
    %c0_72 = arith.constant 0 : index
    %76 = vector.load %arg1[%c0_69, %c1_70, %c1_71, %c0_72] : memref<1x10x10x128xbf16, #tpu.memory_space<vmem>>, vector<1x8x8x128xbf16>
    %77 = vector.shape_cast %76 : vector<1x8x8x128xbf16> to vector<8x8x128xbf16>
    %78 = arith.extf %77 : vector<8x8x128xbf16> to vector<8x8x128xf32>
    %79 = arith.addf %75, %78 : vector<8x8x128xf32>
    %80 = arith.truncf %79 : vector<8x8x128xf32> to vector<8x8x128xbf16>
    %c0_73 = arith.constant 0 : index
    %c0_74 = arith.constant 0 : index
    %c0_75 = arith.constant 0 : index
    %c0_76 = arith.constant 0 : index
    %81 = vector.load %arg5[%c0_73, %c0_74, %c0_75, %c0_76] : memref<1x8x8x128xbf16, #tpu.memory_space<vmem>>, vector<1x8x8x128xbf16>
    %82 = vector.shape_cast %81 : vector<1x8x8x128xbf16> to vector<8x8x128xbf16>
    %83 = vector.shape_cast %80 : vector<8x8x128xbf16> to vector<1x8x8x128xbf16>
    tpu.vector_store %arg5[%c0_73, %c0_74, %c0_75, %c0_76], %83 {strides = array<i32>} : memref<1x8x8x128xbf16, #tpu.memory_space<vmem>>, vector<1x8x8x128xbf16>,
    return
  }
  func.func @transform_0(%arg0: i32) -> (i32, i32, i32, i32) {
    %c0_i32 = arith.constant 0 : i32
    %c0_i32_0 = arith.constant 0 : i32
    %c0_i32_1 = arith.constant 0 : i32
    %c0_i32_2 = arith.constant 0 : i32
    return %arg0, %c0_i32, %c0_i32_0, %c0_i32_1 : i32, i32, i32, i32
  }
  func.func @transform_1(%arg0: i32) -> (i32, i32, i32) {
    %c0_i32 = arith.constant 0 : i32
    %c0_i32_0 = arith.constant 0 : i32
    %c0_i32_1 = arith.constant 0 : i32
    %c0_i32_2 = arith.constant 0 : i32
    return %c0_i32, %c0_i32_0, %c0_i32_1 : i32, i32, i32
  }
  func.func @transform_2(%arg0: i32) -> (i32, i32) {
    %c0_i32 = arith.constant 0 : i32
    %c0_i32_0 = arith.constant 0 : i32
    %c0_i32_1 = arith.constant 0 : i32
    return %c0_i32, %c0_i32_0 : i32, i32
  }
  func.func @transform_3(%arg0: i32) -> (i32, i32) {
    %c0_i32 = arith.constant 0 : i32
    %c0_i32_0 = arith.constant 0 : i32
    %c0_i32_1 = arith.constant 0 : i32
    return %c0_i32, %c0_i32_0 : i32, i32
  }
  func.func @transform_4(%arg0: i32) -> (i32, i32, i32, i32) {
    %c0_i32 = arith.constant 0 : i32
    %c0_i32_0 = arith.constant 0 : i32
    %c0_i32_1 = arith.constant 0 : i32
    %c0_i32_2 = arith.constant 0 : i32
    return %arg0, %c0_i32, %c0_i32_0, %c0_i32_1 : i32, i32, i32, i32
  }
}

module attributes {stable_mosaic.version = 11 : i64} {
  func.func @_upscale_kernel(%arg0: i32, %arg1: memref<1x10x10x128xbf16, #tpu.memory_space<vmem>>, %arg2: memref<16x128x128xbf16, #tpu.memory_space<vmem>>, %arg3: memref<1x128xf32, #tpu.memory_space<vmem>>, %arg4: memref<1x128xf32, #tpu.memory_space<vmem>>, %arg5: memref<1x4x8x8x128xbf16, #tpu.memory_space<vmem>>) attributes {dimension_semantics = [#tpu.dimension_semantics<parallel>], iteration_bounds = array<i64: 2>, scalar_prefetch = 0 : i64, scratch_operands = 0 : i64, tpu.core_type = #tpu.core_type<tc>, window_params = [{transform_indices = @transform_0, window_bounds = array<i64: 1, 10, 10, 128>}, {pipeline_mode = #tpu.pipeline_mode<synchronous>, transform_indices = @transform_1, window_bounds = array<i64: 16, 128, 128>}, {pipeline_mode = #tpu.pipeline_mode<synchronous>, transform_indices = @transform_2, window_bounds = array<i64: 1, 128>}, {pipeline_mode = #tpu.pipeline_mode<synchronous>, transform_indices = @transform_3, window_bounds = array<i64: 1, 128>}, {transform_indices = @transform_4, window_bounds = array<i64: 1, 4, 8, 8, 128>}]} {
    %cst = arith.constant 0.000000e+00 : f32
    %0 = vector.broadcast %cst : f32 to vector<64x128xf32>
    %c0 = arith.constant 0 : index
    %c0_0 = arith.constant 0 : index
    %c0_1 = arith.constant 0 : index
    %c0_2 = arith.constant 0 : index
    %1 = vector.load %arg1[%c0, %c0_0, %c0_1, %c0_2] : memref<1x10x10x128xbf16, #tpu.memory_space<vmem>>, vector<1x8x8x128xbf16>
    %2 = vector.shape_cast %1 : vector<1x8x8x128xbf16> to vector<8x8x128xbf16>
    %3 = vector.shape_cast %2 : vector<8x8x128xbf16> to vector<64x128xbf16>
    %c0_3 = arith.constant 0 : index
    %c0_4 = arith.constant 0 : index
    %c0_5 = arith.constant 0 : index
    %4 = vector.load %arg2[%c0_3, %c0_4, %c0_5] : memref<16x128x128xbf16, #tpu.memory_space<vmem>>, vector<1x128x128xbf16>
    %5 = vector.shape_cast %4 : vector<1x128x128xbf16> to vector<128x128xbf16>
    %cst_6 = arith.constant dense<0.000000e+00> : vector<64x128xf32>
    %6 = tpu.matmul %3, %5, %cst_6 {dimension_numbers = #tpu.dot_dimension_numbers<[1], [0], [0], [1], [0, 0, 1, 1], [], []>} : vector<64x128xbf16>, vector<128x128xbf16>, vector<64x128xf32> -> vector<64x128xf32>
    %7 = arith.addf %0, %6 : vector<64x128xf32>
    %c0_7 = arith.constant 0 : index
    %c0_8 = arith.constant 0 : index
    %c1 = arith.constant 1 : index
    %c0_9 = arith.constant 0 : index
    %8 = vector.load %arg1[%c0_7, %c0_8, %c1, %c0_9] : memref<1x10x10x128xbf16, #tpu.memory_space<vmem>>, vector<1x8x8x128xbf16>
    %9 = vector.shape_cast %8 : vector<1x8x8x128xbf16> to vector<8x8x128xbf16>
    %10 = vector.shape_cast %9 : vector<8x8x128xbf16> to vector<64x128xbf16>
    %c1_10 = arith.constant 1 : index
    %c0_11 = arith.constant 0 : index
    %c0_12 = arith.constant 0 : index
    %11 = vector.load %arg2[%c1_10, %c0_11, %c0_12] : memref<16x128x128xbf16, #tpu.memory_space<vmem>>, vector<1x128x128xbf16>
    %12 = vector.shape_cast %11 : vector<1x128x128xbf16> to vector<128x128xbf16>
    %cst_13 = arith.constant dense<0.000000e+00> : vector<64x128xf32>
    %13 = tpu.matmul %10, %12, %cst_13 {dimension_numbers = #tpu.dot_dimension_numbers<[1], [0], [0], [1], [0, 0, 1, 1], [], []>} : vector<64x128xbf16>, vector<128x128xbf16>, vector<64x128xf32> -> vector<64x128xf32>
    %14 = arith.addf %7, %13 : vector<64x128xf32>
    %c0_14 = arith.constant 0 : index
    %c1_15 = arith.constant 1 : index
    %c0_16 = arith.constant 0 : index
    %c0_17 = arith.constant 0 : index
    %15 = vector.load %arg1[%c0_14, %c1_15, %c0_16, %c0_17] : memref<1x10x10x128xbf16, #tpu.memory_space<vmem>>, vector<1x8x8x128xbf16>
    %16 = vector.shape_cast %15 : vector<1x8x8x128xbf16> to vector<8x8x128xbf16>
    %17 = vector.shape_cast %16 : vector<8x8x128xbf16> to vector<64x128xbf16>
    %c2 = arith.constant 2 : index
    %c0_18 = arith.constant 0 : index
    %c0_19 = arith.constant 0 : index
    %18 = vector.load %arg2[%c2, %c0_18, %c0_19] : memref<16x128x128xbf16, #tpu.memory_space<vmem>>, vector<1x128x128xbf16>
    %19 = vector.shape_cast %18 : vector<1x128x128xbf16> to vector<128x128xbf16>
    %cst_20 = arith.constant dense<0.000000e+00> : vector<64x128xf32>
    %20 = tpu.matmul %17, %19, %cst_20 {dimension_numbers = #tpu.dot_dimension_numbers<[1], [0], [0], [1], [0, 0, 1, 1], [], []>} : vector<64x128xbf16>, vector<128x128xbf16>, vector<64x128xf32> -> vector<64x128xf32>
    %21 = arith.addf %14, %20 : vector<64x128xf32>
    %c0_21 = arith.constant 0 : index
    %c1_22 = arith.constant 1 : index
    %c1_23 = arith.constant 1 : index
    %c0_24 = arith.constant 0 : index
    %22 = vector.load %arg1[%c0_21, %c1_22, %c1_23, %c0_24] : memref<1x10x10x128xbf16, #tpu.memory_space<vmem>>, vector<1x8x8x128xbf16>
    %23 = vector.shape_cast %22 : vector<1x8x8x128xbf16> to vector<8x8x128xbf16>
    %24 = vector.shape_cast %23 : vector<8x8x128xbf16> to vector<64x128xbf16>
    %c3 = arith.constant 3 : index
    %c0_25 = arith.constant 0 : index
    %c0_26 = arith.constant 0 : index
    %25 = vector.load %arg2[%c3, %c0_25, %c0_26] : memref<16x128x128xbf16, #tpu.memory_space<vmem>>, vector<1x128x128xbf16>
    %26 = vector.shape_cast %25 : vector<1x128x128xbf16> to vector<128x128xbf16>
    %cst_27 = arith.constant dense<0.000000e+00> : vector<64x128xf32>
    %27 = tpu.matmul %24, %26, %cst_27 {dimension_numbers = #tpu.dot_dimension_numbers<[1], [0], [0], [1], [0, 0, 1, 1], [], []>} : vector<64x128xbf16>, vector<128x128xbf16>, vector<64x128xf32> -> vector<64x128xf32>
    %28 = arith.addf %21, %27 : vector<64x128xf32>
    %c0_28 = arith.constant 0 : index
    %c0_29 = arith.constant 0 : index
    %29 = vector.load %arg3[%c0_28, %c0_29] : memref<1x128xf32, #tpu.memory_space<vmem>>, vector<1x128xf32>
    %30 = vector.broadcast %29 : vector<1x128xf32> to vector<64x128xf32>
    %31 = arith.mulf %28, %30 : vector<64x128xf32>
    %c0_30 = arith.constant 0 : index
    %c0_31 = arith.constant 0 : index
    %32 = vector.load %arg4[%c0_30, %c0_31] : memref<1x128xf32, #tpu.memory_space<vmem>>, vector<1x128xf32>
    %33 = vector.broadcast %32 : vector<1x128xf32> to vector<64x128xf32>
    %34 = arith.addf %31, %33 : vector<64x128xf32>
    %cst_32 = arith.constant 0.000000e+00 : f32
    %35 = vector.broadcast %cst_32 : f32 to vector<64x128xf32>
    %36 = arith.cmpf oge, %34, %35 : vector<64x128xf32>
    %cst_33 = arith.constant 0.00999999977 : f32
    %37 = vector.broadcast %cst_33 : f32 to vector<64x128xf32>
    %38 = arith.mulf %37, %34 : vector<64x128xf32>
    %39 = arith.select %36, %34, %38 : vector<64x128xi1>, vector<64x128xf32>
    %40 = vector.shape_cast %39 : vector<64x128xf32> to vector<8x8x128xf32>
    %41 = arith.truncf %40 : vector<8x8x128xf32> to vector<8x8x128xbf16>
    %c0_34 = arith.constant 0 : index
    %c0_35 = arith.constant 0 : index
    %c0_36 = arith.constant 0 : index
    %c0_37 = arith.constant 0 : index
    %c0_38 = arith.constant 0 : index
    %42 = vector.load %arg5[%c0_34, %c0_35, %c0_36, %c0_37, %c0_38] : memref<1x4x8x8x128xbf16, #tpu.memory_space<vmem>>, vector<1x1x8x8x128xbf16>
    %43 = vector.shape_cast %42 : vector<1x1x8x8x128xbf16> to vector<8x8x128xbf16>
    %44 = vector.shape_cast %41 : vector<8x8x128xbf16> to vector<1x1x8x8x128xbf16>
    tpu.vector_store %arg5[%c0_34, %c0_35, %c0_36, %c0_37, %c0_38], %44 {strides = array<i32>} : memref<1x4x8x8x128xbf16, #tpu.memory_space<vmem>>, vector<1x1x8x8x128xbf16>,
    %cst_39 = arith.constant 0.000000e+00 : f32
    %45 = vector.broadcast %cst_39 : f32 to vector<64x128xf32>
    %c0_40 = arith.constant 0 : index
    %c0_41 = arith.constant 0 : index
    %c1_42 = arith.constant 1 : index
    %c0_43 = arith.constant 0 : index
    %46 = vector.load %arg1[%c0_40, %c0_41, %c1_42, %c0_43] : memref<1x10x10x128xbf16, #tpu.memory_space<vmem>>, vector<1x8x8x128xbf16>
    %47 = vector.shape_cast %46 : vector<1x8x8x128xbf16> to vector<8x8x128xbf16>
    %48 = vector.shape_cast %47 : vector<8x8x128xbf16> to vector<64x128xbf16>
    %c4 = arith.constant 4 : index
    %c0_44 = arith.constant 0 : index
    %c0_45 = arith.constant 0 : index
    %49 = vector.load %arg2[%c4, %c0_44, %c0_45] : memref<16x128x128xbf16, #tpu.memory_space<vmem>>, vector<1x128x128xbf16>
    %50 = vector.shape_cast %49 : vector<1x128x128xbf16> to vector<128x128xbf16>
    %cst_46 = arith.constant dense<0.000000e+00> : vector<64x128xf32>
    %51 = tpu.matmul %48, %50, %cst_46 {dimension_numbers = #tpu.dot_dimension_numbers<[1], [0], [0], [1], [0, 0, 1, 1], [], []>} : vector<64x128xbf16>, vector<128x128xbf16>, vector<64x128xf32> -> vector<64x128xf32>
    %52 = arith.addf %45, %51 : vector<64x128xf32>
    %c0_47 = arith.constant 0 : index
    %c0_48 = arith.constant 0 : index
    %c2_49 = arith.constant 2 : index
    %c0_50 = arith.constant 0 : index
    %53 = vector.load %arg1[%c0_47, %c0_48, %c2_49, %c0_50] : memref<1x10x10x128xbf16, #tpu.memory_space<vmem>>, vector<1x8x8x128xbf16>
    %54 = vector.shape_cast %53 : vector<1x8x8x128xbf16> to vector<8x8x128xbf16>
    %55 = vector.shape_cast %54 : vector<8x8x128xbf16> to vector<64x128xbf16>
    %c5 = arith.constant 5 : index
    %c0_51 = arith.constant 0 : index
    %c0_52 = arith.constant 0 : index
    %56 = vector.load %arg2[%c5, %c0_51, %c0_52] : memref<16x128x128xbf16, #tpu.memory_space<vmem>>, vector<1x128x128xbf16>
    %57 = vector.shape_cast %56 : vector<1x128x128xbf16> to vector<128x128xbf16>
    %cst_53 = arith.constant dense<0.000000e+00> : vector<64x128xf32>
    %58 = tpu.matmul %55, %57, %cst_53 {dimension_numbers = #tpu.dot_dimension_numbers<[1], [0], [0], [1], [0, 0, 1, 1], [], []>} : vector<64x128xbf16>, vector<128x128xbf16>, vector<64x128xf32> -> vector<64x128xf32>
    %59 = arith.addf %52, %58 : vector<64x128xf32>
    %c0_54 = arith.constant 0 : index
    %c1_55 = arith.constant 1 : index
    %c1_56 = arith.constant 1 : index
    %c0_57 = arith.constant 0 : index
    %60 = vector.load %arg1[%c0_54, %c1_55, %c1_56, %c0_57] : memref<1x10x10x128xbf16, #tpu.memory_space<vmem>>, vector<1x8x8x128xbf16>
    %61 = vector.shape_cast %60 : vector<1x8x8x128xbf16> to vector<8x8x128xbf16>
    %62 = vector.shape_cast %61 : vector<8x8x128xbf16> to vector<64x128xbf16>
    %c6 = arith.constant 6 : index
    %c0_58 = arith.constant 0 : index
    %c0_59 = arith.constant 0 : index
    %63 = vector.load %arg2[%c6, %c0_58, %c0_59] : memref<16x128x128xbf16, #tpu.memory_space<vmem>>, vector<1x128x128xbf16>
    %64 = vector.shape_cast %63 : vector<1x128x128xbf16> to vector<128x128xbf16>
    %cst_60 = arith.constant dense<0.000000e+00> : vector<64x128xf32>
    %65 = tpu.matmul %62, %64, %cst_60 {dimension_numbers = #tpu.dot_dimension_numbers<[1], [0], [0], [1], [0, 0, 1, 1], [], []>} : vector<64x128xbf16>, vector<128x128xbf16>, vector<64x128xf32> -> vector<64x128xf32>
    %66 = arith.addf %59, %65 : vector<64x128xf32>
    %c0_61 = arith.constant 0 : index
    %c1_62 = arith.constant 1 : index
    %c2_63 = arith.constant 2 : index
    %c0_64 = arith.constant 0 : index
    %67 = vector.load %arg1[%c0_61, %c1_62, %c2_63, %c0_64] : memref<1x10x10x128xbf16, #tpu.memory_space<vmem>>, vector<1x8x8x128xbf16>
    %68 = vector.shape_cast %67 : vector<1x8x8x128xbf16> to vector<8x8x128xbf16>
    %69 = vector.shape_cast %68 : vector<8x8x128xbf16> to vector<64x128xbf16>
    %c7 = arith.constant 7 : index
    %c0_65 = arith.constant 0 : index
    %c0_66 = arith.constant 0 : index
    %70 = vector.load %arg2[%c7, %c0_65, %c0_66] : memref<16x128x128xbf16, #tpu.memory_space<vmem>>, vector<1x128x128xbf16>
    %71 = vector.shape_cast %70 : vector<1x128x128xbf16> to vector<128x128xbf16>
    %cst_67 = arith.constant dense<0.000000e+00> : vector<64x128xf32>
    %72 = tpu.matmul %69, %71, %cst_67 {dimension_numbers = #tpu.dot_dimension_numbers<[1], [0], [0], [1], [0, 0, 1, 1], [], []>} : vector<64x128xbf16>, vector<128x128xbf16>, vector<64x128xf32> -> vector<64x128xf32>
    %73 = arith.addf %66, %72 : vector<64x128xf32>
    %c0_68 = arith.constant 0 : index
    %c0_69 = arith.constant 0 : index
    %74 = vector.load %arg3[%c0_68, %c0_69] : memref<1x128xf32, #tpu.memory_space<vmem>>, vector<1x128xf32>
    %75 = vector.broadcast %74 : vector<1x128xf32> to vector<64x128xf32>
    %76 = arith.mulf %73, %75 : vector<64x128xf32>
    %c0_70 = arith.constant 0 : index
    %c0_71 = arith.constant 0 : index
    %77 = vector.load %arg4[%c0_70, %c0_71] : memref<1x128xf32, #tpu.memory_space<vmem>>, vector<1x128xf32>
    %78 = vector.broadcast %77 : vector<1x128xf32> to vector<64x128xf32>
    %79 = arith.addf %76, %78 : vector<64x128xf32>
    %cst_72 = arith.constant 0.000000e+00 : f32
    %80 = vector.broadcast %cst_72 : f32 to vector<64x128xf32>
    %81 = arith.cmpf oge, %79, %80 : vector<64x128xf32>
    %cst_73 = arith.constant 0.00999999977 : f32
    %82 = vector.broadcast %cst_73 : f32 to vector<64x128xf32>
    %83 = arith.mulf %82, %79 : vector<64x128xf32>
    %84 = arith.select %81, %79, %83 : vector<64x128xi1>, vector<64x128xf32>
    %85 = vector.shape_cast %84 : vector<64x128xf32> to vector<8x8x128xf32>
    %86 = arith.truncf %85 : vector<8x8x128xf32> to vector<8x8x128xbf16>
    %c0_74 = arith.constant 0 : index
    %c1_75 = arith.constant 1 : index
    %c0_76 = arith.constant 0 : index
    %c0_77 = arith.constant 0 : index
    %c0_78 = arith.constant 0 : index
    %87 = vector.load %arg5[%c0_74, %c1_75, %c0_76, %c0_77, %c0_78] : memref<1x4x8x8x128xbf16, #tpu.memory_space<vmem>>, vector<1x1x8x8x128xbf16>
    %88 = vector.shape_cast %87 : vector<1x1x8x8x128xbf16> to vector<8x8x128xbf16>
    %89 = vector.shape_cast %86 : vector<8x8x128xbf16> to vector<1x1x8x8x128xbf16>
    tpu.vector_store %arg5[%c0_74, %c1_75, %c0_76, %c0_77, %c0_78], %89 {strides = array<i32>} : memref<1x4x8x8x128xbf16, #tpu.memory_space<vmem>>, vector<1x1x8x8x128xbf16>,
    %cst_79 = arith.constant 0.000000e+00 : f32
    %90 = vector.broadcast %cst_79 : f32 to vector<64x128xf32>
    %c0_80 = arith.constant 0 : index
    %c1_81 = arith.constant 1 : index
    %c0_82 = arith.constant 0 : index
    %c0_83 = arith.constant 0 : index
    %91 = vector.load %arg1[%c0_80, %c1_81, %c0_82, %c0_83] : memref<1x10x10x128xbf16, #tpu.memory_space<vmem>>, vector<1x8x8x128xbf16>
    %92 = vector.shape_cast %91 : vector<1x8x8x128xbf16> to vector<8x8x128xbf16>
    %93 = vector.shape_cast %92 : vector<8x8x128xbf16> to vector<64x128xbf16>
    %c8 = arith.constant 8 : index
    %c0_84 = arith.constant 0 : index
    %c0_85 = arith.constant 0 : index
    %94 = vector.load %arg2[%c8, %c0_84, %c0_85] : memref<16x128x128xbf16, #tpu.memory_space<vmem>>, vector<1x128x128xbf16>
    %95 = vector.shape_cast %94 : vector<1x128x128xbf16> to vector<128x128xbf16>
    %cst_86 = arith.constant dense<0.000000e+00> : vector<64x128xf32>
    %96 = tpu.matmul %93, %95, %cst_86 {dimension_numbers = #tpu.dot_dimension_numbers<[1], [0], [0], [1], [0, 0, 1, 1], [], []>} : vector<64x128xbf16>, vector<128x128xbf16>, vector<64x128xf32> -> vector<64x128xf32>
    %97 = arith.addf %90, %96 : vector<64x128xf32>
    %c0_87 = arith.constant 0 : index
    %c1_88 = arith.constant 1 : index
    %c1_89 = arith.constant 1 : index
    %c0_90 = arith.constant 0 : index
    %98 = vector.load %arg1[%c0_87, %c1_88, %c1_89, %c0_90] : memref<1x10x10x128xbf16, #tpu.memory_space<vmem>>, vector<1x8x8x128xbf16>
    %99 = vector.shape_cast %98 : vector<1x8x8x128xbf16> to vector<8x8x128xbf16>
    %100 = vector.shape_cast %99 : vector<8x8x128xbf16> to vector<64x128xbf16>
    %c9 = arith.constant 9 : index
    %c0_91 = arith.constant 0 : index
    %c0_92 = arith.constant 0 : index
    %101 = vector.load %arg2[%c9, %c0_91, %c0_92] : memref<16x128x128xbf16, #tpu.memory_space<vmem>>, vector<1x128x128xbf16>
    %102 = vector.shape_cast %101 : vector<1x128x128xbf16> to vector<128x128xbf16>
    %cst_93 = arith.constant dense<0.000000e+00> : vector<64x128xf32>
    %103 = tpu.matmul %100, %102, %cst_93 {dimension_numbers = #tpu.dot_dimension_numbers<[1], [0], [0], [1], [0, 0, 1, 1], [], []>} : vector<64x128xbf16>, vector<128x128xbf16>, vector<64x128xf32> -> vector<64x128xf32>
    %104 = arith.addf %97, %103 : vector<64x128xf32>
    %c0_94 = arith.constant 0 : index
    %c2_95 = arith.constant 2 : index
    %c0_96 = arith.constant 0 : index
    %c0_97 = arith.constant 0 : index
    %105 = vector.load %arg1[%c0_94, %c2_95, %c0_96, %c0_97] : memref<1x10x10x128xbf16, #tpu.memory_space<vmem>>, vector<1x8x8x128xbf16>
    %106 = vector.shape_cast %105 : vector<1x8x8x128xbf16> to vector<8x8x128xbf16>
    %107 = vector.shape_cast %106 : vector<8x8x128xbf16> to vector<64x128xbf16>
    %c10 = arith.constant 10 : index
    %c0_98 = arith.constant 0 : index
    %c0_99 = arith.constant 0 : index
    %108 = vector.load %arg2[%c10, %c0_98, %c0_99] : memref<16x128x128xbf16, #tpu.memory_space<vmem>>, vector<1x128x128xbf16>
    %109 = vector.shape_cast %108 : vector<1x128x128xbf16> to vector<128x128xbf16>
    %cst_100 = arith.constant dense<0.000000e+00> : vector<64x128xf32>
    %110 = tpu.matmul %107, %109, %cst_100 {dimension_numbers = #tpu.dot_dimension_numbers<[1], [0], [0], [1], [0, 0, 1, 1], [], []>} : vector<64x128xbf16>, vector<128x128xbf16>, vector<64x128xf32> -> vector<64x128xf32>
    %111 = arith.addf %104, %110 : vector<64x128xf32>
    %c0_101 = arith.constant 0 : index
    %c2_102 = arith.constant 2 : index
    %c1_103 = arith.constant 1 : index
    %c0_104 = arith.constant 0 : index
    %112 = vector.load %arg1[%c0_101, %c2_102, %c1_103, %c0_104] : memref<1x10x10x128xbf16, #tpu.memory_space<vmem>>, vector<1x8x8x128xbf16>
    %113 = vector.shape_cast %112 : vector<1x8x8x128xbf16> to vector<8x8x128xbf16>
    %114 = vector.shape_cast %113 : vector<8x8x128xbf16> to vector<64x128xbf16>
    %c11 = arith.constant 11 : index
    %c0_105 = arith.constant 0 : index
    %c0_106 = arith.constant 0 : index
    %115 = vector.load %arg2[%c11, %c0_105, %c0_106] : memref<16x128x128xbf16, #tpu.memory_space<vmem>>, vector<1x128x128xbf16>
    %116 = vector.shape_cast %115 : vector<1x128x128xbf16> to vector<128x128xbf16>
    %cst_107 = arith.constant dense<0.000000e+00> : vector<64x128xf32>
    %117 = tpu.matmul %114, %116, %cst_107 {dimension_numbers = #tpu.dot_dimension_numbers<[1], [0], [0], [1], [0, 0, 1, 1], [], []>} : vector<64x128xbf16>, vector<128x128xbf16>, vector<64x128xf32> -> vector<64x128xf32>
    %118 = arith.addf %111, %117 : vector<64x128xf32>
    %c0_108 = arith.constant 0 : index
    %c0_109 = arith.constant 0 : index
    %119 = vector.load %arg3[%c0_108, %c0_109] : memref<1x128xf32, #tpu.memory_space<vmem>>, vector<1x128xf32>
    %120 = vector.broadcast %119 : vector<1x128xf32> to vector<64x128xf32>
    %121 = arith.mulf %118, %120 : vector<64x128xf32>
    %c0_110 = arith.constant 0 : index
    %c0_111 = arith.constant 0 : index
    %122 = vector.load %arg4[%c0_110, %c0_111] : memref<1x128xf32, #tpu.memory_space<vmem>>, vector<1x128xf32>
    %123 = vector.broadcast %122 : vector<1x128xf32> to vector<64x128xf32>
    %124 = arith.addf %121, %123 : vector<64x128xf32>
    %cst_112 = arith.constant 0.000000e+00 : f32
    %125 = vector.broadcast %cst_112 : f32 to vector<64x128xf32>
    %126 = arith.cmpf oge, %124, %125 : vector<64x128xf32>
    %cst_113 = arith.constant 0.00999999977 : f32
    %127 = vector.broadcast %cst_113 : f32 to vector<64x128xf32>
    %128 = arith.mulf %127, %124 : vector<64x128xf32>
    %129 = arith.select %126, %124, %128 : vector<64x128xi1>, vector<64x128xf32>
    %130 = vector.shape_cast %129 : vector<64x128xf32> to vector<8x8x128xf32>
    %131 = arith.truncf %130 : vector<8x8x128xf32> to vector<8x8x128xbf16>
    %c0_114 = arith.constant 0 : index
    %c2_115 = arith.constant 2 : index
    %c0_116 = arith.constant 0 : index
    %c0_117 = arith.constant 0 : index
    %c0_118 = arith.constant 0 : index
    %132 = vector.load %arg5[%c0_114, %c2_115, %c0_116, %c0_117, %c0_118] : memref<1x4x8x8x128xbf16, #tpu.memory_space<vmem>>, vector<1x1x8x8x128xbf16>
    %133 = vector.shape_cast %132 : vector<1x1x8x8x128xbf16> to vector<8x8x128xbf16>
    %134 = vector.shape_cast %131 : vector<8x8x128xbf16> to vector<1x1x8x8x128xbf16>
    tpu.vector_store %arg5[%c0_114, %c2_115, %c0_116, %c0_117, %c0_118], %134 {strides = array<i32>} : memref<1x4x8x8x128xbf16, #tpu.memory_space<vmem>>, vector<1x1x8x8x128xbf16>,
    %cst_119 = arith.constant 0.000000e+00 : f32
    %135 = vector.broadcast %cst_119 : f32 to vector<64x128xf32>
    %c0_120 = arith.constant 0 : index
    %c1_121 = arith.constant 1 : index
    %c1_122 = arith.constant 1 : index
    %c0_123 = arith.constant 0 : index
    %136 = vector.load %arg1[%c0_120, %c1_121, %c1_122, %c0_123] : memref<1x10x10x128xbf16, #tpu.memory_space<vmem>>, vector<1x8x8x128xbf16>
    %137 = vector.shape_cast %136 : vector<1x8x8x128xbf16> to vector<8x8x128xbf16>
    %138 = vector.shape_cast %137 : vector<8x8x128xbf16> to vector<64x128xbf16>
    %c12 = arith.constant 12 : index
    %c0_124 = arith.constant 0 : index
    %c0_125 = arith.constant 0 : index
    %139 = vector.load %arg2[%c12, %c0_124, %c0_125] : memref<16x128x128xbf16, #tpu.memory_space<vmem>>, vector<1x128x128xbf16>
    %140 = vector.shape_cast %139 : vector<1x128x128xbf16> to vector<128x128xbf16>
    %cst_126 = arith.constant dense<0.000000e+00> : vector<64x128xf32>
    %141 = tpu.matmul %138, %140, %cst_126 {dimension_numbers = #tpu.dot_dimension_numbers<[1], [0], [0], [1], [0, 0, 1, 1], [], []>} : vector<64x128xbf16>, vector<128x128xbf16>, vector<64x128xf32> -> vector<64x128xf32>
    %142 = arith.addf %135, %141 : vector<64x128xf32>
    %c0_127 = arith.constant 0 : index
    %c1_128 = arith.constant 1 : index
    %c2_129 = arith.constant 2 : index
    %c0_130 = arith.constant 0 : index
    %143 = vector.load %arg1[%c0_127, %c1_128, %c2_129, %c0_130] : memref<1x10x10x128xbf16, #tpu.memory_space<vmem>>, vector<1x8x8x128xbf16>
    %144 = vector.shape_cast %143 : vector<1x8x8x128xbf16> to vector<8x8x128xbf16>
    %145 = vector.shape_cast %144 : vector<8x8x128xbf16> to vector<64x128xbf16>
    %c13 = arith.constant 13 : index
    %c0_131 = arith.constant 0 : index
    %c0_132 = arith.constant 0 : index
    %146 = vector.load %arg2[%c13, %c0_131, %c0_132] : memref<16x128x128xbf16, #tpu.memory_space<vmem>>, vector<1x128x128xbf16>
    %147 = vector.shape_cast %146 : vector<1x128x128xbf16> to vector<128x128xbf16>
    %cst_133 = arith.constant dense<0.000000e+00> : vector<64x128xf32>
    %148 = tpu.matmul %145, %147, %cst_133 {dimension_numbers = #tpu.dot_dimension_numbers<[1], [0], [0], [1], [0, 0, 1, 1], [], []>} : vector<64x128xbf16>, vector<128x128xbf16>, vector<64x128xf32> -> vector<64x128xf32>
    %149 = arith.addf %142, %148 : vector<64x128xf32>
    %c0_134 = arith.constant 0 : index
    %c2_135 = arith.constant 2 : index
    %c1_136 = arith.constant 1 : index
    %c0_137 = arith.constant 0 : index
    %150 = vector.load %arg1[%c0_134, %c2_135, %c1_136, %c0_137] : memref<1x10x10x128xbf16, #tpu.memory_space<vmem>>, vector<1x8x8x128xbf16>
    %151 = vector.shape_cast %150 : vector<1x8x8x128xbf16> to vector<8x8x128xbf16>
    %152 = vector.shape_cast %151 : vector<8x8x128xbf16> to vector<64x128xbf16>
    %c14 = arith.constant 14 : index
    %c0_138 = arith.constant 0 : index
    %c0_139 = arith.constant 0 : index
    %153 = vector.load %arg2[%c14, %c0_138, %c0_139] : memref<16x128x128xbf16, #tpu.memory_space<vmem>>, vector<1x128x128xbf16>
    %154 = vector.shape_cast %153 : vector<1x128x128xbf16> to vector<128x128xbf16>
    %cst_140 = arith.constant dense<0.000000e+00> : vector<64x128xf32>
    %155 = tpu.matmul %152, %154, %cst_140 {dimension_numbers = #tpu.dot_dimension_numbers<[1], [0], [0], [1], [0, 0, 1, 1], [], []>} : vector<64x128xbf16>, vector<128x128xbf16>, vector<64x128xf32> -> vector<64x128xf32>
    %156 = arith.addf %149, %155 : vector<64x128xf32>
    %c0_141 = arith.constant 0 : index
    %c2_142 = arith.constant 2 : index
    %c2_143 = arith.constant 2 : index
    %c0_144 = arith.constant 0 : index
    %157 = vector.load %arg1[%c0_141, %c2_142, %c2_143, %c0_144] : memref<1x10x10x128xbf16, #tpu.memory_space<vmem>>, vector<1x8x8x128xbf16>
    %158 = vector.shape_cast %157 : vector<1x8x8x128xbf16> to vector<8x8x128xbf16>
    %159 = vector.shape_cast %158 : vector<8x8x128xbf16> to vector<64x128xbf16>
    %c15 = arith.constant 15 : index
    %c0_145 = arith.constant 0 : index
    %c0_146 = arith.constant 0 : index
    %160 = vector.load %arg2[%c15, %c0_145, %c0_146] : memref<16x128x128xbf16, #tpu.memory_space<vmem>>, vector<1x128x128xbf16>
    %161 = vector.shape_cast %160 : vector<1x128x128xbf16> to vector<128x128xbf16>
    %cst_147 = arith.constant dense<0.000000e+00> : vector<64x128xf32>
    %162 = tpu.matmul %159, %161, %cst_147 {dimension_numbers = #tpu.dot_dimension_numbers<[1], [0], [0], [1], [0, 0, 1, 1], [], []>} : vector<64x128xbf16>, vector<128x128xbf16>, vector<64x128xf32> -> vector<64x128xf32>
    %163 = arith.addf %156, %162 : vector<64x128xf32>
    %c0_148 = arith.constant 0 : index
    %c0_149 = arith.constant 0 : index
    %164 = vector.load %arg3[%c0_148, %c0_149] : memref<1x128xf32, #tpu.memory_space<vmem>>, vector<1x128xf32>
    %165 = vector.broadcast %164 : vector<1x128xf32> to vector<64x128xf32>
    %166 = arith.mulf %163, %165 : vector<64x128xf32>
    %c0_150 = arith.constant 0 : index
    %c0_151 = arith.constant 0 : index
    %167 = vector.load %arg4[%c0_150, %c0_151] : memref<1x128xf32, #tpu.memory_space<vmem>>, vector<1x128xf32>
    %168 = vector.broadcast %167 : vector<1x128xf32> to vector<64x128xf32>
    %169 = arith.addf %166, %168 : vector<64x128xf32>
    %cst_152 = arith.constant 0.000000e+00 : f32
    %170 = vector.broadcast %cst_152 : f32 to vector<64x128xf32>
    %171 = arith.cmpf oge, %169, %170 : vector<64x128xf32>
    %cst_153 = arith.constant 0.00999999977 : f32
    %172 = vector.broadcast %cst_153 : f32 to vector<64x128xf32>
    %173 = arith.mulf %172, %169 : vector<64x128xf32>
    %174 = arith.select %171, %169, %173 : vector<64x128xi1>, vector<64x128xf32>
    %175 = vector.shape_cast %174 : vector<64x128xf32> to vector<8x8x128xf32>
    %176 = arith.truncf %175 : vector<8x8x128xf32> to vector<8x8x128xbf16>
    %c0_154 = arith.constant 0 : index
    %c3_155 = arith.constant 3 : index
    %c0_156 = arith.constant 0 : index
    %c0_157 = arith.constant 0 : index
    %c0_158 = arith.constant 0 : index
    %177 = vector.load %arg5[%c0_154, %c3_155, %c0_156, %c0_157, %c0_158] : memref<1x4x8x8x128xbf16, #tpu.memory_space<vmem>>, vector<1x1x8x8x128xbf16>
    %178 = vector.shape_cast %177 : vector<1x1x8x8x128xbf16> to vector<8x8x128xbf16>
    %179 = vector.shape_cast %176 : vector<8x8x128xbf16> to vector<1x1x8x8x128xbf16>
    tpu.vector_store %arg5[%c0_154, %c3_155, %c0_156, %c0_157, %c0_158], %179 {strides = array<i32>} : memref<1x4x8x8x128xbf16, #tpu.memory_space<vmem>>, vector<1x1x8x8x128xbf16>,
    return
  }
  func.func @transform_0(%arg0: i32) -> (i32, i32, i32, i32) {
    %c0_i32 = arith.constant 0 : i32
    %c0_i32_0 = arith.constant 0 : i32
    %c0_i32_1 = arith.constant 0 : i32
    %c0_i32_2 = arith.constant 0 : i32
    return %arg0, %c0_i32, %c0_i32_0, %c0_i32_1 : i32, i32, i32, i32
  }
  func.func @transform_1(%arg0: i32) -> (i32, i32, i32) {
    %c0_i32 = arith.constant 0 : i32
    %c0_i32_0 = arith.constant 0 : i32
    %c0_i32_1 = arith.constant 0 : i32
    %c0_i32_2 = arith.constant 0 : i32
    return %c0_i32, %c0_i32_0, %c0_i32_1 : i32, i32, i32
  }
  func.func @transform_2(%arg0: i32) -> (i32, i32) {
    %c0_i32 = arith.constant 0 : i32
    %c0_i32_0 = arith.constant 0 : i32
    %c0_i32_1 = arith.constant 0 : i32
    return %c0_i32, %c0_i32_0 : i32, i32
  }
  func.func @transform_3(%arg0: i32) -> (i32, i32) {
    %c0_i32 = arith.constant 0 : i32
    %c0_i32_0 = arith.constant 0 : i32
    %c0_i32_1 = arith.constant 0 : i32
    return %c0_i32, %c0_i32_0 : i32, i32
  }
  func.func @transform_4(%arg0: i32) -> (i32, i32, i32, i32, i32) {
    %c0_i32 = arith.constant 0 : i32
    %c0_i32_0 = arith.constant 0 : i32
    %c0_i32_1 = arith.constant 0 : i32
    %c0_i32_2 = arith.constant 0 : i32
    %c0_i32_3 = arith.constant 0 : i32
    return %arg0, %c0_i32, %c0_i32_0, %c0_i32_1, %c0_i32_2 : i32, i32, i32, i32, i32
  }
}

module attributes {stable_mosaic.version = 11 : i64} {
  func.func @_conv_kernel(%arg0: i32, %arg1: memref<1x18x18x128xbf16, #tpu.memory_space<vmem>>, %arg2: memref<9x128x128xbf16, #tpu.memory_space<vmem>>, %arg3: memref<1x128xf32, #tpu.memory_space<vmem>>, %arg4: memref<1x128xf32, #tpu.memory_space<vmem>>, %arg5: memref<1x16x16x128xbf16, #tpu.memory_space<vmem>>) attributes {dimension_semantics = [#tpu.dimension_semantics<parallel>], iteration_bounds = array<i64: 2>, scalar_prefetch = 0 : i64, scratch_operands = 0 : i64, tpu.core_type = #tpu.core_type<tc>, window_params = [{transform_indices = @transform_0, window_bounds = array<i64: 1, 18, 18, 128>}, {pipeline_mode = #tpu.pipeline_mode<synchronous>, transform_indices = @transform_1, window_bounds = array<i64: 9, 128, 128>}, {pipeline_mode = #tpu.pipeline_mode<synchronous>, transform_indices = @transform_2, window_bounds = array<i64: 1, 128>}, {pipeline_mode = #tpu.pipeline_mode<synchronous>, transform_indices = @transform_3, window_bounds = array<i64: 1, 128>}, {transform_indices = @transform_4, window_bounds = array<i64: 1, 16, 16, 128>}]} {
    %cst = arith.constant 0.000000e+00 : f32
    %0 = vector.broadcast %cst : f32 to vector<256x128xf32>
    %c0 = arith.constant 0 : index
    %c0_0 = arith.constant 0 : index
    %c0_1 = arith.constant 0 : index
    %c0_2 = arith.constant 0 : index
    %1 = vector.load %arg1[%c0, %c0_0, %c0_1, %c0_2] : memref<1x18x18x128xbf16, #tpu.memory_space<vmem>>, vector<1x16x16x128xbf16>
    %2 = vector.shape_cast %1 : vector<1x16x16x128xbf16> to vector<16x16x128xbf16>
    %3 = vector.shape_cast %2 : vector<16x16x128xbf16> to vector<256x128xbf16>
    %c0_3 = arith.constant 0 : index
    %c0_4 = arith.constant 0 : index
    %c0_5 = arith.constant 0 : index
    %4 = vector.load %arg2[%c0_3, %c0_4, %c0_5] : memref<9x128x128xbf16, #tpu.memory_space<vmem>>, vector<1x128x128xbf16>
    %5 = vector.shape_cast %4 : vector<1x128x128xbf16> to vector<128x128xbf16>
    %cst_6 = arith.constant dense<0.000000e+00> : vector<256x128xf32>
    %6 = tpu.matmul %3, %5, %cst_6 {dimension_numbers = #tpu.dot_dimension_numbers<[1], [0], [0], [1], [0, 0, 1, 1], [], []>} : vector<256x128xbf16>, vector<128x128xbf16>, vector<256x128xf32> -> vector<256x128xf32>
    %7 = arith.addf %0, %6 : vector<256x128xf32>
    %c0_7 = arith.constant 0 : index
    %c0_8 = arith.constant 0 : index
    %c1 = arith.constant 1 : index
    %c0_9 = arith.constant 0 : index
    %8 = vector.load %arg1[%c0_7, %c0_8, %c1, %c0_9] : memref<1x18x18x128xbf16, #tpu.memory_space<vmem>>, vector<1x16x16x128xbf16>
    %9 = vector.shape_cast %8 : vector<1x16x16x128xbf16> to vector<16x16x128xbf16>
    %10 = vector.shape_cast %9 : vector<16x16x128xbf16> to vector<256x128xbf16>
    %c1_10 = arith.constant 1 : index
    %c0_11 = arith.constant 0 : index
    %c0_12 = arith.constant 0 : index
    %11 = vector.load %arg2[%c1_10, %c0_11, %c0_12] : memref<9x128x128xbf16, #tpu.memory_space<vmem>>, vector<1x128x128xbf16>
    %12 = vector.shape_cast %11 : vector<1x128x128xbf16> to vector<128x128xbf16>
    %cst_13 = arith.constant dense<0.000000e+00> : vector<256x128xf32>
    %13 = tpu.matmul %10, %12, %cst_13 {dimension_numbers = #tpu.dot_dimension_numbers<[1], [0], [0], [1], [0, 0, 1, 1], [], []>} : vector<256x128xbf16>, vector<128x128xbf16>, vector<256x128xf32> -> vector<256x128xf32>
    %14 = arith.addf %7, %13 : vector<256x128xf32>
    %c0_14 = arith.constant 0 : index
    %c0_15 = arith.constant 0 : index
    %c2 = arith.constant 2 : index
    %c0_16 = arith.constant 0 : index
    %15 = vector.load %arg1[%c0_14, %c0_15, %c2, %c0_16] : memref<1x18x18x128xbf16, #tpu.memory_space<vmem>>, vector<1x16x16x128xbf16>
    %16 = vector.shape_cast %15 : vector<1x16x16x128xbf16> to vector<16x16x128xbf16>
    %17 = vector.shape_cast %16 : vector<16x16x128xbf16> to vector<256x128xbf16>
    %c2_17 = arith.constant 2 : index
    %c0_18 = arith.constant 0 : index
    %c0_19 = arith.constant 0 : index
    %18 = vector.load %arg2[%c2_17, %c0_18, %c0_19] : memref<9x128x128xbf16, #tpu.memory_space<vmem>>, vector<1x128x128xbf16>
    %19 = vector.shape_cast %18 : vector<1x128x128xbf16> to vector<128x128xbf16>
    %cst_20 = arith.constant dense<0.000000e+00> : vector<256x128xf32>
    %20 = tpu.matmul %17, %19, %cst_20 {dimension_numbers = #tpu.dot_dimension_numbers<[1], [0], [0], [1], [0, 0, 1, 1], [], []>} : vector<256x128xbf16>, vector<128x128xbf16>, vector<256x128xf32> -> vector<256x128xf32>
    %21 = arith.addf %14, %20 : vector<256x128xf32>
    %c0_21 = arith.constant 0 : index
    %c1_22 = arith.constant 1 : index
    %c0_23 = arith.constant 0 : index
    %c0_24 = arith.constant 0 : index
    %22 = vector.load %arg1[%c0_21, %c1_22, %c0_23, %c0_24] : memref<1x18x18x128xbf16, #tpu.memory_space<vmem>>, vector<1x16x16x128xbf16>
    %23 = vector.shape_cast %22 : vector<1x16x16x128xbf16> to vector<16x16x128xbf16>
    %24 = vector.shape_cast %23 : vector<16x16x128xbf16> to vector<256x128xbf16>
    %c3 = arith.constant 3 : index
    %c0_25 = arith.constant 0 : index
    %c0_26 = arith.constant 0 : index
    %25 = vector.load %arg2[%c3, %c0_25, %c0_26] : memref<9x128x128xbf16, #tpu.memory_space<vmem>>, vector<1x128x128xbf16>
    %26 = vector.shape_cast %25 : vector<1x128x128xbf16> to vector<128x128xbf16>
    %cst_27 = arith.constant dense<0.000000e+00> : vector<256x128xf32>
    %27 = tpu.matmul %24, %26, %cst_27 {dimension_numbers = #tpu.dot_dimension_numbers<[1], [0], [0], [1], [0, 0, 1, 1], [], []>} : vector<256x128xbf16>, vector<128x128xbf16>, vector<256x128xf32> -> vector<256x128xf32>
    %28 = arith.addf %21, %27 : vector<256x128xf32>
    %c0_28 = arith.constant 0 : index
    %c1_29 = arith.constant 1 : index
    %c1_30 = arith.constant 1 : index
    %c0_31 = arith.constant 0 : index
    %29 = vector.load %arg1[%c0_28, %c1_29, %c1_30, %c0_31] : memref<1x18x18x128xbf16, #tpu.memory_space<vmem>>, vector<1x16x16x128xbf16>
    %30 = vector.shape_cast %29 : vector<1x16x16x128xbf16> to vector<16x16x128xbf16>
    %31 = vector.shape_cast %30 : vector<16x16x128xbf16> to vector<256x128xbf16>
    %c4 = arith.constant 4 : index
    %c0_32 = arith.constant 0 : index
    %c0_33 = arith.constant 0 : index
    %32 = vector.load %arg2[%c4, %c0_32, %c0_33] : memref<9x128x128xbf16, #tpu.memory_space<vmem>>, vector<1x128x128xbf16>
    %33 = vector.shape_cast %32 : vector<1x128x128xbf16> to vector<128x128xbf16>
    %cst_34 = arith.constant dense<0.000000e+00> : vector<256x128xf32>
    %34 = tpu.matmul %31, %33, %cst_34 {dimension_numbers = #tpu.dot_dimension_numbers<[1], [0], [0], [1], [0, 0, 1, 1], [], []>} : vector<256x128xbf16>, vector<128x128xbf16>, vector<256x128xf32> -> vector<256x128xf32>
    %35 = arith.addf %28, %34 : vector<256x128xf32>
    %c0_35 = arith.constant 0 : index
    %c1_36 = arith.constant 1 : index
    %c2_37 = arith.constant 2 : index
    %c0_38 = arith.constant 0 : index
    %36 = vector.load %arg1[%c0_35, %c1_36, %c2_37, %c0_38] : memref<1x18x18x128xbf16, #tpu.memory_space<vmem>>, vector<1x16x16x128xbf16>
    %37 = vector.shape_cast %36 : vector<1x16x16x128xbf16> to vector<16x16x128xbf16>
    %38 = vector.shape_cast %37 : vector<16x16x128xbf16> to vector<256x128xbf16>
    %c5 = arith.constant 5 : index
    %c0_39 = arith.constant 0 : index
    %c0_40 = arith.constant 0 : index
    %39 = vector.load %arg2[%c5, %c0_39, %c0_40] : memref<9x128x128xbf16, #tpu.memory_space<vmem>>, vector<1x128x128xbf16>
    %40 = vector.shape_cast %39 : vector<1x128x128xbf16> to vector<128x128xbf16>
    %cst_41 = arith.constant dense<0.000000e+00> : vector<256x128xf32>
    %41 = tpu.matmul %38, %40, %cst_41 {dimension_numbers = #tpu.dot_dimension_numbers<[1], [0], [0], [1], [0, 0, 1, 1], [], []>} : vector<256x128xbf16>, vector<128x128xbf16>, vector<256x128xf32> -> vector<256x128xf32>
    %42 = arith.addf %35, %41 : vector<256x128xf32>
    %c0_42 = arith.constant 0 : index
    %c2_43 = arith.constant 2 : index
    %c0_44 = arith.constant 0 : index
    %c0_45 = arith.constant 0 : index
    %43 = vector.load %arg1[%c0_42, %c2_43, %c0_44, %c0_45] : memref<1x18x18x128xbf16, #tpu.memory_space<vmem>>, vector<1x16x16x128xbf16>
    %44 = vector.shape_cast %43 : vector<1x16x16x128xbf16> to vector<16x16x128xbf16>
    %45 = vector.shape_cast %44 : vector<16x16x128xbf16> to vector<256x128xbf16>
    %c6 = arith.constant 6 : index
    %c0_46 = arith.constant 0 : index
    %c0_47 = arith.constant 0 : index
    %46 = vector.load %arg2[%c6, %c0_46, %c0_47] : memref<9x128x128xbf16, #tpu.memory_space<vmem>>, vector<1x128x128xbf16>
    %47 = vector.shape_cast %46 : vector<1x128x128xbf16> to vector<128x128xbf16>
    %cst_48 = arith.constant dense<0.000000e+00> : vector<256x128xf32>
    %48 = tpu.matmul %45, %47, %cst_48 {dimension_numbers = #tpu.dot_dimension_numbers<[1], [0], [0], [1], [0, 0, 1, 1], [], []>} : vector<256x128xbf16>, vector<128x128xbf16>, vector<256x128xf32> -> vector<256x128xf32>
    %49 = arith.addf %42, %48 : vector<256x128xf32>
    %c0_49 = arith.constant 0 : index
    %c2_50 = arith.constant 2 : index
    %c1_51 = arith.constant 1 : index
    %c0_52 = arith.constant 0 : index
    %50 = vector.load %arg1[%c0_49, %c2_50, %c1_51, %c0_52] : memref<1x18x18x128xbf16, #tpu.memory_space<vmem>>, vector<1x16x16x128xbf16>
    %51 = vector.shape_cast %50 : vector<1x16x16x128xbf16> to vector<16x16x128xbf16>
    %52 = vector.shape_cast %51 : vector<16x16x128xbf16> to vector<256x128xbf16>
    %c7 = arith.constant 7 : index
    %c0_53 = arith.constant 0 : index
    %c0_54 = arith.constant 0 : index
    %53 = vector.load %arg2[%c7, %c0_53, %c0_54] : memref<9x128x128xbf16, #tpu.memory_space<vmem>>, vector<1x128x128xbf16>
    %54 = vector.shape_cast %53 : vector<1x128x128xbf16> to vector<128x128xbf16>
    %cst_55 = arith.constant dense<0.000000e+00> : vector<256x128xf32>
    %55 = tpu.matmul %52, %54, %cst_55 {dimension_numbers = #tpu.dot_dimension_numbers<[1], [0], [0], [1], [0, 0, 1, 1], [], []>} : vector<256x128xbf16>, vector<128x128xbf16>, vector<256x128xf32> -> vector<256x128xf32>
    %56 = arith.addf %49, %55 : vector<256x128xf32>
    %c0_56 = arith.constant 0 : index
    %c2_57 = arith.constant 2 : index
    %c2_58 = arith.constant 2 : index
    %c0_59 = arith.constant 0 : index
    %57 = vector.load %arg1[%c0_56, %c2_57, %c2_58, %c0_59] : memref<1x18x18x128xbf16, #tpu.memory_space<vmem>>, vector<1x16x16x128xbf16>
    %58 = vector.shape_cast %57 : vector<1x16x16x128xbf16> to vector<16x16x128xbf16>
    %59 = vector.shape_cast %58 : vector<16x16x128xbf16> to vector<256x128xbf16>
    %c8 = arith.constant 8 : index
    %c0_60 = arith.constant 0 : index
    %c0_61 = arith.constant 0 : index
    %60 = vector.load %arg2[%c8, %c0_60, %c0_61] : memref<9x128x128xbf16, #tpu.memory_space<vmem>>, vector<1x128x128xbf16>
    %61 = vector.shape_cast %60 : vector<1x128x128xbf16> to vector<128x128xbf16>
    %cst_62 = arith.constant dense<0.000000e+00> : vector<256x128xf32>
    %62 = tpu.matmul %59, %61, %cst_62 {dimension_numbers = #tpu.dot_dimension_numbers<[1], [0], [0], [1], [0, 0, 1, 1], [], []>} : vector<256x128xbf16>, vector<128x128xbf16>, vector<256x128xf32> -> vector<256x128xf32>
    %63 = arith.addf %56, %62 : vector<256x128xf32>
    %c0_63 = arith.constant 0 : index
    %c0_64 = arith.constant 0 : index
    %64 = vector.load %arg3[%c0_63, %c0_64] : memref<1x128xf32, #tpu.memory_space<vmem>>, vector<1x128xf32>
    %65 = vector.broadcast %64 : vector<1x128xf32> to vector<256x128xf32>
    %66 = arith.mulf %63, %65 : vector<256x128xf32>
    %c0_65 = arith.constant 0 : index
    %c0_66 = arith.constant 0 : index
    %67 = vector.load %arg4[%c0_65, %c0_66] : memref<1x128xf32, #tpu.memory_space<vmem>>, vector<1x128xf32>
    %68 = vector.broadcast %67 : vector<1x128xf32> to vector<256x128xf32>
    %69 = arith.addf %66, %68 : vector<256x128xf32>
    %cst_67 = arith.constant 0.000000e+00 : f32
    %70 = vector.broadcast %cst_67 : f32 to vector<256x128xf32>
    %71 = arith.cmpf oge, %69, %70 : vector<256x128xf32>
    %cst_68 = arith.constant 0.00999999977 : f32
    %72 = vector.broadcast %cst_68 : f32 to vector<256x128xf32>
    %73 = arith.mulf %72, %69 : vector<256x128xf32>
    %74 = arith.select %71, %69, %73 : vector<256x128xi1>, vector<256x128xf32>
    %75 = vector.shape_cast %74 : vector<256x128xf32> to vector<16x16x128xf32>
    %c0_69 = arith.constant 0 : index
    %c1_70 = arith.constant 1 : index
    %c1_71 = arith.constant 1 : index
    %c0_72 = arith.constant 0 : index
    %76 = vector.load %arg1[%c0_69, %c1_70, %c1_71, %c0_72] : memref<1x18x18x128xbf16, #tpu.memory_space<vmem>>, vector<1x16x16x128xbf16>
    %77 = vector.shape_cast %76 : vector<1x16x16x128xbf16> to vector<16x16x128xbf16>
    %78 = arith.extf %77 : vector<16x16x128xbf16> to vector<16x16x128xf32>
    %79 = arith.addf %75, %78 : vector<16x16x128xf32>
    %80 = arith.truncf %79 : vector<16x16x128xf32> to vector<16x16x128xbf16>
    %c0_73 = arith.constant 0 : index
    %c0_74 = arith.constant 0 : index
    %c0_75 = arith.constant 0 : index
    %c0_76 = arith.constant 0 : index
    %81 = vector.load %arg5[%c0_73, %c0_74, %c0_75, %c0_76] : memref<1x16x16x128xbf16, #tpu.memory_space<vmem>>, vector<1x16x16x128xbf16>
    %82 = vector.shape_cast %81 : vector<1x16x16x128xbf16> to vector<16x16x128xbf16>
    %83 = vector.shape_cast %80 : vector<16x16x128xbf16> to vector<1x16x16x128xbf16>
    tpu.vector_store %arg5[%c0_73, %c0_74, %c0_75, %c0_76], %83 {strides = array<i32>} : memref<1x16x16x128xbf16, #tpu.memory_space<vmem>>, vector<1x16x16x128xbf16>,
    return
  }
  func.func @transform_0(%arg0: i32) -> (i32, i32, i32, i32) {
    %c0_i32 = arith.constant 0 : i32
    %c0_i32_0 = arith.constant 0 : i32
    %c0_i32_1 = arith.constant 0 : i32
    %c0_i32_2 = arith.constant 0 : i32
    return %arg0, %c0_i32, %c0_i32_0, %c0_i32_1 : i32, i32, i32, i32
  }
  func.func @transform_1(%arg0: i32) -> (i32, i32, i32) {
    %c0_i32 = arith.constant 0 : i32
    %c0_i32_0 = arith.constant 0 : i32
    %c0_i32_1 = arith.constant 0 : i32
    %c0_i32_2 = arith.constant 0 : i32
    return %c0_i32, %c0_i32_0, %c0_i32_1 : i32, i32, i32
  }
  func.func @transform_2(%arg0: i32) -> (i32, i32) {
    %c0_i32 = arith.constant 0 : i32
    %c0_i32_0 = arith.constant 0 : i32
    %c0_i32_1 = arith.constant 0 : i32
    return %c0_i32, %c0_i32_0 : i32, i32
  }
  func.func @transform_3(%arg0: i32) -> (i32, i32) {
    %c0_i32 = arith.constant 0 : i32
    %c0_i32_0 = arith.constant 0 : i32
    %c0_i32_1 = arith.constant 0 : i32
    return %c0_i32, %c0_i32_0 : i32, i32
  }
  func.func @transform_4(%arg0: i32) -> (i32, i32, i32, i32) {
    %c0_i32 = arith.constant 0 : i32
    %c0_i32_0 = arith.constant 0 : i32
    %c0_i32_1 = arith.constant 0 : i32
    %c0_i32_2 = arith.constant 0 : i32
    return %arg0, %c0_i32, %c0_i32_0, %c0_i32_1 : i32, i32, i32, i32
  }
}

module attributes {stable_mosaic.version = 11 : i64} {
  func.func @_conv_kernel(%arg0: i32, %arg1: memref<1x16x16x128xbf16, #tpu.memory_space<vmem>>, %arg2: memref<1x128x128xbf16, #tpu.memory_space<vmem>>, %arg3: memref<1x128xf32, #tpu.memory_space<vmem>>, %arg4: memref<1x128xf32, #tpu.memory_space<vmem>>, %arg5: memref<1x16x16x128xf32, #tpu.memory_space<vmem>>) attributes {dimension_semantics = [#tpu.dimension_semantics<parallel>], iteration_bounds = array<i64: 2>, scalar_prefetch = 0 : i64, scratch_operands = 0 : i64, tpu.core_type = #tpu.core_type<tc>, window_params = [{transform_indices = @transform_0, window_bounds = array<i64: 1, 16, 16, 128>}, {pipeline_mode = #tpu.pipeline_mode<synchronous>, transform_indices = @transform_1, window_bounds = array<i64: 1, 128, 128>}, {pipeline_mode = #tpu.pipeline_mode<synchronous>, transform_indices = @transform_2, window_bounds = array<i64: 1, 128>}, {pipeline_mode = #tpu.pipeline_mode<synchronous>, transform_indices = @transform_3, window_bounds = array<i64: 1, 128>}, {transform_indices = @transform_4, window_bounds = array<i64: 1, 16, 16, 128>}]} {
    %cst = arith.constant 0.000000e+00 : f32
    %0 = vector.broadcast %cst : f32 to vector<256x128xf32>
    %c0 = arith.constant 0 : index
    %c0_0 = arith.constant 0 : index
    %c0_1 = arith.constant 0 : index
    %c0_2 = arith.constant 0 : index
    %1 = vector.load %arg1[%c0, %c0_0, %c0_1, %c0_2] : memref<1x16x16x128xbf16, #tpu.memory_space<vmem>>, vector<1x16x16x128xbf16>
    %2 = vector.shape_cast %1 : vector<1x16x16x128xbf16> to vector<16x16x128xbf16>
    %3 = vector.shape_cast %2 : vector<16x16x128xbf16> to vector<256x128xbf16>
    %c0_3 = arith.constant 0 : index
    %c0_4 = arith.constant 0 : index
    %c0_5 = arith.constant 0 : index
    %4 = vector.load %arg2[%c0_3, %c0_4, %c0_5] : memref<1x128x128xbf16, #tpu.memory_space<vmem>>, vector<1x128x128xbf16>
    %5 = vector.shape_cast %4 : vector<1x128x128xbf16> to vector<128x128xbf16>
    %cst_6 = arith.constant dense<0.000000e+00> : vector<256x128xf32>
    %6 = tpu.matmul %3, %5, %cst_6 {dimension_numbers = #tpu.dot_dimension_numbers<[1], [0], [0], [1], [0, 0, 1, 1], [], []>} : vector<256x128xbf16>, vector<128x128xbf16>, vector<256x128xf32> -> vector<256x128xf32>
    %7 = arith.addf %0, %6 : vector<256x128xf32>
    %c0_7 = arith.constant 0 : index
    %c0_8 = arith.constant 0 : index
    %8 = vector.load %arg3[%c0_7, %c0_8] : memref<1x128xf32, #tpu.memory_space<vmem>>, vector<1x128xf32>
    %9 = vector.broadcast %8 : vector<1x128xf32> to vector<256x128xf32>
    %10 = arith.mulf %7, %9 : vector<256x128xf32>
    %c0_9 = arith.constant 0 : index
    %c0_10 = arith.constant 0 : index
    %11 = vector.load %arg4[%c0_9, %c0_10] : memref<1x128xf32, #tpu.memory_space<vmem>>, vector<1x128xf32>
    %12 = vector.broadcast %11 : vector<1x128xf32> to vector<256x128xf32>
    %13 = arith.addf %10, %12 : vector<256x128xf32>
    %14 = vector.shape_cast %13 : vector<256x128xf32> to vector<16x16x128xf32>
    %c0_11 = arith.constant 0 : index
    %c0_12 = arith.constant 0 : index
    %c0_13 = arith.constant 0 : index
    %c0_14 = arith.constant 0 : index
    %15 = vector.load %arg5[%c0_11, %c0_12, %c0_13, %c0_14] : memref<1x16x16x128xf32, #tpu.memory_space<vmem>>, vector<1x16x16x128xf32>
    %16 = vector.shape_cast %15 : vector<1x16x16x128xf32> to vector<16x16x128xf32>
    %17 = vector.shape_cast %14 : vector<16x16x128xf32> to vector<1x16x16x128xf32>
    tpu.vector_store %arg5[%c0_11, %c0_12, %c0_13, %c0_14], %17 {strides = array<i32>} : memref<1x16x16x128xf32, #tpu.memory_space<vmem>>, vector<1x16x16x128xf32>,
    return
  }
  func.func @transform_0(%arg0: i32) -> (i32, i32, i32, i32) {
    %c0_i32 = arith.constant 0 : i32
    %c0_i32_0 = arith.constant 0 : i32
    %c0_i32_1 = arith.constant 0 : i32
    %c0_i32_2 = arith.constant 0 : i32
    return %arg0, %c0_i32, %c0_i32_0, %c0_i32_1 : i32, i32, i32, i32
  }
  func.func @transform_1(%arg0: i32) -> (i32, i32, i32) {
    %c0_i32 = arith.constant 0 : i32
    %c0_i32_0 = arith.constant 0 : i32
    %c0_i32_1 = arith.constant 0 : i32
    %c0_i32_2 = arith.constant 0 : i32
    return %c0_i32, %c0_i32_0, %c0_i32_1 : i32, i32, i32
  }
  func.func @transform_2(%arg0: i32) -> (i32, i32) {
    %c0_i32 = arith.constant 0 : i32
    %c0_i32_0 = arith.constant 0 : i32
    %c0_i32_1 = arith.constant 0 : i32
    return %c0_i32, %c0_i32_0 : i32, i32
  }
  func.func @transform_3(%arg0: i32) -> (i32, i32) {
    %c0_i32 = arith.constant 0 : i32
    %c0_i32_0 = arith.constant 0 : i32
    %c0_i32_1 = arith.constant 0 : i32
    return %c0_i32, %c0_i32_0 : i32, i32
  }
  func.func @transform_4(%arg0: i32) -> (i32, i32, i32, i32) {
    %c0_i32 = arith.constant 0 : i32
    %c0_i32_0 = arith.constant 0 : i32
    %c0_i32_1 = arith.constant 0 : i32
    %c0_i32_2 = arith.constant 0 : i32
    return %arg0, %c0_i32, %c0_i32_0, %c0_i32_1 : i32, i32, i32, i32
  }
}

</mosaic_0001>

<bundles_post_ra>
// kernel: _lambda_.6
= control target key start
LH: loop header
LB: loop body
LE: loop exit
PB: predicated region body
PF: predicated region fallthrough
CT: control target
= control target key end

     0   :  { %v201_v3 = vmov 0.0   ;;  %vm41_vm0 = vcmask 261120   ;;  %v31_v14 = vlaneseq  ;;  %vm116_vm1 = vcmask 1041408   ;;  %s271_s1 = inlined_call_operand.vmem [shape: f32[32,256], index: 1, kind: input, shape index: {}]   ;;  %s272_s0 = inlined_call_operand.vmem [shape: f32[2,32], index: 0, kind: input, shape index: {}]   ;;  %s273_s2 = inlined_call_operand.vmem [shape: f32[1,256], index: 2, kind: input, shape index: {}]   ;;  %s274_s3 = inlined_call_operand.vmem [shape: f32[1,256], index: 3, kind: input, shape index: {}]   ;;  %s275_s4 = inlined_call_operand.vmem [shape: f32[1,256], index: 4, kind: input, shape index: {}]   ;;  %s276_s5 = inlined_call_operand.vmem [shape: f32[2,256], index: 5, kind: output, shape index: {}]  }
   0x1   :  { %v22_v0 = vld [vmem:[%s271_s1 + $0x8] sm:$0xff]  ;;  %v24_v1 = vld [vmem:[%s271_s1 + $0x18] sm:$0xff]  ;;  %v21_v2 = vld [vmem:[%s271_s1] sm:$0xff]  ;;  %109 = vmatprep.mubr.f32.mxu0 %v201_v3 }
   0x2   :  { %v190_v4 = vpack.c.bf16 %v24_v1, %v22_v0  ;;  %v23_v5 = vld [vmem:[%s271_s1 + $0x10] sm:$0xff]  ;;  %v26_v6 = vld [vmem:[%s271_s1 + $0x28] sm:$0xff]  ;;  %v28_v7 = vld [vmem:[%s271_s1 + $0x38] sm:$0xff]  ;;  %v32_v15 = vshrl.u32 %v31_v14, 7 }
   0x3   :  { %v192_v8 = vpack.c.bf16 %v23_v5, %v21_v2  ;;  %v194_v9 = vpack.c.bf16 %v28_v7, %v26_v6  ;;  %v25_v10 = vld [vmem:[%s271_s1 + $0x20] sm:$0xff]  ;;  %v27_v11 = vld [vmem:[%s271_s1 + $0x30] sm:$0xff] }
   0x4   :  { %191 = vmatprep.subr.bf16.mxu0 %v190_v4  ;;  %v196_v12 = vpack.c.bf16 %v27_v11, %v25_v10  ;;  %v20_v13 = vld [vmem:[%s272_s0] sm:$0x3]  ;;  %v33_v16 = vsub.s32 0, %v32_v15  ;;  %v37_v18 = vsub.s32 1, %v32_v15 }
   0x5   :  { %193 = vmatpush1.bf16.msra.mxu0 %v192_v8  ;;  %v29_v17 = vld [vmem:[%s273_s2] sm:$0x3] }
   0x6   :  { %195 = vmatprep.subr.bf16.mxu0 %v194_v9  ;;  %v34_v19 = vrot.slane %v29_v17, %v33_v16  ;;  %v38_v20 = vrot.slane %v29_v17, %v37_v18  ;;  %v138_v40 = vld [vmem:[%s274_s3] sm:$0x3] }
   0x7   :  { %v152_v41 = vld [vmem:[%s275_s4] sm:$0x3]  ;;  %v143_v42 = vrot.slane %v138_v40, %v33_v16  ;;  %v147_v43 = vrot.slane %v138_v40, %v37_v18 }
   0x8   :  { %v157_v45 = vrot.slane %v152_v41, %v33_v16  ;;  %v161_v46 = vrot.slane %v152_v41, %v37_v18 }
   0x9   :  { %197 = vmatpush1.bf16.msra.mxu0 %v196_v12 }
   0xc   :  { %188 = vmatmul.mubr.msk.f32.vlgmr.msra.gmra.mrb[0].mxu0 %vm41_vm0, %v20_v13 }
  0xdf   :  { %v111_v21 = vpop.f32.mrb[0].mxu0 }
  0xe0   :  { %v112_v22 = vadd.f32 %v111_v21, %v34_v19  ;;  %v113_v23 = vpop.f32.mrb[1].mxu0 }
  0xe1   :  { %v114_v24 = vadd.f32 %v113_v23, %v38_v20 }
  0xe2   :  { %v117_v25 = vsel %vm116_vm1, %v112_v22, 0.0 }
  0xe3   :  { %v118_v26 = vsel %vm116_vm1, %v114_v24, 0.0 }
  0xe4   :  { %v119_v27 = vadd.f32 %v118_v26, %v117_v25 }
  0xe6   :  { %120 = vadd.xlane.f32.xlu0 %v119_v27 }
 0x173   :  { %v121_v28 = vpop.xlane.xlu0 %120 }
 0x174   :  { %v123_v29 = vmul.f32 0.00390625, %v121_v28 }
 0x176   :  { %v124_v30 = vsub.f32 %v112_v22, %v123_v29  ;;  %v125_v31 = vsub.f32 %v114_v24, %v123_v29 }
 0x178   :  { %v126_v32 = vmul.f32 %v124_v30, %v124_v30  ;;  %v127_v33 = vmul.f32 %v125_v31, %v125_v31 }
 0x17a   :  { %v128_v34 = vsel %vm116_vm1, %v126_v32, 0.0  ;;  %v129_v35 = vsel %vm116_vm1, %v127_v33, 0.0 }
 0x17b   :  { %v130_v36 = vadd.f32 %v129_v35, %v128_v34 }
 0x17d   :  { %131 = vadd.xlane.f32.xlu0 %v130_v36 }
 0x20a   :  { %v132_v37 = vpop.xlane.xlu0 %131 }
 0x20b   :  { %v133_v38 = vmul.f32 0.00390625, %v132_v37 }
 0x20d   :  { %v134_v39 = vadd.f32 1e-05, %v133_v38 }
 0x20f   :  { %199 = vrsqrt.f32 %v134_v39 }
 0x219   :  { %v200_v44 = vpop.eup %199 }
 0x21a   :  { %v136_v47 = vmul.f32 %v200_v44, %v124_v30  ;;  %v137_v48 = vmul.f32 %v200_v44, %v125_v31 }
 0x21c   :  { %v150_v49 = vmul.f32 %v143_v42, %v136_v47  ;;  %v151_v50 = vmul.f32 %v147_v43, %v137_v48 }
 0x21e   :  { %v164_v51 = vadd.f32 %v157_v45, %v150_v49  ;;  %v165_v52 = vadd.f32 %v161_v46, %v151_v50 }
 0x220   :  { %vm166_vm2 = vcmp.ge.f32.partialorder %v164_v51, 0.0  ;;  %vm167_vm3 = vcmp.ge.f32.partialorder %v165_v52, 0.0  ;;  %v168_v53 = vmul.f32 0.01, %v164_v51  ;;  %v169_v54 = vmul.f32 0.01, %v165_v52 }
 0x222   :  { %v170_v55 = vsel %vm166_vm2, %v164_v51, %v168_v53  ;;  %v171_v56 = vsel %vm167_vm3, %v165_v52, %v169_v54 }
 0x223   :  { %v174_v57 = vcombine.low %v170_v55, %v171_v56 }
 0x225   :  { %189 = vst.sshfl [vmem:[%s276_s5] sm:$0x33 pattern:$0x76325410] %v174_v57 }

// kernel: _lambda_.8
= control target key start
LH: loop header
LB: loop body
LE: loop exit
PB: predicated region body
PF: predicated region fallthrough
CT: control target
= control target key end

     0   :  { %s3272_s15 = smov 0   ;;  %s3890_s0 = inlined_call_operand.vmem [shape: bf16[2,10,10,128], index: 0, kind: input, shape index: {}]   ;;  %s3891_s1 = inlined_call_operand.vmem [shape: bf16[9,128,128], index: 1, kind: input, shape index: {}]   ;;  %s3892_s2 = inlined_call_operand.vmem [shape: f32[1,128], index: 2, kind: input, shape index: {}]   ;;  %s3893_s3 = inlined_call_operand.vmem [shape: f32[1,128], index: 3, kind: input, shape index: {}]   ;;  %s3894_s4 = inlined_call_operand.vmem [shape: bf16[2,8,8,128], index: 4, kind: output, shape index: {}]  }
   0x1 LB: > { %s2366_s16 = sadd.s32 4294967295, %s3245_s15   ;;  %p2370_p0 = scmp.ge.s32.totalorder %s3245_s15, 1  ;;  %s3245_s15 = sphi %s3272_s15, %s14_s15  }
   0x2   : > { %p162_p1 = scmp.lt.s32.totalorder %s3245_s15, 3 }
   0x4   : > { %p163_p2 = pnand %p2370_p0, %p162_p1 }
   0x5   : > { %v3139_v0 = vld [vmem:[%s3891_s1 + $0x40] sm:$0xff] (!%p163_p2)   ;;  %p188_p3 = scmp.lt.s32.totalorder (!%p163_p2), %s2366_s16, 1  ;;  %v3141_v2 = vld [vmem:[%s3891_s1 + $0x48] sm:$0xff] (!%p163_p2)   ;;  %v3143_v4 = vld [vmem:[%s3891_s1 + $0x50] sm:$0xff] (!%p163_p2)   ;;  %vm231_vm0 = vsmask.f32 (!%p163_p2), 3328 }
   0x6   : > { %166 = sbr.rel (%p163_p2) target bundleno = 404 (0x194), region = 36  ;;  %v3140_v1 = vld [vmem:[%s3891_s1 + $0x100] sm:$0xff] (!%p163_p2)   ;;  %2834 = vmatprep.subr.bf16.mxu1 (!%p163_p2), %v3139_v0  ;;  %v3142_v3 = vld [vmem:[%s3891_s1 + $0x108] sm:$0xff] (!%p163_p2)   ;;  %v3144_v5 = vld [vmem:[%s3891_s1 + $0x110] sm:$0xff] (!%p163_p2)   ;;  %vm232_vm1 = vsmask.f32 (!%p163_p2), 7440 }
   0x7   : > { %2930 = vmatprep.subr.bf16.mxu0 (!%p163_p2), %v3140_v1  ;;  %2835 = vmatpush3.bf16.msra.mxu1 (!%p163_p2), %v3139_v0  ;;  %v3145_v6 = vld [vmem:[%s3891_s1 + $0x58] sm:$0xff] (!%p163_p2)   ;;  %v3147_v8 = vld [vmem:[%s3891_s1 + $0x60] sm:$0xff] (!%p163_p2)   ;;  %v3149_v10 = vld [vmem:[%s3891_s1 + $0x68] sm:$0xff] (!%p163_p2)   ;;  %vm653_vm3 = vcmask (!%p163_p2), 1042432   ;;  %vm654_vm4 = vcmask (!%p163_p2), 1046532   ;;  %vm2254_vm6 = vcmask (!%p163_p2), 1046528  }
   0x8   : > { %2931 = vmatpush3.bf16.msra.mxu0 (!%p163_p2), %v3140_v1  ;;  %2836 = vmatprep.subr.bf16.mxu1 (!%p163_p2), %v3141_v2  ;;  %v3146_v7 = vld [vmem:[%s3891_s1 + $0x118] sm:$0xff] (!%p163_p2)   ;;  %v3148_v9 = vld [vmem:[%s3891_s1 + $0x120] sm:$0xff] (!%p163_p2)   ;;  %v3150_v14 = vld [vmem:[%s3891_s1 + $0x128] sm:$0xff] (!%p163_p2)  }
   0x9   : > { %2932 = vmatprep.subr.bf16.mxu0 (!%p163_p2), %v3142_v3  ;;  %v3151_v22 = vld [vmem:[%s3891_s1 + $0x70] sm:$0xff] (!%p163_p2)   ;;  %v3153_v37 = vld [vmem:[%s3891_s1 + $0x78] sm:$0xff] (!%p163_p2)   ;;  %vm3361_vm2 = vmor (!%p163_p2), %vm231_vm0, %vm232_vm1 }
   0xa   : > { %v3152_v23 = vld [vmem:[%s3891_s1 + $0x130] sm:$0xff] (!%p163_p2)   ;;  %v3154_v47 = vld [vmem:[%s3891_s1 + $0x138] sm:$0xff] (!%p163_p2)   ;;  %v3155_v61 = vld [vmem:[%s3891_s1] sm:$0xff] (!%p163_p2)  }
   0xb   : > { %2837 = vmatpush3.bf16.msra.mxu1 (!%p163_p2), %v3141_v2  ;;  %v3389_v63 = vld [vmem:[%s3891_s1 + $0x140] sm:$0xff] (!%p163_p2)   ;;  %vm3532_vm5 = vmor (!%p163_p2), %vm653_vm3, %vm654_vm4 }
   0xc   : > { %2933 = vmatpush3.bf16.msra.mxu0 (!%p163_p2), %v3142_v3  ;;  %2838 = vmatprep.subr.bf16.mxu1 (!%p163_p2), %v3143_v4  ;;  %v3219_v38 = vld [vmem:[%s3891_s1 + $0x220] sm:$0xff] (!%p163_p2)  }
   0xd   : > { %s3900_s16 = smov (!%p188_p3, %s2366_s16), 1  ;;  %2934 = vmatprep.subr.bf16.mxu0 %v3144_v5 }
   0xe   : > { %s3130_s7 = smul.u32 80, %s3900_s16  ;;  %s2702_s29 = sshll.u32 %s3900_s16, 5 }
   0xf   : > { %2839 = vmatpush3.bf16.msra.mxu1 %v3143_v4  ;;  %s197_s6 = scalar_lea.vmem %s3894_s4, %s2702_s29 }
  0x10   : > { %2935 = vmatpush3.bf16.msra.mxu0 %v3144_v5  ;;  %2840 = vmatprep.subr.bf16.mxu1 %v3145_v6  ;;  %s3316_s14 = scalar_lea.vmem %s3890_s0, %s3130_s7 }
  0x11   : > { %2936 = vmatprep.subr.bf16.mxu0 %v3146_v7  ;;  %v3322_v11 = vld [vmem:[%s3316_s14] sm:$0xf]  ;;  %v3325_v12 = vld [vmem:[%s3316_s14 + $0x8] sm:$0xf]  ;;  %v3328_v13 = vld [vmem:[%s3316_s14 + $0x4] sm:$0x1] }
  0x12   : > { %v3334_v15 = vld [vmem:[%s3316_s14 + $0xc] sm:$0x1]  ;;  %v235_v16 = vshrl.u32 %v3322_v11, 16  ;;  %v238_v17 = vshll.u32 %v3322_v11, 16  ;;  %v244_v18 = vshll.u32 %v3328_v13, 16  ;;  %v249_v19 = vshrl.u32 %v3325_v12, 16 }
  0x13   : > { %2841 = vmatpush3.bf16.msra.mxu1 %v3145_v6  ;;  %v252_v20 = vshll.u32 %v3325_v12, 16  ;;  %v258_v21 = vshll.u32 %v3334_v15, 16  ;;  %v2486_v30 = vld [vmem:[%s3316_s14 + $0x8] sm:$0xf]  ;;  %v3350_v31 = vld [vmem:[%s3316_s14 + $0xc] sm:$0x1] }
  0x14   : > { %2937 = vmatpush3.bf16.msra.mxu0 %v3146_v7  ;;  %2842 = vmatprep.subr.bf16.mxu1 %v3147_v8  ;;  %v237_v24 = vrot.slane %v235_v16, 4  ;;  %v240_v25 = vrot.slane %v238_v17, 5  ;;  %v246_v26 = vrot.slane %v244_v18, 5  ;;  %v251_v27 = vrot.slane %v249_v19, 4  ;;  %v2488_v33 = vld [vmem:[%s3316_s14 + $0x10] sm:$0xf] }
  0x15   : > { %2938 = vmatprep.subr.bf16.mxu0 %v3148_v9  ;;  %v254_v28 = vrot.slane %v252_v20, 5  ;;  %v260_v29 = vrot.slane %v258_v21, 5  ;;  %v3354_v34 = vld [vmem:[%s3316_s14 + $0x14] sm:$0x1]  ;;  %v1030_v35 = vshrl.u32 %v2486_v30, 16  ;;  %v1033_v36 = vshll.u32 %v2486_v30, 16 }
  0x16   : > { %v241_v32 = vor.u32 %v240_v25, %v237_v24  ;;  %v1039_v40 = vshll.u32 %v3350_v31, 16  ;;  %v1044_v41 = vshrl.u32 %v2488_v33, 16  ;;  %v1047_v42 = vshll.u32 %v2488_v33, 16  ;;  %v3373_v54 = vld [vmem:[%s3316_s14 + $0x10] sm:$0xf] }
  0x17   : > { %2843 = vmatpush3.bf16.msra.mxu1 %v3147_v8  ;;  %v255_v39 = vor.u32 %v254_v28, %v251_v27  ;;  %v1032_v44 = vrot.slane %v1030_v35, 4  ;;  %v1035_v45 = vrot.slane %v1033_v36, 5  ;;  %v1053_v46 = vshll.u32 %v3354_v34, 16  ;;  %v3378_v58 = vld [vmem:[%s3316_s14 + $0x18] sm:$0xf] }
  0x18   : > { %2939 = vmatpush3.bf16.msra.mxu0 %v3148_v9  ;;  %2844 = vmatprep.subr.bf16.mxu1 %v3149_v10  ;;  %v242_v43 = vrot.slane %v241_v32, 4  ;;  %v1046_v49 = vrot.slane %v1044_v41, 4  ;;  %v1049_v50 = vrot.slane %v1047_v42, 5  ;;  %v1041_v53 = vrot.slane %v1039_v40, 5  ;;  %v3381_v59 = vld [vmem:[%s3316_s14 + $0x14] sm:$0x1] }
  0x19   : > { %2940 = vmatprep.subr.bf16.mxu0 %v3150_v14  ;;  %v256_v48 = vrot.slane %v255_v39, 4  ;;  %v1036_v52 = vor.u32 %v1035_v45, %v1032_v44  ;;  %v1055_v57 = vrot.slane %v1053_v46, 5  ;;  %v3392_v0 = vld [vmem:[%s3316_s14 + $0x1c] sm:$0x1]  ;;  %v263_v2 = vshrl.u32 %v3373_v54, 16 }
  0x1a   : > { %v247_v51 = vsel %vm3361_vm2, %v242_v43, %v246_v26  ;;  %v1050_v56 = vor.u32 %v1049_v50, %v1046_v49  ;;  %v2490_v3 = vld [vmem:[%s3316_s14 + $0x18] sm:$0xf]  ;;  %v3397_v4 = vld [vmem:[%s3316_s14 + $0x1c] sm:$0x1]  ;;  %v266_v6 = vshll.u32 %v3373_v54, 16  ;;  %v272_v7 = vshll.u32 %v3381_v59, 16 }
  0x1b   : > { %2845 = vmatpush3.bf16.msra.mxu1 %v3149_v10  ;;  %v261_v55 = vsel %vm3361_vm2, %v256_v48, %v260_v29  ;;  %v1037_v62 = vrot.slane %v1036_v52, 4  ;;  %v277_v8 = vshrl.u32 %v3378_v58, 16  ;;  %v2492_v9 = vld [vmem:[%s3316_s14 + $0x20] sm:$0xf]  ;;  %v280_v16 = vshll.u32 %v3378_v58, 16  ;;  %v3157_v50 = vld [vmem:[%s3891_s1 + $0x8] sm:$0xff]  }
  0x1c   : > { %2941 = vmatpush3.bf16.msra.mxu0 %v3150_v14  ;;  %2846 = vmatprep.subr.bf16.mxu1 %v3151_v22  ;;  %v2390_v60 = vcombine.low %v247_v51, %v261_v55  ;;  %v1051_v1 = vrot.slane %v1050_v56, 4  ;;  %v265_v14 = vrot.slane %v263_v2, 4  ;;  %v286_v17 = vshll.u32 %v3392_v0, 16  ;;  %v3410_v21 = vld [vmem:[%s3316_s14 + $0x24] sm:$0x1]  ;;  %v3159_v55 = vld [vmem:[%s3891_s1 + $0x10] sm:$0xff]  }
  0x1d   : > { %2942 = vmatprep.subr.bf16.mxu0 %v3152_v23  ;;  %v1042_v5 = vsel %vm3361_vm2, %v1037_v62, %v1041_v53  ;;  %v268_v19 = vrot.slane %v266_v6, 5  ;;  %v279_v20 = vrot.slane %v277_v8, 4  ;;  %v1058_v26 = vshrl.u32 %v2490_v3, 16  ;;  %v3158_v53 = vld [vmem:[%s3891_s1 + $0x148] sm:$0xff]  }
  0x1e   : > { %2850 = vmatprep.mubr.bf16.mxu1 %v2390_v60  ;;  %v1056_v10 = vsel %vm3361_vm2, %v1051_v1, %v1055_v57  ;;  %v288_v24 = vrot.slane %v286_v17, 5  ;;  %v1061_v27 = vshll.u32 %v2490_v3, 16  ;;  %v1067_v28 = vshll.u32 %v3397_v4, 16  ;;  %v3433_v57 = vld [vmem:[%s3316_s14 + $0x20] sm:$0xf] }
  0x1f   : > { %2847 = vmatpush3.bf16.msra.mxu1 %v3151_v22  ;;  %v2518_v18 = vcombine.low %v1042_v5, %v1056_v10  ;;  %v274_v22 = vrot.slane %v272_v7, 5  ;;  %v269_v25 = vor.u32 %v268_v19, %v265_v14  ;;  %v1072_v30 = vshrl.u32 %v2492_v9, 16  ;;  %v3436_v60 = vld [vmem:[%s3316_s14 + $0x28] sm:$0xf]  ;;  %v3439_v1 = vld [vmem:[%s3316_s14 + $0x24] sm:$0x1] }
  0x20   : > { %2943 = vmatpush3.bf16.msra.mxu0 %v3152_v23  ;;  %2848 = vmatprep.subr.bf16.mxu1 %v3153_v37  ;;  %v282_v23 = vrot.slane %v280_v16, 5  ;;  %v1075_v32 = vshll.u32 %v2492_v9, 16  ;;  %v1081_v33 = vshll.u32 %v3410_v21, 16  ;;  %v1060_v36 = vrot.slane %v1058_v26, 4  ;;  %v3442_v2 = vld [vmem:[%s3316_s14 + $0x2c] sm:$0x1] }
  0x21   : > { %2944 = vmatprep.subr.bf16.mxu0 %v3154_v47  ;;  %2946 = vmatprep.mubr.bf16.mxu0 %v2518_v18  ;;  %v270_v35 = vrot.slane %v269_v25, 4  ;;  %v1074_v40 = vrot.slane %v1072_v30, 4  ;;  %v1069_v44 = vrot.slane %v1067_v28, 5  ;;  %v291_v3 = vshrl.u32 %v3433_v57, 16  ;;  %v3160_v9 = vld [vmem:[%s3891_s1 + $0x150] sm:$0xff]   ;;  %v3161_v10 = vld [vmem:[%s3891_s1 + $0x18] sm:$0xff]  }
  0x22   : > { %v283_v29 = vor.u32 %v282_v23, %v279_v20  ;;  %v1077_v41 = vrot.slane %v1075_v32, 5  ;;  %v1083_v45 = vrot.slane %v1081_v33, 5  ;;  %v294_v5 = vshll.u32 %v3433_v57, 16  ;;  %v2496_v25 = vld [vmem:[%s3316_s14 + $0x30] sm:$0xf] }
  0x23   : > { %2849 = vmatpush3.bf16.msra.mxu1 %v3153_v37  ;;  %v1063_v37 = vrot.slane %v1061_v27, 5  ;;  %v275_v42 = vsel %vm3361_vm2, %v270_v35, %v274_v22  ;;  %v305_v6 = vshrl.u32 %v3436_v60, 16  ;;  %v308_v7 = vshll.u32 %v3436_v60, 16  ;;  %v2494_v22 = vld [vmem:[%s3316_s14 + $0x28] sm:$0xf] }
  0x24   : > { %2945 = vmatpush3.bf16.msra.mxu0 %v3154_v47  ;;  %2858 = vmatprep.subr.bf16.mxu1 %v3155_v61  ;;  %v284_v39 = vrot.slane %v283_v29, 4  ;;  %v1078_v47 = vor.u32 %v1077_v41, %v1074_v40  ;;  %v314_v8 = vshll.u32 %v3442_v2, 16  ;;  %v293_v14 = vrot.slane %v291_v3, 4  ;;  %v3463_v26 = vld [vmem:[%s3316_s14 + $0x34] sm:$0x1] }
  0x25   : > { %2954 = vmatprep.subr.bf16.mxu0 %v3389_v63  ;;  %v1064_v43 = vor.u32 %v1063_v37, %v1060_v36  ;;  %v296_v16 = vrot.slane %v294_v5, 5  ;;  %v307_v18 = vrot.slane %v305_v6, 4  ;;  %v310_v19 = vrot.slane %v308_v7, 5  ;;  %v3468_v40 = vld [vmem:[%s3316_s14 + $0x30] sm:$0xf] }
  0x26   : > { %v289_v46 = vsel %vm3361_vm2, %v284_v39, %v288_v24  ;;  %v1079_v51 = vrot.slane %v1078_v47, 4  ;;  %v316_v20 = vrot.slane %v314_v8, 5  ;;  %v3459_v24 = vld [vmem:[%s3316_s14 + $0x2c] sm:$0x1]  ;;  %v1086_v28 = vshrl.u32 %v2494_v22, 16 }
  0x27   : > { %v2391_v48 = vcombine.low %v275_v42, %v289_v46  ;;  %v1065_v49 = vrot.slane %v1064_v43, 4  ;;  %v297_v23 = vor.u32 %v296_v16, %v293_v14  ;;  %v311_v27 = vor.u32 %v310_v19, %v307_v18  ;;  %v3162_v42 = vld [vmem:[%s3891_s1 + $0x158] sm:$0xff]   ;;  %v3163_v43 = vld [vmem:[%s3891_s1 + $0x20] sm:$0xff]  }
  0x28   : > { %v1084_v56 = vsel %vm3361_vm2, %v1079_v51, %v1083_v45  ;;  %v1089_v29 = vshll.u32 %v2494_v22, 16  ;;  %v1100_v32 = vshrl.u32 %v2496_v25, 16  ;;  %v1103_v33 = vshll.u32 %v2496_v25, 16  ;;  %v3482_v51 = vld [vmem:[%s3316_s14 + $0x38] sm:$0xf] }
  0x29   : > { %2851 = vmatmul.mubr.bf16.vlgmr.msra.gmra.mrb[0].mxu1 %v2391_v48  ;;  %v1070_v52 = vsel %vm3361_vm2, %v1065_v49, %v1069_v44  ;;  %v298_v30 = vrot.slane %v297_v23, 4  ;;  %v1109_v35 = vshll.u32 %v3463_v26, 16  ;;  %v312_v36 = vrot.slane %v311_v27, 4  ;;  %v3494_v3 = vld [vmem:[%s3316_s14 + $0x3c] sm:$0x1]  ;;  %v3166_v27 = vld [vmem:[%s3891_s1 + $0x168] sm:$0xff]  }
  0x2a   : > { %2859 = vmatpush3.bf16.msra.mxu1 %v3155_v61  ;;  %v2519_v62 = vcombine.low %v1070_v52, %v1084_v56  ;;  %v300_v61 = vshll.u32 %v3439_v1, 16  ;;  %v1088_v37 = vrot.slane %v1086_v28, 4  ;;  %v1091_v39 = vrot.slane %v1089_v29, 5  ;;  %v3485_v52 = vld [vmem:[%s3316_s14 + $0x34] sm:$0x1] }
  0x2b   : > { %2860 = vmatprep.subr.bf16.mxu1 %v3157_v50  ;;  %v1329_v41 = vrot.slane %v3397_v4, 5  ;;  %v1102_v45 = vrot.slane %v1100_v32, 4  ;;  %v1105_v46 = vrot.slane %v1103_v33, 5  ;;  %v317_v47 = vsel %vm3361_vm2, %v312_v36, %v316_v20  ;;  %v2498_v6 = vld [vmem:[%s3316_s14 + $0x38] sm:$0xf]  ;;  %v3167_v32 = vld [vmem:[%s3891_s1 + $0x30] sm:$0xff]  }
  0x2c   : > { %2947 = vmatmul.mubr.bf16.vlgmr.msra.gmra.mrb[0].mxu0 %v2519_v62  ;;  %v302_v17 = vrot.slane %v300_v61, 5  ;;  %v1092_v48 = vor.u32 %v1091_v39, %v1088_v37  ;;  %v319_v5 = vshrl.u32 %v3468_v40, 16  ;;  %v322_v61 = vshll.u32 %v3468_v40, 16  ;;  %v3501_v14 = vld [vmem:[%s3316_s14 + $0x3c] sm:$0x1] }
  0x2d   : > { %2955 = vmatpush3.bf16.msra.mxu0 %v3389_v63  ;;  %v1095_v63 = vshll.u32 %v3459_v24, 16  ;;  %v1106_v62 = vor.u32 %v1105_v46, %v1102_v45  ;;  %v328_v8 = vshll.u32 %v3485_v52, 16  ;;  %v2500_v16 = vld [vmem:[%s3316_s14 + $0x40] sm:$0xf]  ;;  %v333_v20 = vshrl.u32 %v3482_v51, 16 }
  0x2e   : > { %2861 = vmatpush3.bf16.msra.mxu1 %v3157_v50  ;;  %2956 = vmatprep.subr.bf16.mxu0 %v3158_v53  ;;  %v303_v44 = vsel %vm3361_vm2, %v298_v30, %v302_v17  ;;  %v1111_v50 = vrot.slane %v1109_v35, 5  ;;  %v1093_v7 = vrot.slane %v1092_v48, 4  ;;  %v321_v18 = vrot.slane %v319_v5, 4  ;;  %v3506_v22 = vld [vmem:[%s3316_s14 + $0x44] sm:$0x1] }
  0x2f   : > { %2862 = vmatprep.subr.bf16.mxu1 %v3159_v55  ;;  %v1097_v49 = vrot.slane %v1095_v63, 5  ;;  %v2392_v56 = vcombine.low %v303_v44, %v317_v47  ;;  %v1107_v17 = vrot.slane %v1106_v62, 4  ;;  %v324_v19 = vrot.slane %v322_v61, 5  ;;  %v2531_v5 = vld [vmem:[%s3316_s14 + $0x10] sm:$0xe] }
  0x30   : > { %v336_v23 = vshll.u32 %v3482_v51, 16  ;;  %v342_v25 = vshll.u32 %v3494_v3, 16  ;;  %v335_v63 = vrot.slane %v333_v20, 4  ;;  %v1114_v30 = vshrl.u32 %v2498_v6, 16  ;;  %v3168_v61 = vld [vmem:[%s3891_s1 + $0x170] sm:$0xff]  }
  0x31   : > { %2957 = vmatpush3.bf16.msra.mxu0 %v3158_v53  ;;  %v3164_v53 = vld [vmem:[%s3891_s1 + $0x160] sm:$0xff]   ;;  %2854 = vmatprep.mubr.bf16.mxu1 %v2392_v56  ;;  %v1112_v28 = vsel %vm3361_vm2, %v1107_v17, %v1111_v50  ;;  %v325_v29 = vor.u32 %v324_v19, %v321_v18  ;;  %v1117_v37 = vshll.u32 %v2498_v6, 16  ;;  %v1123_v45 = vshll.u32 %v3501_v14, 16  ;;  %v2532_v20 = vld [vmem:[%s3316_s14 + $0x18] sm:$0xe] }
  0x32   : > { %2863 = vmatpush3.bf16.msra.mxu1 %v3159_v55  ;;  %2958 = vmatprep.subr.bf16.mxu0 %v3160_v9  ;;  %v3165_v55 = vld [vmem:[%s3891_s1 + $0x28] sm:$0xff]   ;;  %v338_v35 = vrot.slane %v336_v23, 5  ;;  %v344_v36 = vrot.slane %v342_v25, 5  ;;  %v1116_v44 = vrot.slane %v1114_v30, 4  ;;  %v1128_v46 = vshrl.u32 %v2500_v16, 16 }
  0x33   : > { %2864 = vmatprep.subr.bf16.mxu1 %v3161_v10  ;;  %v326_v39 = vrot.slane %v325_v29, 4  ;;  %v1131_v47 = vshll.u32 %v2500_v16, 16  ;;  %v1137_v48 = vshll.u32 %v3506_v22, 16  ;;  %v1333_v50 = vrot.slane %v3410_v21, 5 }
  0x34   : > { %v1130_v62 = vrot.slane %v1128_v46, 4  ;;  %v1321_v19 = vrot.slane %v3350_v31, 5  ;;  %v2539_v25 = vrot.slane %v2531_v5, 9 }
  0x35   : > { %2959 = vmatpush3.bf16.msra.mxu0 %v3160_v9  ;;  %v1098_v9 = vsel %vm3361_vm2, %v1093_v7, %v1097_v49  ;;  %v2530_v49 = vld [vmem:[%s3316_s14 + $0x8] sm:$0xe]  ;;  %v1133_v16 = vrot.slane %v1131_v47, 5  ;;  %v1139_v17 = vrot.slane %v1137_v48, 5  ;;  %v1349_v48 = vrot.slane %v3506_v22, 5 }
  0x36   : > { %2865 = vmatpush3.bf16.msra.mxu1 %v3161_v10  ;;  %2960 = vmatprep.subr.bf16.mxu0 %v3162_v42  ;;  %v330_v10 = vrot.slane %v328_v8, 5  ;;  %v2520_v33 = vcombine.low %v1098_v9, %v1112_v28  ;;  %v1125_v8 = vrot.slane %v1123_v45, 5  ;;  %v2538_v18 = vrot.slane %v2530_v49, 9  ;;  %v2533_v28 = vld [vmem:[%s3316_s14 + $0x20] sm:$0xe] }
  0x37   : > { %2866 = vmatprep.subr.bf16.mxu1 %v3163_v43  ;;  %v1134_v23 = vor.u32 %v1133_v16, %v1130_v62  ;;  %v2534_v47 = vld [vmem:[%s3316_s14 + $0x28] sm:$0xe]  ;;  %v2537_v62 = vld [vmem:[%s3316_s14 + $0x40] sm:$0xe]  ;;  %v3179_v16 = vld [vmem:[%s3891_s1 + $0x98] sm:$0xff]  }
  0x38   : > { %2950 = vmatprep.mubr.bf16.mxu0 %v2520_v33  ;;  %v331_v56 = vsel %vm3361_vm2, %v326_v39, %v330_v10  ;;  %v1322_v30 = vsel %vm3532_vm5, %v2538_v18, %v1321_v19  ;;  %v3172_v33 = vld [vmem:[%s3891_s1 + $0x80] sm:$0xff]   ;;  %v670_v19 = vrot.slane %v3392_v0, 5 }
  0x39   : > { %2961 = vmatpush3.bf16.msra.mxu0 %v3162_v42  ;;  %v339_v42 = vor.u32 %v338_v35, %v335_v63  ;;  %v3170_v63 = vld [vmem:[%s3891_s1 + $0x178] sm:$0xff]   ;;  %v1135_v31 = vrot.slane %v1134_v23, 4  ;;  %v2540_v35 = vrot.slane %v2532_v20, 9  ;;  %v3173_v39 = vld [vmem:[%s3891_s1 + $0x180] sm:$0xff]  }
  0x3a   : > { %2867 = vmatpush3.bf16.msra.mxu1 %v3163_v43  ;;  %2962 = vmatprep.subr.bf16.mxu0 %v3164_v53  ;;  %v1119_v43 = vrot.slane %v1117_v37, 5  ;;  %v3180_v20 = vld [vmem:[%s3891_s1 + $0x198] sm:$0xff]  }
  0x3b   : > { %2868 = vmatprep.subr.bf16.mxu1 %v3165_v55  ;;  %v340_v6 = vrot.slane %v339_v42, 4  ;;  %v1330_v45 = vsel %vm3532_vm5, %v2540_v35, %v1329_v41  ;;  %v2404_v42 = vcombine.low %v3433_v57, %v3436_v60  ;;  %v3176_v41 = vld [vmem:[%s3891_s1 + $0x188] sm:$0xff]   ;;  %v2535_v57 = vld [vmem:[%s3316_s14 + $0x30] sm:$0xe]  ;;  %v1345_v60 = vrot.slane %v3501_v14, 5 }
  0x3c   : > { %v1120_v7 = vor.u32 %v1119_v43, %v1116_v44  ;;  %v2403_v44 = vcombine.low %v3373_v54, %v3378_v58  ;;  %v3175_v43 = vld [vmem:[%s3891_s1 + $0x88] sm:$0xff]   ;;  %v1337_v54 = vrot.slane %v3459_v24, 5  ;;  %v1341_v58 = vrot.slane %v3463_v26, 5 }
  0x3d   : > { %2963 = vmatpush3.bf16.msra.mxu0 %v3164_v53  ;;  %v3169_v53 = vld [vmem:[%s3891_s1 + $0x38] sm:$0xff]   ;;  %v345_v9 = vsel %vm3361_vm2, %v340_v6, %v344_v36  ;;  %v2541_v36 = vrot.slane %v2533_v28, 9  ;;  %v2542_v24 = vrot.slane %v2534_v47, 9  ;;  %v2543_v49 = vrot.slane %v2535_v57, 9  ;;  %v3183_v35 = vld [vmem:[%s3891_s1 + $0xa8] sm:$0xff]  }
  0x3e   : > { %2869 = vmatpush3.bf16.msra.mxu1 %v3165_v55  ;;  %2964 = vmatprep.subr.bf16.mxu0 %v3166_v27  ;;  %v2402_v55 = vcombine.low %v3322_v11, %v3325_v12  ;;  %v1121_v10 = vrot.slane %v1120_v7, 4  ;;  %v2393_v29 = vcombine.low %v331_v56, %v345_v9  ;;  %v1325_v11 = vrot.slane %v3354_v34, 5  ;;  %v2536_v56 = vld [vmem:[%s3316_s14 + $0x38] sm:$0xe] }
  0x3f   : > { %2870 = vmatprep.subr.bf16.mxu1 %v3167_v32  ;;  %v1140_v34 = vsel %vm3361_vm2, %v1135_v31, %v1139_v17  ;;  %v1334_v46 = vsel %vm3532_vm5, %v2541_v36, %v1333_v50  ;;  %v658_v26 = vrot.slane %v3328_v13, 5  ;;  %v3177_v50 = vld [vmem:[%s3891_s1 + $0x90] sm:$0xff]   ;;  %v1338_v14 = vsel %vm3532_vm5, %v2542_v24, %v1337_v54  ;;  %v632_v28 = vld [vmem:[%s3316_s14 + $0x18] sm:$0xe]  ;;  %v3182_v31 = vld [vmem:[%s3891_s1 + $0x1a0] sm:$0xff]  }
  0x40   : > { %v1126_v12 = vsel %vm3361_vm2, %v1121_v10, %v1125_v8  ;;  %2855 = vmatmul.mubr.bf16.gmra.mrb[4].mxu1 %v2393_v29  ;;  %v1326_v37 = vsel %vm3532_vm5, %v2539_v25, %v1325_v11  ;;  %v2563_v4 = vcombine.low %v1330_v45, %v1334_v46  ;;  %v1342_v22 = vsel %vm3532_vm5, %v2543_v49, %v1341_v58  ;;  %v3178_v13 = vld [vmem:[%s3891_s1 + $0x190] sm:$0xff]   ;;  %v3184_v36 = vld [vmem:[%s3891_s1 + $0x1a8] sm:$0xff]   ;;  %v3190_v46 = vld [vmem:[%s3891_s1 + $0x1b8] sm:$0xff]  }
  0x41   : > { %2965 = vmatpush3.bf16.msra.mxu0 %v3166_v27  ;;  %2874 = vmatprep.mubr.bf16.mxu1 %v2402_v55  ;;  %v2562_v27 = vcombine.low %v1322_v30, %v1326_v37  ;;  %v2544_v5 = vrot.slane %v2536_v56, 9  ;;  %v662_v6 = vrot.slane %v3334_v15, 5  ;;  %v2564_v7 = vcombine.low %v1338_v14, %v1342_v22  ;;  %v630_v55 = vld [vmem:[%s3316_s14 + $0x8] sm:$0xe]  ;;  %v631_v25 = vld [vmem:[%s3316_s14 + $0x10] sm:$0xe] }
  0x42   : > { %2871 = vmatpush3.bf16.msra.mxu1 %v3167_v32  ;;  %2966 = vmatprep.subr.bf16.mxu0 %v3168_v61  ;;  %v2521_v32 = vcombine.low %v1126_v12, %v1140_v34  ;;  %v2405_v8 = vcombine.low %v3468_v40, %v3482_v51  ;;  %v2415_v40 = vrot.slane %v630_v55, 9  ;;  %v666_v51 = vrot.slane %v3381_v59, 5  ;;  %v3181_v59 = vld [vmem:[%s3891_s1 + $0xa0] sm:$0xff]   ;;  %v3192_v30 = vld [vmem:[%s3316_s14 + $0x10] ss:$8 sps:$4 sm:$0xff]   ;;  %v3195_v24 = vld [vmem:[%s3891_s1 + $0xc8] sm:$0xff]  }
  0x43   : > { %2872 = vmatprep.subr.bf16.mxu1 %v3169_v53  ;;  %v1346_v17 = vsel %vm3532_vm5, %v2544_v5, %v1345_v60  ;;  %v2416_v29 = vrot.slane %v631_v25, 9  ;;  %v3186_v37 = vld [vmem:[%s3891_s1 + $0xb0] sm:$0xff]   ;;  %v678_v45 = vrot.slane %v3442_v2, 5  ;;  %v682_v2 = vrot.slane %v3485_v52, 5  ;;  %v3194_v52 = vld [vmem:[%s3316_s14 + $0x20] ss:$8 sps:$4 sm:$0xff]  }
  0x44   : > { %2951 = vmatmul.mubr.bf16.gmra.mrb[4].mxu0 %v2521_v32  ;;  %v663_v23 = vsel %vm3532_vm5, %v2415_v40, %v662_v6  ;;  %v3187_v34 = vld [vmem:[%s3891_s1 + $0x1b0] sm:$0xff]   ;;  %v634_v32 = vld [vmem:[%s3316_s14 + $0x28] sm:$0xe]  ;;  %v686_v57 = vrot.slane %v3494_v3, 5  ;;  %v2612_v56 = vld [vmem:[%s3316_s14 + $0x18] sm:$0xf] }
  0x45   : > { %2967 = vmatpush3.bf16.msra.mxu0 %v3168_v61  ;;  %2970 = vmatprep.mubr.bf16.mxu0 %v2562_v27  ;;  %v2545_v61 = vrot.slane %v2537_v62, 9  ;;  %v667_v11 = vsel %vm3532_vm5, %v2416_v29, %v666_v51  ;;  %v633_v27 = vld [vmem:[%s3316_s14 + $0x20] sm:$0xe]  ;;  %v2419_v54 = vrot.slane %v634_v32, 9  ;;  %v635_v58 = vld [vmem:[%s3316_s14 + $0x30] sm:$0xe] }
  0x46   : > { %2873 = vmatpush3.bf16.msra.mxu1 %v3169_v53  ;;  %2968 = vmatprep.subr.bf16.mxu0 %v3170_v63  ;;  %v629_v53 = vld [vmem:[%s3316_s14] sm:$0xe]  ;;  %v2420_v60 = vrot.slane %v635_v58, 9  ;;  %v2610_v49 = vld [vmem:[%s3316_s14 + $0x10] sm:$0xf]  ;;  %v1707_v5 = vshrl.u32 %v2612_v56, 16 }
  0x47   : > { %2882 = vmatprep.subr.bf16.mxu1 %v3172_v33  ;;  %v1350_v15 = vsel %vm3532_vm5, %v2545_v61, %v1349_v48  ;;  %v2414_v18 = vrot.slane %v629_v53, 9  ;;  %v679_v47 = vsel %vm3532_vm5, %v2419_v54, %v678_v45  ;;  %v3679_v62 = vld [vmem:[%s3316_s14 + $0x1c] sm:$0x1]  ;;  %v1693_v14 = vshrl.u32 %v2610_v49, 16  ;;  %v3205_v40 = vld [vmem:[%s3316_s14 + $0x30] ss:$8 sps:$4 sm:$0xff]  }
  0x48   : > { %v2565_v9 = vcombine.low %v1346_v17, %v1350_v15  ;;  %v1696_v3 = vshll.u32 %v2610_v49, 16  ;;  %v1710_v61 = vshll.u32 %v2612_v56, 16  ;;  %v1716_v6 = vshll.u32 %v3679_v62, 16  ;;  %v3196_v17 = vld [vmem:[%s3891_s1 + $0x1c8] sm:$0xff]   ;;  %v3197_v15 = vld [vmem:[%s3891_s1 + $0xd0] sm:$0xff]   ;;  %v3202_v54 = vld [vmem:[%s3891_s1 + $0x1e0] sm:$0xff]  }
  0x49   : > { %2969 = vmatpush3.bf16.msra.mxu0 %v3170_v63  ;;  %2875 = vmatmul.mubr.bf16.vlgmr.msra.gmra.mrb[0].mxu1 %v2403_v44  ;;  %v659_v10 = vsel %vm3532_vm5, %v2414_v18, %v658_v26  ;;  %v2417_v63 = vrot.slane %v632_v28, 9  ;;  %v674_v44 = vrot.slane %v3439_v1, 5  ;;  %v636_v1 = vld [vmem:[%s3316_s14 + $0x38] sm:$0xe]  ;;  %v3675_v26 = vld [vmem:[%s3316_s14 + $0x14] sm:$0x1] }
  0x4a   : > { %2978 = vmatprep.subr.bf16.mxu0 %v3173_v39  ;;  %2883 = vmatpush3.bf16.msra.mxu1 %v3172_v33  ;;  %v2438_v0 = vcombine.low %v659_v10, %v663_v23  ;;  %v2421_v48 = vrot.slane %v636_v1, 9  ;;  %v1702_v22 = vshll.u32 %v3675_v26, 16  ;;  %v1709_v53 = vrot.slane %v1707_v5, 4  ;;  %v2614_v18 = vld [vmem:[%s3316_s14 + $0x20] sm:$0xf]  ;;  %v3198_v25 = vld [vmem:[%s3891_s1 + $0x1d0] sm:$0xff]  }
  0x4b   : > { %2878 = vmatprep.mubr.bf16.mxu1 %v2404_v42  ;;  %2884 = vmatprep.subr.bf16.mxu1 %v3175_v43  ;;  %v671_v12 = vsel %vm3532_vm5, %v2417_v63, %v670_v19  ;;  %v3191_v42 = vld [vmem:[%s3891_s1 + $0xc0] sm:$0xff]   ;;  %v1712_v55 = vrot.slane %v1710_v61, 5  ;;  %v1718_v10 = vrot.slane %v1716_v6, 5  ;;  %v3199_v28 = vld [vmem:[%s3891_s1 + $0xd8] sm:$0xff]   ;;  %v3211_v63 = vld [vmem:[%s3316_s14 + $0x8] ss:$8 sps:$4 sm:$0xff]  }
  0x4c   : > { %2971 = vmatmul.mubr.bf16.vlgmr.msra.gmra.mrb[0].mxu0 %v2563_v4  ;;  %v2439_v33 = vcombine.low %v667_v11, %v671_v12  ;;  %v3193_v4 = vld [vmem:[%s3891_s1 + $0x1c0] sm:$0xff]   ;;  %v3203_v58 = vld [vmem:[%s3891_s1 + $0xe8] sm:$0xff]  }
  0x4d   : > { %2979 = vmatpush3.bf16.msra.mxu0 %v3173_v39  ;;  %2974 = vmatprep.mubr.bf16.mxu0 %v2564_v7  ;;  %v3189_v39 = vld [vmem:[%s3891_s1 + $0xb8] sm:$0xff]   ;;  %v687_v7 = vsel %vm3532_vm5, %v2421_v48, %v686_v57  ;;  %v3207_v11 = vld [vmem:[%s3316_s14 + $0x40] ss:$8 sps:$4 sm:$0xff]   ;;  %v3731_v57 = vld [vmem:[%s3316_s14 + $0x34] sm:$0x1] }
  0x4e   : > { %2885 = vmatpush3.bf16.msra.mxu1 %v3175_v43  ;;  %2980 = vmatprep.subr.bf16.mxu0 %v3176_v41  ;;  %v2418_v43 = vrot.slane %v633_v27, 9  ;;  %v3201_v27 = vld [vmem:[%s3891_s1 + $0xe0] sm:$0xff]   ;;  %v1758_v61 = vshll.u32 %v3731_v57, 16 }
  0x4f   : > { %2886 = vmatprep.subr.bf16.mxu1 %v3177_v50  ;;  %v2622_v56 = vld [vmem:[%s3316_s14 + $0x40] sm:$0xf] }
  0x51   : > { %2879 = vmatmul.mubr.bf16.gmra.mrb[4].mxu1 %v2405_v8  ;;  %2981 = vmatpush3.bf16.msra.mxu0 %v3176_v41  ;;  %v675_v41 = vsel %vm3532_vm5, %v2418_v43, %v674_v44  ;;  %v1695_v8 = vrot.slane %v1693_v14, 4  ;;  %v2618_v44 = vld [vmem:[%s3316_s14 + $0x30] sm:$0xf] }
  0x52   : > { %2887 = vmatpush3.bf16.msra.mxu1 %v3177_v50  ;;  %2982 = vmatprep.subr.bf16.mxu0 %v3178_v13  ;;  %v2440_v50 = vcombine.low %v675_v41, %v679_v47 }
  0x53   : > { %2888 = vmatprep.subr.bf16.mxu1 %v3179_v16  ;;  %2898 = vmatprep.mubr.bf16.mxu1 %v2438_v0  ;;  %v1724_v0 = vshll.u32 %v2614_v18, 16 }
  0x54   : > { %2975 = vmatmul.mubr.bf16.gmra.mrb[4].mxu0 %v2565_v9  ;;  %v1713_v9 = vor.u32 %v1712_v55, %v1709_v53  ;;  %v3209_v53 = vld [vmem:[%s3891_s1 + $0xf8] sm:$0xff]  }
  0x55   : > { %2983 = vmatpush3.bf16.msra.mxu0 %v3178_v13  ;;  %2994 = vmatprep.mubr.bf16.mxu0 %v3192_v30  ;;  %v683_v13 = vsel %vm3532_vm5, %v2420_v60, %v682_v2  ;;  %v2616_v30 = vld [vmem:[%s3316_s14 + $0x28] sm:$0xf]  ;;  %v1749_v2 = vshrl.u32 %v2618_v44, 16 }
  0x56   : > { %2889 = vmatpush3.bf16.msra.mxu1 %v3179_v16  ;;  %2984 = vmatprep.subr.bf16.mxu0 %v3180_v20  ;;  %v1698_v16 = vrot.slane %v1696_v3, 5  ;;  %v2441_v19 = vcombine.low %v683_v13, %v687_v7  ;;  %v1714_v29 = vrot.slane %v1713_v9, 4  ;;  %v1735_v32 = vshrl.u32 %v2616_v30, 16  ;;  %v3741_v3 = vld [vmem:[%s3316_s14 + $0x3c] sm:$0x1] }
  0x57   : > { %2890 = vmatprep.subr.bf16.mxu1 %v3181_v59  ;;  %v3753_v9 = vld [vmem:[%s3316_s14 + $0x44] sm:$0x1] }
  0x58   : > { %v1699_v51 = vor.u32 %v1698_v16, %v1695_v8  ;;  %v1737_v41 = vrot.slane %v1735_v32, 4  ;;  %v2624_v8 = vld [vmem:[%s3316_s14 + $0x48] sm:$0xf]  ;;  %v1777_v16 = vshrl.u32 %v2622_v56, 16 }
  0x59   : > { %2985 = vmatpush3.bf16.msra.mxu0 %v3180_v20  ;;  %v1704_v20 = vrot.slane %v1702_v22, 5  ;;  %v1751_v22 = vrot.slane %v1749_v2, 4  ;;  %v1791_v55 = vshrl.u32 %v2624_v8, 16 }
  0x5a   : > { %2891 = vmatpush3.bf16.msra.mxu1 %v3181_v59  ;;  %2986 = vmatprep.subr.bf16.mxu0 %v3182_v31  ;;  %v1700_v23 = vrot.slane %v1699_v51, 4  ;;  %v1721_v59 = vshrl.u32 %v2614_v18, 16  ;;  %v1794_v18 = vshll.u32 %v2624_v8, 16  ;;  %v1772_v51 = vshll.u32 %v3741_v3, 16 }
  0x5b   : > { %2892 = vmatprep.subr.bf16.mxu1 %v3183_v35 }
  0x5c   : > { %v1705_v12 = vsel %vm3361_vm2, %v1700_v23, %v1704_v20  ;;  %v1779_v23 = vrot.slane %v1777_v16, 4 }
  0x5d   : > { %2987 = vmatpush3.bf16.msra.mxu0 %v3182_v31  ;;  %v1719_v31 = vsel %vm3361_vm2, %v1714_v29, %v1718_v10  ;;  %v3756_v10 = vld [vmem:[%s3316_s14 + $0x4c] sm:$0x1] }
  0x5e   : > { %2893 = vmatpush3.bf16.msra.mxu1 %v3183_v35  ;;  %2988 = vmatprep.subr.bf16.mxu0 %v3184_v36  ;;  %v3712_v35 = vld [vmem:[%s3316_s14 + $0x2c] sm:$0x1]  ;;  %v2642_v45 = vcombine.low %v1705_v12, %v1719_v31  ;;  %v1774_v12 = vrot.slane %v1772_v51, 5  ;;  %v2008_v51 = vrot.slane %v3753_v9, 5 }
  0x5f   : > { %2894 = vmatprep.subr.bf16.mxu1 %v3186_v37  ;;  %v1744_v43 = vshll.u32 %v3712_v35, 16 }
  0x61   : > { %2989 = vmatpush3.bf16.msra.mxu0 %v3184_v36  ;;  %v1723_v36 = vrot.slane %v1721_v59, 4 }
  0x62   : > { %2895 = vmatpush3.bf16.msra.mxu1 %v3186_v37  ;;  %2990 = vmatprep.subr.bf16.mxu0 %v3187_v34  ;;  %v1726_v37 = vrot.slane %v1724_v0, 5  ;;  %v1793_v0 = vrot.slane %v1791_v55, 4  ;;  %v3221_v55 = vld [vmem:[%s3891_s1 + $0x230] sm:$0xff]  }
  0x63   : > { %2896 = vmatprep.subr.bf16.mxu1 %v3189_v39 }
  0x64   : > { %v1727_v1 = vor.u32 %v1726_v37, %v1723_v36  ;;  %v1786_v37 = vshll.u32 %v3753_v9, 16 }
  0x65   : > { %2991 = vmatpush3.bf16.msra.mxu0 %v3187_v34  ;;  %v3200_v34 = vld [vmem:[%s3891_s1 + $0x1d8] sm:$0xff]  }
  0x66   : > { %2897 = vmatpush3.bf16.msra.mxu1 %v3189_v39  ;;  %2992 = vmatprep.subr.bf16.mxu0 %v3190_v46  ;;  %v1738_v39 = vshll.u32 %v2616_v30, 16  ;;  %v1728_v14 = vrot.slane %v1727_v1, 4  ;;  %v3213_v30 = vld [vmem:[%s3891_s1 + $0x200] sm:$0xff]   ;;  %v1788_v1 = vrot.slane %v1786_v37, 5  ;;  %v3224_v37 = vld [vmem:[%s3316_s14 + $0xc] sm:$0x1] }
  0x67   : > { %2906 = vmatprep.subr.bf16.mxu1 %v3191_v42 }
  0x68   : > { %v1740_v47 = vrot.slane %v1738_v39, 5 }
  0x69   : > { %2899 = vmatmul.mubr.bf16.vlgmr.msra.gmra.mrb[0].mxu1 %v2439_v33  ;;  %2993 = vmatpush3.bf16.msra.mxu0 %v3190_v46  ;;  %v3709_v33 = vld [vmem:[%s3316_s14 + $0x24] sm:$0x1]  ;;  %v2620_v46 = vld [vmem:[%s3316_s14 + $0x38] sm:$0xf] }
  0x6a   : > { %2907 = vmatpush3.bf16.msra.mxu1 %v3191_v42  ;;  %3002 = vmatprep.subr.bf16.mxu0 %v3193_v4  ;;  %v1730_v42 = vshll.u32 %v3709_v33, 16  ;;  %v1763_v60 = vshrl.u32 %v2620_v46, 16  ;;  %v1766_v48 = vshll.u32 %v2620_v46, 16  ;;  %v1741_v6 = vor.u32 %v1740_v47, %v1737_v41 }
  0x6b   : > { %2908 = vmatprep.subr.bf16.mxu1 %v3195_v24  ;;  %2902 = vmatprep.mubr.bf16.mxu1 %v2440_v50  ;;  %v1746_v50 = vrot.slane %v1744_v43, 5  ;;  %v3215_v43 = vld [vmem:[%s3316_s14 + $0x28] ss:$8 sps:$4 sm:$0xff]   ;;  %v2000_v41 = vrot.slane %v3731_v57, 5  ;;  %v1984_v57 = vrot.slane %v3675_v26, 5 }
  0x6c   : > { %2995 = vmatmul.mubr.bf16.vlgmr.msra.gmra.mrb[0].mxu0 %v3194_v52  ;;  %v3204_v52 = vld [vmem:[%s3891_s1 + $0x1e8] sm:$0xff]   ;;  %v1732_v49 = vrot.slane %v1730_v42, 5  ;;  %v1765_v13 = vrot.slane %v1763_v60, 4  ;;  %v1768_v7 = vrot.slane %v1766_v48, 5  ;;  %v2004_v60 = vrot.slane %v3741_v3, 5 }
  0x6d   : > { %3003 = vmatpush3.bf16.msra.mxu0 %v3193_v4  ;;  %2998 = vmatprep.mubr.bf16.mxu0 %v3205_v40  ;;  %v1752_v4 = vshll.u32 %v2618_v44, 16  ;;  %v1742_v40 = vrot.slane %v1741_v6, 4  ;;  %v2658_v44 = vld [vmem:[%s3316_s14 + $0x30] sm:$0xe]  ;;  %v3214_v42 = vld [vmem:[%s3891_s1 + $0x208] sm:$0xff]  }
  0x6e   : > { %2909 = vmatpush3.bf16.msra.mxu1 %v3195_v24  ;;  %3004 = vmatprep.subr.bf16.mxu0 %v3196_v17  ;;  %v3206_v24 = vld [vmem:[%s3891_s1 + $0xf0] sm:$0xff]   ;;  %v1769_v20 = vor.u32 %v1768_v7, %v1765_v13  ;;  %v1733_v29 = vsel %vm3361_vm2, %v1728_v14, %v1732_v49  ;;  %v2655_v49 = vld [vmem:[%s3316_s14 + $0x18] sm:$0xe]  ;;  %v1988_v14 = vrot.slane %v3679_v62, 5 }
  0x6f   : > { %2910 = vmatprep.subr.bf16.mxu1 %v3197_v15  ;;  %v1754_v5 = vrot.slane %v1752_v4, 5  ;;  %v2666_v4 = vrot.slane %v2658_v44, 9  ;;  %v3216_v3 = vld [vmem:[%s3316_s14 + $0x38] ss:$8 sps:$4 sm:$0xff]  }
  0x70   : > { %v1770_v36 = vrot.slane %v1769_v20, 4  ;;  %v3218_v62 = vld [vmem:[%s3891_s1 + $0x218] sm:$0xff]   ;;  %v2656_v20 = vld [vmem:[%s3316_s14 + $0x20] sm:$0xe] }
  0x71   : > { %2903 = vmatmul.mubr.bf16.gmra.mrb[4].mxu1 %v2441_v19  ;;  %3005 = vmatpush3.bf16.msra.mxu0 %v3196_v17  ;;  %v1780_v17 = vshll.u32 %v2622_v56, 16  ;;  %v1755_v19 = vor.u32 %v1754_v5, %v1751_v22  ;;  %v3217_v56 = vld [vmem:[%s3891_s1 + $0x210] sm:$0xff]   ;;  %v2663_v5 = vrot.slane %v2655_v49, 9 }
  0x72   : > { %2911 = vmatpush3.bf16.msra.mxu1 %v3197_v15  ;;  %3006 = vmatprep.subr.bf16.mxu0 %v3198_v25  ;;  %v3208_v15 = vld [vmem:[%s3891_s1 + $0x1f0] sm:$0xff]  }
  0x73   : > { %2912 = vmatprep.subr.bf16.mxu1 %v3199_v28  ;;  %2922 = vmatprep.mubr.bf16.mxu1 %v3211_v63  ;;  %v1782_v59 = vrot.slane %v1780_v17, 5  ;;  %v1747_v63 = vsel %vm3361_vm2, %v1742_v40, %v1746_v50  ;;  %v1756_v31 = vrot.slane %v1755_v19, 4  ;;  %v1989_v17 = vsel %vm3532_vm5, %v2663_v5, %v1988_v14  ;;  %v2661_v40 = vld [vmem:[%s3316_s14 + $0x48] sm:$0xe] }
  0x74   : > { %2999 = vmatmul.mubr.bf16.gmra.mrb[4].mxu0 %v3207_v11  ;;  %v1760_v11 = vrot.slane %v1758_v61, 5  ;;  %v2643_v46 = vcombine.low %v1733_v29, %v1747_v63  ;;  %v2001_v61 = vsel %vm3532_vm5, %v2666_v4, %v2000_v41  ;;  %v2012_v19 = vrot.slane %v3756_v10, 5 }
  0x75   : > { %3007 = vmatpush3.bf16.msra.mxu0 %v3198_v25  ;;  %3018 = vmatprep.mubr.bf16.mxu0 %v2642_v45  ;;  %v1796_v25 = vrot.slane %v1794_v18, 5  ;;  %v1783_v32 = vor.u32 %v1782_v59, %v1779_v23  ;;  %v2659_v45 = vld [vmem:[%s3316_s14 + $0x38] sm:$0xe]  ;;  %v2660_v18 = vld [vmem:[%s3316_s14 + $0x40] sm:$0xe]  ;;  %v2669_v59 = vrot.slane %v2661_v40, 9 }
  0x76   : > { %2913 = vmatpush3.bf16.msra.mxu1 %v3199_v28  ;;  %3008 = vmatprep.subr.bf16.mxu0 %v3200_v34  ;;  %v3210_v28 = vld [vmem:[%s3891_s1 + $0x1f8] sm:$0xff]   ;;  %v2667_v47 = vrot.slane %v2659_v45, 9  ;;  %v2668_v23 = vrot.slane %v2660_v18, 9  ;;  %v1992_v29 = vrot.slane %v3709_v33, 5  ;;  %v3235_v40 = vld [vmem:[%s3316_s14 + $0x44] sm:$0x1] }
  0x77   : > { %2914 = vmatprep.subr.bf16.mxu1 %v3201_v27  ;;  %v1797_v39 = vor.u32 %v1796_v25, %v1793_v0  ;;  %v1784_v48 = vrot.slane %v1783_v32, 4  ;;  %v3222_v0 = vld [vmem:[%s3891_s1 + $0x238] sm:$0xff]   ;;  %v2657_v25 = vld [vmem:[%s3316_s14 + $0x28] sm:$0xe] }
  0x78   : > { %v2005_v6 = vsel %vm3532_vm5, %v2667_v47, %v2004_v60  ;;  %v2665_v9 = vrot.slane %v2657_v25, 9  ;;  %v2009_v63 = vsel %vm3532_vm5, %v2668_v23, %v2008_v51  ;;  %v2237_v51 = vunpack.c.l.bf16 %v3235_v40  ;;  %v3238_v25 = vld [vmem:[%s3316_s14 + $0x30] sm:$0xf] }
  0x79   : > { %3009 = vmatpush3.bf16.msra.mxu0 %v3200_v34  ;;  %v1800_v34 = vshll.u32 %v3756_v10, 16  ;;  %v1789_v13 = vsel %vm3361_vm2, %v1784_v48, %v1788_v1  ;;  %v2688_v7 = vcombine.low %v2001_v61, %v2005_v6  ;;  %v1996_v10 = vrot.slane %v3712_v35, 5  ;;  %v3228_v61 = vld [vmem:[%s3316_s14 + $0x24] sm:$0x1] }
  0x7a   : > { %2915 = vmatpush3.bf16.msra.mxu1 %v3201_v27  ;;  %3010 = vmatprep.subr.bf16.mxu0 %v3202_v54  ;;  %v3212_v27 = vld [vmem:[%s3316_s14 + $0x18] ss:$8 sps:$4 sm:$0xff]   ;;  %v2229_v6 = vunpack.c.l.bf16 %v3228_v61 }
  0x7b   : > { %2916 = vmatprep.subr.bf16.mxu1 %v3203_v58  ;;  %v1802_v2 = vrot.slane %v1800_v34, 5  ;;  %v1997_v35 = vsel %vm3532_vm5, %v2665_v9, %v1996_v10  ;;  %v2223_v34 = vunpack.c.l.bf16 %v3224_v37 }
  0x7d   : > { %3011 = vmatpush3.bf16.msra.mxu0 %v3202_v54  ;;  %v1761_v54 = vsel %vm3361_vm2, %v1756_v31, %v1760_v11  ;;  %v3223_v31 = vld [vmem:[%s3316_s14 + $0x8] sm:$0xf] }
  0x7e   : > { %2917 = vmatpush3.bf16.msra.mxu1 %v3203_v58  ;;  %3012 = vmatprep.subr.bf16.mxu0 %v3204_v52  ;;  %v1775_v58 = vsel %vm3361_vm2, %v1770_v36, %v1774_v12  ;;  %v2222_v36 = vunpack.c.l.bf16 %v3223_v31  ;;  %v2277_v31 = vrot.slane %v2237_v51, 1 }
  0x7f   : > { %2918 = vmatprep.subr.bf16.mxu1 %v3206_v24  ;;  %v2644_v50 = vcombine.low %v1761_v54, %v1775_v58 }
  0x80   : > { %v2255_v45 = vrot.slane %v2222_v36, 1 }
  0x81   : > { %3013 = vmatpush3.bf16.msra.mxu0 %v3204_v52  ;;  %v1798_v52 = vrot.slane %v1797_v39, 4  ;;  %v3226_v39 = vld [vmem:[%s3316_s14 + $0x14] sm:$0x1] }
  0x82   : > { %2919 = vmatpush3.bf16.msra.mxu1 %v3206_v24  ;;  %3014 = vmatprep.subr.bf16.mxu0 %v3208_v15  ;;  %v2654_v24 = vld [vmem:[%s3316_s14 + $0x10] sm:$0xe]  ;;  %v2225_v44 = vunpack.c.l.bf16 %v3226_v39 }
  0x83   : > { %2920 = vmatprep.subr.bf16.mxu1 %v3209_v53  ;;  %v2662_v22 = vrot.slane %v2654_v24, 9  ;;  %v1803_v26 = vsel %vm3361_vm2, %v1798_v52, %v1802_v2 }
  0x84   : > { %v2645_v8 = vcombine.low %v1789_v13, %v1803_v26  ;;  %v3229_v13 = vld [vmem:[%s3316_s14 + $0x3c] sm:$0x1] }
  0x85   : > { %3015 = vmatpush3.bf16.msra.mxu0 %v3208_v15  ;;  %v1985_v16 = vsel %vm3532_vm5, %v2662_v22, %v1984_v57  ;;  %v3227_v22 = vld [vmem:[%s3316_s14 + $0x1c] sm:$0x1]  ;;  %v2235_v26 = vunpack.c.l.bf16 %v3229_v13 }
  0x86   : > { %2921 = vmatpush3.bf16.msra.mxu1 %v3209_v53  ;;  %3016 = vmatprep.subr.bf16.mxu0 %v3210_v28  ;;  %v2686_v15 = vcombine.low %v1985_v16, %v1989_v17  ;;  %v3220_v53 = vld [vmem:[%s3891_s1 + $0x228] sm:$0xff]   ;;  %v2227_v5 = vunpack.c.l.bf16 %v3227_v22 }
  0x87   : > { %3050 = vmatprep.subr.bf16.mxu1 %v3213_v30  ;;  %v3232_v17 = vld [vmem:[%s3316_s14 + $0x2c] sm:$0x1]  ;;  %v2274_v9 = vrot.slane %v2235_v26, 1 }
  0x88   : > { %v2262_v23 = vrot.slane %v2227_v5, 1 }
  0x89   : > { %2923 = vmatmul.mubr.bf16.vlgmr.msra.gmra.mrb[0].mxu1 %v3212_v27  ;;  %3017 = vmatpush3.bf16.msra.mxu0 %v3210_v28  ;;  %v2664_v28 = vrot.slane %v2656_v20, 9  ;;  %v3225_v27 = vld [vmem:[%s3316_s14 + $0x10] sm:$0xf] }
  0x8a   : > { %3058 = vmatpush3.bf16.msra.mxu1 %v3213_v30  ;;  %3026 = vmatprep.subr.bf16.mxu0 %v3213_v30  ;;  %v2224_v32 = vunpack.c.l.bf16 %v3225_v27 }
  0x8b   : > { %3051 = vmatprep.subr.bf16.mxu1 %v3214_v42  ;;  %2926 = vmatprep.mubr.bf16.mxu1 %v3215_v43  ;;  %v1993_v33 = vsel %vm3532_vm5, %v2664_v28, %v1992_v29  ;;  %v2259_v43 = vrot.slane %v2225_v44, 1  ;;  %v2232_v28 = vunpack.c.l.bf16 %v3238_v25  ;;  %v2265_v29 = vrot.slane %v2229_v6, 1 }
  0x8c   : > { %3019 = vmatmul.mubr.bf16.vlgmr.msra.gmra.mrb[0].mxu0 %v2643_v46  ;;  %v2687_v12 = vcombine.low %v1993_v33, %v1997_v35  ;;  %v2256_v46 = vrot.slane %v2223_v34, 1 }
  0x8d   : > { %3027 = vmatpush3.bf16.msra.mxu0 %v3213_v30  ;;  %3022 = vmatprep.mubr.bf16.mxu0 %v2644_v50  ;;  %v2013_v30 = vsel %vm3532_vm5, %v2669_v59, %v2012_v19  ;;  %v3236_v19 = vld [vmem:[%s3316_s14 + $0x40] sm:$0xf]  ;;  %v3237_v59 = vld [vmem:[%s3316_s14 + $0x34] sm:$0x1] }
  0x8e   : > { %3059 = vmatpush3.bf16.msra.mxu1 %v3214_v42  ;;  %3028 = vmatprep.subr.bf16.mxu0 %v3214_v42  ;;  %v2689_v11 = vcombine.low %v2009_v63, %v2013_v30  ;;  %v3839_v21 = vsel %vm2254_vm6, %v2255_v45, %v2256_v46  ;;  %v2236_v20 = vunpack.c.l.bf16 %v3236_v19  ;;  %v2270_v45 = vrot.slane %v2232_v28, 1 }
  0x8f   : > { %3052 = vmatprep.subr.bf16.mxu1 %v3217_v56 }
  0x90   : > { %v2276_v34 = vrot.slane %v2236_v20, 1 }
  0x91   : > { %2927 = vmatmul.mubr.bf16.gmra.mrb[4].mxu1 %v3216_v3  ;;  %3029 = vmatpush3.bf16.msra.mxu0 %v3214_v42  ;;  %v2258_v42 = vrot.slane %v2224_v32, 1  ;;  %v2699_v32 = vld [vmem:[%s3893_s3] ss:$0 sm:$0xff] }
  0x92   : > { %3060 = vmatpush3.bf16.msra.mxu1 %v3217_v56  ;;  %3030 = vmatprep.subr.bf16.mxu0 %v3217_v56  ;;  %v2278_v5 = vsel %vm2254_vm6, %v2276_v34, %v2277_v31 }
  0x93   : > { %3053 = vmatprep.subr.bf16.mxu1 %v3218_v62  ;;  %3046 = vmatprep.mubr.bf16.mxu1 %v2688_v7  ;;  %v3842_v54 = vsel %vm2254_vm6, %v2258_v42, %v2259_v43 }
  0x94   : > { %3023 = vmatmul.mubr.bf16.gmra.mrb[4].mxu0 %v2645_v8  ;;  %v3231_v8 = vld [vmem:[%s3316_s14 + $0x38] sm:$0xf] }
  0x95   : > { %3031 = vmatpush3.bf16.msra.mxu0 %v3217_v56  ;;  %3042 = vmatprep.mubr.bf16.mxu0 %v2686_v15  ;;  %v2234_v16 = vunpack.c.l.bf16 %v3231_v8  ;;  %v3233_v15 = vld [vmem:[%s3316_s14 + $0x28] sm:$0xf] }
  0x96   : > { %3061 = vmatpush3.bf16.msra.mxu1 %v3218_v62  ;;  %3032 = vmatprep.subr.bf16.mxu0 %v3218_v62 }
  0x97   : > { %3054 = vmatprep.subr.bf16.mxu1 %v3219_v38  ;;  %v2273_v63 = vrot.slane %v2234_v16, 1 }
  0x99   : > { %3033 = vmatpush3.bf16.msra.mxu0 %v3218_v62  ;;  %v3230_v62 = vld [vmem:[%s3316_s14 + $0x18] sm:$0xf]  ;;  %v2275_v43 = vsel %vm2254_vm6, %v2273_v63, %v2274_v9 }
  0x9a   : > { %3062 = vmatpush3.bf16.msra.mxu1 %v3219_v38  ;;  %3034 = vmatprep.subr.bf16.mxu0 %v3219_v38  ;;  %v2226_v7 = vunpack.c.l.bf16 %v3230_v62 }
  0x9b   : > { %3055 = vmatprep.subr.bf16.mxu1 %v3220_v53 }
  0x9c   : > { %v2261_v10 = vrot.slane %v2226_v7, 1 }
  0x9d   : > { %3035 = vmatpush3.bf16.msra.mxu0 %v3219_v38  ;;  %v2231_v38 = vunpack.c.l.bf16 %v3232_v17 }
  0x9e   : > { %3063 = vmatpush3.bf16.msra.mxu1 %v3220_v53  ;;  %3036 = vmatprep.subr.bf16.mxu0 %v3220_v53  ;;  %v2263_v46 = vsel %vm2254_vm6, %v2261_v10, %v2262_v23 }
  0x9f   : > { %3056 = vmatprep.subr.bf16.mxu1 %v3221_v55  ;;  %v2268_v30 = vrot.slane %v2231_v38, 1 }
  0xa1   : > { %3037 = vmatpush3.bf16.msra.mxu0 %v3220_v53  ;;  %v2230_v53 = vunpack.c.l.bf16 %v3233_v15 }
  0xa2   : > { %3064 = vmatpush3.bf16.msra.mxu1 %v3221_v55  ;;  %3038 = vmatprep.subr.bf16.mxu0 %v3221_v55 }
  0xa3   : > { %3057 = vmatprep.subr.bf16.mxu1 %v3222_v0  ;;  %v2267_v35 = vrot.slane %v2230_v53, 1 }
  0xa5   : > { %3039 = vmatpush3.bf16.msra.mxu0 %v3221_v55  ;;  %v3234_v55 = vld [vmem:[%s3316_s14 + $0x20] sm:$0xf] }
  0xa6   : > { %3065 = vmatpush3.bf16.msra.mxu1 %v3222_v0  ;;  %3040 = vmatprep.subr.bf16.mxu0 %v3222_v0  ;;  %v2228_v18 = vunpack.c.l.bf16 %v3234_v55 }
  0xa9   : > { %3047 = vmatmul.mubr.bf16.vlgmr.msra.gmra.mrb[8].mxu1 %v2689_v11  ;;  %3041 = vmatpush3.bf16.msra.mxu0 %v3222_v0  ;;  %v2233_v0 = vunpack.c.l.bf16 %v3237_v59  ;;  %v2698_v11 = vld [vmem:[%s3892_s2] ss:$0 sm:$0xff] }
  0xab   : > { %v2271_v27 = vrot.slane %v2233_v0, 1 }
  0xac   : > { %3043 = vmatmul.mubr.bf16.vlgmr.msra.gmra.mrb[0].mxu0 %v2687_v12  ;;  %v2264_v12 = vrot.slane %v2228_v18, 1 }
  0xad   : > { %v2272_v26 = vsel %vm2254_vm6, %v2270_v45, %v2271_v27 }
 0x15c   : > { %v3844_v58 = vpop.f32.mrb[0].mxu1 }
 0x15d   : > { %v3846_v1 = vpop.f32.mrb[1].mxu1 }
 0x15e   : > { %v3848_v2 = vpop.f32.mrb[2].mxu1 }
 0x15f   : > { %v3850_v4 = vpop.f32.mrb[3].mxu1 }
 0x164   : > { %v2928_v41 = vpop.f32.mrb[4].mxu1 }
 0x165   : > { %v990_v47 = vpop.f32.mrb[5].mxu1 }
 0x166   : > { %v2929_v60 = vpop.f32.mrb[6].mxu1 }
 0x167   : > { %v993_v48 = vpop.f32.mrb[7].mxu1  ;;  %v3024_v52 = vpop.f32.mrb[4].mxu0 }
 0x168   : > { %v3070_v24 = vadd.f32 %v3024_v52, %v2928_v41  ;;  %v1935_v49 = vpop.f32.mrb[5].mxu0  ;;  %v2269_v52 = vsel %vm2254_vm6, %v2267_v35, %v2268_v30 }
 0x169   : > { %v3072_v50 = vadd.f32 %v1935_v49, %v990_v47  ;;  %v3025_v56 = vpop.f32.mrb[6].mxu0 }
 0x16a   : > { %v3074_v57 = vadd.f32 %v3025_v56, %v2929_v60  ;;  %v1938_v14 = vpop.f32.mrb[7].mxu0 }
 0x16b   : > { %v3076_v3 = vadd.f32 %v1938_v14, %v993_v48 }
 0x17c   : > { %v3048_v33 = vpop.f32.mrb[8].mxu1 }
 0x17d   : > { %v3071_v36 = vadd.f32 %v3070_v24, %v3048_v33  ;;  %v2145_v37 = vpop.f32.mrb[9].mxu1  ;;  %v2266_v24 = vsel %vm2254_vm6, %v2264_v12, %v2265_v29 }
 0x17e   : > { %v3073_v39 = vadd.f32 %v3072_v50, %v2145_v37  ;;  %v3049_v44 = vpop.f32.mrb[10].mxu1 }
 0x17f   : > { %v2181_v42 = vmul.f32 %v3071_v36, %v2698_v11  ;;  %v3075_v41 = vadd.f32 %v3074_v57, %v3049_v44  ;;  %v2148_v47 = vpop.f32.mrb[11].mxu1  ;;  %v3044_v60 = vpop.f32.mrb[0].mxu0 }
 0x180   : > { %v2179_v48 = vmul.f32 %v3073_v39, %v2698_v11  ;;  %v3077_v49 = vadd.f32 %v3076_v3, %v2148_v47  ;;  %v3066_v56 = vadd.f32 %v3044_v60, %v3844_v58  ;;  %v2129_v50 = vpop.f32.mrb[1].mxu0 }
 0x181   : > { %v2196_v14 = vadd.f32 %v2699_v32, %v2181_v42  ;;  %v2182_v22 = vmul.f32 %v3075_v41, %v2698_v11  ;;  %v3067_v61 = vadd.f32 %v2129_v50, %v3846_v1  ;;  %v3045_v13 = vpop.f32.mrb[2].mxu0 }
 0x182   : > { %v2194_v6 = vadd.f32 %v2699_v32, %v2179_v48  ;;  %v2180_v57 = vmul.f32 %v3077_v49, %v2698_v11  ;;  %v2177_v62 = vmul.f32 %v3066_v56, %v2698_v11  ;;  %v3068_v8 = vadd.f32 %v3045_v13, %v3848_v2  ;;  %v2132_v3 = vpop.f32.mrb[3].mxu0 }
 0x183   : > { %vm2204_vm7 = vcmp.ge.f32.partialorder %v2196_v14, 0.0  ;;  %v2212_v7 = vmul.f32 0.01, %v2196_v14  ;;  %v2175_v16 = vmul.f32 %v3067_v61, %v2698_v11  ;;  %v2197_v17 = vadd.f32 %v2699_v32, %v2182_v22 }
 0x184   : > { %vm2202_vm8 = vcmp.ge.f32.partialorder %v2194_v6, 0.0  ;;  %v2210_v58 = vmul.f32 0.01, %v2194_v6  ;;  %v2192_v38 = vadd.f32 %v2699_v32, %v2177_v62  ;;  %v2178_v53 = vmul.f32 %v3068_v8, %v2698_v11 }
 0x185   : > { %v2220_v15 = vsel %vm2204_vm7, %v2196_v14, %v2212_v7  ;;  %v3069_v1 = vadd.f32 %v2132_v3, %v3850_v4  ;;  %v2190_v18 = vadd.f32 %v2699_v32, %v2175_v16  ;;  %vm2205_vm9 = vcmp.ge.f32.partialorder %v2197_v17, 0.0 }
 0x186   : > { %v2293_v55 = vadd.f32 %v2275_v43, %v2220_v15  ;;  %v2218_v40 = vsel %vm2202_vm8, %v2194_v6, %v2210_v58  ;;  %vm2200_vm10 = vcmp.ge.f32.partialorder %v2192_v38, 0.0  ;;  %v2208_v51 = vmul.f32 0.01, %v2192_v38 }
 0x187   : > { %v2291_v19 = vadd.f32 %v2269_v52, %v2218_v40  ;;  %v2193_v20 = vadd.f32 %v2699_v32, %v2178_v53  ;;  %vm2198_vm11 = vcmp.ge.f32.partialorder %v2190_v18, 0.0  ;;  %v2206_v2 = vmul.f32 0.01, %v2190_v18 }
 0x188   : > { %v2213_v23 = vmul.f32 0.01, %v2197_v17  ;;  %v2176_v59 = vmul.f32 %v3069_v1, %v2698_v11  ;;  %v2216_v0 = vsel %vm2200_vm10, %v2192_v38, %v2208_v51  ;;  %v2195_v28 = vadd.f32 %v2699_v32, %v2180_v57 }
 0x189   : > { %vm2201_vm12 = vcmp.ge.f32.partialorder %v2193_v20, 0.0  ;;  %v2209_v25 = vmul.f32 0.01, %v2193_v20  ;;  %v2289_v29 = vadd.f32 %v2263_v46, %v2216_v0  ;;  %v2214_v9 = vsel %vm2198_vm11, %v2190_v18, %v2206_v2 }
 0x18a   : > { %v2221_v4 = vsel %vm2205_vm9, %v2197_v17, %v2213_v23  ;;  %v2191_v10 = vadd.f32 %v2699_v32, %v2176_v59  ;;  %v2287_v63 = vadd.f32 %v3839_v21, %v2214_v9  ;;  %vm2203_vm13 = vcmp.ge.f32.partialorder %v2195_v28, 0.0 }
 0x18b   : > { %v2217_v30 = vsel %vm2201_vm12, %v2193_v20, %v2209_v25  ;;  %v2294_v33 = vadd.f32 %v2278_v5, %v2221_v4  ;;  %v2211_v12 = vmul.f32 0.01, %v2195_v28 }
 0x18c   : > { %v2290_v11 = vadd.f32 %v2266_v24, %v2217_v30  ;;  %vm2199_vm14 = vcmp.ge.f32.partialorder %v2191_v10, 0.0  ;;  %v2207_v35 = vmul.f32 0.01, %v2191_v10 }
 0x18d   : > { %v2721_v31 = vpack.c.bf16 %v2294_v33, %v2293_v55  ;;  %v2219_v34 = vsel %vm2203_vm13, %v2195_v28, %v2211_v12 }
 0x18e   : > { %v2711_v36 = vpack.c.bf16 %v2290_v11, %v2289_v29  ;;  %v2215_v37 = vsel %vm2199_vm14, %v2191_v10, %v2207_v35  ;;  %v2292_v32 = vadd.f32 %v2272_v26, %v2219_v34 }
 0x18f   : > { %2725 = vst [vmem:[%s197_s6 + $0x18] sm:$0xff] %v2721_v31   ;;  %v2288_v27 = vadd.f32 %v3842_v54, %v2215_v37 }
 0x190   : > { %2723 = vst [vmem:[%s197_s6 + $0x8] sm:$0xff] %v2711_v36   ;;  %v2716_v39 = vpack.c.bf16 %v2292_v32, %v2291_v19 }
 0x191   : > { %v2706_v21 = vpack.c.bf16 %v2288_v27, %v2287_v63 }
 0x192   : > { %2724 = vst [vmem:[%s197_s6 + $0x10] sm:$0xff] %v2716_v39  }
 0x193   : > { %2707 = vst [vmem:[%s197_s6] sm:$0xff] %v2706_v21  }
 0x194 PF: > { %s14_s15 = sadd.s32 1, %s3245_s15  }
 0x195   : > { %p11_p4 = scmp.ge.s32.totalorder %s14_s15, 4  }
 0x197   :  { %13 = sbr.rel (!%p11_p4) target bundleno = 1 (0x1), region = 76 }

// kernel: _lambda_.7
= control target key start
LH: loop header
LB: loop body
LE: loop exit
PB: predicated region body
PF: predicated region fallthrough
CT: control target
= control target key end

     0   :  { %s4285_s15 = smov 0   ;;  %s5048_s0 = inlined_call_operand.vmem [shape: bf16[2,6,10,128], index: 0, kind: input, shape index: {}]   ;;  %s5049_s1 = inlined_call_operand.vmem [shape: bf16[16,128,128], index: 1, kind: input, shape index: {}]   ;;  %s5050_s2 = inlined_call_operand.vmem [shape: f32[1,128], index: 2, kind: input, shape index: {}]   ;;  %s5051_s3 = inlined_call_operand.vmem [shape: f32[1,128], index: 3, kind: input, shape index: {}]   ;;  %s5052_s4 = inlined_call_operand.vmem [shape: bf16[2,4,4,4,128], index: 4, kind: output, shape index: {}]  }
   0x1 LB: > { %s3064_s16 = sadd.s32 4294967295, %s4258_s15   ;;  %p3068_p0 = scmp.ge.s32.totalorder %s4258_s15, 1  ;;  %s4258_s15 = sphi %s4285_s15, %s14_s15  }
   0x2   : > { %p162_p1 = scmp.lt.s32.totalorder %s4258_s15, 3 }
   0x4   : > { %p163_p2 = pnand %p3068_p0, %p162_p1 }
   0x5   : > { %v4116_v0 = vld [vmem:[%s5049_s1 + $0x40] sm:$0xff] (!%p163_p2)   ;;  %p188_p3 = scmp.lt.s32.totalorder (!%p163_p2), %s3064_s16, 1  ;;  %v4118_v2 = vld [vmem:[%s5049_s1 + $0x48] sm:$0xff] (!%p163_p2)   ;;  %v4120_v4 = vld [vmem:[%s5049_s1 + $0x50] sm:$0xff] (!%p163_p2)   ;;  %vm973_vm0 = vcmask (!%p163_p2), 1042432   ;;  %vm974_vm2 = vcmask (!%p163_p2), 1046532  }
   0x6   : > { %166 = sbr.rel (%p163_p2) target bundleno = 493 (0x1ed), region = 36  ;;  %v4117_v1 = vld [vmem:[%s5049_s1 + $0x140] sm:$0xff] (!%p163_p2)   ;;  %3739 = vmatprep.subr.bf16.mxu0 (!%p163_p2), %v4116_v0  ;;  %v4119_v3 = vld [vmem:[%s5049_s1 + $0x148] sm:$0xff] (!%p163_p2)   ;;  %v4121_v5 = vld [vmem:[%s5049_s1 + $0x150] sm:$0xff] (!%p163_p2)   ;;  %vm223_vm1 = vsmask.f32 (!%p163_p2), 3328 }
   0x7   : > { %3819 = vmatprep.subr.bf16.mxu1 (!%p163_p2), %v4117_v1  ;;  %3740 = vmatpush3.bf16.msra.mxu0 (!%p163_p2), %v4116_v0  ;;  %v4122_v6 = vld [vmem:[%s5049_s1 + $0x58] sm:$0xff] (!%p163_p2)   ;;  %v4124_v8 = vld [vmem:[%s5049_s1 + $0x60] sm:$0xff] (!%p163_p2)   ;;  %v4126_v10 = vld [vmem:[%s5049_s1 + $0x68] sm:$0xff] (!%p163_p2)   ;;  %vm224_vm3 = vsmask.f32 (!%p163_p2), 7440 }
   0x8   : > { %3820 = vmatpush3.bf16.msra.mxu1 (!%p163_p2), %v4117_v1  ;;  %3741 = vmatprep.subr.bf16.mxu0 (!%p163_p2), %v4118_v2  ;;  %v4123_v7 = vld [vmem:[%s5049_s1 + $0x158] sm:$0xff] (!%p163_p2)   ;;  %v4125_v9 = vld [vmem:[%s5049_s1 + $0x160] sm:$0xff] (!%p163_p2)   ;;  %v4127_v14 = vld [vmem:[%s5049_s1 + $0x168] sm:$0xff] (!%p163_p2)  }
   0x9   : > { %3821 = vmatprep.subr.bf16.mxu1 (!%p163_p2), %v4119_v3  ;;  %v4128_v22 = vld [vmem:[%s5049_s1 + $0x70] sm:$0xff] (!%p163_p2)   ;;  %vm4366_vm4 = vmor (!%p163_p2), %vm973_vm0, %vm974_vm2  ;;  %v4130_v37 = vld [vmem:[%s5049_s1 + $0x78] sm:$0xff] (!%p163_p2)  }
   0xa   : > { %v4129_v27 = vld [vmem:[%s5049_s1 + $0x170] sm:$0xff] (!%p163_p2)   ;;  %vm4376_vm5 = vmor (!%p163_p2), %vm223_vm1, %vm224_vm3  ;;  %v4131_v43 = vld [vmem:[%s5049_s1 + $0x178] sm:$0xff] (!%p163_p2)  }
   0xb   : > { %3742 = vmatpush3.bf16.msra.mxu0 (!%p163_p2), %v4118_v2  ;;  %v4132_v63 = vld [vmem:[%s5049_s1] sm:$0xff] (!%p163_p2)  }
   0xc   : > { %3822 = vmatpush3.bf16.msra.mxu1 (!%p163_p2), %v4119_v3  ;;  %3743 = vmatprep.subr.bf16.mxu0 (!%p163_p2), %v4120_v4  ;;  %v4133_v0 = vld [vmem:[%s5049_s1 + $0x100] sm:$0xff] (!%p163_p2)  }
   0xd   : > { %s5058_s16 = smov (!%p188_p3, %s3064_s16), 1  ;;  %3823 = vmatprep.subr.bf16.mxu1 %v4121_v5  ;;  %v4984_v35 = vld [vmem:[%s5050_s2] ss:$0 sm:$0xff] }
   0xe   : > { %s4107_s7 = smul.u32 48, %s5058_s16  ;;  %s3578_s26 = sshll.u32 %s5058_s16, 5 }
   0xf   : > { %3744 = vmatpush3.bf16.msra.mxu0 %v4120_v4  ;;  %s5007_s28 = scalar_lea.vmem %s5052_s4, %s3578_s26 }
  0x10   : > { %3824 = vmatpush3.bf16.msra.mxu1 %v4121_v5  ;;  %3745 = vmatprep.subr.bf16.mxu0 %v4122_v6  ;;  %s4329_s14 = scalar_lea.vmem %s5048_s0, %s4107_s7 }
  0x11   : > { %3825 = vmatprep.subr.bf16.mxu1 %v4123_v7  ;;  %v4335_v11 = vld [vmem:[%s4329_s14] sm:$0xf]  ;;  %v4338_v12 = vld [vmem:[%s4329_s14 + $0x8] sm:$0xf]  ;;  %v219_v13 = vld [vmem:[%s4329_s14 + $0x4] sm:$0x1] }
  0x12   : > { %v220_v15 = vld [vmem:[%s4329_s14 + $0xc] sm:$0x1]  ;;  %v227_v16 = vshrl.u32 %v4335_v11, 16  ;;  %v230_v17 = vshll.u32 %v4335_v11, 16  ;;  %v236_v18 = vshll.u32 %v219_v13, 16  ;;  %v241_v19 = vshrl.u32 %v4338_v12, 16 }
  0x13   : > { %3746 = vmatpush3.bf16.msra.mxu0 %v4122_v6  ;;  %v244_v20 = vshll.u32 %v4338_v12, 16  ;;  %v250_v21 = vshll.u32 %v220_v15, 16  ;;  %v4353_v26 = vld [vmem:[%s4329_s14 + $0x4] sm:$0x1]  ;;  %v4359_v29 = vld [vmem:[%s4329_s14 + $0xc] sm:$0x1] }
  0x14   : > { %3826 = vmatpush3.bf16.msra.mxu1 %v4123_v7  ;;  %3747 = vmatprep.subr.bf16.mxu0 %v4124_v8  ;;  %v229_v23 = vrot.slane %v227_v16, 4  ;;  %v232_v24 = vrot.slane %v230_v17, 5  ;;  %v243_v25 = vrot.slane %v241_v19, 4  ;;  %v978_v30 = vrot.slane %v4353_v26, 5  ;;  %v961_v33 = vld [vmem:[%s4329_s14] sm:$0xe] }
  0x15   : > { %3827 = vmatprep.subr.bf16.mxu1 %v4125_v9  ;;  %v246_v28 = vrot.slane %v244_v20, 5  ;;  %v238_v32 = vrot.slane %v236_v18, 5  ;;  %v962_v34 = vld [vmem:[%s4329_s14 + $0x8] sm:$0xe]  ;;  %v982_v36 = vrot.slane %v4359_v29, 5  ;;  %v252_v40 = vrot.slane %v250_v21, 5 }
  0x16   : > { %v233_v31 = vor.u32 %v232_v24, %v229_v23  ;;  %v3190_v41 = vrot.slane %v961_v33, 9  ;;  %v3191_v42 = vrot.slane %v962_v34, 9  ;;  %v4384_v45 = vld [vmem:[%s4329_s14 + $0x10] sm:$0xf]  ;;  %v4391_v49 = vld [vmem:[%s4329_s14 + $0x18] sm:$0xf] }
  0x17   : > { %3748 = vmatpush3.bf16.msra.mxu0 %v4124_v8  ;;  %v247_v39 = vor.u32 %v246_v28, %v243_v25  ;;  %v221_v50 = vld [vmem:[%s4329_s14 + $0x14] sm:$0x1]  ;;  %v255_v51 = vshrl.u32 %v4384_v45, 16  ;;  %v222_v54 = vld [vmem:[%s4329_s14 + $0x1c] sm:$0x1]  ;;  %v258_v55 = vshll.u32 %v4384_v45, 16 }
  0x18   : > { %3828 = vmatpush3.bf16.msra.mxu1 %v4125_v9  ;;  %3749 = vmatprep.subr.bf16.mxu0 %v4126_v10  ;;  %v234_v44 = vrot.slane %v233_v31, 4  ;;  %v979_v47 = vsel %vm4366_vm4, %v3190_v41, %v978_v30  ;;  %v983_v48 = vsel %vm4366_vm4, %v3191_v42, %v982_v36  ;;  %v264_v56 = vshll.u32 %v221_v50, 16  ;;  %v4404_v61 = vld [vmem:[%s4329_s14 + $0x14] sm:$0x1]  ;;  %v963_v3 = vld [vmem:[%s4329_s14 + $0x10] sm:$0xe] }
  0x19   : > { %3829 = vmatprep.subr.bf16.mxu1 %v4127_v14  ;;  %v248_v46 = vrot.slane %v247_v39, 4  ;;  %v3210_v53 = vcombine.low %v979_v47, %v983_v48  ;;  %v257_v58 = vrot.slane %v255_v51, 4  ;;  %v269_v59 = vshrl.u32 %v4391_v49, 16  ;;  %v4414_v6 = vld [vmem:[%s4329_s14 + $0x1c] sm:$0x1]  ;;  %v4135_v21 = vld [vmem:[%s5049_s1 + $0x108] sm:$0xff]  }
  0x1a   : > { %v239_v52 = vsel %vm4376_vm5, %v234_v44, %v238_v32  ;;  %v272_v60 = vshll.u32 %v4391_v49, 16  ;;  %v260_v1 = vrot.slane %v258_v55, 5  ;;  %v278_v2 = vshll.u32 %v222_v54, 16  ;;  %v964_v7 = vld [vmem:[%s4329_s14 + $0x18] sm:$0xe]  ;;  %v4134_v28 = vld [vmem:[%s5049_s1 + $0x8] sm:$0xff]  }
  0x1b   : > { %3750 = vmatpush3.bf16.msra.mxu0 %v4126_v10  ;;  %v253_v57 = vsel %vm4376_vm5, %v248_v46, %v252_v40  ;;  %3835 = vmatprep.mubr.bf16.mxu1 %v3210_v53  ;;  %v271_v4 = vrot.slane %v269_v59, 4  ;;  %v266_v9 = vrot.slane %v264_v56, 5  ;;  %v3192_v10 = vrot.slane %v963_v3, 9  ;;  %v4137_v31 = vld [vmem:[%s5049_s1 + $0x110] sm:$0xff]   ;;  %v4138_v34 = vld [vmem:[%s5049_s1 + $0x18] sm:$0xff]   ;;  %v4142_v59 = vld [vmem:[%s5049_s1 + $0x28] sm:$0xff]  }
  0x1c   : > { %3830 = vmatpush3.bf16.msra.mxu1 %v4127_v14  ;;  %3751 = vmatprep.subr.bf16.mxu0 %v4128_v22  ;;  %v3088_v62 = vcombine.low %v239_v52, %v253_v57  ;;  %v274_v5 = vrot.slane %v272_v60, 5  ;;  %v261_v8 = vor.u32 %v260_v1, %v257_v58  ;;  %v986_v13 = vrot.slane %v4404_v61, 5  ;;  %v4136_v32 = vld [vmem:[%s5049_s1 + $0x10] sm:$0xff]   ;;  %v880_v36 = vld [vmem:[%s4329_s14] sm:$0xf]  ;;  %v4143_v60 = vld [vmem:[%s5049_s1 + $0x128] sm:$0xff]  }
  0x1d   : > { %3831 = vmatprep.subr.bf16.mxu1 %v4129_v27  ;;  %v280_v15 = vrot.slane %v278_v2, 5  ;;  %v3193_v16 = vrot.slane %v964_v7, 9  ;;  %v990_v19 = vrot.slane %v4414_v6, 5  ;;  %v3098_v30 = vcombine.low %v4335_v11, %v4338_v12  ;;  %v4139_v12 = vld [vmem:[%s5049_s1 + $0x118] sm:$0xff]  }
  0x1e   : > { %3755 = vmatprep.mubr.bf16.mxu0 %v3088_v62  ;;  %v275_v14 = vor.u32 %v274_v5, %v271_v4  ;;  %v262_v17 = vrot.slane %v261_v8, 4  ;;  %v987_v18 = vsel %vm4366_vm4, %v3192_v10, %v986_v13  ;;  %v898_v11 = vshll.u32 %v4353_v26, 16  ;;  %v4140_v26 = vld [vmem:[%s5049_s1 + $0x20] sm:$0xff]   ;;  %v886_v44 = vld [vmem:[%s4329_s14 + $0x18] sm:$0xf]  ;;  %v4145_v13 = vld [vmem:[%s5049_s1 + $0x130] sm:$0xff]  }
  0x1f   : > { %3752 = vmatpush3.bf16.msra.mxu0 %v4128_v22  ;;  %v991_v23 = vsel %vm4366_vm4, %v3193_v16, %v990_v19  ;;  %v912_v33 = vshll.u32 %v4359_v29, 16  ;;  %v889_v39 = vshrl.u32 %v880_v36, 16  ;;  %v892_v40 = vshll.u32 %v880_v36, 16  ;;  %v4141_v29 = vld [vmem:[%s5049_s1 + $0x120] sm:$0xff]   ;;  %v4146_v19 = vld [vmem:[%s5049_s1 + $0x38] sm:$0xff]  }
  0x20   : > { %3832 = vmatpush3.bf16.msra.mxu1 %v4129_v27  ;;  %3753 = vmatprep.subr.bf16.mxu0 %v4130_v37  ;;  %v276_v20 = vrot.slane %v275_v14, 4  ;;  %v267_v22 = vsel %vm4376_vm5, %v262_v17, %v266_v9  ;;  %v3211_v25 = vcombine.low %v987_v18, %v991_v23  ;;  %v931_v53 = vshrl.u32 %v886_v44, 16  ;;  %v4147_v18 = vld [vmem:[%s5049_s1 + $0x138] sm:$0xff]   ;;  %v4149_v23 = vld [vmem:[%s5049_s1 + $0x80] sm:$0xff]  }
  0x21   : > { %3833 = vmatprep.subr.bf16.mxu1 %v4131_v43  ;;  %v891_v46 = vrot.slane %v889_v39, 4  ;;  %v894_v47 = vrot.slane %v892_v40, 5  ;;  %v934_v54 = vshll.u32 %v886_v44, 16  ;;  %v900_v55 = vrot.slane %v898_v11, 5  ;;  %v3232_v11 = vld [vmem:[%s4329_s14 + $0x10] sm:$0xf] }
  0x22   : > { %v281_v24 = vsel %vm4376_vm5, %v276_v20, %v280_v15  ;;  %v914_v56 = vrot.slane %v912_v33, 5  ;;  %v926_v4 = vshll.u32 %v4404_v61, 16  ;;  %v940_v5 = vshll.u32 %v4414_v6, 16  ;;  %v4144_v61 = vld [vmem:[%s5049_s1 + $0x30] sm:$0xff]  }
  0x23   : > { %3754 = vmatpush3.bf16.msra.mxu0 %v4130_v37  ;;  %v3089_v27 = vcombine.low %v267_v22, %v281_v24  ;;  %v882_v37 = vld [vmem:[%s4329_s14 + $0x8] sm:$0xf]  ;;  %v895_v57 = vor.u32 %v894_v47, %v891_v46  ;;  %v936_v1 = vrot.slane %v934_v54, 5  ;;  %v4150_v22 = vld [vmem:[%s5049_s1 + $0x180] sm:$0xff]   ;;  %v4154_v44 = vld [vmem:[%s5049_s1 + $0x90] sm:$0xff]  }
  0x24   : > { %3834 = vmatpush3.bf16.msra.mxu1 %v4131_v43  ;;  %3759 = vmatprep.subr.bf16.mxu0 %v4132_v63  ;;  %v903_v41 = vshrl.u32 %v882_v37, 16  ;;  %v906_v42 = vshll.u32 %v882_v37, 16  ;;  %v884_v43 = vld [vmem:[%s4329_s14 + $0x10] sm:$0xf]  ;;  %v928_v6 = vrot.slane %v926_v4, 5  ;;  %v942_v15 = vrot.slane %v940_v5, 5 }
  0x25   : > { %3839 = vmatprep.subr.bf16.mxu1 %v4133_v0  ;;  %v917_v51 = vshrl.u32 %v884_v43, 16  ;;  %v920_v52 = vshll.u32 %v884_v43, 16  ;;  %v896_v2 = vrot.slane %v895_v57, 4  ;;  %v1242_v37 = vshrl.u32 %v3232_v11, 16  ;;  %v4156_v57 = vld [vmem:[%s5049_s1 + $0x98] sm:$0xff]  }
  0x26   : > { %3756 = vmatmul.mubr.bf16.vlgmr.msra.gmra.mrb[0].mxu0 %v3089_v27  ;;  %v905_v48 = vrot.slane %v903_v41, 4  ;;  %v908_v50 = vrot.slane %v906_v42, 5  ;;  %v3099_v27 = vcombine.low %v4384_v45, %v4391_v49  ;;  %v1245_v45 = vshll.u32 %v3232_v11, 16  ;;  %v4155_v42 = vld [vmem:[%s5049_s1 + $0x190] sm:$0xff]  }
  0x27   : > { %3836 = vmatmul.mubr.bf16.vlgmr.msra.gmra.mrb[0].mxu1 %v3211_v25  ;;  %3760 = vmatpush3.bf16.msra.mxu0 %v4132_v63  ;;  %v919_v62 = vrot.slane %v917_v51, 4  ;;  %v922_v63 = vrot.slane %v920_v52, 5  ;;  %v901_v7 = vsel %vm4376_vm5, %v896_v2, %v900_v55  ;;  %v4153_v25 = vld [vmem:[%s5049_s1 + $0x188] sm:$0xff]   ;;  %v1244_v40 = vrot.slane %v1242_v37, 4  ;;  %v3236_v51 = vld [vmem:[%s4329_s14 + $0x20] sm:$0xf] }
  0x28   : > { %3840 = vmatpush3.bf16.msra.mxu1 %v4133_v0  ;;  %3761 = vmatprep.subr.bf16.mxu0 %v4134_v28  ;;  %v909_v58 = vor.u32 %v908_v50, %v905_v48  ;;  %v933_v0 = vrot.slane %v931_v53, 4  ;;  %v1247_v41 = vrot.slane %v1245_v45, 5  ;;  %v3234_v48 = vld [vmem:[%s4329_s14 + $0x18] sm:$0xf]  ;;  %v4540_v2 = vld [vmem:[%s4329_s14 + $0x24] sm:$0x1] }
  0x29   : > { %3841 = vmatprep.subr.bf16.mxu1 %v4135_v21  ;;  %3775 = vmatprep.mubr.bf16.mxu0 %v3098_v30  ;;  %v923_v9 = vor.u32 %v922_v63, %v919_v62  ;;  %v4166_v30 = vld [vmem:[%s4329_s14 + $0x8] ss:$8 sps:$4 sm:$0xff]   ;;  %v4157_v53 = vld [vmem:[%s5049_s1 + $0x198] sm:$0xff]   ;;  %v1256_v55 = vshrl.u32 %v3234_v48, 16  ;;  %v4159_v62 = vld [vmem:[%s5049_s1 + $0x1a0] sm:$0xff]  }
  0x2a   : > { %v910_v3 = vrot.slane %v909_v58, 4  ;;  %v937_v10 = vor.u32 %v936_v1, %v933_v0  ;;  %v1248_v46 = vor.u32 %v1247_v41, %v1244_v40  ;;  %v4158_v0 = vld [vmem:[%s5049_s1 + $0xa0] sm:$0xff]   ;;  %v4537_v1 = vld [vmem:[%s4329_s14 + $0x1c] sm:$0x1] }
  0x2b   : > { %3762 = vmatpush3.bf16.msra.mxu0 %v4134_v28  ;;  %v924_v16 = vrot.slane %v923_v9, 4  ;;  %v4152_v28 = vld [vmem:[%s5049_s1 + $0x88] sm:$0xff]   ;;  %v1265_v9 = vshll.u32 %v4537_v1, 16 }
  0x2c   : > { %3842 = vmatpush3.bf16.msra.mxu1 %v4135_v21  ;;  %3763 = vmatprep.subr.bf16.mxu0 %v4136_v32  ;;  %v915_v8 = vsel %vm4376_vm5, %v910_v3, %v914_v56  ;;  %v938_v17 = vrot.slane %v937_v10, 4  ;;  %v1249_v52 = vrot.slane %v1248_v46, 4  ;;  %v1259_v56 = vshll.u32 %v3234_v48, 16 }
  0x2d   : > { %3843 = vmatprep.subr.bf16.mxu1 %v4137_v31  ;;  %v3220_v14 = vcombine.low %v901_v7, %v915_v8  ;;  %v929_v20 = vsel %vm4376_vm5, %v924_v16, %v928_v6  ;;  %v1258_v3 = vrot.slane %v1256_v55, 4  ;;  %v4161_v8 = vld [vmem:[%s5049_s1 + $0x1a8] sm:$0xff]   ;;  %v1279_v10 = vshll.u32 %v4540_v2, 16  ;;  %v4162_v6 = vld [vmem:[%s5049_s1 + $0xb0] sm:$0xff]  }
  0x2e   : > { %v943_v21 = vsel %vm4376_vm5, %v938_v17, %v942_v15  ;;  %v1261_v4 = vrot.slane %v1259_v56, 5  ;;  %v4163_v15 = vld [vmem:[%s5049_s1 + $0x1b0] sm:$0xff]   ;;  %v1267_v16 = vrot.slane %v1265_v9, 5 }
  0x2f   : > { %3764 = vmatpush3.bf16.msra.mxu0 %v4136_v32  ;;  %3855 = vmatprep.mubr.bf16.mxu1 %v3220_v14  ;;  %v3221_v24 = vcombine.low %v929_v20, %v943_v21  ;;  %v4504_v32 = vld [vmem:[%s4329_s14 + $0xc] sm:$0x1]  ;;  %v1281_v17 = vrot.slane %v1279_v10, 5  ;;  %v3138_v20 = vld [vmem:[%s4329_s14 + $0x8] sm:$0xf] }
  0x30   : > { %3844 = vmatpush3.bf16.msra.mxu1 %v4137_v31  ;;  %3765 = vmatprep.subr.bf16.mxu0 %v4138_v34  ;;  %v3230_v31 = vld [vmem:[%s4329_s14 + $0x8] sm:$0xf]  ;;  %v1237_v36 = vshll.u32 %v4504_v32, 16  ;;  %v1262_v14 = vor.u32 %v1261_v4, %v1258_v3  ;;  %v3139_v21 = vld [vmem:[%s4329_s14 + $0xc] sm:$0x1]  ;;  %v4175_v3 = vld [vmem:[%s5049_s1 + $0x1d8] sm:$0xff]  }
  0x31   : > { %3845 = vmatprep.subr.bf16.mxu1 %v4139_v12  ;;  %v1228_v33 = vshrl.u32 %v3230_v31, 16  ;;  %v3142_v4 = vld [vmem:[%s4329_s14 + $0x18] sm:$0xf] }
  0x32   : > { %v1239_v43 = vrot.slane %v1237_v36, 5  ;;  %v4164_v36 = vld [vmem:[%s5049_s1 + $0xb8] sm:$0xff]   ;;  %v688_v9 = vshll.u32 %v3142_v4, 16 }
  0x33   : > { %3766 = vmatpush3.bf16.msra.mxu0 %v4138_v34  ;;  %v1231_v34 = vshll.u32 %v3230_v31, 16 }
  0x34   : > { %3846 = vmatpush3.bf16.msra.mxu1 %v4139_v12  ;;  %3767 = vmatprep.subr.bf16.mxu0 %v4140_v26  ;;  %v4508_v12 = vld [vmem:[%s4329_s14 + $0x14] sm:$0x1] }
  0x35   : > { %3847 = vmatprep.subr.bf16.mxu1 %v4141_v29  ;;  %v1251_v49 = vshll.u32 %v4508_v12, 16  ;;  %v1233_v39 = vrot.slane %v1231_v34, 5  ;;  %v3265_v34 = vld [vmem:[%s4329_s14 + $0x10] sm:$0xe] }
  0x36   : > { %v3269_v46 = vrot.slane %v3265_v34, 9 }
  0x37   : > { %3768 = vmatpush3.bf16.msra.mxu0 %v4140_v26  ;;  %v1230_v26 = vrot.slane %v1228_v33, 4  ;;  %v1253_v47 = vrot.slane %v1251_v49, 5  ;;  %v3264_v33 = vld [vmem:[%s4329_s14 + $0x8] sm:$0xe] }
  0x38   : > { %3848 = vmatpush3.bf16.msra.mxu1 %v4141_v29  ;;  %3769 = vmatprep.subr.bf16.mxu0 %v4142_v59 }
  0x39   : > { %3849 = vmatprep.subr.bf16.mxu1 %v4143_v60  ;;  %v1234_v29 = vor.u32 %v1233_v39, %v1230_v26  ;;  %v1254_v58 = vsel %vm4376_vm5, %v1249_v52, %v1253_v47  ;;  %v1423_v26 = vrot.slane %v4504_v32, 5  ;;  %v4168_v32 = vld [vmem:[%s5049_s1 + $0x1c0] sm:$0xff]  }
  0x3b   : > { %3770 = vmatpush3.bf16.msra.mxu0 %v4142_v59  ;;  %v1235_v50 = vrot.slane %v1234_v29, 4  ;;  %v1270_v59 = vshrl.u32 %v3236_v51, 16 }
  0x3c   : > { %3850 = vmatpush3.bf16.msra.mxu1 %v4143_v60  ;;  %3771 = vmatprep.subr.bf16.mxu0 %v4144_v61  ;;  %v1273_v60 = vshll.u32 %v3236_v51, 16 }
  0x3d   : > { %3851 = vmatprep.subr.bf16.mxu1 %v4145_v13  ;;  %v1240_v54 = vsel %vm4376_vm5, %v1235_v50, %v1239_v43  ;;  %v1272_v5 = vrot.slane %v1270_v59, 4  ;;  %v4167_v50 = vld [vmem:[%s5049_s1 + $0xc0] sm:$0xff]   ;;  %v4170_v59 = vld [vmem:[%s5049_s1 + $0xc8] sm:$0xff]  }
  0x3e   : > { %v3254_v63 = vcombine.low %v1240_v54, %v1254_v58  ;;  %v1275_v7 = vrot.slane %v1273_v60, 5 }
  0x3f   : > { %3772 = vmatpush3.bf16.msra.mxu0 %v4144_v61 }
  0x40   : > { %3852 = vmatpush3.bf16.msra.mxu1 %v4145_v13  ;;  %3773 = vmatprep.subr.bf16.mxu0 %v4146_v19  ;;  %v4160_v13 = vld [vmem:[%s5049_s1 + $0xa8] sm:$0xff]   ;;  %v1276_v61 = vor.u32 %v1275_v7, %v1272_v5  ;;  %v3144_v5 = vld [vmem:[%s4329_s14 + $0x20] sm:$0xf]  ;;  %v4174_v7 = vld [vmem:[%s5049_s1 + $0xd8] sm:$0xff]  }
  0x41   : > { %3853 = vmatprep.subr.bf16.mxu1 %v4147_v18  ;;  %v699_v10 = vshrl.u32 %v3144_v5, 16 }
  0x43   : > { %3774 = vmatpush3.bf16.msra.mxu0 %v4146_v19  ;;  %v1277_v19 = vrot.slane %v1276_v61, 4  ;;  %v4176_v61 = vld [vmem:[%s5049_s1 + $0xe0] sm:$0xff]  }
  0x44   : > { %3854 = vmatpush3.bf16.msra.mxu1 %v4147_v18  ;;  %3779 = vmatprep.subr.bf16.mxu0 %v4149_v23  ;;  %v1263_v18 = vrot.slane %v1262_v14, 4  ;;  %v4177_v14 = vld [vmem:[%s5049_s1 + $0x1e0] sm:$0xff]  }
  0x45   : > { %3859 = vmatprep.subr.bf16.mxu1 %v4150_v22  ;;  %v1282_v40 = vsel %vm4376_vm5, %v1277_v19, %v1281_v17  ;;  %v4619_v17 = vld [vmem:[%s4329_s14 + $0x8] sm:$0xf]  ;;  %v3143_v19 = vld [vmem:[%s4329_s14 + $0x1c] sm:$0x1] }
  0x46   : > { %3776 = vmatmul.mubr.bf16.vlgmr.msra.gmra.mrb[0].mxu0 %v3099_v27  ;;  %v660_v27 = vshll.u32 %v3138_v20, 16  ;;  %v1268_v39 = vsel %vm4376_vm5, %v1263_v18, %v1267_v16  ;;  %v690_v16 = vrot.slane %v688_v9, 5  ;;  %v4622_v18 = vld [vmem:[%s4329_s14 + $0x10] sm:$0xf] }
  0x47   : > { %3856 = vmatmul.mubr.bf16.vlgmr.msra.gmra.mrb[0].mxu1 %v3221_v24  ;;  %3780 = vmatpush3.bf16.msra.mxu0 %v4149_v23  ;;  %v3141_v23 = vld [vmem:[%s4329_s14 + $0x14] sm:$0x1]  ;;  %v4165_v24 = vld [vmem:[%s5049_s1 + $0x1b8] sm:$0xff]   ;;  %v3255_v51 = vcombine.low %v1268_v39, %v1282_v40  ;;  %v3324_v39 = vld [vmem:[%s4329_s14 + $0xc] sm:$0x1] }
  0x48   : > { %3860 = vmatpush3.bf16.msra.mxu1 %v4150_v22  ;;  %3781 = vmatprep.subr.bf16.mxu0 %v4152_v28  ;;  %v3140_v22 = vld [vmem:[%s4329_s14 + $0x10] sm:$0xf]  ;;  %v680_v11 = vshll.u32 %v3141_v23, 16  ;;  %v662_v45 = vrot.slane %v660_v27, 5  ;;  %v1635_v23 = vshll.u32 %v4619_v17, 16  ;;  %v1649_v27 = vshll.u32 %v4622_v18, 16 }
  0x49   : > { %3861 = vmatprep.subr.bf16.mxu1 %v4153_v25  ;;  %3795 = vmatprep.mubr.bf16.mxu0 %v4166_v30  ;;  %v671_v30 = vshrl.u32 %v3140_v22, 16  ;;  %v674_v31 = vshll.u32 %v3140_v22, 16  ;;  %v1632_v22 = vshrl.u32 %v4619_v17, 16  ;;  %v3325_v40 = vld [vmem:[%s4329_s14 + $0x14] sm:$0x1] }
  0x4a   : > { %3875 = vmatprep.mubr.bf16.mxu1 %v3254_v63  ;;  %v682_v48 = vrot.slane %v680_v11, 5  ;;  %v4173_v63 = vld [vmem:[%s5049_s1 + $0x1d0] sm:$0xff]  }
  0x4b   : > { %3782 = vmatpush3.bf16.msra.mxu0 %v4152_v28  ;;  %v666_v28 = vshll.u32 %v3139_v21, 16  ;;  %v673_v49 = vrot.slane %v671_v30, 4  ;;  %v676_v41 = vrot.slane %v674_v31, 5  ;;  %v3266_v30 = vld [vmem:[%s4329_s14 + $0x18] sm:$0xe]  ;;  %v1634_v11 = vrot.slane %v1632_v22, 4 }
  0x4c   : > { %3862 = vmatpush3.bf16.msra.mxu1 %v4153_v25  ;;  %3783 = vmatprep.subr.bf16.mxu0 %v4154_v44  ;;  %v657_v25 = vshrl.u32 %v3138_v20, 16  ;;  %v701_v20 = vrot.slane %v699_v10, 4  ;;  %v3267_v31 = vld [vmem:[%s4329_s14 + $0x20] sm:$0xe] }
  0x4d   : > { %3863 = vmatprep.subr.bf16.mxu1 %v4155_v42  ;;  %v668_v43 = vrot.slane %v666_v28, 5  ;;  %v677_v47 = vor.u32 %v676_v41, %v673_v49  ;;  %v4178_v28 = vld [vmem:[%s5049_s1 + $0xe8] sm:$0xff]   ;;  %v4181_v41 = vld [vmem:[%s5049_s1 + $0x1f0] sm:$0xff]   ;;  %v4185_v10 = vld [vmem:[%s5049_s1 + $0x340] sm:$0xff]  }
  0x4e   : > { %v659_v37 = vrot.slane %v657_v25, 4  ;;  %v1646_v25 = vshrl.u32 %v4622_v18, 16 }
  0x4f   : > { %3784 = vmatpush3.bf16.msra.mxu0 %v4154_v44  ;;  %v3268_v44 = vrot.slane %v3264_v33, 9  ;;  %v678_v52 = vrot.slane %v677_v47, 4  ;;  %v1637_v33 = vrot.slane %v1635_v23, 5 }
  0x50   : > { %3864 = vmatpush3.bf16.msra.mxu1 %v4155_v42  ;;  %3785 = vmatprep.subr.bf16.mxu0 %v4156_v57  ;;  %v1427_v42 = vrot.slane %v4508_v12, 5  ;;  %v663_v29 = vor.u32 %v662_v45, %v659_v37  ;;  %v1648_v34 = vrot.slane %v1646_v25, 4  ;;  %v694_v45 = vshll.u32 %v3143_v19, 16  ;;  %v4188_v25 = vld [vmem:[%s5049_s1 + $0x250] sm:$0xff]  }
  0x51   : > { %3865 = vmatprep.subr.bf16.mxu1 %v4157_v53  ;;  %v1424_v55 = vsel %vm4366_vm4, %v3268_v44, %v1423_v26  ;;  %v683_v58 = vsel %vm4376_vm5, %v678_v52, %v682_v48  ;;  %v3271_v44 = vrot.slane %v3267_v31, 9  ;;  %v1638_v47 = vor.u32 %v1637_v33, %v1634_v11  ;;  %v4190_v31 = vld [vmem:[%s5049_s1 + $0x258] sm:$0xff]   ;;  %v4706_v11 = vld [vmem:[%s4329_s14 + $0x20] sm:$0xf] }
  0x52   : > { %v664_v12 = vrot.slane %v663_v29, 4  ;;  %v1428_v56 = vsel %vm4366_vm4, %v3269_v46, %v1427_v42  ;;  %v1431_v42 = vrot.slane %v4537_v1, 5  ;;  %v4180_v29 = vld [vmem:[%s5049_s1 + $0xf0] sm:$0xff]   ;;  %v1435_v46 = vrot.slane %v4540_v2, 5  ;;  %v3458_v2 = vld [vmem:[%s4329_s14 + $0x8] sm:$0xe] }
  0x53   : > { %3786 = vmatpush3.bf16.msra.mxu0 %v4156_v57  ;;  %v4171_v57 = vld [vmem:[%s5049_s1 + $0x1c8] sm:$0xff]   ;;  %v1641_v48 = vshll.u32 %v3324_v39, 16  ;;  %v3436_v39 = vld [vmem:[%s4329_s14 + $0x10] sm:$0xf] }
  0x54   : > { %3866 = vmatpush3.bf16.msra.mxu1 %v4157_v53  ;;  %3787 = vmatprep.subr.bf16.mxu0 %v4158_v0  ;;  %v4169_v53 = vld [vmem:[%s4329_s14 + $0x18] ss:$8 sps:$4 sm:$0xff]   ;;  %v669_v54 = vsel %vm4376_vm5, %v664_v12, %v668_v43  ;;  %v3270_v43 = vrot.slane %v3266_v30, 9 }
  0x55   : > { %3867 = vmatprep.subr.bf16.mxu1 %v4159_v62  ;;  %v3162_v60 = vcombine.low %v669_v54, %v683_v58  ;;  %v4649_v54 = vld [vmem:[%s4329_s14 + $0xc] sm:$0x1]  ;;  %v4191_v30 = vld [vmem:[%s5049_s1 + $0x358] sm:$0xff]  }
  0x56   : > { %v1432_v58 = vsel %vm4366_vm4, %v3270_v43, %v1431_v42  ;;  %v4195_v43 = vld [vmem:[%s5049_s1 + $0x368] sm:$0xff]  }
  0x57   : > { %3788 = vmatpush3.bf16.msra.mxu0 %v4158_v0  ;;  %v4172_v0 = vld [vmem:[%s5049_s1 + $0xd0] sm:$0xff]  }
  0x58   : > { %3868 = vmatpush3.bf16.msra.mxu1 %v4159_v62  ;;  %3789 = vmatprep.subr.bf16.mxu0 %v4160_v13  ;;  %v3288_v62 = vcombine.low %v1424_v55, %v1428_v56  ;;  %v4652_v55 = vld [vmem:[%s4329_s14 + $0x14] sm:$0x1]  ;;  %v3459_v56 = vld [vmem:[%s4329_s14 + $0x10] sm:$0xe] }
  0x59   : > { %3869 = vmatprep.subr.bf16.mxu1 %v4161_v8 }
  0x5b   : > { %3790 = vmatpush3.bf16.msra.mxu0 %v4160_v13  ;;  %v702_v13 = vshll.u32 %v3144_v5, 16  ;;  %v3463_v5 = vrot.slane %v3459_v56, 9 }
  0x5c   : > { %3870 = vmatpush3.bf16.msra.mxu1 %v4161_v8  ;;  %3791 = vmatprep.subr.bf16.mxu0 %v4162_v6  ;;  %v685_v8 = vshrl.u32 %v3142_v4, 16  ;;  %v2381_v4 = vrot.slane %v4649_v54, 5 }
  0x5d   : > { %3871 = vmatprep.subr.bf16.mxu1 %v4163_v15  ;;  %v704_v21 = vrot.slane %v702_v13, 5  ;;  %v4184_v13 = vld [vmem:[%s5049_s1 + $0x240] sm:$0xff]  }
  0x5f   : > { %3792 = vmatpush3.bf16.msra.mxu0 %v4162_v6  ;;  %v4179_v6 = vld [vmem:[%s5049_s1 + $0x1e8] sm:$0xff]   ;;  %v705_v49 = vor.u32 %v704_v21, %v701_v20 }
  0x60   : > { %3872 = vmatpush3.bf16.msra.mxu1 %v4163_v15  ;;  %3793 = vmatprep.subr.bf16.mxu0 %v4164_v36  ;;  %v687_v15 = vrot.slane %v685_v8, 4  ;;  %v4186_v21 = vld [vmem:[%s5049_s1 + $0x248] sm:$0xff]  }
  0x61   : > { %3873 = vmatprep.subr.bf16.mxu1 %v4165_v24  ;;  %v706_v52 = vrot.slane %v705_v49, 4  ;;  %v1677_v49 = vshll.u32 %v4706_v11, 16 }
  0x62   : > { %v691_v37 = vor.u32 %v690_v16, %v687_v15  ;;  %v4187_v16 = vld [vmem:[%s5049_s1 + $0x348] sm:$0xff]  }
  0x63   : > { %3794 = vmatpush3.bf16.msra.mxu0 %v4164_v36  ;;  %v1651_v36 = vrot.slane %v1649_v27, 5  ;;  %v4696_v27 = vld [vmem:[%s4329_s14 + $0x18] sm:$0xf] }
  0x64   : > { %3874 = vmatpush3.bf16.msra.mxu1 %v4165_v24  ;;  %3799 = vmatprep.subr.bf16.mxu0 %v4167_v50  ;;  %v3145_v24 = vld [vmem:[%s4329_s14 + $0x24] sm:$0x1]  ;;  %v692_v12 = vrot.slane %v691_v37, 4  ;;  %v1660_v33 = vshrl.u32 %v4696_v27, 16 }
  0x65   : > { %3879 = vmatprep.subr.bf16.mxu1 %v4168_v32  ;;  %v708_v26 = vshll.u32 %v3145_v24, 16  ;;  %v1652_v1 = vor.u32 %v1651_v36, %v1648_v34  ;;  %v4189_v24 = vld [vmem:[%s5049_s1 + $0x350] sm:$0xff]   ;;  %v1663_v34 = vshll.u32 %v4696_v27, 16  ;;  %v4193_v37 = vld [vmem:[%s5049_s1 + $0x360] sm:$0xff]  }
  0x66   : > { %3796 = vmatmul.mubr.bf16.vlgmr.msra.gmra.mrb[0].mxu0 %v4169_v53  ;;  %v1662_v42 = vrot.slane %v1660_v33, 4 }
  0x67   : > { %3876 = vmatmul.mubr.bf16.vlgmr.msra.gmra.mrb[0].mxu1 %v3255_v51  ;;  %3800 = vmatpush3.bf16.msra.mxu0 %v4167_v50  ;;  %v1655_v50 = vshll.u32 %v3325_v40, 16  ;;  %v696_v51 = vrot.slane %v694_v45, 5  ;;  %v710_v53 = vrot.slane %v708_v26, 5  ;;  %v1674_v45 = vshrl.u32 %v4706_v11, 16  ;;  %v3434_v26 = vld [vmem:[%s4329_s14 + $0x8] sm:$0xf] }
  0x68   : > { %3880 = vmatpush3.bf16.msra.mxu1 %v4168_v32  ;;  %3801 = vmatprep.subr.bf16.mxu0 %v4170_v59  ;;  %v4183_v32 = vld [vmem:[%s5049_s1 + $0x1f8] sm:$0xff]   ;;  %v4192_v40 = vld [vmem:[%s5049_s1 + $0x260] sm:$0xff]  }
  0x69   : > { %3881 = vmatprep.subr.bf16.mxu1 %v4171_v57  ;;  %3815 = vmatprep.mubr.bf16.mxu0 %v3162_v60  ;;  %v1639_v60 = vrot.slane %v1638_v47, 4  ;;  %v697_v8 = vsel %vm4376_vm5, %v692_v12, %v696_v51  ;;  %v711_v9 = vsel %vm4376_vm5, %v706_v52, %v710_v53  ;;  %v2295_v47 = vshrl.u32 %v3434_v26, 16  ;;  %v4729_v52 = vld [vmem:[%s4329_s14 + $0x1c] sm:$0x1]  ;;  %v3461_v53 = vld [vmem:[%s4329_s14 + $0x20] sm:$0xe] }
  0x6a   : > { %3895 = vmatprep.mubr.bf16.mxu1 %v3288_v62  ;;  %v1643_v62 = vrot.slane %v1641_v48, 5  ;;  %v3163_v15 = vcombine.low %v697_v8, %v711_v9  ;;  %v2298_v48 = vshll.u32 %v3434_v26, 16  ;;  %v1676_v12 = vrot.slane %v1674_v45, 4  ;;  %v4199_v8 = vld [vmem:[%s5049_s1 + $0x378] sm:$0xff]   ;;  %v4202_v45 = vld [vmem:[%s5049_s1 + $0x208] sm:$0xff]  }
  0x6b   : > { %3802 = vmatpush3.bf16.msra.mxu0 %v4170_v59  ;;  %v1436_v59 = vsel %vm4366_vm4, %v3271_v44, %v1435_v46  ;;  %v1665_v44 = vrot.slane %v1663_v34, 5  ;;  %v1679_v51 = vrot.slane %v1677_v49, 5  ;;  %v2304_v9 = vshll.u32 %v4649_v54, 16 }
  0x6c   : > { %3882 = vmatpush3.bf16.msra.mxu1 %v4171_v57  ;;  %3803 = vmatprep.subr.bf16.mxu0 %v4172_v0  ;;  %v4182_v57 = vld [vmem:[%s5049_s1 + $0xf8] sm:$0xff]   ;;  %v3354_v49 = vcombine.low %v4619_v17, %v4622_v18 }
  0x6d   : > { %3883 = vmatprep.subr.bf16.mxu1 %v4173_v63 }
  0x6f   : > { %3804 = vmatpush3.bf16.msra.mxu0 %v4172_v0  ;;  %v1657_v0 = vrot.slane %v1655_v50, 5  ;;  %v2312_v50 = vshll.u32 %v3436_v39, 16 }
  0x70   : > { %3884 = vmatpush3.bf16.msra.mxu1 %v4173_v63  ;;  %3805 = vmatprep.subr.bf16.mxu0 %v4174_v7  ;;  %v1653_v63 = vrot.slane %v1652_v1, 4  ;;  %v2309_v1 = vshrl.u32 %v3436_v39, 16  ;;  %v3438_v39 = vld [vmem:[%s4329_s14 + $0x18] sm:$0xf] }
  0x71   : > { %3885 = vmatprep.subr.bf16.mxu1 %v4175_v3  ;;  %v2323_v17 = vshrl.u32 %v3438_v39, 16  ;;  %v2326_v18 = vshll.u32 %v3438_v39, 16  ;;  %v4234_v39 = vld [vmem:[%s4329_s14 + $0x10] ss:$8 sps:$4 sm:$0xff]  }
  0x73   : > { %3806 = vmatpush3.bf16.msra.mxu0 %v4174_v7  ;;  %v2385_v7 = vrot.slane %v4652_v55, 5 }
  0x74   : > { %3886 = vmatpush3.bf16.msra.mxu1 %v4175_v3  ;;  %3807 = vmatprep.subr.bf16.mxu0 %v4176_v61  ;;  %v3462_v3 = vrot.slane %v3458_v2, 9  ;;  %v4197_v2 = vld [vmem:[%s5049_s1 + $0x370] sm:$0xff]  }
  0x75   : > { %3887 = vmatprep.subr.bf16.mxu1 %v4177_v14  ;;  %v2386_v20 = vsel %vm4366_vm4, %v3463_v5, %v2385_v7  ;;  %v2389_v5 = vrot.slane %v4729_v52, 5  ;;  %v3465_v7 = vrot.slane %v3461_v53, 9 }
  0x76   : > { %v2382_v19 = vsel %vm4366_vm4, %v3462_v3, %v2381_v4  ;;  %v1666_v3 = vor.u32 %v1665_v44, %v1662_v42  ;;  %v1680_v4 = vor.u32 %v1679_v51, %v1676_v12  ;;  %v3440_v42 = vld [vmem:[%s4329_s14 + $0x20] sm:$0xf]  ;;  %v3504_v12 = vld [vmem:[%s4329_s14 + $0x18] sm:$0xf] }
  0x77   : > { %3808 = vmatpush3.bf16.msra.mxu0 %v4176_v61  ;;  %v1644_v61 = vsel %vm4376_vm5, %v1639_v60, %v1643_v62  ;;  %v3482_v23 = vcombine.low %v2382_v19, %v2386_v20  ;;  %v2297_v60 = vrot.slane %v2295_v47, 4  ;;  %v2300_v62 = vrot.slane %v2298_v48, 5  ;;  %v4198_v19 = vld [vmem:[%s5049_s1 + $0x278] sm:$0xff]  }
  0x78   : > { %3888 = vmatpush3.bf16.msra.mxu1 %v4177_v14  ;;  %3809 = vmatprep.subr.bf16.mxu0 %v4178_v28  ;;  %v3289_v14 = vcombine.low %v1432_v58, %v1436_v59  ;;  %v4196_v59 = vld [vmem:[%s5049_s1 + $0x270] sm:$0xff]   ;;  %v2306_v20 = vrot.slane %v2304_v9, 5  ;;  %v2337_v44 = vshrl.u32 %v3440_v42, 16  ;;  %v2325_v47 = vrot.slane %v2323_v17, 4  ;;  %v3508_v17 = vld [vmem:[%s4329_s14 + $0x28] sm:$0xf] }
  0x79   : > { %3889 = vmatprep.subr.bf16.mxu1 %v4179_v6  ;;  %v2328_v48 = vrot.slane %v2326_v18, 5  ;;  %v4224_v18 = vld [vmem:[%s5049_s1 + $0x298] sm:$0xff]  }
  0x7a   : > { %v2339_v51 = vrot.slane %v2337_v44, 4  ;;  %v2673_v44 = vshrl.u32 %v3508_v17, 16 }
  0x7b   : > { %3810 = vmatpush3.bf16.msra.mxu0 %v4178_v28  ;;  %v3326_v28 = vld [vmem:[%s4329_s14 + $0x1c] sm:$0x1] }
  0x7c   : > { %3890 = vmatpush3.bf16.msra.mxu1 %v4179_v6  ;;  %3811 = vmatprep.subr.bf16.mxu0 %v4180_v29  ;;  %v1658_v6 = vsel %vm4376_vm5, %v1653_v63, %v1657_v0  ;;  %v1669_v36 = vshll.u32 %v3326_v28, 16  ;;  %v2311_v63 = vrot.slane %v2309_v1, 4  ;;  %v2314_v0 = vrot.slane %v2312_v50, 5  ;;  %v4208_v1 = vld [vmem:[%s5049_s1 + $0x220] sm:$0xff]   ;;  %v3502_v50 = vld [vmem:[%s4329_s14 + $0x10] sm:$0xf] }
  0x7d   : > { %3891 = vmatprep.subr.bf16.mxu1 %v4181_v41  ;;  %v3344_v22 = vcombine.low %v1644_v61, %v1658_v6  ;;  %v2301_v61 = vor.u32 %v2300_v62, %v2297_v60  ;;  %v2648_v60 = vshll.u32 %v3504_v12, 16  ;;  %v4211_v62 = vld [vmem:[%s5049_s1 + $0x328] sm:$0xff]  }
  0x7e   : > { %v1671_v46 = vrot.slane %v1669_v36, 5  ;;  %v2315_v6 = vor.u32 %v2314_v0, %v2311_v63  ;;  %v2332_v63 = vshll.u32 %v4729_v52, 16  ;;  %v4212_v52 = vld [vmem:[%s5049_s1 + $0x230] sm:$0xff]  }
  0x7f   : > { %3812 = vmatpush3.bf16.msra.mxu0 %v4180_v29  ;;  %v3460_v29 = vld [vmem:[%s4329_s14 + $0x18] sm:$0xe] }
  0x80   : > { %3892 = vmatpush3.bf16.msra.mxu1 %v4181_v41  ;;  %3813 = vmatprep.subr.bf16.mxu0 %v4182_v57  ;;  %v3327_v41 = vld [vmem:[%s4329_s14 + $0x24] sm:$0x1]  ;;  %v3464_v58 = vrot.slane %v3460_v29, 9  ;;  %v4206_v29 = vld [vmem:[%s5049_s1 + $0x218] sm:$0xff]  }
  0x81   : > { %3893 = vmatprep.subr.bf16.mxu1 %v4183_v32  ;;  %v1683_v56 = vshll.u32 %v3327_v41, 16  ;;  %v4204_v41 = vld [vmem:[%s5049_s1 + $0x210] sm:$0xff]  }
  0x82   : > { %v2390_v54 = vsel %vm4366_vm4, %v3464_v58, %v2389_v5  ;;  %v4210_v58 = vld [vmem:[%s5049_s1 + $0x228] sm:$0xff]  }
  0x83   : > { %3814 = vmatpush3.bf16.msra.mxu0 %v4182_v57  ;;  %v4736_v57 = vld [vmem:[%s4329_s14 + $0x24] sm:$0x1] }
  0x84   : > { %3894 = vmatpush3.bf16.msra.mxu1 %v4183_v32  ;;  %3899 = vmatprep.subr.bf16.mxu0 %v4184_v13  ;;  %v4194_v32 = vld [vmem:[%s5049_s1 + $0x268] sm:$0xff]   ;;  %v2346_v0 = vshll.u32 %v4736_v57, 16 }
  0x85   : > { %3979 = vmatprep.subr.bf16.mxu1 %v4185_v10 }
  0x86   : > { %3816 = vmatmul.mubr.bf16.vlgmr.msra.gmra.mrb[0].mxu0 %v3163_v15  ;;  %v1667_v15 = vrot.slane %v1666_v3, 4  ;;  %v4213_v3 = vld [vmem:[%s5049_s1 + $0x330] sm:$0xff]  }
  0x87   : > { %3896 = vmatmul.mubr.bf16.vlgmr.msra.gmra.mrb[0].mxu1 %v3289_v14  ;;  %3900 = vmatpush3.bf16.msra.mxu0 %v4184_v13  ;;  %v1685_v13 = vrot.slane %v1683_v56, 5  ;;  %v2393_v14 = vrot.slane %v4736_v57, 5  ;;  %v2634_v56 = vshll.u32 %v3502_v50, 16 }
  0x88   : > { %3980 = vmatpush3.bf16.msra.mxu1 %v4185_v10  ;;  %3901 = vmatprep.subr.bf16.mxu0 %v4186_v21  ;;  %v2318_v10 = vshll.u32 %v4652_v55, 16 }
  0x89   : > { %3981 = vmatprep.subr.bf16.mxu1 %v4187_v16  ;;  %3915 = vmatprep.mubr.bf16.mxu0 %v3344_v22  ;;  %v2394_v55 = vsel %vm4366_vm4, %v3465_v7, %v2393_v14  ;;  %v2302_v22 = vrot.slane %v2301_v61, 4  ;;  %v4814_v14 = vld [vmem:[%s4329_s14 + $0x1c] sm:$0x1]  ;;  %v2334_v61 = vrot.slane %v2332_v63, 5  ;;  %v4879_v63 = vld [vmem:[%s4329_s14 + $0x2c] sm:$0x1] }
  0x8a   : > { %3995 = vmatprep.mubr.bf16.mxu1 %v3482_v23  ;;  %v2316_v23 = vrot.slane %v2315_v6, 4 }
  0x8b   : > { %3902 = vmatpush3.bf16.msra.mxu0 %v4186_v21  ;;  %v2320_v21 = vrot.slane %v2318_v10, 5  ;;  %v2307_v34 = vsel %vm4376_vm5, %v2302_v22, %v2306_v20  ;;  %v2650_v10 = vrot.slane %v2648_v60, 5 }
  0x8c   : > { %3982 = vmatpush3.bf16.msra.mxu1 %v4187_v16  ;;  %3903 = vmatprep.subr.bf16.mxu0 %v4188_v25  ;;  %v1681_v16 = vrot.slane %v1680_v4, 4  ;;  %v2329_v4 = vor.u32 %v2328_v48, %v2325_v47  ;;  %v3396_v47 = vld [vmem:[%s4329_s14 + $0x18] sm:$0xf]  ;;  %v4227_v48 = vld [vmem:[%s5049_s1 + $0x3a0] sm:$0xff]  }
  0x8d   : > { %3983 = vmatprep.subr.bf16.mxu1 %v4189_v24  ;;  %v2321_v36 = vsel %vm4376_vm5, %v2316_v23, %v2320_v21  ;;  %v2654_v21 = vshll.u32 %v4814_v14, 16 }
  0x8e   : > { %v1686_v28 = vsel %vm4376_vm5, %v1681_v16, %v1685_v13  ;;  %v3492_v26 = vcombine.low %v2307_v34, %v2321_v36  ;;  %v4811_v13 = vld [vmem:[%s4329_s14 + $0x14] sm:$0x1]  ;;  %v2330_v57 = vrot.slane %v2329_v4, 4  ;;  %v3355_v36 = vcombine.low %v4696_v27, %v4706_v11 }
  0x8f   : > { %3904 = vmatpush3.bf16.msra.mxu0 %v4188_v25  ;;  %v1672_v25 = vsel %vm4376_vm5, %v1667_v15, %v1671_v46  ;;  %v2340_v46 = vshll.u32 %v3440_v42, 16  ;;  %v2348_v15 = vrot.slane %v2346_v0, 5  ;;  %v4223_v11 = vld [vmem:[%s5049_s1 + $0x390] sm:$0xff]   ;;  %v4225_v42 = vld [vmem:[%s5049_s1 + $0x398] sm:$0xff]   ;;  %v4228_v0 = vld [vmem:[%s5049_s1 + $0x2a8] sm:$0xff]  }
  0x90   : > { %3984 = vmatpush3.bf16.msra.mxu1 %v4189_v24  ;;  %3905 = vmatprep.subr.bf16.mxu0 %v4190_v31  ;;  %v4201_v24 = vld [vmem:[%s5049_s1 + $0x300] sm:$0xff]   ;;  %v3345_v33 = vcombine.low %v1672_v25, %v1686_v28  ;;  %v2335_v22 = vsel %vm4376_vm5, %v2330_v57, %v2334_v61  ;;  %v3395_v57 = vld [vmem:[%s4329_s14 + $0x14] sm:$0x1]  ;;  %v3397_v61 = vld [vmem:[%s4329_s14 + $0x1c] sm:$0x1] }
  0x91   : > { %3985 = vmatprep.subr.bf16.mxu1 %v4191_v30  ;;  %v2342_v53 = vrot.slane %v2340_v46, 5  ;;  %v2676_v46 = vshll.u32 %v3508_v17, 16 }
  0x93   : > { %3906 = vmatpush3.bf16.msra.mxu0 %v4190_v31  ;;  %v3483_v31 = vcombine.low %v2390_v54, %v2394_v55  ;;  %v2343_v5 = vor.u32 %v2342_v53, %v2339_v51  ;;  %v4215_v54 = vld [vmem:[%s5049_s1 + $0x338] sm:$0xff]   ;;  %v4873_v51 = vld [vmem:[%s4329_s14 + $0x24] sm:$0x1]  ;;  %v2678_v60 = vrot.slane %v2676_v46, 5 }
  0x94   : > { %3986 = vmatpush3.bf16.msra.mxu1 %v4191_v30  ;;  %3907 = vmatprep.subr.bf16.mxu0 %v4192_v40  ;;  %v4200_v30 = vld [vmem:[%s5049_s1 + $0x200] sm:$0xff]   ;;  %v4214_v55 = vld [vmem:[%s5049_s1 + $0x238] sm:$0xff]   ;;  %v2668_v4 = vshll.u32 %v4873_v51, 16 }
  0x95   : > { %3987 = vmatprep.subr.bf16.mxu1 %v4193_v37  ;;  %v2344_v6 = vrot.slane %v2343_v5, 4 }
  0x97   : > { %3908 = vmatpush3.bf16.msra.mxu0 %v4192_v40  ;;  %v4205_v40 = vld [vmem:[%s5049_s1 + $0x310] sm:$0xff]   ;;  %v2349_v23 = vsel %vm4376_vm5, %v2344_v6, %v2348_v15 }
  0x98   : > { %3988 = vmatpush3.bf16.msra.mxu1 %v4193_v37  ;;  %3909 = vmatprep.subr.bf16.mxu0 %v4194_v32  ;;  %v4203_v37 = vld [vmem:[%s5049_s1 + $0x308] sm:$0xff]   ;;  %v3493_v34 = vcombine.low %v2335_v22, %v2349_v23  ;;  %v4231_v6 = vld [vmem:[%s5049_s1 + $0x3b0] sm:$0xff]  }
  0x99   : > { %3989 = vmatprep.subr.bf16.mxu1 %v4195_v43  ;;  %v4230_v15 = vld [vmem:[%s5049_s1 + $0x2b0] sm:$0xff]  }
  0x9b   : > { %3910 = vmatpush3.bf16.msra.mxu0 %v4194_v32  ;;  %v4209_v32 = vld [vmem:[%s5049_s1 + $0x320] sm:$0xff]  }
  0x9c   : > { %3990 = vmatpush3.bf16.msra.mxu1 %v4195_v43  ;;  %3911 = vmatprep.subr.bf16.mxu0 %v4196_v59  ;;  %v4207_v43 = vld [vmem:[%s5049_s1 + $0x318] sm:$0xff]  }
  0x9d   : > { %3991 = vmatprep.subr.bf16.mxu1 %v4197_v2 }
  0x9f   : > { %3912 = vmatpush3.bf16.msra.mxu0 %v4196_v59  ;;  %v2645_v59 = vshrl.u32 %v3504_v12, 16 }
  0xa0   : > { %3992 = vmatpush3.bf16.msra.mxu1 %v4197_v2  ;;  %3913 = vmatprep.subr.bf16.mxu0 %v4198_v19  ;;  %v2631_v2 = vshrl.u32 %v3502_v50, 16 }
  0xa1   : > { %3993 = vmatprep.subr.bf16.mxu1 %v4199_v8  ;;  %v2647_v9 = vrot.slane %v2645_v59, 4  ;;  %v2675_v59 = vrot.slane %v2673_v44, 4 }
  0xa2   : > { %v2633_v7 = vrot.slane %v2631_v2, 4 }
  0xa3   : > { %3914 = vmatpush3.bf16.msra.mxu0 %v4198_v19  ;;  %v2640_v19 = vshll.u32 %v4811_v13, 16  ;;  %v2651_v20 = vor.u32 %v2650_v10, %v2647_v9  ;;  %v2679_v10 = vor.u32 %v2678_v60, %v2675_v59  ;;  %v4244_v60 = vld [vmem:[%s5049_s1 + $0x2e0] sm:$0xff]  }
  0xa4   : > { %3994 = vmatpush3.bf16.msra.mxu1 %v4199_v8  ;;  %3919 = vmatprep.subr.bf16.mxu0 %v4200_v30  ;;  %v2636_v8 = vrot.slane %v2634_v56, 5  ;;  %v2076_v56 = vshrl.u32 %v3396_v47, 16 }
  0xa5   : > { %3999 = vmatprep.subr.bf16.mxu1 %v4201_v24  ;;  %v2642_v25 = vrot.slane %v2640_v19, 5  ;;  %v2652_v28 = vrot.slane %v2651_v20, 4  ;;  %v2670_v19 = vrot.slane %v2668_v4, 5  ;;  %v2680_v22 = vrot.slane %v2679_v10, 4  ;;  %v4249_v10 = vld [vmem:[%s5049_s1 + $0x3f0] sm:$0xff]  }
  0xa6   : > { %3916 = vmatmul.mubr.bf16.vlgmr.msra.gmra.mrb[4].mxu0 %v3345_v33  ;;  %v2637_v16 = vor.u32 %v2636_v8, %v2633_v7  ;;  %v4217_v33 = vld [vmem:[%s5049_s1 + $0x280] sm:$0xff]   ;;  %v2078_v8 = vrot.slane %v2076_v56, 4 }
  0xa7   : > { %3996 = vmatmul.mubr.bf16.vlgmr.msra.gmra.mrb[4].mxu1 %v3483_v31  ;;  %3920 = vmatpush3.bf16.msra.mxu0 %v4200_v30  ;;  %v2656_v30 = vrot.slane %v2654_v21, 5  ;;  %v4218_v31 = vld [vmem:[%s5049_s1 + $0x380] sm:$0xff]   ;;  %v2071_v21 = vshll.u32 %v3395_v57, 16 }
  0xa8   : > { %4000 = vmatpush3.bf16.msra.mxu1 %v4201_v24  ;;  %3921 = vmatprep.subr.bf16.mxu0 %v4202_v45  ;;  %v2638_v24 = vrot.slane %v2637_v16, 4 }
  0xa9   : > { %4001 = vmatprep.subr.bf16.mxu1 %v4203_v37  ;;  %3935 = vmatprep.mubr.bf16.mxu0 %v3354_v49  ;;  %v4221_v49 = vld [vmem:[%s5049_s1 + $0x388] sm:$0xff]  }
  0xaa   : > { %4015 = vmatprep.mubr.bf16.mxu1 %v3492_v26  ;;  %v4220_v26 = vld [vmem:[%s5049_s1 + $0x288] sm:$0xff]  }
  0xab   : > { %3922 = vmatpush3.bf16.msra.mxu0 %v4202_v45  ;;  %v2657_v45 = vsel %vm4376_vm5, %v2652_v28, %v2656_v30  ;;  %v3537_v28 = vld [vmem:[%s4329_s14 + $0x18] sm:$0xe] }
  0xac   : > { %4002 = vmatpush3.bf16.msra.mxu1 %v4203_v37  ;;  %3923 = vmatprep.subr.bf16.mxu0 %v4204_v41  ;;  %v2643_v37 = vsel %vm4376_vm5, %v2638_v24, %v2642_v25  ;;  %v4233_v24 = vld [vmem:[%s5049_s1 + $0x3b8] sm:$0xff]   ;;  %v3536_v25 = vld [vmem:[%s4329_s14 + $0x10] sm:$0xe] }
  0xad   : > { %4003 = vmatprep.subr.bf16.mxu1 %v4205_v40  ;;  %v3526_v27 = vcombine.low %v2643_v37, %v2657_v45  ;;  %v4232_v30 = vld [vmem:[%s5049_s1 + $0x2b8] sm:$0xff]  }
  0xaf   : > { %3924 = vmatpush3.bf16.msra.mxu0 %v4204_v41  ;;  %v3506_v41 = vld [vmem:[%s4329_s14 + $0x20] sm:$0xf] }
  0xb0   : > { %4004 = vmatpush3.bf16.msra.mxu1 %v4205_v40  ;;  %3925 = vmatprep.subr.bf16.mxu0 %v4206_v29  ;;  %v4222_v40 = vld [vmem:[%s5049_s1 + $0x290] sm:$0xff]  }
  0xb1   : > { %4005 = vmatprep.subr.bf16.mxu1 %v4207_v43 }
  0xb3   : > { %3926 = vmatpush3.bf16.msra.mxu0 %v4206_v29  ;;  %v2659_v29 = vshrl.u32 %v3506_v41, 16 }
  0xb4   : > { %4006 = vmatpush3.bf16.msra.mxu1 %v4207_v43  ;;  %3927 = vmatprep.subr.bf16.mxu0 %v4208_v1  ;;  %v2662_v43 = vshll.u32 %v3506_v41, 16 }
  0xb5   : > { %4007 = vmatprep.subr.bf16.mxu1 %v4209_v32  ;;  %v2661_v50 = vrot.slane %v2659_v29, 4  ;;  %v4239_v29 = vld [vmem:[%s5049_s1 + $0x3c8] sm:$0xff]  }
  0xb6   : > { %v2664_v12 = vrot.slane %v2662_v43, 5  ;;  %v4238_v43 = vld [vmem:[%s5049_s1 + $0x2c8] sm:$0xff]  }
  0xb7   : > { %3928 = vmatpush3.bf16.msra.mxu0 %v4208_v1  ;;  %v4226_v1 = vld [vmem:[%s5049_s1 + $0x2a0] sm:$0xff]  }
  0xb8   : > { %4008 = vmatpush3.bf16.msra.mxu1 %v4209_v32  ;;  %3929 = vmatprep.subr.bf16.mxu0 %v4210_v58  ;;  %v3394_v32 = vld [vmem:[%s4329_s14 + $0x10] sm:$0xf] }
  0xb9   : > { %4009 = vmatprep.subr.bf16.mxu1 %v4211_v62  ;;  %v2062_v53 = vshrl.u32 %v3394_v32, 16  ;;  %v2065_v2 = vshll.u32 %v3394_v32, 16  ;;  %v4241_v32 = vld [vmem:[%s5049_s1 + $0x3d0] sm:$0xff]  }
  0xbb   : > { %3930 = vmatpush3.bf16.msra.mxu0 %v4210_v58  ;;  %v2079_v58 = vshll.u32 %v3396_v47, 16  ;;  %v2064_v5 = vrot.slane %v2062_v53, 4  ;;  %v2067_v7 = vrot.slane %v2065_v2, 5  ;;  %v4240_v47 = vld [vmem:[%s5049_s1 + $0x2d0] sm:$0xff]   ;;  %v4245_v53 = vld [vmem:[%s5049_s1 + $0x3e0] sm:$0xff]  }
  0xbc   : > { %4010 = vmatpush3.bf16.msra.mxu1 %v4211_v62  ;;  %3931 = vmatprep.subr.bf16.mxu0 %v4212_v52  ;;  %v4229_v62 = vld [vmem:[%s5049_s1 + $0x3a8] sm:$0xff]  }
  0xbd   : > { %4011 = vmatprep.subr.bf16.mxu1 %v4213_v3  ;;  %v2081_v9 = vrot.slane %v2079_v58, 5  ;;  %v2068_v20 = vor.u32 %v2067_v7, %v2064_v5  ;;  %v4246_v7 = vld [vmem:[%s5049_s1 + $0x2e8] sm:$0xff]  }
  0xbf   : > { %3932 = vmatpush3.bf16.msra.mxu0 %v4212_v52  ;;  %v2682_v52 = vshll.u32 %v4879_v63, 16 }
  0xc0   : > { %4012 = vmatpush3.bf16.msra.mxu1 %v4213_v3  ;;  %3933 = vmatprep.subr.bf16.mxu0 %v4214_v55  ;;  %v2665_v3 = vor.u32 %v2664_v12, %v2661_v50  ;;  %v3398_v50 = vld [vmem:[%s4329_s14 + $0x20] sm:$0xf]  ;;  %v3400_v12 = vld [vmem:[%s4329_s14 + $0x28] sm:$0xf] }
  0xc1   : > { %4013 = vmatprep.subr.bf16.mxu1 %v4215_v54  ;;  %v2684_v23 = vrot.slane %v2682_v52, 5  ;;  %v2090_v2 = vshrl.u32 %v3398_v50, 16  ;;  %v2093_v56 = vshll.u32 %v3398_v50, 16  ;;  %v2104_v58 = vshrl.u32 %v3400_v12, 16 }
  0xc2   : > { %v2666_v16 = vrot.slane %v2665_v3, 4  ;;  %v2107_v59 = vshll.u32 %v3400_v12, 16 }
  0xc3   : > { %3934 = vmatpush3.bf16.msra.mxu0 %v4214_v55  ;;  %v2085_v55 = vshll.u32 %v3397_v61, 16  ;;  %v2095_v3 = vrot.slane %v2093_v56, 5  ;;  %v2106_v4 = vrot.slane %v2104_v58, 4 }
  0xc4   : > { %4014 = vmatpush3.bf16.msra.mxu1 %v4215_v54  ;;  %3939 = vmatprep.subr.bf16.mxu0 %v4217_v33  ;;  %v2082_v54 = vor.u32 %v2081_v9, %v2078_v8  ;;  %v2109_v5 = vrot.slane %v2107_v59, 5  ;;  %v3399_v8 = vld [vmem:[%s4329_s14 + $0x24] sm:$0x1]  ;;  %v3401_v9 = vld [vmem:[%s4329_s14 + $0x2c] sm:$0x1] }
  0xc5   : > { %4019 = vmatprep.subr.bf16.mxu1 %v4218_v31  ;;  %v2087_v45 = vrot.slane %v2085_v55, 5  ;;  %v2099_v57 = vshll.u32 %v3399_v8, 16  ;;  %v2838_v55 = vrot.slane %v4879_v63, 5 }
  0xc6   : > { %3936 = vmatmul.mubr.bf16.vlgmr.msra.gmra.mrb[4].mxu0 %v3355_v36  ;;  %v2073_v36 = vrot.slane %v2071_v21, 5  ;;  %v2083_v37 = vrot.slane %v2082_v54, 4  ;;  %v2110_v61 = vor.u32 %v2109_v5, %v2106_v4  ;;  %v2834_v21 = vrot.slane %v4873_v51, 5 }
  0xc7   : > { %4016 = vmatmul.mubr.bf16.vlgmr.msra.gmra.mrb[4].mxu1 %v3493_v34  ;;  %3940 = vmatpush3.bf16.msra.mxu0 %v4217_v33  ;;  %v2826_v33 = vrot.slane %v4811_v13, 5  ;;  %v2069_v34 = vrot.slane %v2068_v20, 4  ;;  %v4235_v13 = vld [vmem:[%s5049_s1 + $0x2c0] sm:$0xff]  }
  0xc8   : > { %4020 = vmatpush3.bf16.msra.mxu1 %v4218_v31  ;;  %3941 = vmatprep.subr.bf16.mxu0 %v4220_v26  ;;  %v2671_v31 = vsel %vm4376_vm5, %v2666_v16, %v2670_v19  ;;  %v3539_v16 = vld [vmem:[%s4329_s14 + $0x28] sm:$0xe]  ;;  %v4248_v19 = vld [vmem:[%s5049_s1 + $0x2f0] sm:$0xff]  }
  0xc9   : > { %4021 = vmatprep.subr.bf16.mxu1 %v4221_v49  ;;  %3955 = vmatprep.mubr.bf16.mxu0 %v4234_v39  ;;  %v3541_v39 = vrot.slane %v3537_v28, 9  ;;  %v2074_v41 = vsel %vm4376_vm5, %v2069_v34, %v2073_v36  ;;  %v3543_v54 = vrot.slane %v3539_v16, 9 }
  0xca   : > { %4035 = vmatprep.mubr.bf16.mxu1 %v3526_v27  ;;  %v2830_v27 = vrot.slane %v4814_v14, 5  ;;  %v4237_v14 = vld [vmem:[%s4329_s14 + $0x20] ss:$8 sps:$4 sm:$0xff]  }
  0xcb   : > { %3942 = vmatpush3.bf16.msra.mxu0 %v4220_v26  ;;  %v3540_v26 = vrot.slane %v3536_v25, 9  ;;  %v2111_v25 = vrot.slane %v2110_v61, 4  ;;  %v2839_v63 = vsel %vm4366_vm4, %v3543_v54, %v2838_v55 }
  0xcc   : > { %4022 = vmatpush3.bf16.msra.mxu1 %v4221_v49  ;;  %3943 = vmatprep.subr.bf16.mxu0 %v4222_v40  ;;  %v2685_v49 = vsel %vm4376_vm5, %v2680_v22, %v2684_v23  ;;  %v4251_v22 = vld [vmem:[%s5049_s1 + $0x3f8] sm:$0xff]  }
  0xcd   : > { %4023 = vmatprep.subr.bf16.mxu1 %v4223_v11  ;;  %v2827_v17 = vsel %vm4366_vm4, %v3540_v26, %v2826_v33 }
  0xcf   : > { %3944 = vmatpush3.bf16.msra.mxu0 %v4222_v40  ;;  %v3527_v40 = vcombine.low %v2671_v31, %v2685_v49 }
  0xd0   : > { %4024 = vmatpush3.bf16.msra.mxu1 %v4223_v11  ;;  %3945 = vmatprep.subr.bf16.mxu0 %v4224_v18  ;;  %v4236_v11 = vld [vmem:[%s5049_s1 + $0x3c0] sm:$0xff]  }
  0xd1   : > { %4025 = vmatprep.subr.bf16.mxu1 %v4225_v42 }
  0xd3   : > { %3946 = vmatpush3.bf16.msra.mxu0 %v4224_v18  ;;  %v2831_v18 = vsel %vm4366_vm4, %v3541_v39, %v2830_v27 }
  0xd4   : > { %4026 = vmatpush3.bf16.msra.mxu1 %v4225_v42  ;;  %3947 = vmatprep.subr.bf16.mxu0 %v4226_v1  ;;  %v2088_v42 = vsel %vm4376_vm5, %v2083_v37, %v2087_v45  ;;  %v3560_v46 = vcombine.low %v2827_v17, %v2831_v18  ;;  %v4989_v37 = vld [vmem:[%s5051_s3] ss:$0 sm:$0xff] }
  0xd5   : > { %4027 = vmatprep.subr.bf16.mxu1 %v4227_v48  ;;  %v3418_v44 = vcombine.low %v2074_v41, %v2088_v42 }
  0xd7   : > { %3948 = vmatpush3.bf16.msra.mxu0 %v4226_v1  ;;  %v4242_v1 = vld [vmem:[%s5049_s1 + $0x2d8] sm:$0xff]  }
  0xd8   : > { %4028 = vmatpush3.bf16.msra.mxu1 %v4227_v48  ;;  %3949 = vmatprep.subr.bf16.mxu0 %v4228_v0  ;;  %v4243_v48 = vld [vmem:[%s5049_s1 + $0x3d8] sm:$0xff]  }
  0xd9   : > { %4029 = vmatprep.subr.bf16.mxu1 %v4229_v62 }
  0xdb   : > { %3950 = vmatpush3.bf16.msra.mxu0 %v4228_v0  ;;  %v2092_v0 = vrot.slane %v2090_v2, 4 }
  0xdc   : > { %4030 = vmatpush3.bf16.msra.mxu1 %v4229_v62  ;;  %3951 = vmatprep.subr.bf16.mxu0 %v4230_v15  ;;  %v4247_v62 = vld [vmem:[%s5049_s1 + $0x3e8] sm:$0xff]  }
  0xdd   : > { %4031 = vmatprep.subr.bf16.mxu1 %v4231_v6  ;;  %v2096_v52 = vor.u32 %v2095_v3, %v2092_v0 }
  0xdf   : > { %3952 = vmatpush3.bf16.msra.mxu0 %v4230_v15  ;;  %v3538_v15 = vld [vmem:[%s4329_s14 + $0x20] sm:$0xe]  ;;  %v2097_v23 = vrot.slane %v2096_v52, 4 }
  0xe0   : > { %4032 = vmatpush3.bf16.msra.mxu1 %v4231_v6  ;;  %3953 = vmatprep.subr.bf16.mxu0 %v4232_v30  ;;  %v2113_v6 = vshll.u32 %v3401_v9, 16  ;;  %v3542_v20 = vrot.slane %v3538_v15, 9 }
  0xe1   : > { %4033 = vmatprep.subr.bf16.mxu1 %v4233_v24 }
  0xe2   : > { %v2115_v28 = vrot.slane %v2113_v6, 5  ;;  %v2835_v51 = vsel %vm4366_vm4, %v3542_v20, %v2834_v21 }
  0xe3   : > { %3954 = vmatpush3.bf16.msra.mxu0 %v4232_v30  ;;  %v4250_v30 = vld [vmem:[%s5049_s1 + $0x2f8] sm:$0xff]   ;;  %v3561_v34 = vcombine.low %v2835_v51, %v2839_v63 }
  0xe4   : > { %4034 = vmatpush3.bf16.msra.mxu1 %v4233_v24  ;;  %3959 = vmatprep.subr.bf16.mxu0 %v4235_v13  ;;  %v2101_v24 = vrot.slane %v2099_v57, 5  ;;  %v2116_v33 = vsel %vm4376_vm5, %v2111_v25, %v2115_v28 }
  0xe5   : > { %4039 = vmatprep.subr.bf16.mxu1 %v4236_v11 }
  0xe6   : > { %3956 = vmatmul.mubr.bf16.vlgmr.msra.gmra.mrb[4].mxu0 %v4237_v14  ;;  %v2102_v31 = vsel %vm4376_vm5, %v2097_v23, %v2101_v24 }
  0xe7   : > { %4036 = vmatmul.mubr.bf16.vlgmr.msra.gmra.mrb[4].mxu1 %v3527_v40  ;;  %3960 = vmatpush3.bf16.msra.mxu0 %v4235_v13  ;;  %v3419_v36 = vcombine.low %v2102_v31, %v2116_v33 }
  0xe8   : > { %4040 = vmatpush3.bf16.msra.mxu1 %v4236_v11  ;;  %3961 = vmatprep.subr.bf16.mxu0 %v4238_v43 }
  0xe9   : > { %4041 = vmatprep.subr.bf16.mxu1 %v4239_v29  ;;  %3975 = vmatprep.mubr.bf16.mxu0 %v3418_v44 }
  0xea   : > { %4055 = vmatprep.mubr.bf16.mxu1 %v3560_v46 }
  0xeb   : > { %3962 = vmatpush3.bf16.msra.mxu0 %v4238_v43 }
  0xec   : > { %4042 = vmatpush3.bf16.msra.mxu1 %v4239_v29  ;;  %3963 = vmatprep.subr.bf16.mxu0 %v4240_v47 }
  0xed   : > { %4043 = vmatprep.subr.bf16.mxu1 %v4241_v32 }
  0xef   : > { %3964 = vmatpush3.bf16.msra.mxu0 %v4240_v47 }
  0xf0   : > { %4044 = vmatpush3.bf16.msra.mxu1 %v4241_v32  ;;  %3965 = vmatprep.subr.bf16.mxu0 %v4242_v1 }
  0xf1   : > { %4045 = vmatprep.subr.bf16.mxu1 %v4243_v48 }
  0xf3   : > { %3966 = vmatpush3.bf16.msra.mxu0 %v4242_v1 }
  0xf4   : > { %4046 = vmatpush3.bf16.msra.mxu1 %v4243_v48  ;;  %3967 = vmatprep.subr.bf16.mxu0 %v4244_v60 }
  0xf5   : > { %4047 = vmatprep.subr.bf16.mxu1 %v4245_v53 }
  0xf7   : > { %3968 = vmatpush3.bf16.msra.mxu0 %v4244_v60 }
  0xf8   : > { %4048 = vmatpush3.bf16.msra.mxu1 %v4245_v53  ;;  %3969 = vmatprep.subr.bf16.mxu0 %v4246_v7 }
  0xf9   : > { %4049 = vmatprep.subr.bf16.mxu1 %v4247_v62 }
  0xfb   : > { %3970 = vmatpush3.bf16.msra.mxu0 %v4246_v7 }
  0xfc   : > { %4050 = vmatpush3.bf16.msra.mxu1 %v4247_v62  ;;  %3971 = vmatprep.subr.bf16.mxu0 %v4248_v19 }
  0xfd   : > { %4051 = vmatprep.subr.bf16.mxu1 %v4249_v10 }
  0xff   : > { %3972 = vmatpush3.bf16.msra.mxu0 %v4248_v19 }
 0x100   : > { %4052 = vmatpush3.bf16.msra.mxu1 %v4249_v10  ;;  %3973 = vmatprep.subr.bf16.mxu0 %v4250_v30 }
 0x101   : > { %4053 = vmatprep.subr.bf16.mxu1 %v4251_v22 }
 0x103   : > { %3974 = vmatpush3.bf16.msra.mxu0 %v4250_v30 }
 0x104   : > { %4054 = vmatpush3.bf16.msra.mxu1 %v4251_v22 }
 0x106   : > { %3976 = vmatmul.mubr.bf16.vlgmr.msra.gmra.mrb[4].mxu0 %v3419_v36 }
 0x107   : > { %4056 = vmatmul.mubr.bf16.vlgmr.msra.gmra.mrb[4].mxu1 %v3561_v34 }
 0x159   : > { %v3817_v45 = vpop.f32.mrb[0].mxu0 }
 0x15a   : > { %v3897_v38 = vpop.f32.mrb[0].mxu1  ;;  %v847_v39 = vmul.f32 %v3817_v45, %v4984_v35  ;;  %v819_v27 = vpop.f32.mrb[1].mxu0 }
 0x15b   : > { %v1572_v49 = vmul.f32 %v3897_v38, %v4984_v35  ;;  %v1544_v26 = vpop.f32.mrb[1].mxu1  ;;  %v845_v41 = vmul.f32 %v4984_v35, %v819_v27  ;;  %v3818_v42 = vpop.f32.mrb[2].mxu0 }
 0x15c   : > { %v1570_v11 = vmul.f32 %v4984_v35, %v1544_v26  ;;  %v3898_v13 = vpop.f32.mrb[2].mxu1  ;;  %v858_v18 = vadd.f32 %v4989_v37, %v847_v39  ;;  %v848_v43 = vmul.f32 %v3818_v42, %v4984_v35  ;;  %v822_v44 = vpop.f32.mrb[3].mxu0 }
 0x15d   : > { %v1583_v40 = vadd.f32 %v4989_v37, %v1572_v49  ;;  %v1573_v14 = vmul.f32 %v3898_v13, %v4984_v35  ;;  %v1547_v17 = vpop.f32.mrb[3].mxu1  ;;  %v856_v47 = vadd.f32 %v4989_v37, %v845_v41  ;;  %v846_v7 = vmul.f32 %v4984_v35, %v822_v44 }
 0x15e   : > { %v1581_v29 = vadd.f32 %v4989_v37, %v1570_v11  ;;  %v1571_v46 = vmul.f32 %v4984_v35, %v1547_v17  ;;  %vm862_vm7 = vcmp.ge.f32.partialorder %v858_v18, 0.0  ;;  %v866_v1 = vmul.f32 0.01, %v858_v18 }
 0x15f   : > { %vm1587_vm6 = vcmp.ge.f32.partialorder %v1583_v40, 0.0  ;;  %v1591_v32 = vmul.f32 0.01, %v1583_v40  ;;  %v1584_v48 = vadd.f32 %v4989_v37, %v1573_v14  ;;  %vm860_vm9 = vcmp.ge.f32.partialorder %v856_v47, 0.0 }
 0x160   : > { %vm1585_vm8 = vcmp.ge.f32.partialorder %v1581_v29, 0.0  ;;  %v1589_v50 = vmul.f32 0.01, %v1581_v29  ;;  %v864_v53 = vmul.f32 0.01, %v856_v47  ;;  %v859_v2 = vadd.f32 %v4989_v37, %v848_v43 }
 0x161   : > { %v1595_v12 = vsel %vm1587_vm6, %v1583_v40, %v1591_v32  ;;  %v870_v56 = vsel %vm862_vm7, %v858_v18, %v866_v1  ;;  %vm1588_vm10 = vcmp.ge.f32.partialorder %v1584_v48, 0.0  ;;  %v1592_v5 = vmul.f32 0.01, %v1584_v48 }
 0x162   : > { %v1599_v58 = vpack.c.bf16 %v1595_v12, %v1595_v12  ;;  %v1593_v59 = vsel %vm1585_vm8, %v1581_v29, %v1589_v50  ;;  %v874_v60 = vpack.c.bf16 %v870_v56, %v870_v56  ;;  %v868_v62 = vsel %vm860_vm9, %v856_v47, %v864_v53 }
 0x163   : > { %v1597_v0 = vpack.c.bf16 %v1593_v59, %v1593_v59  ;;  %vm863_vm11 = vcmp.ge.f32.partialorder %v859_v2, 0.0  ;;  %v872_v3 = vpack.c.bf16 %v868_v62, %v868_v62  ;;  %v867_v4 = vmul.f32 0.01, %v859_v2 }
 0x164   : > { %3302 = vst [vmem:[%s5007_s28 + $0xc] sm:$0x3] %v1599_v58  ;;  %878 = vst [vmem:[%s5007_s28 + $0x4] sm:$0x3] %v874_v60  ;;  %v1582_v8 = vadd.f32 %v4989_v37, %v1571_v46  ;;  %v1596_v10 = vsel %vm1588_vm10, %v1584_v48, %v1592_v5  ;;  %v857_v52 = vadd.f32 %v4989_v37, %v846_v7 }
 0x165   : > { %3300 = vst [vmem:[%s5007_s28 + $0x8] sm:$0x3] %v1597_v0  ;;  %876 = vst [vmem:[%s5007_s28] sm:$0x3] %v872_v3  ;;  %v871_v9 = vsel %vm863_vm11, %v859_v2, %v867_v4  ;;  %v1600_v61 = vpack.c.bf16 %v1596_v10, %v1596_v10 }
 0x166   : > { %v875_v57 = vpack.c.bf16 %v871_v9, %v871_v9  ;;  %vm1586_vm12 = vcmp.ge.f32.partialorder %v1582_v8, 0.0  ;;  %v1590_v6 = vmul.f32 0.01, %v1582_v8  ;;  %vm861_vm13 = vcmp.ge.f32.partialorder %v857_v52, 0.0 }
 0x167   : > { %v865_v15 = vmul.f32 0.01, %v857_v52  ;;  %3303 = vst [vmem:[%s5007_s28 + $0xe] sm:$0x3] %v1600_v61 }
 0x168   : > { %879 = vst [vmem:[%s5007_s28 + $0x6] sm:$0x3] %v875_v57  ;;  %v1594_v16 = vsel %vm1586_vm12, %v1582_v8, %v1590_v6 }
 0x169   : > { %v869_v19 = vsel %vm861_vm13, %v857_v52, %v865_v15  ;;  %v1598_v20 = vpack.c.bf16 %v1594_v16, %v1594_v16 }
 0x16a   : > { %v873_v21 = vpack.c.bf16 %v869_v19, %v869_v19 }
 0x16b   : > { %3301 = vst [vmem:[%s5007_s28 + $0xa] sm:$0x3] %v1598_v20 }
 0x16c   : > { %877 = vst [vmem:[%s5007_s28 + $0x2] sm:$0x3] %v873_v21 }
 0x1d9   : > { %v3977_v55 = vpop.f32.mrb[4].mxu0 }
 0x1da   : > { %v4057_v54 = vpop.f32.mrb[4].mxu1  ;;  %v2252_v24 = vmul.f32 %v3977_v55, %v4984_v35  ;;  %v2224_v25 = vpop.f32.mrb[5].mxu0 }
 0x1db   : > { %v2975_v22 = vmul.f32 %v4057_v54, %v4984_v35  ;;  %v2947_v23 = vpop.f32.mrb[5].mxu1  ;;  %v2250_v63 = vmul.f32 %v4984_v35, %v2224_v25  ;;  %v3978_v31 = vpop.f32.mrb[6].mxu0 }
 0x1dc   : > { %v2973_v28 = vmul.f32 %v4984_v35, %v2947_v23  ;;  %v4058_v30 = vpop.f32.mrb[6].mxu1  ;;  %v2263_v36 = vadd.f32 %v4989_v37, %v2252_v24  ;;  %v2253_v45 = vmul.f32 %v3978_v31, %v4984_v35  ;;  %v2227_v49 = vpop.f32.mrb[7].mxu0 }
 0x1dd   : > { %v2986_v51 = vadd.f32 %v4989_v37, %v2975_v22  ;;  %v2976_v33 = vmul.f32 %v4058_v30, %v4984_v35  ;;  %v2950_v34 = vpop.f32.mrb[7].mxu1  ;;  %v2261_v27 = vadd.f32 %v4989_v37, %v2250_v63  ;;  %v2251_v1 = vmul.f32 %v4984_v35, %v2227_v49 }
 0x1de   : > { %v2984_v38 = vadd.f32 %v4989_v37, %v2973_v28  ;;  %v2974_v26 = vmul.f32 %v4984_v35, %v2950_v34  ;;  %vm2267_vm15 = vcmp.ge.f32.partialorder %v2263_v36, 0.0  ;;  %v2271_v13 = vmul.f32 0.01, %v2263_v36 }
 0x1df   : > { %vm2990_vm14 = vcmp.ge.f32.partialorder %v2986_v51, 0.0  ;;  %v2994_v39 = vmul.f32 0.01, %v2986_v51  ;;  %v2987_v11 = vadd.f32 %v4989_v37, %v2976_v33  ;;  %vm2265_vm1 = vcmp.ge.f32.partialorder %v2261_v27, 0.0 }
 0x1e0   : > { %vm2988_vm0 = vcmp.ge.f32.partialorder %v2984_v38, 0.0  ;;  %v2992_v40 = vmul.f32 0.01, %v2984_v38  ;;  %v2269_v42 = vmul.f32 0.01, %v2261_v27  ;;  %v2264_v14 = vadd.f32 %v4989_v37, %v2253_v45 }
 0x1e1   : > { %v2998_v41 = vsel %vm2990_vm14, %v2986_v51, %v2994_v39  ;;  %v2275_v17 = vsel %vm2267_vm15, %v2263_v36, %v2271_v13  ;;  %vm2991_vm2 = vcmp.ge.f32.partialorder %v2987_v11, 0.0  ;;  %v2995_v48 = vmul.f32 0.01, %v2987_v11 }
 0x1e2   : > { %v3002_v18 = vpack.c.bf16 %v2998_v41, %v2998_v41  ;;  %v2996_v29 = vsel %vm2988_vm0, %v2984_v38, %v2992_v40  ;;  %v2279_v43 = vpack.c.bf16 %v2275_v17, %v2275_v17  ;;  %v2273_v44 = vsel %vm2265_vm1, %v2261_v27, %v2269_v42 }
 0x1e3   : > { %v3000_v46 = vpack.c.bf16 %v2996_v29, %v2996_v29  ;;  %vm2268_vm3 = vcmp.ge.f32.partialorder %v2264_v14, 0.0  ;;  %v2277_v32 = vpack.c.bf16 %v2273_v44, %v2273_v44  ;;  %v2272_v47 = vmul.f32 0.01, %v2264_v14 }
 0x1e4   : > { %3574 = vst [vmem:[%s5007_s28 + $0x1c] sm:$0x3] %v3002_v18  ;;  %3432 = vst [vmem:[%s5007_s28 + $0x14] sm:$0x3] %v2279_v43  ;;  %v2985_v50 = vadd.f32 %v4989_v37, %v2974_v26  ;;  %v2999_v53 = vsel %vm2991_vm2, %v2987_v11, %v2995_v48  ;;  %v2262_v2 = vadd.f32 %v4989_v37, %v2251_v1 }
 0x1e5   : > { %3572 = vst [vmem:[%s5007_s28 + $0x18] sm:$0x3] %v3000_v46  ;;  %3430 = vst [vmem:[%s5007_s28 + $0x10] sm:$0x3] %v2277_v32  ;;  %v2276_v12 = vsel %vm2268_vm3, %v2264_v14, %v2272_v47  ;;  %v3003_v58 = vpack.c.bf16 %v2999_v53, %v2999_v53 }
 0x1e6   : > { %v2280_v56 = vpack.c.bf16 %v2276_v12, %v2276_v12  ;;  %vm2989_vm4 = vcmp.ge.f32.partialorder %v2985_v50, 0.0  ;;  %v2993_v59 = vmul.f32 0.01, %v2985_v50  ;;  %vm2266_vm5 = vcmp.ge.f32.partialorder %v2262_v2, 0.0 }
 0x1e7   : > { %v2270_v60 = vmul.f32 0.01, %v2262_v2  ;;  %3575 = vst [vmem:[%s5007_s28 + $0x1e] sm:$0x3] %v3003_v58 }
 0x1e8   : > { %3433 = vst [vmem:[%s5007_s28 + $0x16] sm:$0x3] %v2280_v56  ;;  %v2997_v35 = vsel %vm2989_vm4, %v2985_v50, %v2993_v59 }
 0x1e9   : > { %v2274_v62 = vsel %vm2266_vm5, %v2262_v2, %v2270_v60  ;;  %v3001_v0 = vpack.c.bf16 %v2997_v35, %v2997_v35 }
 0x1ea   : > { %v2278_v3 = vpack.c.bf16 %v2274_v62, %v2274_v62 }
 0x1eb   : > { %3573 = vst [vmem:[%s5007_s28 + $0x1a] sm:$0x3] %v3001_v0 }
 0x1ec   : > { %3431 = vst [vmem:[%s5007_s28 + $0x12] sm:$0x3] %v2278_v3 }
 0x1ed PF: > { %s14_s15 = sadd.s32 1, %s4258_s15  }
 0x1ee   : > { %p11_p4 = scmp.ge.s32.totalorder %s14_s15, 4  }
 0x1f0   :  { %13 = sbr.rel (!%p11_p4) target bundleno = 1 (0x1), region = 86 }

// kernel: _lambda_.11
= control target key start
LH: loop header
LB: loop body
LE: loop exit
PB: predicated region body
PF: predicated region fallthrough
CT: control target
= control target key end

     0   :  { %s909_s15 = smov 0   ;;  %s1080_s0 = inlined_call_operand.vmem [shape: bf16[2,16,16,128], index: 0, kind: input, shape index: {}]   ;;  %s1081_s1 = inlined_call_operand.vmem [shape: bf16[1,128,128], index: 1, kind: input, shape index: {}]   ;;  %s1082_s2 = inlined_call_operand.vmem [shape: f32[1,128], index: 2, kind: input, shape index: {}]   ;;  %s1083_s3 = inlined_call_operand.vmem [shape: f32[1,128], index: 3, kind: input, shape index: {}]   ;;  %s1084_s4 = inlined_call_operand.vmem [shape: f32[2,16,16,128], index: 4, kind: output, shape index: {}]  }
   0x1 LB: > { %s717_s16 = sadd.s32 4294967295, %s882_s15   ;;  %p721_p0 = scmp.ge.s32.totalorder %s882_s15, 1  ;;  %s882_s15 = sphi %s909_s15, %s14_s15  }
   0x2   : > { %p162_p1 = scmp.lt.s32.totalorder %s882_s15, 3 }
   0x4   : > { %p163_p2 = pnand %p721_p0, %p162_p1 }
   0x5   : > { %v852_v0 = vld [vmem:[%s1081_s1] sm:$0xff] (!%p163_p2)   ;;  %p188_p3 = scmp.lt.s32.totalorder (!%p163_p2), %s717_s16, 1  ;;  %v853_v1 = vld [vmem:[%s1081_s1 + $0x8] sm:$0xff] (!%p163_p2)   ;;  %v854_v2 = vld [vmem:[%s1081_s1 + $0x10] sm:$0xff] (!%p163_p2)  }
   0x6   : > { %166 = sbr.rel (%p163_p2) target bundleno = 282 (0x11a), region = 36  ;;  %780 = vmatprep.subr.bf16.mxu0 (!%p163_p2), %v852_v0  ;;  %828 = vmatprep.subr.bf16.mxu1 (!%p163_p2), %v852_v0  ;;  %v855_v3 = vld [vmem:[%s1081_s1 + $0x18] sm:$0xff] (!%p163_p2)   ;;  %v856_v6 = vld [vmem:[%s1081_s1 + $0x20] sm:$0xff] (!%p163_p2)   ;;  %v857_v7 = vld [vmem:[%s1081_s1 + $0x28] sm:$0xff] (!%p163_p2)  }
   0x7   : > { %781 = vmatpush3.bf16.msra.mxu0 (!%p163_p2), %v852_v0  ;;  %836 = vmatpush3.bf16.msra.mxu1 (!%p163_p2), %v852_v0  ;;  %v858_v8 = vld [vmem:[%s1081_s1 + $0x30] sm:$0xff] (!%p163_p2)   ;;  %v859_v9 = vld [vmem:[%s1081_s1 + $0x38] sm:$0xff] (!%p163_p2)   ;;  %v968_v24 = vld [vmem:[%s1082_s2] ss:$0 sm:$0xff] (!%p163_p2) }
   0x8   : > { %782 = vmatprep.subr.bf16.mxu0 (!%p163_p2), %v853_v1  ;;  %829 = vmatprep.subr.bf16.mxu1 (!%p163_p2), %v853_v1  ;;  %v974_v26 = vld [vmem:[%s1083_s3] ss:$0 sm:$0xff] (!%p163_p2) }
   0xb   : > { %783 = vmatpush3.bf16.msra.mxu0 (!%p163_p2), %v853_v1  ;;  %837 = vmatpush3.bf16.msra.mxu1 (!%p163_p2), %v853_v1 }
   0xc   : > { %784 = vmatprep.subr.bf16.mxu0 (!%p163_p2), %v854_v2  ;;  %830 = vmatprep.subr.bf16.mxu1 (!%p163_p2), %v854_v2 }
   0xd   : > { %s1086_s16 = smov (!%p188_p3, %s717_s16), 1 }
   0xe   : > { %s754_s23 = sshll.u32 %s1086_s16, 7  ;;  %s755_s13 = sshll.u32 %s1086_s16, 8 }
   0xf   : > { %s932_s26 = scalar_lea.vmem %s1080_s0, %s754_s23  ;;  %785 = vmatpush3.bf16.msra.mxu0 %v854_v2  ;;  %838 = vmatpush3.bf16.msra.mxu1 %v854_v2  ;;  %s981_s20 = scalar_lea.vmem %s1084_s4, %s755_s13 }
  0x10   : > { %v860_v4 = vld [vmem:[%s932_s26] sm:$0xff]   ;;  %786 = vmatprep.subr.bf16.mxu0 %v855_v3  ;;  %831 = vmatprep.subr.bf16.mxu1 %v855_v3  ;;  %v862_v10 = vld [vmem:[%s932_s26 + $0x8] sm:$0xff]   ;;  %v864_v12 = vld [vmem:[%s932_s26 + $0x10] sm:$0xff]  }
  0x11   : > { %v861_v5 = vld [vmem:[%s932_s26 + $0x40] sm:$0xff]   ;;  %796 = vmatprep.mubr.bf16.mxu0 %v860_v4  ;;  %v863_v11 = vld [vmem:[%s932_s26 + $0x48] sm:$0xff]   ;;  %v865_v13 = vld [vmem:[%s932_s26 + $0x50] sm:$0xff]  }
  0x12   : > { %812 = vmatprep.mubr.bf16.mxu1 %v861_v5  ;;  %v866_v14 = vld [vmem:[%s932_s26 + $0x18] sm:$0xff]   ;;  %v868_v16 = vld [vmem:[%s932_s26 + $0x20] sm:$0xff]   ;;  %v870_v18 = vld [vmem:[%s932_s26 + $0x28] sm:$0xff]  }
  0x13   : > { %787 = vmatpush3.bf16.msra.mxu0 %v855_v3  ;;  %839 = vmatpush3.bf16.msra.mxu1 %v855_v3  ;;  %v867_v15 = vld [vmem:[%s932_s26 + $0x58] sm:$0xff]   ;;  %v869_v17 = vld [vmem:[%s932_s26 + $0x60] sm:$0xff]   ;;  %v871_v19 = vld [vmem:[%s932_s26 + $0x68] sm:$0xff]  }
  0x14   : > { %788 = vmatprep.subr.bf16.mxu0 %v856_v6  ;;  %832 = vmatprep.subr.bf16.mxu1 %v856_v6  ;;  %v872_v20 = vld [vmem:[%s932_s26 + $0x30] sm:$0xff]   ;;  %v874_v22 = vld [vmem:[%s932_s26 + $0x38] sm:$0xff]  }
  0x15   : > { %v873_v21 = vld [vmem:[%s932_s26 + $0x70] sm:$0xff]   ;;  %v875_v23 = vld [vmem:[%s932_s26 + $0x78] sm:$0xff]  }
  0x17   : > { %789 = vmatpush3.bf16.msra.mxu0 %v856_v6  ;;  %840 = vmatpush3.bf16.msra.mxu1 %v856_v6 }
  0x18   : > { %790 = vmatprep.subr.bf16.mxu0 %v857_v7  ;;  %833 = vmatprep.subr.bf16.mxu1 %v857_v7 }
  0x1b   : > { %791 = vmatpush3.bf16.msra.mxu0 %v857_v7  ;;  %841 = vmatpush3.bf16.msra.mxu1 %v857_v7 }
  0x1c   : > { %792 = vmatprep.subr.bf16.mxu0 %v858_v8  ;;  %834 = vmatprep.subr.bf16.mxu1 %v858_v8 }
  0x1f   : > { %793 = vmatpush3.bf16.msra.mxu0 %v858_v8  ;;  %842 = vmatpush3.bf16.msra.mxu1 %v858_v8 }
  0x20   : > { %794 = vmatprep.subr.bf16.mxu0 %v859_v9  ;;  %835 = vmatprep.subr.bf16.mxu1 %v859_v9 }
  0x23   : > { %795 = vmatpush3.bf16.msra.mxu0 %v859_v9  ;;  %843 = vmatpush3.bf16.msra.mxu1 %v859_v9 }
  0x26   : > { %797 = vmatmul.mubr.bf16.vlgmr.msra.gmra.mrb[0].mxu0 %v862_v10  ;;  %813 = vmatmul.mubr.bf16.vlgmr.msra.gmra.mrb[0].mxu1 %v863_v11 }
  0x27   : > { %800 = vmatprep.mubr.bf16.mxu0 %v864_v12  ;;  %816 = vmatprep.mubr.bf16.mxu1 %v865_v13 }
  0x2e   : > { %801 = vmatmul.mubr.bf16.gmra.mrb[4].mxu0 %v866_v14  ;;  %817 = vmatmul.mubr.bf16.gmra.mrb[4].mxu1 %v867_v15 }
  0x2f   : > { %804 = vmatprep.mubr.bf16.mxu0 %v868_v16  ;;  %820 = vmatprep.mubr.bf16.mxu1 %v869_v17 }
  0x36   : > { %805 = vmatmul.mubr.bf16.gmra.mrb[8].mxu0 %v870_v18  ;;  %821 = vmatmul.mubr.bf16.gmra.mrb[8].mxu1 %v871_v19 }
  0x37   : > { %808 = vmatprep.mubr.bf16.mxu0 %v872_v20  ;;  %824 = vmatprep.mubr.bf16.mxu1 %v873_v21 }
  0x3e   : > { %809 = vmatmul.mubr.bf16.gmra.mrb[12].mxu0 %v874_v22  ;;  %825 = vmatmul.mubr.bf16.gmra.mrb[12].mxu1 %v875_v23 }
  0xf9   : > { %v798_v25 = vpop.f32.mrb[0].mxu0  ;;  %v814_v27 = vpop.f32.mrb[0].mxu1 }
  0xfa   : > { %v561_v28 = vmul.f32 %v798_v25, %v968_v24  ;;  %v577_v29 = vmul.f32 %v814_v27, %v968_v24  ;;  %v425_v30 = vpop.f32.mrb[1].mxu0  ;;  %v489_v31 = vpop.f32.mrb[1].mxu1 }
  0xfb   : > { %v559_v32 = vmul.f32 %v968_v24, %v425_v30  ;;  %v575_v33 = vmul.f32 %v968_v24, %v489_v31  ;;  %v799_v34 = vpop.f32.mrb[2].mxu0  ;;  %v815_v35 = vpop.f32.mrb[2].mxu1 }
  0xfc   : > { %v600_v36 = vadd.f32 %v974_v26, %v561_v28  ;;  %v616_v37 = vadd.f32 %v974_v26, %v577_v29  ;;  %v562_v38 = vmul.f32 %v799_v34, %v968_v24  ;;  %v578_v39 = vmul.f32 %v815_v35, %v968_v24  ;;  %v428_v40 = vpop.f32.mrb[3].mxu0  ;;  %v492_v41 = vpop.f32.mrb[3].mxu1 }
  0xfd   : > { %v598_v42 = vadd.f32 %v974_v26, %v559_v32  ;;  %v614_v43 = vadd.f32 %v974_v26, %v575_v33  ;;  %v560_v44 = vmul.f32 %v968_v24, %v428_v40  ;;  %v576_v45 = vmul.f32 %v968_v24, %v492_v41 }
  0xfe   : > { %632 = vst [vmem:[%s981_s20 + $0x10] sm:$0xff] %v600_v36  ;;  %648 = vst [vmem:[%s981_s20 + $0x90] sm:$0xff] %v616_v37  ;;  %v601_v46 = vadd.f32 %v974_v26, %v562_v38  ;;  %v617_v47 = vadd.f32 %v974_v26, %v578_v39 }
  0xff   : > { %630 = vst [vmem:[%s981_s20] sm:$0xff] %v598_v42  ;;  %646 = vst [vmem:[%s981_s20 + $0x80] sm:$0xff] %v614_v43  ;;  %v599_v48 = vadd.f32 %v974_v26, %v560_v44  ;;  %v615_v49 = vadd.f32 %v974_v26, %v576_v45 }
 0x100   : > { %633 = vst [vmem:[%s981_s20 + $0x18] sm:$0xff] %v601_v46  ;;  %649 = vst [vmem:[%s981_s20 + $0x98] sm:$0xff] %v617_v47 }
 0x101   : > { %631 = vst [vmem:[%s981_s20 + $0x8] sm:$0xff] %v599_v48  ;;  %647 = vst [vmem:[%s981_s20 + $0x88] sm:$0xff] %v615_v49  ;;  %v802_v50 = vpop.f32.mrb[4].mxu0  ;;  %v818_v51 = vpop.f32.mrb[4].mxu1 }
 0x102   : > { %v565_v52 = vmul.f32 %v802_v50, %v968_v24  ;;  %v581_v53 = vmul.f32 %v818_v51, %v968_v24  ;;  %v441_v54 = vpop.f32.mrb[5].mxu0  ;;  %v505_v55 = vpop.f32.mrb[5].mxu1 }
 0x103   : > { %v563_v56 = vmul.f32 %v968_v24, %v441_v54  ;;  %v579_v57 = vmul.f32 %v968_v24, %v505_v55  ;;  %v803_v58 = vpop.f32.mrb[6].mxu0  ;;  %v819_v59 = vpop.f32.mrb[6].mxu1 }
 0x104   : > { %v604_v60 = vadd.f32 %v974_v26, %v565_v52  ;;  %v620_v61 = vadd.f32 %v974_v26, %v581_v53  ;;  %v566_v62 = vmul.f32 %v803_v58, %v968_v24  ;;  %v582_v63 = vmul.f32 %v819_v59, %v968_v24  ;;  %v444_v0 = vpop.f32.mrb[7].mxu0  ;;  %v508_v1 = vpop.f32.mrb[7].mxu1 }
 0x105   : > { %v602_v2 = vadd.f32 %v974_v26, %v563_v56  ;;  %v618_v3 = vadd.f32 %v974_v26, %v579_v57  ;;  %v564_v4 = vmul.f32 %v968_v24, %v444_v0  ;;  %v580_v5 = vmul.f32 %v968_v24, %v508_v1 }
 0x106   : > { %636 = vst [vmem:[%s981_s20 + $0x30] sm:$0xff] %v604_v60  ;;  %652 = vst [vmem:[%s981_s20 + $0xb0] sm:$0xff] %v620_v61  ;;  %v605_v6 = vadd.f32 %v974_v26, %v566_v62  ;;  %v621_v7 = vadd.f32 %v974_v26, %v582_v63 }
 0x107   : > { %634 = vst [vmem:[%s981_s20 + $0x20] sm:$0xff] %v602_v2  ;;  %650 = vst [vmem:[%s981_s20 + $0xa0] sm:$0xff] %v618_v3  ;;  %v603_v8 = vadd.f32 %v974_v26, %v564_v4  ;;  %v619_v9 = vadd.f32 %v974_v26, %v580_v5 }
 0x108   : > { %637 = vst [vmem:[%s981_s20 + $0x38] sm:$0xff] %v605_v6  ;;  %653 = vst [vmem:[%s981_s20 + $0xb8] sm:$0xff] %v621_v7 }
 0x109   : > { %635 = vst [vmem:[%s981_s20 + $0x28] sm:$0xff] %v603_v8  ;;  %651 = vst [vmem:[%s981_s20 + $0xa8] sm:$0xff] %v619_v9  ;;  %v806_v10 = vpop.f32.mrb[8].mxu0  ;;  %v822_v11 = vpop.f32.mrb[8].mxu1 }
 0x10a   : > { %v569_v12 = vmul.f32 %v806_v10, %v968_v24  ;;  %v585_v13 = vmul.f32 %v822_v11, %v968_v24  ;;  %v457_v14 = vpop.f32.mrb[9].mxu0  ;;  %v521_v15 = vpop.f32.mrb[9].mxu1 }
 0x10b   : > { %v567_v16 = vmul.f32 %v968_v24, %v457_v14  ;;  %v583_v17 = vmul.f32 %v968_v24, %v521_v15  ;;  %v807_v18 = vpop.f32.mrb[10].mxu0  ;;  %v823_v19 = vpop.f32.mrb[10].mxu1 }
 0x10c   : > { %v608_v20 = vadd.f32 %v974_v26, %v569_v12  ;;  %v624_v21 = vadd.f32 %v974_v26, %v585_v13  ;;  %v570_v22 = vmul.f32 %v807_v18, %v968_v24  ;;  %v586_v23 = vmul.f32 %v823_v19, %v968_v24  ;;  %v460_v25 = vpop.f32.mrb[11].mxu0  ;;  %v524_v27 = vpop.f32.mrb[11].mxu1 }
 0x10d   : > { %v606_v28 = vadd.f32 %v974_v26, %v567_v16  ;;  %v622_v29 = vadd.f32 %v974_v26, %v583_v17  ;;  %v568_v30 = vmul.f32 %v968_v24, %v460_v25  ;;  %v584_v31 = vmul.f32 %v968_v24, %v524_v27 }
 0x10e   : > { %640 = vst [vmem:[%s981_s20 + $0x50] sm:$0xff] %v608_v20  ;;  %656 = vst [vmem:[%s981_s20 + $0xd0] sm:$0xff] %v624_v21  ;;  %v609_v32 = vadd.f32 %v974_v26, %v570_v22  ;;  %v625_v33 = vadd.f32 %v974_v26, %v586_v23 }
 0x10f   : > { %638 = vst [vmem:[%s981_s20 + $0x40] sm:$0xff] %v606_v28  ;;  %654 = vst [vmem:[%s981_s20 + $0xc0] sm:$0xff] %v622_v29  ;;  %v607_v34 = vadd.f32 %v974_v26, %v568_v30  ;;  %v623_v35 = vadd.f32 %v974_v26, %v584_v31 }
 0x110   : > { %641 = vst [vmem:[%s981_s20 + $0x58] sm:$0xff] %v609_v32  ;;  %657 = vst [vmem:[%s981_s20 + $0xd8] sm:$0xff] %v625_v33 }
 0x111   : > { %639 = vst [vmem:[%s981_s20 + $0x48] sm:$0xff] %v607_v34  ;;  %655 = vst [vmem:[%s981_s20 + $0xc8] sm:$0xff] %v623_v35  ;;  %v810_v36 = vpop.f32.mrb[12].mxu0  ;;  %v826_v37 = vpop.f32.mrb[12].mxu1 }
 0x112   : > { %v573_v38 = vmul.f32 %v810_v36, %v968_v24  ;;  %v589_v39 = vmul.f32 %v826_v37, %v968_v24  ;;  %v473_v40 = vpop.f32.mrb[13].mxu0  ;;  %v537_v41 = vpop.f32.mrb[13].mxu1 }
 0x113   : > { %v571_v42 = vmul.f32 %v968_v24, %v473_v40  ;;  %v587_v43 = vmul.f32 %v968_v24, %v537_v41  ;;  %v811_v44 = vpop.f32.mrb[14].mxu0  ;;  %v827_v45 = vpop.f32.mrb[14].mxu1 }
 0x114   : > { %v612_v46 = vadd.f32 %v974_v26, %v573_v38  ;;  %v628_v47 = vadd.f32 %v974_v26, %v589_v39  ;;  %v574_v48 = vmul.f32 %v811_v44, %v968_v24  ;;  %v590_v49 = vmul.f32 %v827_v45, %v968_v24  ;;  %v476_v50 = vpop.f32.mrb[15].mxu0  ;;  %v540_v51 = vpop.f32.mrb[15].mxu1 }
 0x115   : > { %v610_v52 = vadd.f32 %v974_v26, %v571_v42  ;;  %v626_v53 = vadd.f32 %v974_v26, %v587_v43  ;;  %v572_v54 = vmul.f32 %v968_v24, %v476_v50  ;;  %v588_v55 = vmul.f32 %v968_v24, %v540_v51 }
 0x116   : > { %644 = vst [vmem:[%s981_s20 + $0x70] sm:$0xff] %v612_v46  ;;  %660 = vst [vmem:[%s981_s20 + $0xf0] sm:$0xff] %v628_v47  ;;  %v613_v56 = vadd.f32 %v974_v26, %v574_v48  ;;  %v629_v57 = vadd.f32 %v974_v26, %v590_v49 }
 0x117   : > { %642 = vst [vmem:[%s981_s20 + $0x60] sm:$0xff] %v610_v52  ;;  %658 = vst [vmem:[%s981_s20 + $0xe0] sm:$0xff] %v626_v53  ;;  %v611_v58 = vadd.f32 %v974_v26, %v572_v54  ;;  %v627_v59 = vadd.f32 %v974_v26, %v588_v55 }
 0x118   : > { %645 = vst [vmem:[%s981_s20 + $0x78] sm:$0xff] %v613_v56  ;;  %661 = vst [vmem:[%s981_s20 + $0xf8] sm:$0xff] %v629_v57 }
 0x119   : > { %643 = vst [vmem:[%s981_s20 + $0x68] sm:$0xff] %v611_v58  ;;  %659 = vst [vmem:[%s981_s20 + $0xe8] sm:$0xff] %v627_v59 }
 0x11a PF: > { %s14_s15 = sadd.s32 1, %s882_s15  }
 0x11b   : > { %p11_p4 = scmp.ge.s32.totalorder %s14_s15, 4  }
 0x11d   :  { %13 = sbr.rel (!%p11_p4) target bundleno = 1 (0x1), region = 66 }

// kernel: _lambda_.9
= control target key start
LH: loop header
LB: loop body
LE: loop exit
PB: predicated region body
PF: predicated region fallthrough
CT: control target
= control target key end

     0   :  { %s5836_s15 = smov 0   ;;  %s6963_s0 = inlined_call_operand.vmem [shape: bf16[2,10,10,128], index: 0, kind: input, shape index: {}]   ;;  %s6964_s1 = inlined_call_operand.vmem [shape: bf16[16,128,128], index: 1, kind: input, shape index: {}]   ;;  %s6965_s2 = inlined_call_operand.vmem [shape: f32[1,128], index: 2, kind: input, shape index: {}]   ;;  %s6966_s3 = inlined_call_operand.vmem [shape: f32[1,128], index: 3, kind: input, shape index: {}]   ;;  %s6967_s4 = inlined_call_operand.vmem [shape: bf16[2,4,8,8,128], index: 4, kind: output, shape index: {}]  }
   0x1 LB: > { %s4240_s16 = sadd.s32 4294967295, %s5809_s15   ;;  %p4244_p0 = scmp.ge.s32.totalorder %s5809_s15, 1  ;;  %s5809_s15 = sphi %s5836_s15, %s14_s15  }
   0x2   : > { %p162_p1 = scmp.lt.s32.totalorder %s5809_s15, 3 }
   0x4   : > { %p163_p2 = pnand %p4244_p0, %p162_p1 }
   0x5   : > { %v5659_v0 = vld [vmem:[%s6964_s1 + $0x40] sm:$0xff] (!%p163_p2)   ;;  %p188_p3 = scmp.lt.s32.totalorder (!%p163_p2), %s4240_s16, 1  ;;  %v5661_v2 = vld [vmem:[%s6964_s1 + $0x48] sm:$0xff] (!%p163_p2)   ;;  %v5663_v4 = vld [vmem:[%s6964_s1 + $0x50] sm:$0xff] (!%p163_p2)   ;;  %vm1321_vm0 = vcmask (!%p163_p2), 1042432   ;;  %vm1322_vm2 = vcmask (!%p163_p2), 1046532  }
   0x6   : > { %166 = sbr.rel (%p163_p2) target bundleno = 501 (0x1f5), region = 36  ;;  %v5660_v1 = vld [vmem:[%s6964_s1 + $0x140] sm:$0xff] (!%p163_p2)   ;;  %5170 = vmatprep.subr.bf16.mxu0 (!%p163_p2), %v5659_v0  ;;  %v5662_v3 = vld [vmem:[%s6964_s1 + $0x148] sm:$0xff] (!%p163_p2)   ;;  %v5664_v5 = vld [vmem:[%s6964_s1 + $0x150] sm:$0xff] (!%p163_p2)   ;;  %vm231_vm1 = vsmask.f32 (!%p163_p2), 3328 }
   0x7   : > { %5266 = vmatprep.subr.bf16.mxu1 (!%p163_p2), %v5660_v1  ;;  %5171 = vmatpush3.bf16.msra.mxu0 (!%p163_p2), %v5659_v0  ;;  %v5665_v6 = vld [vmem:[%s6964_s1 + $0x58] sm:$0xff] (!%p163_p2)   ;;  %v5667_v8 = vld [vmem:[%s6964_s1 + $0x60] sm:$0xff] (!%p163_p2)   ;;  %v5669_v10 = vld [vmem:[%s6964_s1 + $0x68] sm:$0xff] (!%p163_p2)   ;;  %vm232_vm3 = vsmask.f32 (!%p163_p2), 7440 }
   0x8   : > { %5267 = vmatpush3.bf16.msra.mxu1 (!%p163_p2), %v5660_v1  ;;  %5172 = vmatprep.subr.bf16.mxu0 (!%p163_p2), %v5661_v2  ;;  %v5666_v7 = vld [vmem:[%s6964_s1 + $0x158] sm:$0xff] (!%p163_p2)   ;;  %v5668_v9 = vld [vmem:[%s6964_s1 + $0x160] sm:$0xff] (!%p163_p2)   ;;  %v5670_v14 = vld [vmem:[%s6964_s1 + $0x168] sm:$0xff] (!%p163_p2)  }
   0x9   : > { %5268 = vmatprep.subr.bf16.mxu1 (!%p163_p2), %v5662_v3  ;;  %v5671_v22 = vld [vmem:[%s6964_s1 + $0x70] sm:$0xff] (!%p163_p2)   ;;  %vm5917_vm4 = vmor (!%p163_p2), %vm1321_vm0, %vm1322_vm2  ;;  %v5673_v37 = vld [vmem:[%s6964_s1 + $0x78] sm:$0xff] (!%p163_p2)  }
   0xa   : > { %v5672_v27 = vld [vmem:[%s6964_s1 + $0x170] sm:$0xff] (!%p163_p2)   ;;  %vm5927_vm5 = vmor (!%p163_p2), %vm231_vm1, %vm232_vm3  ;;  %v5674_v43 = vld [vmem:[%s6964_s1 + $0x178] sm:$0xff] (!%p163_p2)  }
   0xb   : > { %5173 = vmatpush3.bf16.msra.mxu0 (!%p163_p2), %v5661_v2  ;;  %v5675_v58 = vld [vmem:[%s6964_s1] sm:$0xff] (!%p163_p2)  }
   0xc   : > { %5269 = vmatpush3.bf16.msra.mxu1 (!%p163_p2), %v5662_v3  ;;  %5174 = vmatprep.subr.bf16.mxu0 (!%p163_p2), %v5663_v4  ;;  %v5676_v1 = vld [vmem:[%s6964_s1 + $0x100] sm:$0xff] (!%p163_p2)  }
   0xd   : > { %s6973_s16 = smov (!%p188_p3, %s4240_s16), 1  ;;  %5270 = vmatprep.subr.bf16.mxu1 %v5664_v5  ;;  %v6867_v35 = vld [vmem:[%s6966_s3] ss:$0 sm:$0xff] }
   0xe   : > { %s5650_s7 = smul.u32 80, %s6973_s16  ;;  %s4882_s26 = sshll.u32 %s6973_s16, 7 }
   0xf   : > { %5175 = vmatpush3.bf16.msra.mxu0 %v5663_v4  ;;  %s6888_s29 = scalar_lea.vmem %s6967_s4, %s4882_s26 }
  0x10   : > { %5271 = vmatpush3.bf16.msra.mxu1 %v5664_v5  ;;  %5176 = vmatprep.subr.bf16.mxu0 %v5665_v6  ;;  %s5880_s14 = scalar_lea.vmem %s6963_s0, %s5650_s7 }
  0x11   : > { %5272 = vmatprep.subr.bf16.mxu1 %v5666_v7  ;;  %v5886_v11 = vld [vmem:[%s5880_s14] sm:$0xf]  ;;  %v5889_v12 = vld [vmem:[%s5880_s14 + $0x8] sm:$0xf]  ;;  %v223_v13 = vld [vmem:[%s5880_s14 + $0x4] sm:$0x1] }
  0x12   : > { %v224_v15 = vld [vmem:[%s5880_s14 + $0xc] sm:$0x1]  ;;  %v235_v16 = vshrl.u32 %v5886_v11, 16  ;;  %v238_v17 = vshll.u32 %v5886_v11, 16  ;;  %v244_v18 = vshll.u32 %v223_v13, 16  ;;  %v249_v19 = vshrl.u32 %v5889_v12, 16 }
  0x13   : > { %5177 = vmatpush3.bf16.msra.mxu0 %v5665_v6  ;;  %v252_v20 = vshll.u32 %v5889_v12, 16  ;;  %v258_v21 = vshll.u32 %v224_v15, 16  ;;  %v5904_v26 = vld [vmem:[%s5880_s14 + $0x4] sm:$0x1]  ;;  %v5910_v29 = vld [vmem:[%s5880_s14 + $0xc] sm:$0x1] }
  0x14   : > { %5273 = vmatpush3.bf16.msra.mxu1 %v5666_v7  ;;  %5178 = vmatprep.subr.bf16.mxu0 %v5667_v8  ;;  %v237_v23 = vrot.slane %v235_v16, 4  ;;  %v240_v24 = vrot.slane %v238_v17, 5  ;;  %v251_v25 = vrot.slane %v249_v19, 4  ;;  %v1326_v30 = vrot.slane %v5904_v26, 5  ;;  %v1297_v33 = vld [vmem:[%s5880_s14] sm:$0xe] }
  0x15   : > { %5274 = vmatprep.subr.bf16.mxu1 %v5668_v9  ;;  %v254_v28 = vrot.slane %v252_v20, 5  ;;  %v246_v32 = vrot.slane %v244_v18, 5  ;;  %v1298_v34 = vld [vmem:[%s5880_s14 + $0x8] sm:$0xe]  ;;  %v1330_v36 = vrot.slane %v5910_v29, 5  ;;  %v260_v40 = vrot.slane %v258_v21, 5 }
  0x16   : > { %v241_v31 = vor.u32 %v240_v24, %v237_v23  ;;  %v4386_v41 = vrot.slane %v1297_v33, 9  ;;  %v4387_v42 = vrot.slane %v1298_v34, 9  ;;  %v5935_v45 = vld [vmem:[%s5880_s14 + $0x10] sm:$0xf]  ;;  %v5942_v49 = vld [vmem:[%s5880_s14 + $0x18] sm:$0xf] }
  0x17   : > { %5179 = vmatpush3.bf16.msra.mxu0 %v5667_v8  ;;  %v255_v39 = vor.u32 %v254_v28, %v251_v25  ;;  %v225_v50 = vld [vmem:[%s5880_s14 + $0x14] sm:$0x1]  ;;  %v263_v51 = vshrl.u32 %v5935_v45, 16  ;;  %v226_v54 = vld [vmem:[%s5880_s14 + $0x1c] sm:$0x1]  ;;  %v266_v55 = vshll.u32 %v5935_v45, 16 }
  0x18   : > { %5275 = vmatpush3.bf16.msra.mxu1 %v5668_v9  ;;  %5180 = vmatprep.subr.bf16.mxu0 %v5669_v10  ;;  %v242_v44 = vrot.slane %v241_v31, 4  ;;  %v1327_v47 = vsel %vm5917_vm4, %v4386_v41, %v1326_v30  ;;  %v1331_v48 = vsel %vm5917_vm4, %v4387_v42, %v1330_v36  ;;  %v272_v56 = vshll.u32 %v225_v50, 16  ;;  %v1157_v62 = vld [vmem:[%s5880_s14 + $0x14] sm:$0x1]  ;;  %v1299_v4 = vld [vmem:[%s5880_s14 + $0x10] sm:$0xe] }
  0x19   : > { %5276 = vmatprep.subr.bf16.mxu1 %v5670_v14  ;;  %v256_v46 = vrot.slane %v255_v39, 4  ;;  %v4410_v53 = vcombine.low %v1327_v47, %v1331_v48  ;;  %v265_v59 = vrot.slane %v263_v51, 4  ;;  %v277_v60 = vshrl.u32 %v5942_v49, 16  ;;  %v5964_v7 = vld [vmem:[%s5880_s14 + $0x1c] sm:$0x1]  ;;  %v5678_v24 = vld [vmem:[%s6964_s1 + $0x108] sm:$0xff]  }
  0x1a   : > { %v247_v52 = vsel %vm5927_vm5, %v242_v44, %v246_v32  ;;  %v280_v61 = vshll.u32 %v5942_v49, 16  ;;  %v1178_v0 = vshll.u32 %v5904_v26, 16  ;;  %v268_v2 = vrot.slane %v266_v55, 5  ;;  %v1300_v8 = vld [vmem:[%s5880_s14 + $0x18] sm:$0xe]  ;;  %v5677_v30 = vld [vmem:[%s6964_s1 + $0x8] sm:$0xff]  }
  0x1b   : > { %5181 = vmatpush3.bf16.msra.mxu0 %v5669_v10  ;;  %v261_v57 = vsel %vm5927_vm5, %v256_v46, %v260_v40  ;;  %v286_v3 = vshll.u32 %v226_v54, 16  ;;  %5282 = vmatprep.mubr.bf16.mxu1 %v4410_v53  ;;  %v279_v5 = vrot.slane %v277_v60, 4  ;;  %v274_v10 = vrot.slane %v272_v56, 5  ;;  %v5679_v34 = vld [vmem:[%s6964_s1 + $0x10] sm:$0xff]   ;;  %v5997_v39 = vld [vmem:[%s5880_s14 + $0x20] sm:$0xf] }
  0x1c   : > { %5277 = vmatpush3.bf16.msra.mxu1 %v5670_v14  ;;  %5182 = vmatprep.subr.bf16.mxu0 %v5671_v22  ;;  %v4264_v63 = vcombine.low %v247_v52, %v261_v57  ;;  %v282_v6 = vrot.slane %v280_v61, 5  ;;  %v269_v9 = vor.u32 %v268_v2, %v265_v59  ;;  %v4388_v13 = vrot.slane %v1299_v4, 9  ;;  %v6000_v40 = vld [vmem:[%s5880_s14 + $0x28] sm:$0xf]  ;;  %v227_v41 = vld [vmem:[%s5880_s14 + $0x24] sm:$0x1] }
  0x1d   : > { %5278 = vmatprep.subr.bf16.mxu1 %v5672_v27  ;;  %v1334_v14 = vrot.slane %v1157_v62, 5  ;;  %v1192_v15 = vshll.u32 %v5910_v29, 16  ;;  %v288_v17 = vrot.slane %v286_v3, 5  ;;  %v4389_v18 = vrot.slane %v1300_v8, 9  ;;  %v228_v42 = vld [vmem:[%s5880_s14 + $0x2c] sm:$0x1] }
  0x1e   : > { %5186 = vmatprep.mubr.bf16.mxu0 %v4264_v63  ;;  %v283_v16 = vor.u32 %v282_v6, %v279_v5  ;;  %v270_v19 = vrot.slane %v269_v9, 4  ;;  %v1338_v21 = vrot.slane %v5964_v7, 5  ;;  %v1206_v23 = vshll.u32 %v1157_v62, 16  ;;  %v5681_v51 = vld [vmem:[%s6964_s1 + $0x18] sm:$0xff]   ;;  %v6015_v59 = vld [vmem:[%s5880_s14 + $0x24] sm:$0x1] }
  0x1f   : > { %5183 = vmatpush3.bf16.msra.mxu0 %v5671_v22  ;;  %v1335_v20 = vsel %vm5917_vm4, %v4388_v13, %v1334_v14  ;;  %v5983_v31 = vrot.slane %v1178_v0, 5  ;;  %v5985_v32 = vrot.slane %v1192_v15, 5  ;;  %v1220_v33 = vshll.u32 %v5964_v7, 16  ;;  %v5682_v52 = vld [vmem:[%s6964_s1 + $0x118] sm:$0xff]   ;;  %v6018_v60 = vld [vmem:[%s5880_s14 + $0x2c] sm:$0x1] }
  0x20   : > { %5279 = vmatpush3.bf16.msra.mxu1 %v5672_v27  ;;  %5184 = vmatprep.subr.bf16.mxu0 %v5673_v37  ;;  %v284_v22 = vrot.slane %v283_v16, 4  ;;  %v275_v25 = vsel %vm5927_vm5, %v270_v19, %v274_v10  ;;  %v1339_v26 = vsel %vm5917_vm4, %v4389_v18, %v1338_v21  ;;  %v5991_v36 = vrot.slane %v1206_v23, 5  ;;  %v1301_v62 = vld [vmem:[%s5880_s14 + $0x20] sm:$0xe]  ;;  %v1302_v63 = vld [vmem:[%s5880_s14 + $0x28] sm:$0xe] }
  0x21   : > { %5280 = vmatprep.subr.bf16.mxu1 %v5674_v43  ;;  %v4411_v28 = vcombine.low %v1335_v20, %v1339_v26  ;;  %v294_v44 = vshll.u32 %v5997_v39, 16  ;;  %v300_v46 = vshll.u32 %v227_v41, 16  ;;  %v305_v47 = vshrl.u32 %v6000_v40, 16  ;;  %v5683_v2 = vld [vmem:[%s6964_s1 + $0x20] sm:$0xff]   ;;  %v6031_v9 = vld [vmem:[%s5880_s14 + $0x30] sm:$0xf] }
  0x22   : > { %v289_v27 = vsel %vm5927_vm5, %v284_v22, %v288_v17  ;;  %v308_v48 = vshll.u32 %v6000_v40, 16  ;;  %v314_v50 = vshll.u32 %v228_v42, 16  ;;  %v1342_v0 = vrot.slane %v6015_v59, 5  ;;  %v5684_v6 = vld [vmem:[%s6964_s1 + $0x120] sm:$0xff]   ;;  %v6034_v10 = vld [vmem:[%s5880_s14 + $0x38] sm:$0xf] }
  0x23   : > { %5185 = vmatpush3.bf16.msra.mxu0 %v5673_v37  ;;  %v4265_v29 = vcombine.low %v275_v25, %v289_v27  ;;  %v5680_v37 = vld [vmem:[%s6964_s1 + $0x110] sm:$0xff]   ;;  %v296_v54 = vrot.slane %v294_v44, 5  ;;  %v302_v55 = vrot.slane %v300_v46, 5  ;;  %v307_v56 = vrot.slane %v305_v47, 4  ;;  %v230_v17 = vld [vmem:[%s5880_s14 + $0x3c] sm:$0x1] }
  0x24   : > { %5281 = vmatpush3.bf16.msra.mxu1 %v5674_v43  ;;  %5194 = vmatprep.subr.bf16.mxu0 %v5675_v58  ;;  %v291_v43 = vshrl.u32 %v5997_v39, 16  ;;  %v310_v57 = vrot.slane %v308_v48, 5  ;;  %v4390_v4 = vrot.slane %v1301_v62, 9  ;;  %v4391_v5 = vrot.slane %v1302_v63, 9  ;;  %v229_v16 = vld [vmem:[%s5880_s14 + $0x34] sm:$0x1] }
  0x25   : > { %5290 = vmatprep.subr.bf16.mxu1 %v5676_v1  ;;  %v319_v18 = vshrl.u32 %v6031_v9, 16  ;;  %v322_v21 = vshll.u32 %v6031_v9, 16  ;;  %v328_v22 = vshll.u32 %v229_v16, 16  ;;  %v6047_v23 = vld [vmem:[%s5880_s14 + $0x34] sm:$0x1]  ;;  %v5685_v25 = vld [vmem:[%s6964_s1 + $0x28] sm:$0xff]  }
  0x26   : > { %5187 = vmatmul.mubr.bf16.vlgmr.msra.gmra.mrb[0].mxu0 %v4265_v29  ;;  %v293_v53 = vrot.slane %v291_v43, 4  ;;  %v311_v3 = vor.u32 %v310_v57, %v307_v56  ;;  %v1343_v14 = vsel %vm5917_vm4, %v4390_v4, %v1342_v0  ;;  %v336_v29 = vshll.u32 %v6034_v10, 16  ;;  %v1304_v44 = vld [vmem:[%s5880_s14 + $0x38] sm:$0xe]  ;;  %v5688_v57 = vld [vmem:[%s6964_s1 + $0x130] sm:$0xff]   ;;  %v5693_v7 = vld [vmem:[%s6964_s1 + $0x180] sm:$0xff]  }
  0x27   : > { %5283 = vmatmul.mubr.bf16.vlgmr.msra.gmra.mrb[0].mxu1 %v4411_v28  ;;  %5195 = vmatpush3.bf16.msra.mxu0 %v5675_v58  ;;  %v316_v58 = vrot.slane %v314_v50, 5  ;;  %v321_v27 = vrot.slane %v319_v18, 4  ;;  %v333_v28 = vshrl.u32 %v6034_v10, 16  ;;  %v324_v41 = vrot.slane %v322_v21, 5  ;;  %v1152_v62 = vld [vmem:[%s5880_s14] sm:$0xf] }
  0x28   : > { %5291 = vmatpush3.bf16.msra.mxu1 %v5676_v1  ;;  %5196 = vmatprep.subr.bf16.mxu0 %v5677_v30  ;;  %v297_v61 = vor.u32 %v296_v54, %v293_v53  ;;  %v1346_v1 = vrot.slane %v6018_v60, 5  ;;  %v312_v13 = vrot.slane %v311_v3, 4  ;;  %v330_v42 = vrot.slane %v328_v22, 5  ;;  %v5687_v63 = vld [vmem:[%s6964_s1 + $0x30] sm:$0xff]   ;;  %v1158_v18 = vld [vmem:[%s5880_s14 + $0x18] sm:$0xf] }
  0x29   : > { %5292 = vmatprep.subr.bf16.mxu1 %v5678_v24  ;;  %v342_v43 = vshll.u32 %v230_v17, 16  ;;  %v335_v46 = vrot.slane %v333_v28, 4  ;;  %v338_v47 = vrot.slane %v336_v29, 5  ;;  %v1350_v50 = vrot.slane %v6047_v23, 5  ;;  %v1156_v17 = vld [vmem:[%s5880_s14 + $0x10] sm:$0xf] }
  0x2a   : > { %v298_v8 = vrot.slane %v297_v61, 4  ;;  %v1347_v15 = vsel %vm5917_vm4, %v4391_v5, %v1346_v1  ;;  %v317_v26 = vsel %vm5927_vm5, %v312_v13, %v316_v58  ;;  %v4393_v53 = vrot.slane %v1304_v44, 9 }
  0x2b   : > { %5197 = vmatpush3.bf16.msra.mxu0 %v5677_v30  ;;  %v4412_v20 = vcombine.low %v1343_v14, %v1347_v15  ;;  %v1303_v30 = vld [vmem:[%s5880_s14 + $0x30] sm:$0xe]  ;;  %v1169_v3 = vshrl.u32 %v1152_v62, 16  ;;  %v1172_v4 = vshll.u32 %v1152_v62, 16  ;;  %v4276_v14 = vcombine.low %v5886_v11, %v5889_v12  ;;  %v5689_v11 = vld [vmem:[%s6964_s1 + $0x38] sm:$0xff]  }
  0x2c   : > { %5293 = vmatpush3.bf16.msra.mxu1 %v5678_v24  ;;  %5198 = vmatprep.subr.bf16.mxu0 %v5679_v34  ;;  %v303_v19 = vsel %vm5927_vm5, %v298_v8, %v302_v55  ;;  %v6050_v24 = vld [vmem:[%s5880_s14 + $0x3c] sm:$0x1]  ;;  %v4392_v48 = vrot.slane %v1303_v30, 9  ;;  %v339_v55 = vor.u32 %v338_v47, %v335_v46  ;;  %v1211_v28 = vshrl.u32 %v1158_v18, 16  ;;  %v1162_v62 = vld [vmem:[%s5880_s14 + $0x28] sm:$0xf] }
  0x2d   : > { %5294 = vmatprep.subr.bf16.mxu1 %v5680_v37  ;;  %5286 = vmatprep.mubr.bf16.mxu1 %v4412_v20  ;;  %v1354_v54 = vrot.slane %v6050_v24, 5  ;;  %v1171_v15 = vrot.slane %v1169_v3, 4  ;;  %v1174_v16 = vrot.slane %v1172_v4, 5  ;;  %v5690_v20 = vld [vmem:[%s6964_s1 + $0x138] sm:$0xff]   ;;  %v1214_v29 = vshll.u32 %v1158_v18, 16 }
  0x2e   : > { %v1351_v56 = vsel %vm5917_vm4, %v4392_v48, %v1350_v50  ;;  %v340_v0 = vrot.slane %v339_v55, 4  ;;  %v5695_v55 = vld [vmem:[%s6964_s1 + $0x88] sm:$0xff]   ;;  %v4279_v4 = vcombine.low %v6031_v9, %v6034_v10  ;;  %v1262_v18 = vshll.u32 %v6047_v23, 16  ;;  %v5700_v9 = vld [vmem:[%s6964_s1 + $0x198] sm:$0xff]  }
  0x2f   : > { %5199 = vmatpush3.bf16.msra.mxu0 %v5679_v34  ;;  %v5686_v34 = vld [vmem:[%s6964_s1 + $0x128] sm:$0xff]   ;;  %v1355_v61 = vsel %vm5917_vm4, %v4393_v53, %v1354_v54  ;;  %v1175_v12 = vor.u32 %v1174_v16, %v1171_v15  ;;  %v1216_v44 = vrot.slane %v1214_v29, 5  ;;  %v5699_v16 = vld [vmem:[%s6964_s1 + $0x98] sm:$0xff]  }
  0x30   : > { %5295 = vmatpush3.bf16.msra.mxu1 %v5680_v37  ;;  %5200 = vmatprep.subr.bf16.mxu0 %v5681_v51  ;;  %v4266_v37 = vcombine.low %v303_v19, %v317_v26  ;;  %v4413_v1 = vcombine.low %v1351_v56, %v1355_v61  ;;  %v1197_v26 = vshrl.u32 %v1156_v17, 16  ;;  %v5696_v56 = vld [vmem:[%s6964_s1 + $0x188] sm:$0xff]   ;;  %v1160_v61 = vld [vmem:[%s5880_s14 + $0x20] sm:$0xf] }
  0x31   : > { %5296 = vmatprep.subr.bf16.mxu1 %v5682_v52 }
  0x32   : > { %5190 = vmatprep.mubr.bf16.mxu0 %v4266_v37  ;;  %5287 = vmatmul.mubr.bf16.gmra.mrb[4].mxu1 %v4413_v1  ;;  %v5692_v37 = vld [vmem:[%s6964_s1 + $0x80] sm:$0xff]   ;;  %v1242_v1 = vshll.u32 %v1162_v62, 16 }
  0x33   : > { %5201 = vmatpush3.bf16.msra.mxu0 %v5681_v51  ;;  %v325_v51 = vor.u32 %v324_v41, %v321_v27  ;;  %v1200_v27 = vshll.u32 %v1156_v17, 16  ;;  %v1176_v41 = vrot.slane %v1175_v12, 4  ;;  %v1264_v12 = vrot.slane %v1262_v18, 5 }
  0x34   : > { %5297 = vmatpush3.bf16.msra.mxu1 %v5682_v52  ;;  %5202 = vmatprep.subr.bf16.mxu0 %v5683_v2  ;;  %v344_v52 = vrot.slane %v342_v43, 5  ;;  %v1213_v43 = vrot.slane %v1211_v28, 4  ;;  %v5701_v28 = vld [vmem:[%s6964_s1 + $0xa0] sm:$0xff]  }
  0x35   : > { %5298 = vmatprep.subr.bf16.mxu1 %v5684_v6  ;;  %v326_v58 = vrot.slane %v325_v51, 4 }
  0x36   : > { %v345_v13 = vsel %vm5927_vm5, %v340_v0, %v344_v52  ;;  %v1217_v48 = vor.u32 %v1216_v44, %v1213_v43  ;;  %v4277_v52 = vcombine.low %v5935_v45, %v5942_v49  ;;  %v1234_v45 = vshll.u32 %v6015_v59, 16  ;;  %v5698_v59 = vld [vmem:[%s6964_s1 + $0x190] sm:$0xff]   ;;  %v4434_v44 = vld [vmem:[%s5880_s14 + $0x8] sm:$0xf] }
  0x37   : > { %5203 = vmatpush3.bf16.msra.mxu0 %v5683_v2  ;;  %v1154_v2 = vld [vmem:[%s5880_s14 + $0x8] sm:$0xf]  ;;  %v331_v5 = vsel %vm5927_vm5, %v326_v58, %v330_v42  ;;  %v1202_v42 = vrot.slane %v1200_v27, 5  ;;  %v1248_v58 = vshll.u32 %v6018_v60, 16  ;;  %v1228_v0 = vshll.u32 %v1160_v61, 16 }
  0x38   : > { %5299 = vmatpush3.bf16.msra.mxu1 %v5684_v6  ;;  %5204 = vmatprep.subr.bf16.mxu0 %v5685_v25  ;;  %v1183_v6 = vshrl.u32 %v1154_v2, 16  ;;  %v1186_v8 = vshll.u32 %v1154_v2, 16  ;;  %v4267_v19 = vcombine.low %v331_v5, %v345_v13  ;;  %v1218_v54 = vrot.slane %v1217_v48, 4  ;;  %v1164_v5 = vld [vmem:[%s5880_s14 + $0x30] sm:$0xf] }
  0x39   : > { %5300 = vmatprep.subr.bf16.mxu1 %v5686_v34  ;;  %v1239_v60 = vshrl.u32 %v1162_v62, 16  ;;  %v1230_v3 = vrot.slane %v1228_v0, 5  ;;  %v1244_v13 = vrot.slane %v1242_v1, 5  ;;  %v1256_v15 = vshll.u32 %v1164_v5, 16  ;;  %v6160_v48 = vld [vmem:[%s5880_s14 + $0x14] sm:$0x1] }
  0x3a   : > { %v1185_v21 = vrot.slane %v1183_v6, 4  ;;  %v1188_v22 = vrot.slane %v1186_v8, 5  ;;  %5191 = vmatmul.mubr.bf16.gmra.mrb[4].mxu0 %v4267_v19  ;;  %v1166_v6 = vld [vmem:[%s5880_s14 + $0x38] sm:$0xf]  ;;  %v5707_v1 = vld [vmem:[%s6964_s1 + $0x1b0] sm:$0xff]  }
  0x3b   : > { %5205 = vmatpush3.bf16.msra.mxu0 %v5685_v25  ;;  %v1222_v25 = vrot.slane %v1220_v33, 5  ;;  %5210 = vmatprep.mubr.bf16.mxu0 %v4276_v14  ;;  %v1181_v33 = vsel %vm5927_vm5, %v1176_v41, %v5983_v31  ;;  %v1241_v8 = vrot.slane %v1239_v60, 4  ;;  %v1253_v14 = vshrl.u32 %v1164_v5, 16  ;;  %v5702_v41 = vld [vmem:[%s6964_s1 + $0x1a0] sm:$0xff]  }
  0x3c   : > { %5301 = vmatpush3.bf16.msra.mxu1 %v5686_v34  ;;  %5206 = vmatprep.subr.bf16.mxu0 %v5687_v63  ;;  %v1189_v30 = vor.u32 %v1188_v22, %v1185_v21  ;;  %v1199_v34 = vrot.slane %v1197_v26, 4  ;;  %v1267_v19 = vshrl.u32 %v1166_v6, 16  ;;  %v1258_v22 = vrot.slane %v1256_v15, 5  ;;  %v4440_v60 = vld [vmem:[%s5880_s14 + $0x20] sm:$0xf] }
  0x3d   : > { %5302 = vmatprep.subr.bf16.mxu1 %v5688_v57  ;;  %v1245_v10 = vor.u32 %v1244_v13, %v1241_v8  ;;  %v1255_v21 = vrot.slane %v1253_v14, 4  ;;  %v1276_v26 = vshll.u32 %v6050_v24, 16  ;;  %v1690_v13 = vshrl.u32 %v4440_v60, 16 }
  0x3e   : > { %v1190_v46 = vrot.slane %v1189_v30, 4  ;;  %v1203_v47 = vor.u32 %v1202_v42, %v1199_v34  ;;  %v1269_v27 = vrot.slane %v1267_v19, 4  ;;  %v1693_v14 = vshll.u32 %v4440_v60, 16 }
  0x3f   : > { %5207 = vmatpush3.bf16.msra.mxu0 %v5687_v63  ;;  %v1225_v63 = vshrl.u32 %v1160_v61, 16  ;;  %v1246_v29 = vrot.slane %v1245_v10, 4  ;;  %v1278_v30 = vrot.slane %v1276_v26, 5  ;;  %v1692_v10 = vrot.slane %v1690_v13, 4 }
  0x40   : > { %5303 = vmatpush3.bf16.msra.mxu1 %v5688_v57  ;;  %5208 = vmatprep.subr.bf16.mxu0 %v5689_v11  ;;  %v1195_v50 = vsel %vm5927_vm5, %v1190_v46, %v5985_v32  ;;  %v1204_v53 = vrot.slane %v1203_v47, 4  ;;  %v1223_v32 = vsel %vm5927_vm5, %v1218_v54, %v1222_v25  ;;  %v4278_v57 = vcombine.low %v5997_v39, %v6000_v40  ;;  %v6156_v46 = vld [vmem:[%s5880_s14 + $0xc] sm:$0x1]  ;;  %v4436_v47 = vld [vmem:[%s5880_s14 + $0x10] sm:$0xf] }
  0x41   : > { %5304 = vmatprep.subr.bf16.mxu1 %v5690_v20  ;;  %v4422_v51 = vcombine.low %v1181_v33, %v1195_v50  ;;  %v1236_v39 = vrot.slane %v1234_v45, 5  ;;  %v1250_v40 = vrot.slane %v1248_v58, 5  ;;  %v1227_v2 = vrot.slane %v1225_v63, 4  ;;  %v5706_v63 = vld [vmem:[%s6964_s1 + $0xb0] sm:$0xff]  }
  0x42   : > { %v1209_v31 = vsel %vm5927_vm5, %v1204_v53, %v5991_v36  ;;  %v5697_v36 = vld [vmem:[%s6964_s1 + $0x90] sm:$0xff]   ;;  %v1259_v25 = vor.u32 %v1258_v22, %v1255_v21  ;;  %v1648_v50 = vshrl.u32 %v4434_v44, 16  ;;  %v1657_v53 = vshll.u32 %v6156_v46, 16 }
  0x43   : > { %5209 = vmatpush3.bf16.msra.mxu0 %v5689_v11  ;;  %5306 = vmatprep.mubr.bf16.mxu1 %v4422_v51  ;;  %v4423_v49 = vcombine.low %v1209_v31, %v1223_v32  ;;  %v1231_v17 = vor.u32 %v1230_v3, %v1227_v2  ;;  %v1251_v42 = vsel %vm5927_vm5, %v1246_v29, %v1250_v40  ;;  %v1662_v54 = vshrl.u32 %v4436_v47, 16  ;;  %v6179_v40 = vld [vmem:[%s5880_s14 + $0x1c] sm:$0x1]  ;;  %v6186_v3 = vld [vmem:[%s5880_s14 + $0x24] sm:$0x1] }
  0x44   : > { %5305 = vmatpush3.bf16.msra.mxu1 %v5690_v20  ;;  %5218 = vmatprep.subr.bf16.mxu0 %v5692_v37  ;;  %v1270_v20 = vshll.u32 %v1166_v6, 16  ;;  %v1260_v43 = vrot.slane %v1259_v25, 4  ;;  %v1650_v32 = vrot.slane %v1648_v50, 4  ;;  %v1671_v45 = vshll.u32 %v6160_v48, 16  ;;  %v5712_v25 = vld [vmem:[%s6964_s1 + $0xc0] sm:$0xff]  }
  0x45   : > { %5314 = vmatprep.subr.bf16.mxu1 %v5693_v7  ;;  %v1232_v11 = vrot.slane %v1231_v17, 4  ;;  %v1664_v58 = vrot.slane %v1662_v54, 4  ;;  %v1659_v61 = vrot.slane %v1657_v53, 5  ;;  %v1685_v6 = vshll.u32 %v6179_v40, 16  ;;  %v6224_v50 = vld [vmem:[%s5880_s14 + $0x34] sm:$0x1] }
  0x46   : > { %5211 = vmatmul.mubr.bf16.vlgmr.msra.gmra.mrb[0].mxu0 %v4277_v52  ;;  %v1272_v23 = vrot.slane %v1270_v20, 5  ;;  %v1265_v51 = vsel %vm5927_vm5, %v1260_v43, %v1264_v12  ;;  %v1651_v52 = vshll.u32 %v4434_v44, 16  ;;  %v1673_v62 = vrot.slane %v1671_v45, 5  ;;  %v5709_v20 = vld [vmem:[%s6964_s1 + $0xb8] sm:$0xff]   ;;  %v5716_v43 = vld [vmem:[%s6964_s1 + $0x1c8] sm:$0xff]  }
  0x47   : > { %5219 = vmatpush3.bf16.msra.mxu0 %v5692_v37  ;;  %5307 = vmatmul.mubr.bf16.vlgmr.msra.gmra.mrb[0].mxu1 %v4423_v49  ;;  %v1237_v24 = vsel %vm5927_vm5, %v1232_v11, %v1236_v39  ;;  %v5711_v37 = vld [vmem:[%s5880_s14 + $0x8] ss:$8 sps:$4 sm:$0xff]   ;;  %v4438_v39 = vld [vmem:[%s5880_s14 + $0x18] sm:$0xf]  ;;  %v1699_v15 = vshll.u32 %v6186_v3, 16  ;;  %v1687_v19 = vrot.slane %v1685_v6, 5 }
  0x48   : > { %5315 = vmatpush3.bf16.msra.mxu1 %v5693_v7  ;;  %5220 = vmatprep.subr.bf16.mxu0 %v5695_v55  ;;  %v1273_v34 = vor.u32 %v1272_v23, %v1269_v27  ;;  %v4424_v7 = vcombine.low %v1237_v24, %v1251_v42  ;;  %v5703_v49 = vld [vmem:[%s6964_s1 + $0xa8] sm:$0xff]   ;;  %v1679_v5 = vshll.u32 %v4438_v39, 16  ;;  %v1695_v21 = vrot.slane %v1693_v14, 5  ;;  %v5710_v23 = vld [vmem:[%s6964_s1 + $0x1b8] sm:$0xff]  }
  0x49   : > { %5316 = vmatprep.subr.bf16.mxu1 %v5696_v56  ;;  %5214 = vmatprep.mubr.bf16.mxu0 %v4278_v57  ;;  %v1653_v57 = vrot.slane %v1651_v52, 5  ;;  %v1701_v22 = vrot.slane %v1699_v15, 5  ;;  %v5725_v44 = vld [vmem:[%s5880_s14 + $0x28] ss:$8 sps:$4 sm:$0xff]   ;;  %v1939_v45 = vrot.slane %v6156_v46, 5 }
  0x4a   : > { %v1274_v33 = vrot.slane %v1273_v34, 4  ;;  %5310 = vmatprep.mubr.bf16.mxu1 %v4424_v7  ;;  %v1681_v18 = vrot.slane %v1679_v5, 5  ;;  %v1696_v27 = vor.u32 %v1695_v21, %v1692_v10  ;;  %v5713_v34 = vld [vmem:[%s6964_s1 + $0x1c0] sm:$0xff]   ;;  %v4442_v7 = vld [vmem:[%s5880_s14 + $0x28] sm:$0xf]  ;;  %v5719_v5 = vld [vmem:[%s6964_s1 + $0xd8] sm:$0xff]  }
  0x4b   : > { %5221 = vmatpush3.bf16.msra.mxu0 %v5695_v55  ;;  %v1665_v55 = vshll.u32 %v4436_v47, 16  ;;  %v1654_v0 = vor.u32 %v1653_v57, %v1650_v32  ;;  %v4444_v47 = vld [vmem:[%s5880_s14 + $0x30] sm:$0xf]  ;;  %v1707_v52 = vshll.u32 %v4442_v7, 16 }
  0x4c   : > { %5317 = vmatpush3.bf16.msra.mxu1 %v5696_v56  ;;  %5222 = vmatprep.subr.bf16.mxu0 %v5697_v36  ;;  %v1279_v31 = vsel %vm5927_vm5, %v1274_v33, %v1278_v30  ;;  %v1697_v29 = vrot.slane %v1696_v27, 4  ;;  %v6220_v33 = vld [vmem:[%s5880_s14 + $0x2c] sm:$0x1]  ;;  %v1718_v54 = vshrl.u32 %v4444_v47, 16  ;;  %v1721_v32 = vshll.u32 %v4444_v47, 16 }
  0x4d   : > { %5318 = vmatprep.subr.bf16.mxu1 %v5698_v59  ;;  %v4425_v56 = vcombine.low %v1265_v51, %v1279_v31  ;;  %v1655_v8 = vrot.slane %v1654_v0, 4  ;;  %v1704_v51 = vshrl.u32 %v4442_v7, 16  ;;  %v1713_v53 = vshll.u32 %v6220_v33, 16  ;;  %v5717_v31 = vld [vmem:[%s6964_s1 + $0xd0] sm:$0xff]   ;;  %v5726_v0 = vld [vmem:[%s5880_s14 + $0x38] ss:$8 sps:$4 sm:$0xff]  }
  0x4e   : > { %5215 = vmatmul.mubr.bf16.gmra.mrb[4].mxu0 %v4279_v4  ;;  %v1676_v4 = vshrl.u32 %v4438_v39, 16  ;;  %v1702_v24 = vsel %vm5927_vm5, %v1697_v29, %v1701_v22  ;;  %v1951_v39 = vrot.slane %v6186_v3, 5  ;;  %v5720_v22 = vld [vmem:[%s6964_s1 + $0x1d8] sm:$0xff]  }
  0x4f   : > { %5223 = vmatpush3.bf16.msra.mxu0 %v5697_v36  ;;  %5234 = vmatprep.mubr.bf16.mxu0 %v5711_v37  ;;  %v5704_v36 = vld [vmem:[%s6964_s1 + $0x1a8] sm:$0xff]   ;;  %v5714_v37 = vld [vmem:[%s5880_s14 + $0x18] ss:$8 sps:$4 sm:$0xff]   ;;  %v1706_v57 = vrot.slane %v1704_v51, 4 }
  0x50   : > { %5319 = vmatpush3.bf16.msra.mxu1 %v5698_v59  ;;  %5224 = vmatprep.subr.bf16.mxu0 %v5699_v16  ;;  %v1667_v59 = vrot.slane %v1665_v55, 5  ;;  %v1678_v17 = vrot.slane %v1676_v4, 4  ;;  %v1727_v55 = vshll.u32 %v6224_v50, 16  ;;  %v4448_v4 = vld [vmem:[%s5880_s14 + $0x40] sm:$0xf] }
  0x51   : > { %5320 = vmatprep.subr.bf16.mxu1 %v5700_v9  ;;  %5311 = vmatmul.mubr.bf16.gmra.mrb[4].mxu1 %v4425_v56  ;;  %v5718_v56 = vld [vmem:[%s6964_s1 + $0x1d0] sm:$0xff]  }
  0x52   : > { %v1668_v2 = vor.u32 %v1667_v59, %v1664_v58  ;;  %v1682_v11 = vor.u32 %v1681_v18, %v1678_v17  ;;  %v1709_v58 = vrot.slane %v1707_v52, 5  ;;  %v1715_v59 = vrot.slane %v1713_v53, 5 }
  0x53   : > { %5225 = vmatpush3.bf16.msra.mxu0 %v5699_v16  ;;  %v1746_v17 = vshrl.u32 %v4448_v4, 16  ;;  %v1749_v18 = vshll.u32 %v4448_v4, 16 }
  0x54   : > { %5321 = vmatpush3.bf16.msra.mxu1 %v5700_v9  ;;  %5226 = vmatprep.subr.bf16.mxu0 %v5701_v28  ;;  %v1669_v16 = vrot.slane %v1668_v2, 4  ;;  %v1660_v9 = vsel %vm5927_vm5, %v1655_v8, %v1659_v61  ;;  %v1947_v61 = vrot.slane %v6179_v40, 5  ;;  %v1710_v60 = vor.u32 %v1709_v58, %v1706_v57  ;;  %v6241_v2 = vld [vmem:[%s5880_s14 + $0x3c] sm:$0x1]  ;;  %v6248_v8 = vld [vmem:[%s5880_s14 + $0x44] sm:$0x1] }
  0x55   : > { %5322 = vmatprep.subr.bf16.mxu1 %v5702_v41  ;;  %v1741_v15 = vshll.u32 %v6241_v2, 16  ;;  %v4479_v58 = vld [vmem:[%s5880_s14 + $0x10] sm:$0xe] }
  0x56   : > { %v1674_v26 = vsel %vm5927_vm5, %v1669_v16, %v1673_v62  ;;  %v1723_v62 = vrot.slane %v1721_v32, 5  ;;  %v1711_v16 = vrot.slane %v1710_v60, 4  ;;  %v4328_v60 = vld [vmem:[%s5880_s14 + $0x18] sm:$0xf] }
  0x57   : > { %5227 = vmatpush3.bf16.msra.mxu0 %v5701_v28  ;;  %v4466_v12 = vcombine.low %v1660_v9, %v1674_v26  ;;  %v1683_v28 = vrot.slane %v1682_v11, 4  ;;  %v1743_v21 = vrot.slane %v1741_v15, 5  ;;  %v1748_v11 = vrot.slane %v1746_v17, 4  ;;  %v5724_v15 = vld [vmem:[%s6964_s1 + $0x1e8] sm:$0xff]   ;;  %v4331_v17 = vld [vmem:[%s5880_s14 + $0x24] sm:$0x1] }
  0x58   : > { %5323 = vmatpush3.bf16.msra.mxu1 %v5702_v41  ;;  %5228 = vmatprep.subr.bf16.mxu0 %v5703_v49  ;;  %v5715_v41 = vld [vmem:[%s6964_s1 + $0xc8] sm:$0xff]   ;;  %v1716_v26 = vsel %vm5927_vm5, %v1711_v16, %v1715_v59 }
  0x59   : > { %5324 = vmatprep.subr.bf16.mxu1 %v5704_v36  ;;  %5330 = vmatprep.mubr.bf16.mxu1 %v4466_v12  ;;  %v1688_v30 = vsel %vm5927_vm5, %v1683_v28, %v1687_v19  ;;  %v1755_v19 = vshll.u32 %v6248_v8, 16  ;;  %v1751_v12 = vrot.slane %v1749_v18, 5  ;;  %v845_v18 = vshrl.u32 %v4328_v60, 16 }
  0x5a   : > { %v4467_v42 = vcombine.low %v1688_v30, %v1702_v24 }
  0x5b   : > { %5229 = vmatpush3.bf16.msra.mxu0 %v5703_v49  ;;  %v1943_v49 = vrot.slane %v6160_v48, 5  ;;  %v1757_v27 = vrot.slane %v1755_v19, 5  ;;  %v1752_v24 = vor.u32 %v1751_v12, %v1748_v11  ;;  %v848_v19 = vshll.u32 %v4328_v60, 16  ;;  %v4481_v11 = vld [vmem:[%s5880_s14 + $0x20] sm:$0xe]  ;;  %v5727_v12 = vld [vmem:[%s6964_s1 + $0xf0] sm:$0xff]  }
  0x5c   : > { %5325 = vmatpush3.bf16.msra.mxu1 %v5704_v36  ;;  %5230 = vmatprep.subr.bf16.mxu0 %v5706_v63  ;;  %v1720_v36 = vrot.slane %v1718_v54, 4  ;;  %v5728_v48 = vld [vmem:[%s6964_s1 + $0x1f0] sm:$0xff]  }
  0x5d   : > { %5326 = vmatprep.subr.bf16.mxu1 %v5707_v1  ;;  %v1753_v51 = vrot.slane %v1752_v24, 4  ;;  %v850_v46 = vrot.slane %v848_v19, 5 }
  0x5e   : > { %v1724_v6 = vor.u32 %v1723_v62, %v1720_v36  ;;  %v5723_v36 = vld [vmem:[%s6964_s1 + $0xe8] sm:$0xff]  }
  0x5f   : > { %5231 = vmatpush3.bf16.msra.mxu0 %v5706_v63  ;;  %v1729_v63 = vrot.slane %v1727_v55, 5  ;;  %v1758_v59 = vsel %vm5927_vm5, %v1753_v51, %v1757_v27 }
  0x60   : > { %5327 = vmatpush3.bf16.msra.mxu1 %v5707_v1  ;;  %5232 = vmatprep.subr.bf16.mxu0 %v5709_v20  ;;  %v4446_v1 = vld [vmem:[%s5880_s14 + $0x38] sm:$0xf] }
  0x61   : > { %5328 = vmatprep.subr.bf16.mxu1 %v5710_v23  ;;  %v1732_v13 = vshrl.u32 %v4446_v1, 16  ;;  %v1735_v14 = vshll.u32 %v4446_v1, 16 }
  0x63   : > { %5233 = vmatpush3.bf16.msra.mxu0 %v5709_v20  ;;  %v1725_v20 = vrot.slane %v1724_v6, 4  ;;  %v1734_v9 = vrot.slane %v1732_v13, 4  ;;  %v1737_v10 = vrot.slane %v1735_v14, 5  ;;  %v4487_v13 = vrot.slane %v4479_v58, 9  ;;  %v4330_v14 = vld [vmem:[%s5880_s14 + $0x20] sm:$0xf] }
  0x64   : > { %5329 = vmatpush3.bf16.msra.mxu1 %v5710_v23  ;;  %5242 = vmatprep.subr.bf16.mxu0 %v5712_v25  ;;  %v5721_v23 = vld [vmem:[%s6964_s1 + $0xe0] sm:$0xff]   ;;  %v4482_v58 = vld [vmem:[%s5880_s14 + $0x28] sm:$0xe] }
  0x65   : > { %5338 = vmatprep.subr.bf16.mxu1 %v5713_v34  ;;  %v1730_v28 = vsel %vm5927_vm5, %v1725_v20, %v1729_v63  ;;  %v1738_v29 = vor.u32 %v1737_v10, %v1734_v9 }
  0x66   : > { %5235 = vmatmul.mubr.bf16.vlgmr.msra.gmra.mrb[0].mxu0 %v5714_v37  ;;  %v4468_v30 = vcombine.low %v1716_v26, %v1730_v28  ;;  %v4325_v37 = vld [vmem:[%s5880_s14 + $0xc] sm:$0x1]  ;;  %v4480_v26 = vld [vmem:[%s5880_s14 + $0x18] sm:$0xe] }
  0x67   : > { %5243 = vmatpush3.bf16.msra.mxu0 %v5712_v25  ;;  %5331 = vmatmul.mubr.bf16.vlgmr.msra.gmra.mrb[0].mxu1 %v4467_v42  ;;  %v5722_v25 = vld [vmem:[%s6964_s1 + $0x1e0] sm:$0xff]   ;;  %v1739_v42 = vrot.slane %v1738_v29, 4  ;;  %v826_v47 = vshll.u32 %v4325_v37, 16  ;;  %v847_v29 = vrot.slane %v845_v18, 4  ;;  %v868_v37 = vshll.u32 %v4331_v17, 16 }
  0x68   : > { %5339 = vmatpush3.bf16.msra.mxu1 %v5713_v34  ;;  %5244 = vmatprep.subr.bf16.mxu0 %v5715_v41  ;;  %v4324_v34 = vld [vmem:[%s5880_s14 + $0x8] sm:$0xf]  ;;  %v4337_v18 = vld [vmem:[%s5880_s14 + $0x3c] sm:$0x1] }
  0x69   : > { %5340 = vmatprep.subr.bf16.mxu1 %v5716_v43  ;;  %5238 = vmatprep.mubr.bf16.mxu0 %v5725_v44  ;;  %v817_v44 = vshrl.u32 %v4324_v34, 16  ;;  %v820_v7 = vshll.u32 %v4324_v34, 16  ;;  %v1744_v32 = vsel %vm5927_vm5, %v1739_v42, %v1743_v21  ;;  %v828_v57 = vrot.slane %v826_v47, 5 }
  0x6a   : > { %5334 = vmatprep.mubr.bf16.mxu1 %v4468_v30  ;;  %v4469_v1 = vcombine.low %v1744_v32, %v1758_v59  ;;  %v1944_v21 = vsel %vm5917_vm4, %v4487_v13, %v1943_v49  ;;  %v851_v34 = vor.u32 %v850_v46, %v847_v29  ;;  %v870_v51 = vrot.slane %v868_v37, 5  ;;  %v4333_v32 = vld [vmem:[%s5880_s14 + $0x2c] sm:$0x1]  ;;  %v4336_v13 = vld [vmem:[%s5880_s14 + $0x38] sm:$0xf] }
  0x6b   : > { %5245 = vmatpush3.bf16.msra.mxu0 %v5715_v41  ;;  %v4326_v41 = vld [vmem:[%s5880_s14 + $0x10] sm:$0xf]  ;;  %v819_v55 = vrot.slane %v817_v44, 4  ;;  %v4489_v44 = vrot.slane %v4481_v11, 9  ;;  %v882_v59 = vshll.u32 %v4333_v32, 16 }
  0x6c   : > { %5341 = vmatpush3.bf16.msra.mxu1 %v5716_v43  ;;  %5246 = vmatprep.subr.bf16.mxu0 %v5717_v31  ;;  %v4327_v43 = vld [vmem:[%s5880_s14 + $0x14] sm:$0x1]  ;;  %v831_v52 = vshrl.u32 %v4326_v41, 16  ;;  %v834_v53 = vshll.u32 %v4326_v41, 16  ;;  %v5729_v41 = vld [vmem:[%s6964_s1 + $0xf8] sm:$0xff]   ;;  %v852_v47 = vrot.slane %v851_v34, 4 }
  0x6d   : > { %5342 = vmatprep.subr.bf16.mxu1 %v5718_v56  ;;  %v840_v54 = vshll.u32 %v4327_v43, 16  ;;  %v5734_v34 = vld [vmem:[%s6964_s1 + $0x348] sm:$0xff]  }
  0x6e   : > { %5239 = vmatmul.mubr.bf16.gmra.mrb[4].mxu0 %v5726_v0  ;;  %v833_v62 = vrot.slane %v831_v52, 4  ;;  %v836_v63 = vrot.slane %v834_v53, 5 }
  0x6f   : > { %5247 = vmatpush3.bf16.msra.mxu0 %v5717_v31  ;;  %v4478_v31 = vld [vmem:[%s5880_s14 + $0x8] sm:$0xe]  ;;  %v842_v0 = vrot.slane %v840_v54, 5  ;;  %5335 = vmatmul.mubr.bf16.gmra.mrb[4].mxu1 %v4469_v1  ;;  %v6321_v54 = vsel %vm5917_vm4, %v4489_v44, %v1951_v39  ;;  %v5731_v39 = vld [vmem:[%s6964_s1 + $0x240] sm:$0xff]  }
  0x70   : > { %5343 = vmatpush3.bf16.msra.mxu1 %v5718_v56  ;;  %5248 = vmatprep.subr.bf16.mxu0 %v5719_v5  ;;  %v822_v56 = vrot.slane %v820_v7, 5  ;;  %v4486_v6 = vrot.slane %v4478_v31, 9  ;;  %v837_v16 = vor.u32 %v836_v63, %v833_v62  ;;  %v5730_v7 = vld [vmem:[%s6964_s1 + $0x1f8] sm:$0xff]   ;;  %v4332_v31 = vld [vmem:[%s5880_s14 + $0x28] sm:$0xf] }
  0x71   : > { %5344 = vmatprep.subr.bf16.mxu1 %v5720_v22  ;;  %v876_v3 = vshll.u32 %v4332_v31, 16 }
  0x72   : > { %v823_v4 = vor.u32 %v822_v56, %v819_v55  ;;  %v1940_v10 = vsel %vm5917_vm4, %v4486_v6, %v1939_v45  ;;  %v838_v27 = vrot.slane %v837_v16, 4  ;;  %v4334_v55 = vld [vmem:[%s5880_s14 + $0x30] sm:$0xf]  ;;  %v4335_v56 = vld [vmem:[%s5880_s14 + $0x34] sm:$0x1]  ;;  %v4490_v6 = vrot.slane %v4482_v58, 9 }
  0x73   : > { %5249 = vmatpush3.bf16.msra.mxu0 %v5719_v5  ;;  %v4329_v5 = vld [vmem:[%s5880_s14 + $0x1c] sm:$0x1]  ;;  %v4510_v28 = vcombine.low %v1940_v10, %v1944_v21  ;;  %v887_v62 = vshrl.u32 %v4334_v55, 16  ;;  %v890_v63 = vshll.u32 %v4334_v55, 16  ;;  %v878_v1 = vrot.slane %v876_v3, 5 }
  0x74   : > { %5345 = vmatpush3.bf16.msra.mxu1 %v5720_v22  ;;  %5250 = vmatprep.subr.bf16.mxu0 %v5721_v23  ;;  %v854_v20 = vshll.u32 %v4329_v5, 16  ;;  %v824_v9 = vrot.slane %v823_v4, 4  ;;  %v859_v22 = vshrl.u32 %v4330_v14, 16  ;;  %v843_v24 = vsel %vm5927_vm5, %v838_v27, %v842_v0  ;;  %v4483_v0 = vld [vmem:[%s5880_s14 + $0x30] sm:$0xe] }
  0x75   : > { %5346 = vmatprep.subr.bf16.mxu1 %v5722_v25  ;;  %5354 = vmatprep.mubr.bf16.mxu1 %v4510_v28  ;;  %v896_v4 = vshll.u32 %v4335_v56, 16  ;;  %v889_v16 = vrot.slane %v887_v62, 4  ;;  %v892_v17 = vrot.slane %v890_v63, 5  ;;  %v1955_v10 = vrot.slane %v6220_v33, 5  ;;  %v4338_v21 = vld [vmem:[%s5880_s14 + $0x40] sm:$0xf] }
  0x76   : > { %v829_v45 = vsel %vm5927_vm5, %v824_v9, %v828_v57  ;;  %v856_v49 = vrot.slane %v854_v20, 5  ;;  %v861_v30 = vrot.slane %v859_v22, 4  ;;  %v873_v57 = vshrl.u32 %v4332_v31, 16  ;;  %v4339_v22 = vld [vmem:[%s5880_s14 + $0x44] sm:$0x1]  ;;  %v5733_v33 = vld [vmem:[%s6964_s1 + $0x248] sm:$0xff]  }
  0x77   : > { %5251 = vmatpush3.bf16.msra.mxu0 %v5721_v23  ;;  %v862_v23 = vshll.u32 %v4330_v14, 16  ;;  %v4356_v42 = vcombine.low %v829_v45, %v843_v24  ;;  %v5732_v14 = vld [vmem:[%s6964_s1 + $0x340] sm:$0xff]   ;;  %v898_v9 = vrot.slane %v896_v4, 5  ;;  %v4491_v11 = vrot.slane %v4483_v0, 9  ;;  %v4484_v28 = vld [vmem:[%s5880_s14 + $0x38] sm:$0xe] }
  0x78   : > { %5347 = vmatpush3.bf16.msra.mxu1 %v5722_v25  ;;  %5252 = vmatprep.subr.bf16.mxu0 %v5723_v36  ;;  %v4488_v25 = vrot.slane %v4480_v26, 9  ;;  %v857_v40 = vsel %vm5927_vm5, %v852_v47, %v856_v49  ;;  %v875_v60 = vrot.slane %v873_v57, 4  ;;  %v893_v26 = vor.u32 %v892_v17, %v889_v16  ;;  %v4485_v49 = vld [vmem:[%s5880_s14 + $0x40] sm:$0xe]  ;;  %v5735_v47 = vld [vmem:[%s6964_s1 + $0x250] sm:$0xff]   ;;  %v5738_v62 = vld [vmem:[%s6964_s1 + $0x358] sm:$0xff]  }
  0x79   : > { %5348 = vmatprep.subr.bf16.mxu1 %v5724_v15  ;;  %v864_v43 = vrot.slane %v862_v23, 5  ;;  %5258 = vmatprep.mubr.bf16.mxu0 %v4356_v42  ;;  %v901_v27 = vshrl.u32 %v4336_v13, 16  ;;  %v1956_v46 = vsel %vm5917_vm4, %v4490_v6, %v1955_v10  ;;  %v910_v45 = vshll.u32 %v4337_v18, 16  ;;  %v5736_v31 = vld [vmem:[%s6964_s1 + $0x350] sm:$0xff]   ;;  %v6392_v4 = vld [vmem:[%s5880_s14 + $0x8] sm:$0xf] }
  0x7a   : > { %v6315_v52 = vsel %vm5917_vm4, %v4488_v25, %v1947_v61  ;;  %v879_v20 = vor.u32 %v878_v1, %v875_v60  ;;  %v915_v24 = vshrl.u32 %v4338_v21, 16  ;;  %v918_v44 = vshll.u32 %v4338_v21, 16  ;;  %v5739_v60 = vld [vmem:[%s6964_s1 + $0x260] sm:$0xff]   ;;  %v6395_v6 = vld [vmem:[%s5880_s14 + $0x10] sm:$0xf]  ;;  %v5741_v18 = vld [vmem:[%s6964_s1 + $0x268] sm:$0xff]  }
  0x7b   : > { %5253 = vmatpush3.bf16.msra.mxu0 %v5723_v36  ;;  %v865_v53 = vor.u32 %v864_v43, %v861_v30  ;;  %v4511_v61 = vcombine.low %v6315_v52, %v6321_v54  ;;  %v894_v30 = vrot.slane %v893_v26, 4  ;;  %v903_v23 = vrot.slane %v901_v27, 4  ;;  %v5740_v1 = vld [vmem:[%s6964_s1 + $0x360] sm:$0xff]   ;;  %v6410_v26 = vld [vmem:[%s5880_s14 + $0xc] sm:$0x1] }
  0x7c   : > { %5349 = vmatpush3.bf16.msra.mxu1 %v5724_v15  ;;  %5254 = vmatprep.subr.bf16.mxu0 %v5727_v12  ;;  %v884_v15 = vrot.slane %v882_v59, 5  ;;  %v880_v29 = vrot.slane %v879_v20, 4  ;;  %v917_v43 = vrot.slane %v915_v24, 4  ;;  %v1963_v54 = vrot.slane %v6241_v2, 5  ;;  %v5737_v59 = vld [vmem:[%s6964_s1 + $0x258] sm:$0xff]   ;;  %v5744_v24 = vld [vmem:[%s6964_s1 + $0x370] sm:$0xff]  }
  0x7d   : > { %5350 = vmatprep.subr.bf16.mxu1 %v5728_v48  ;;  %v866_v36 = vrot.slane %v865_v53, 4  ;;  %v899_v42 = vsel %vm5927_vm5, %v894_v30, %v898_v9  ;;  %v4492_v53 = vrot.slane %v4484_v28, 9  ;;  %v912_v32 = vrot.slane %v910_v45, 5  ;;  %v5742_v9 = vld [vmem:[%s6964_s1 + $0x368] sm:$0xff]   ;;  %v6413_v27 = vld [vmem:[%s5880_s14 + $0x14] sm:$0x1] }
  0x7e   : > { %v885_v37 = vsel %vm5927_vm5, %v880_v29, %v884_v15  ;;  %v920_v55 = vrot.slane %v918_v44, 5  ;;  %v1967_v56 = vrot.slane %v6248_v8, 5  ;;  %v2231_v15 = vshll.u32 %v6392_v4, 16  ;;  %v4726_v28 = vld [vmem:[%s5880_s14 + $0x8] sm:$0xe]  ;;  %v5743_v29 = vld [vmem:[%s6964_s1 + $0x270] sm:$0xff]  }
  0x7f   : > { %5255 = vmatpush3.bf16.msra.mxu0 %v5727_v12  ;;  %v871_v5 = vsel %vm5927_vm5, %v866_v36, %v870_v51  ;;  %v1959_v12 = vrot.slane %v6224_v50, 5  ;;  %v4358_v51 = vcombine.low %v885_v37, %v899_v42  ;;  %v1964_v3 = vsel %vm5917_vm4, %v4492_v53, %v1963_v54  ;;  %v4558_v44 = vld [vmem:[%s5880_s14 + $0x1c] sm:$0x1] }
  0x80   : > { %5351 = vmatpush3.bf16.msra.mxu1 %v5728_v48  ;;  %5256 = vmatprep.subr.bf16.mxu0 %v5729_v41  ;;  %v4357_v19 = vcombine.low %v857_v40, %v871_v5  ;;  %v904_v48 = vshll.u32 %v4336_v13, 16  ;;  %v4493_v40 = vrot.slane %v4485_v49, 9  ;;  %v921_v2 = vor.u32 %v920_v55, %v917_v43  ;;  %v4556_v13 = vld [vmem:[%s5880_s14 + $0xc] sm:$0x1]  ;;  %v4557_v5 = vld [vmem:[%s5880_s14 + $0x14] sm:$0x1] }
  0x81   : > { %5352 = vmatprep.subr.bf16.mxu1 %v5730_v7  ;;  %v1960_v50 = vsel %vm5917_vm4, %v4491_v11, %v1959_v12  ;;  %v2237_v16 = vshll.u32 %v4556_v13, 16  ;;  %v2242_v17 = vshrl.u32 %v6395_v6, 16  ;;  %v2251_v20 = vshll.u32 %v4557_v5, 16  ;;  %v5745_v55 = vld [vmem:[%s6964_s1 + $0x278] sm:$0xff]  }
  0x82   : > { %v4512_v25 = vcombine.low %v1956_v46, %v1960_v50  ;;  %v1968_v58 = vsel %vm5917_vm4, %v4493_v40, %v1967_v56  ;;  %v922_v8 = vrot.slane %v921_v2, 4  ;;  %v2233_v21 = vrot.slane %v2231_v15, 5  ;;  %v5746_v2 = vld [vmem:[%s6964_s1 + $0x378] sm:$0xff]  }
  0x83   : > { %5257 = vmatpush3.bf16.msra.mxu0 %v5729_v41  ;;  %v906_v41 = vrot.slane %v904_v48, 5  ;;  %v4513_v36 = vcombine.low %v1964_v3, %v1968_v58  ;;  %v2239_v11 = vrot.slane %v2237_v16, 5  ;;  %v4727_v48 = vld [vmem:[%s5880_s14 + $0x10] sm:$0xe]  ;;  %v4734_v45 = vrot.slane %v4726_v28, 9  ;;  %v5747_v16 = vld [vmem:[%s6964_s1 + $0x200] sm:$0xff]  }
  0x84   : > { %5353 = vmatpush3.bf16.msra.mxu1 %v5730_v7  ;;  %5362 = vmatprep.subr.bf16.mxu0 %v5731_v39  ;;  %v924_v7 = vshll.u32 %v4339_v22, 16  ;;  %v2244_v22 = vrot.slane %v2242_v17, 4  ;;  %v3317_v49 = vrot.slane %v6410_v26, 5  ;;  %v2253_v50 = vrot.slane %v2251_v20, 5  ;;  %v4728_v3 = vld [vmem:[%s5880_s14 + $0x18] sm:$0xe] }
  0x85   : > { %5458 = vmatprep.subr.bf16.mxu1 %v5732_v14  ;;  %v907_v52 = vor.u32 %v906_v41, %v903_v23  ;;  %v4735_v23 = vrot.slane %v4727_v48, 9  ;;  %v6431_v41 = vld [vmem:[%s5880_s14 + $0x20] sm:$0xf]  ;;  %v2265_v54 = vshll.u32 %v4558_v44, 16  ;;  %v5750_v28 = vld [vmem:[%s6964_s1 + $0x308] sm:$0xff]   ;;  %v3172_v44 = vshll.u32 %v6410_v26, 16 }
  0x86   : > { %5259 = vmatmul.mubr.bf16.vlgmr.msra.gmra.mrb[0].mxu0 %v4357_v19  ;;  %v926_v57 = vrot.slane %v924_v7, 5  ;;  %v2245_v19 = vshll.u32 %v6395_v6, 16  ;;  %v3318_v37 = vsel %vm5917_vm4, %v4734_v45, %v3317_v49  ;;  %v4559_v7 = vld [vmem:[%s5880_s14 + $0x24] sm:$0x1]  ;;  %v6488_v48 = vld [vmem:[%s5880_s14 + $0x30] sm:$0xf] }
  0x87   : > { %5355 = vmatmul.mubr.bf16.vlgmr.msra.gmra.mrb[0].mxu1 %v4511_v61  ;;  %5363 = vmatpush3.bf16.msra.mxu0 %v5731_v39  ;;  %v908_v61 = vrot.slane %v907_v52, 4  ;;  %v5748_v20 = vld [vmem:[%s6964_s1 + $0x300] sm:$0xff]   ;;  %v5752_v45 = vld [vmem:[%s6964_s1 + $0x310] sm:$0xff]   ;;  %v4560_v49 = vld [vmem:[%s5880_s14 + $0x2c] sm:$0x1] }
  0x88   : > { %5459 = vmatpush3.bf16.msra.mxu1 %v5732_v14  ;;  %5364 = vmatprep.subr.bf16.mxu0 %v5733_v33  ;;  %v927_v63 = vsel %vm5927_vm5, %v922_v8, %v926_v57  ;;  %v2228_v14 = vshrl.u32 %v6392_v4, 16  ;;  %v2247_v12 = vrot.slane %v2245_v19, 5  ;;  %v2273_v57 = vshll.u32 %v6431_v41, 16  ;;  %v5759_v26 = vld [vmem:[%s6964_s1 + $0x230] sm:$0xff]  }
  0x89   : > { %5460 = vmatprep.subr.bf16.mxu1 %v5734_v34  ;;  %5262 = vmatprep.mubr.bf16.mxu0 %v4358_v51  ;;  %v913_v39 = vsel %vm5927_vm5, %v908_v61, %v912_v32  ;;  %v6445_v32 = vld [vmem:[%s5880_s14 + $0x24] sm:$0x1]  ;;  %v2270_v61 = vshrl.u32 %v6431_v41, 16  ;;  %v2279_v8 = vshll.u32 %v4559_v7, 16  ;;  %v3186_v7 = vshll.u32 %v6413_v27, 16 }
  0x8a   : > { %5358 = vmatprep.mubr.bf16.mxu1 %v4512_v25  ;;  %v4359_v0 = vcombine.low %v913_v39, %v927_v63  ;;  %v2230_v10 = vrot.slane %v2228_v14, 4  ;;  %v2248_v30 = vor.u32 %v2247_v12, %v2244_v22  ;;  %v6428_v25 = vld [vmem:[%s5880_s14 + $0x18] sm:$0xf]  ;;  %v2267_v39 = vrot.slane %v2265_v54, 5 }
  0x8b   : > { %5365 = vmatpush3.bf16.msra.mxu0 %v5733_v33  ;;  %v3321_v33 = vrot.slane %v6413_v27, 5  ;;  %v2259_v53 = vshll.u32 %v6428_v25, 16  ;;  %v2275_v63 = vrot.slane %v2273_v57, 5  ;;  %v2281_v13 = vrot.slane %v2279_v8, 5  ;;  %v4731_v57 = vld [vmem:[%s5880_s14 + $0x30] sm:$0xe] }
  0x8c   : > { %5461 = vmatpush3.bf16.msra.mxu1 %v5734_v34  ;;  %5366 = vmatprep.subr.bf16.mxu0 %v5735_v47  ;;  %v2234_v46 = vor.u32 %v2233_v21, %v2230_v10  ;;  %v2249_v42 = vrot.slane %v2248_v30, 4  ;;  %v3329_v14 = vrot.slane %v6445_v32, 5  ;;  %v5749_v21 = vld [vmem:[%s6964_s1 + $0x208] sm:$0xff]   ;;  %v4592_v27 = vcombine.low %v6392_v4, %v6395_v6 }
  0x8d   : > { %5462 = vmatprep.subr.bf16.mxu1 %v5736_v31  ;;  %v3322_v43 = vsel %vm5917_vm4, %v4735_v23, %v3321_v33  ;;  %v4561_v33 = vld [vmem:[%s5880_s14 + $0x34] sm:$0x1]  ;;  %v2293_v23 = vshll.u32 %v4560_v49, 16 }
  0x8e   : > { %5263 = vmatmul.mubr.bf16.gmra.mrb[4].mxu0 %v4359_v0  ;;  %v2235_v34 = vrot.slane %v2234_v46, 4  ;;  %v4758_v52 = vcombine.low %v3318_v37, %v3322_v43  ;;  %v2254_v40 = vsel %vm5927_vm5, %v2249_v42, %v2253_v50  ;;  %v4736_v0 = vrot.slane %v4728_v3, 9  ;;  %v6485_v46 = vld [vmem:[%s5880_s14 + $0x28] sm:$0xf]  ;;  %v5754_v3 = vld [vmem:[%s6964_s1 + $0x318] sm:$0xff]  }
  0x8f   : > { %5359 = vmatmul.mubr.bf16.gmra.mrb[4].mxu1 %v4513_v36  ;;  %5367 = vmatpush3.bf16.msra.mxu0 %v5735_v47  ;;  %v2256_v47 = vshrl.u32 %v6428_v25, 16  ;;  %v2261_v36 = vrot.slane %v2259_v53, 5  ;;  %v2284_v30 = vshrl.u32 %v6485_v46, 16  ;;  %v2287_v50 = vshll.u32 %v6485_v46, 16 }
  0x90   : > { %5463 = vmatpush3.bf16.msra.mxu1 %v5736_v31  ;;  %5368 = vmatprep.subr.bf16.mxu0 %v5737_v59  ;;  %v2240_v51 = vsel %vm5927_vm5, %v2235_v34, %v2239_v11  ;;  %v6442_v31 = vld [vmem:[%s5880_s14 + $0x1c] sm:$0x1]  ;;  %v2301_v34 = vshll.u32 %v6488_v48, 16  ;;  %v2307_v37 = vshll.u32 %v4561_v33, 16  ;;  %v4733_v33 = vld [vmem:[%s5880_s14 + $0x40] sm:$0xe] }
  0x91   : > { %5464 = vmatprep.subr.bf16.mxu1 %v5738_v62  ;;  %v2258_v56 = vrot.slane %v2256_v47, 4  ;;  %v4580_v58 = vcombine.low %v2240_v51, %v2254_v40  ;;  %5474 = vmatprep.mubr.bf16.mxu1 %v4758_v52  ;;  %v2286_v42 = vrot.slane %v2284_v30, 4  ;;  %v2289_v43 = vrot.slane %v2287_v50, 5  ;;  %v5753_v47 = vld [vmem:[%s6964_s1 + $0x218] sm:$0xff]   ;;  %v5757_v30 = vld [vmem:[%s6964_s1 + $0x228] sm:$0xff]  }
  0x92   : > { %v2295_v51 = vrot.slane %v2293_v23, 5  ;;  %v2303_v53 = vrot.slane %v2301_v34, 5  ;;  %v2309_v54 = vrot.slane %v2307_v37, 5  ;;  %v5758_v37 = vld [vmem:[%s6964_s1 + $0x328] sm:$0xff]  }
  0x93   : > { %5369 = vmatpush3.bf16.msra.mxu0 %v5737_v59  ;;  %v4729_v59 = vld [vmem:[%s5880_s14 + $0x20] sm:$0xe]  ;;  %5378 = vmatprep.mubr.bf16.mxu0 %v4580_v58  ;;  %v2290_v40 = vor.u32 %v2289_v43, %v2286_v42 }
  0x94   : > { %5465 = vmatpush3.bf16.msra.mxu1 %v5738_v62  ;;  %5370 = vmatprep.subr.bf16.mxu0 %v5739_v60  ;;  %v2272_v62 = vrot.slane %v2270_v61, 4  ;;  %v4737_v5 = vrot.slane %v4729_v59, 9  ;;  %v4730_v61 = vld [vmem:[%s5880_s14 + $0x28] sm:$0xe] }
  0x95   : > { %5466 = vmatprep.subr.bf16.mxu1 %v5740_v1  ;;  %v4738_v58 = vrot.slane %v4730_v61, 9  ;;  %v2291_v8 = vrot.slane %v2290_v40, 4 }
  0x96   : > { %v2276_v15 = vor.u32 %v2275_v63, %v2272_v62  ;;  %v3330_v19 = vsel %vm5917_vm4, %v4737_v5, %v3329_v14  ;;  %v6518_v62 = vld [vmem:[%s5880_s14 + $0x38] sm:$0xf]  ;;  %v5755_v63 = vld [vmem:[%s6964_s1 + $0x220] sm:$0xff]  }
  0x97   : > { %5371 = vmatpush3.bf16.msra.mxu0 %v5739_v60  ;;  %v3325_v60 = vrot.slane %v6442_v31, 5  ;;  %v2312_v5 = vshrl.u32 %v6518_v62, 16  ;;  %v2296_v14 = vsel %vm5927_vm5, %v2291_v8, %v2295_v51  ;;  %v4741_v51 = vrot.slane %v4733_v33, 9 }
  0x98   : > { %5467 = vmatpush3.bf16.msra.mxu1 %v5740_v1  ;;  %5372 = vmatprep.subr.bf16.mxu0 %v5741_v18  ;;  %v2262_v1 = vor.u32 %v2261_v36, %v2258_v56  ;;  %v6508_v56 = vld [vmem:[%s5880_s14 + $0x34] sm:$0x1] }
  0x99   : > { %5468 = vmatprep.subr.bf16.mxu1 %v5742_v9  ;;  %v3337_v59 = vrot.slane %v6508_v56, 5 }
  0x9a   : > { %v2263_v17 = vrot.slane %v2262_v1, 4  ;;  %v6526_v1 = vld [vmem:[%s5880_s14 + $0x40] sm:$0xf] }
  0x9b   : > { %5373 = vmatpush3.bf16.msra.mxu0 %v5741_v18  ;;  %v3326_v18 = vsel %vm5917_vm4, %v4736_v0, %v3325_v60 }
  0x9c   : > { %5469 = vmatpush3.bf16.msra.mxu1 %v5742_v9  ;;  %5374 = vmatprep.subr.bf16.mxu0 %v5743_v29  ;;  %v2277_v9 = vrot.slane %v2276_v15, 4  ;;  %v2268_v10 = vsel %vm5927_vm5, %v2263_v17, %v2267_v39  ;;  %v4759_v11 = vcombine.low %v3326_v18, %v3330_v19  ;;  %v4739_v39 = vrot.slane %v4731_v57, 9  ;;  %v6537_v19 = vld [vmem:[%s5880_s14 + $0x3c] sm:$0x1] }
  0x9d   : > { %5470 = vmatprep.subr.bf16.mxu1 %v5744_v24  ;;  %v2315_v17 = vshll.u32 %v6518_v62, 16  ;;  %v3341_v34 = vrot.slane %v6537_v19, 5 }
  0x9e   : > { %v2282_v22 = vsel %vm5927_vm5, %v2277_v9, %v2281_v13  ;;  %v4562_v13 = vld [vmem:[%s5880_s14 + $0x3c] sm:$0x1]  ;;  %v3338_v15 = vsel %vm5917_vm4, %v4739_v39, %v3337_v59 }
  0x9f   : > { %5375 = vmatpush3.bf16.msra.mxu0 %v5743_v29  ;;  %v4581_v12 = vcombine.low %v2268_v10, %v2282_v22  ;;  %v5751_v29 = vld [vmem:[%s6964_s1 + $0x210] sm:$0xff]   ;;  %v2321_v18 = vshll.u32 %v4562_v13, 16  ;;  %v2314_v10 = vrot.slane %v2312_v5, 4  ;;  %v6543_v22 = vld [vmem:[%s5880_s14 + $0x44] sm:$0x1] }
  0xa0   : > { %5471 = vmatpush3.bf16.msra.mxu1 %v5744_v24  ;;  %5376 = vmatprep.subr.bf16.mxu0 %v5745_v55  ;;  %v2298_v24 = vshrl.u32 %v6488_v48, 16  ;;  %v4700_v13 = vld [vmem:[%s5880_s14 + $0x20] sm:$0xf] }
  0xa1   : > { %5472 = vmatprep.subr.bf16.mxu1 %v5746_v2  ;;  %v2323_v49 = vrot.slane %v2321_v18, 5 }
  0xa2   : > { %v2300_v52 = vrot.slane %v2298_v24, 4 }
  0xa3   : > { %5377 = vmatpush3.bf16.msra.mxu0 %v5745_v55  ;;  %v6505_v55 = vld [vmem:[%s5880_s14 + $0x2c] sm:$0x1] }
  0xa4   : > { %5473 = vmatpush3.bf16.msra.mxu1 %v5746_v2  ;;  %5386 = vmatprep.subr.bf16.mxu0 %v5747_v16  ;;  %v2304_v2 = vor.u32 %v2303_v53, %v2300_v52  ;;  %v3333_v36 = vrot.slane %v6505_v55, 5  ;;  %v3345_v52 = vrot.slane %v6543_v22, 5 }
  0xa5   : > { %5482 = vmatprep.subr.bf16.mxu1 %v5748_v20 }
  0xa6   : > { %5379 = vmatmul.mubr.bf16.vlgmr.msra.gmra.mrb[8].mxu0 %v4581_v12  ;;  %v2305_v0 = vrot.slane %v2304_v2, 4  ;;  %v3334_v60 = vsel %vm5917_vm4, %v4738_v58, %v3333_v36  ;;  %v5756_v12 = vld [vmem:[%s6964_s1 + $0x320] sm:$0xff]   ;;  %v3346_v57 = vsel %vm5917_vm4, %v4741_v51, %v3345_v52  ;;  %v3188_v2 = vrot.slane %v3186_v7, 5  ;;  %v4694_v58 = vld [vmem:[%s5880_s14 + $0x8] sm:$0xf] }
  0xa7   : > { %5387 = vmatpush3.bf16.msra.mxu0 %v5747_v16  ;;  %5475 = vmatmul.mubr.bf16.vlgmr.msra.gmra.mrb[8].mxu1 %v4759_v11  ;;  %v4563_v16 = vld [vmem:[%s5880_s14 + $0x44] sm:$0x1]  ;;  %v4760_v9 = vcombine.low %v3334_v60, %v3338_v15  ;;  %v4732_v11 = vld [vmem:[%s5880_s14 + $0x38] sm:$0xe]  ;;  %v4696_v36 = vld [vmem:[%s5880_s14 + $0x10] sm:$0xf] }
  0xa8   : > { %5483 = vmatpush3.bf16.msra.mxu1 %v5748_v20  ;;  %5388 = vmatprep.subr.bf16.mxu0 %v5749_v21  ;;  %v2310_v20 = vsel %vm5927_vm5, %v2305_v0, %v2309_v54  ;;  %v2335_v23 = vshll.u32 %v4563_v16, 16  ;;  %v4740_v24 = vrot.slane %v4732_v11, 9  ;;  %v3163_v8 = vshrl.u32 %v4694_v58, 16  ;;  %v4698_v60 = vld [vmem:[%s5880_s14 + $0x18] sm:$0xf] }
  0xa9   : > { %5484 = vmatprep.subr.bf16.mxu1 %v5750_v28  ;;  %5478 = vmatprep.mubr.bf16.mxu1 %v4760_v9  ;;  %v3166_v59 = vshll.u32 %v4694_v58, 16  ;;  %v3177_v7 = vshrl.u32 %v4696_v36, 16  ;;  %v3180_v0 = vshll.u32 %v4696_v36, 16  ;;  %v3191_v16 = vshrl.u32 %v4698_v60, 16  ;;  %v5761_v11 = vld [vmem:[%s6964_s1 + $0x238] sm:$0xff]   ;;  %v5769_v58 = vld [vmem:[%s6964_s1 + $0x290] sm:$0xff]  }
  0xaa   : > { %v2337_v53 = vrot.slane %v2335_v23, 5  ;;  %v3342_v54 = vsel %vm5917_vm4, %v4740_v24, %v3341_v34  ;;  %v3194_v4 = vshll.u32 %v4698_v60, 16  ;;  %v4702_v36 = vld [vmem:[%s5880_s14 + $0x28] sm:$0xf] }
  0xab   : > { %5389 = vmatpush3.bf16.msra.mxu0 %v5749_v21  ;;  %v2326_v21 = vshrl.u32 %v6526_v1, 16  ;;  %v3168_v15 = vrot.slane %v3166_v59, 5  ;;  %v3179_v18 = vrot.slane %v3177_v7, 4  ;;  %v3193_v9 = vrot.slane %v3191_v16, 4  ;;  %v4706_v7 = vld [vmem:[%s5880_s14 + $0x38] sm:$0xf] }
  0xac   : > { %5485 = vmatpush3.bf16.msra.mxu1 %v5750_v28  ;;  %5390 = vmatprep.subr.bf16.mxu0 %v5751_v29  ;;  %v4582_v28 = vcombine.low %v2296_v14, %v2310_v20  ;;  %v3165_v14 = vrot.slane %v3163_v8, 4  ;;  %v3182_v20 = vrot.slane %v3180_v0, 5  ;;  %v3219_v8 = vshrl.u32 %v4702_v36, 16  ;;  %v4708_v0 = vld [vmem:[%s5880_s14 + $0x40] sm:$0xf] }
  0xad   : > { %5486 = vmatprep.subr.bf16.mxu1 %v5752_v45  ;;  %v2328_v50 = vrot.slane %v2326_v21, 4  ;;  %v3205_v21 = vshrl.u32 %v4700_v13, 16  ;;  %v3222_v59 = vshll.u32 %v4702_v36, 16  ;;  %v3256_v16 = vshll.u32 %v6537_v19, 16 }
  0xae   : > { %5382 = vmatprep.mubr.bf16.mxu0 %v4582_v28  ;;  %v3169_v6 = vor.u32 %v3168_v15, %v3165_v14  ;;  %v3196_v28 = vrot.slane %v3194_v4, 5  ;;  %v3221_v60 = vrot.slane %v3219_v8, 4  ;;  %v3247_v14 = vshrl.u32 %v4706_v7, 16  ;;  %v6673_v8 = vld [vmem:[%s5880_s14 + $0x24] sm:$0x1] }
  0xaf   : > { %5391 = vmatpush3.bf16.msra.mxu0 %v5751_v29  ;;  %v2317_v29 = vrot.slane %v2315_v17, 5  ;;  %v3250_v15 = vshll.u32 %v4706_v7, 16  ;;  %v3270_v4 = vshll.u32 %v6543_v22, 16  ;;  %v5773_v22 = vld [vmem:[%s6964_s1 + $0x2a0] sm:$0xff]  }
  0xb0   : > { %5487 = vmatpush3.bf16.msra.mxu1 %v5752_v45  ;;  %5392 = vmatprep.subr.bf16.mxu0 %v5753_v47  ;;  %v2329_v45 = vshll.u32 %v6526_v1, 16  ;;  %v3170_v33 = vrot.slane %v3169_v6, 4  ;;  %v3197_v23 = vor.u32 %v3196_v28, %v3193_v9  ;;  %v5772_v6 = vld [vmem:[%s6964_s1 + $0x398] sm:$0xff]   ;;  %v3249_v9 = vrot.slane %v3247_v14, 4 }
  0xb1   : > { %5488 = vmatprep.subr.bf16.mxu1 %v5754_v3  ;;  %v2318_v42 = vor.u32 %v2317_v29, %v2314_v10  ;;  %v3200_v10 = vshll.u32 %v6442_v31, 16  ;;  %v3208_v29 = vshll.u32 %v4700_v13, 16  ;;  %v3207_v31 = vrot.slane %v3205_v21, 4 }
  0xb2   : > { %v2331_v43 = vrot.slane %v2329_v45, 5  ;;  %v5762_v45 = vld [vmem:[%s6964_s1 + $0x338] sm:$0xff]   ;;  %v3224_v13 = vrot.slane %v3222_v59, 5  ;;  %v3252_v19 = vrot.slane %v3250_v15, 5  ;;  %v5778_v59 = vld [vmem:[%s6964_s1 + $0x2b0] sm:$0xff]  }
  0xb3   : > { %5393 = vmatpush3.bf16.msra.mxu0 %v5753_v47  ;;  %v6563_v47 = vrot.slane %v3172_v44, 5  ;;  %v2319_v40 = vrot.slane %v2318_v42, 4  ;;  %v3202_v24 = vrot.slane %v3200_v10, 5  ;;  %v3210_v34 = vrot.slane %v3208_v29, 5 }
  0xb4   : > { %5489 = vmatpush3.bf16.msra.mxu1 %v5754_v3  ;;  %5394 = vmatprep.subr.bf16.mxu0 %v5755_v63  ;;  %v2332_v61 = vor.u32 %v2331_v43, %v2328_v50  ;;  %v4761_v3 = vcombine.low %v3342_v54, %v3346_v57  ;;  %v3198_v43 = vrot.slane %v3197_v23, 4  ;;  %v4593_v54 = vcombine.low %v6428_v25, %v6431_v41  ;;  %v4782_v23 = vld [vmem:[%s5880_s14 + $0x10] sm:$0xf] }
  0xb5   : > { %5490 = vmatprep.subr.bf16.mxu1 %v5756_v12  ;;  %v2324_v44 = vsel %vm5927_vm5, %v2319_v40, %v2323_v49  ;;  %v3214_v49 = vshll.u32 %v6445_v32, 16  ;;  %v3175_v32 = vsel %vm5927_vm5, %v3170_v33, %v6563_v47  ;;  %v3211_v51 = vor.u32 %v3210_v34, %v3207_v31 }
  0xb6   : > { %v2333_v39 = vrot.slane %v2332_v61, 4  ;;  %5479 = vmatmul.mubr.bf16.gmra.mrb[12].mxu1 %v4761_v3  ;;  %v3203_v47 = vsel %vm5927_vm5, %v3198_v43, %v3202_v24  ;;  %v3228_v61 = vshll.u32 %v6505_v55, 16  ;;  %v3242_v25 = vshll.u32 %v6508_v56, 16  ;;  %v5768_v3 = vld [vmem:[%s6964_s1 + $0x388] sm:$0xff]  }
  0xb7   : > { %5395 = vmatpush3.bf16.msra.mxu0 %v5755_v63  ;;  %v5760_v63 = vld [vmem:[%s6964_s1 + $0x330] sm:$0xff]   ;;  %v3216_v52 = vrot.slane %v3214_v49, 5  ;;  %v3212_v40 = vrot.slane %v3211_v51, 4  ;;  %v4594_v55 = vcombine.low %v6485_v46, %v6488_v48  ;;  %v3253_v29 = vor.u32 %v3252_v19, %v3249_v9  ;;  %v6657_v51 = vld [vmem:[%s5880_s14 + $0x1c] sm:$0x1] }
  0xb8   : > { %5491 = vmatpush3.bf16.msra.mxu1 %v5756_v12  ;;  %5396 = vmatprep.subr.bf16.mxu0 %v5757_v30  ;;  %v2338_v5 = vsel %vm5927_vm5, %v2333_v39, %v2337_v53  ;;  %v3183_v12 = vor.u32 %v3182_v20, %v3179_v18  ;;  %v3244_v56 = vrot.slane %v3242_v25, 5  ;;  %v5770_v39 = vld [vmem:[%s6964_s1 + $0x390] sm:$0xff]   ;;  %v5771_v18 = vld [vmem:[%s6964_s1 + $0x298] sm:$0xff]   ;;  %v3225_v20 = vor.u32 %v3224_v13, %v3221_v60 }
  0xb9   : > { %5492 = vmatprep.subr.bf16.mxu1 %v5758_v37  ;;  %v4583_v17 = vcombine.low %v2324_v44, %v2338_v5  ;;  %v3217_v57 = vsel %vm5927_vm5, %v3212_v40, %v3216_v52  ;;  %v3230_v44 = vrot.slane %v3228_v61, 5  ;;  %v5783_v49 = vld [vmem:[%s5880_s14 + $0x10] ss:$8 sps:$4 sm:$0xff]   ;;  %v3254_v34 = vrot.slane %v3253_v29, 4  ;;  %v5784_v29 = vld [vmem:[%s6964_s1 + $0x2c0] sm:$0xff]  }
  0xba   : > { %v3184_v50 = vrot.slane %v3183_v12, 4  ;;  %v4771_v41 = vcombine.low %v3203_v47, %v3217_v57  ;;  %v3226_v21 = vrot.slane %v3225_v20, 4  ;;  %v3258_v12 = vrot.slane %v3256_v16, 5 }
  0xbb   : > { %5397 = vmatpush3.bf16.msra.mxu0 %v5757_v30  ;;  %v5764_v30 = vld [vmem:[%s6964_s1 + $0x280] sm:$0xff]   ;;  %v3642_v52 = vshll.u32 %v4782_v23, 16  ;;  %v3662_v57 = vshll.u32 %v6657_v51, 16  ;;  %v3676_v13 = vshll.u32 %v6673_v8, 16 }
  0xbc   : > { %5493 = vmatpush3.bf16.msra.mxu1 %v5758_v37  ;;  %5398 = vmatprep.subr.bf16.mxu0 %v5759_v26  ;;  %v5765_v37 = vld [vmem:[%s6964_s1 + $0x380] sm:$0xff]   ;;  %v3189_v42 = vsel %vm5927_vm5, %v3184_v50, %v3188_v2  ;;  %v5767_v2 = vld [vmem:[%s6964_s1 + $0x288] sm:$0xff]   ;;  %v3231_v33 = vsel %vm5927_vm5, %v3226_v21, %v3230_v44  ;;  %v3272_v50 = vrot.slane %v3270_v4, 5  ;;  %v3259_v47 = vsel %vm5927_vm5, %v3254_v34, %v3258_v12  ;;  %v5781_v4 = vld [vmem:[%s6964_s1 + $0x2b8] sm:$0xff]  }
  0xbd   : > { %5494 = vmatprep.subr.bf16.mxu1 %v5760_v63  ;;  %5383 = vmatmul.mubr.bf16.gmra.mrb[12].mxu0 %v4583_v17  ;;  %v4770_v53 = vcombine.low %v3175_v32, %v3189_v42  ;;  %v3261_v17 = vshrl.u32 %v4708_v0, 16  ;;  %v6653_v32 = vld [vmem:[%s5880_s14 + $0x14] sm:$0x1]  ;;  %v3639_v42 = vshrl.u32 %v4782_v23, 16  ;;  %v3678_v19 = vrot.slane %v3676_v13, 5  ;;  %v5788_v23 = vld [vmem:[%s6964_s1 + $0x3c8] sm:$0xff]  }
  0xbe   : > { %5402 = vmatprep.mubr.bf16.mxu0 %v4592_v27  ;;  %v4595_v27 = vcombine.low %v6518_v62, %v6526_v1  ;;  %v3264_v1 = vshll.u32 %v4708_v0, 16  ;;  %v4790_v34 = vld [vmem:[%s5880_s14 + $0x30] sm:$0xf]  ;;  %v6742_v13 = vld [vmem:[%s5880_s14 + $0x4c] sm:$0x1] }
  0xbf   : > { %5399 = vmatpush3.bf16.msra.mxu0 %v5759_v26  ;;  %5498 = vmatprep.mubr.bf16.mxu1 %v4770_v53  ;;  %v4704_v26 = vld [vmem:[%s5880_s14 + $0x30] sm:$0xf]  ;;  %v3263_v10 = vrot.slane %v3261_v17, 4  ;;  %v3648_v53 = vshll.u32 %v6653_v32, 16  ;;  %v3641_v40 = vrot.slane %v3639_v42, 4 }
  0xc0   : > { %5495 = vmatpush3.bf16.msra.mxu1 %v5760_v63  ;;  %5400 = vmatprep.subr.bf16.mxu0 %v5761_v11  ;;  %v3233_v46 = vshrl.u32 %v4704_v26, 16  ;;  %v3236_v48 = vshll.u32 %v4704_v26, 16  ;;  %v3266_v28 = vrot.slane %v3264_v1, 5  ;;  %v4792_v42 = vld [vmem:[%s5880_s14 + $0x38] sm:$0xf] }
  0xc1   : > { %5496 = vmatprep.subr.bf16.mxu1 %v5762_v45  ;;  %v3650_v44 = vrot.slane %v3648_v53, 5  ;;  %v3698_v53 = vshll.u32 %v4790_v34, 16 }
  0xc2   : > { %v3235_v63 = vrot.slane %v3233_v46, 4  ;;  %v3238_v5 = vrot.slane %v3236_v48, 5  ;;  %v4788_v48 = vld [vmem:[%s5880_s14 + $0x28] sm:$0xf] }
  0xc3   : > { %5401 = vmatpush3.bf16.msra.mxu0 %v5761_v11 }
  0xc4   : > { %5497 = vmatpush3.bf16.msra.mxu1 %v5762_v45  ;;  %5410 = vmatprep.subr.bf16.mxu0 %v5764_v30  ;;  %v3239_v62 = vor.u32 %v3238_v5, %v3235_v63  ;;  %v5774_v45 = vld [vmem:[%s6964_s1 + $0x3a0] sm:$0xff]   ;;  %v3681_v63 = vshrl.u32 %v4788_v48, 16  ;;  %v3684_v5 = vshll.u32 %v4788_v48, 16 }
  0xc5   : > { %5506 = vmatprep.subr.bf16.mxu1 %v5765_v37  ;;  %v4794_v48 = vld [vmem:[%s5880_s14 + $0x40] sm:$0xf] }
  0xc6   : > { %5403 = vmatmul.mubr.bf16.vlgmr.msra.gmra.mrb[8].mxu0 %v4593_v54  ;;  %v3240_v11 = vrot.slane %v3239_v62, 4  ;;  %v3683_v62 = vrot.slane %v3681_v63, 4  ;;  %v3686_v1 = vrot.slane %v3684_v5, 5  ;;  %v3723_v5 = vshrl.u32 %v4794_v48, 16 }
  0xc7   : > { %5411 = vmatpush3.bf16.msra.mxu0 %v5764_v30  ;;  %5499 = vmatmul.mubr.bf16.vlgmr.msra.gmra.mrb[8].mxu1 %v4771_v41  ;;  %v3267_v30 = vor.u32 %v3266_v28, %v3263_v10  ;;  %v3644_v41 = vrot.slane %v3642_v52, 5  ;;  %v5782_v28 = vld [vmem:[%s6964_s1 + $0x3b8] sm:$0xff]   ;;  %v3695_v52 = vshrl.u32 %v4790_v34, 16 }
  0xc8   : > { %5507 = vmatpush3.bf16.msra.mxu1 %v5765_v37  ;;  %5412 = vmatprep.subr.bf16.mxu0 %v5767_v2  ;;  %v3245_v31 = vsel %vm5927_vm5, %v3240_v11, %v3244_v56  ;;  %v4784_v37 = vld [vmem:[%s5880_s14 + $0x18] sm:$0xf]  ;;  %v3664_v56 = vrot.slane %v3662_v57, 5  ;;  %v3687_v21 = vor.u32 %v3686_v1, %v3683_v62  ;;  %v5789_v57 = vld [vmem:[%s6964_s1 + $0x2d0] sm:$0xff]   ;;  %v4643_v34 = vld [vmem:[%s5880_s14 + $0x1c] sm:$0x1] }
  0xc9   : > { %5508 = vmatprep.subr.bf16.mxu1 %v5768_v3  ;;  %5406 = vmatprep.mubr.bf16.mxu0 %v4594_v55  ;;  %v4772_v24 = vcombine.low %v3231_v33, %v3245_v31  ;;  %v3268_v43 = vrot.slane %v3267_v30, 4  ;;  %v3653_v54 = vshrl.u32 %v4784_v37, 16  ;;  %v3656_v61 = vshll.u32 %v4784_v37, 16  ;;  %v5776_v55 = vld [vmem:[%s6964_s1 + $0x3a8] sm:$0xff]   ;;  %v5785_v33 = vld [vmem:[%s6964_s1 + $0x3c0] sm:$0xff]   ;;  %v5791_v62 = vld [vmem:[%s6964_s1 + $0x2d8] sm:$0xff]  }
  0xca   : > { %v3645_v26 = vor.u32 %v3644_v41, %v3641_v40  ;;  %v5786_v31 = vld [vmem:[%s5880_s14 + $0x20] ss:$8 sps:$4 sm:$0xff]   ;;  %v6717_v37 = vld [vmem:[%s5880_s14 + $0x34] sm:$0x1]  ;;  %v3712_v40 = vshll.u32 %v4792_v42, 16  ;;  %v3930_v41 = vrot.slane %v6653_v32, 5 }
  0xcb   : > { %5413 = vmatpush3.bf16.msra.mxu0 %v5767_v2  ;;  %5502 = vmatprep.mubr.bf16.mxu1 %v4772_v24  ;;  %v5775_v2 = vld [vmem:[%s6964_s1 + $0x2a8] sm:$0xff]   ;;  %v3273_v25 = vsel %vm5927_vm5, %v3268_v43, %v3272_v50  ;;  %v3658_v36 = vrot.slane %v3656_v61, 5  ;;  %v5797_v24 = vld [vmem:[%s5880_s14 + $0x30] ss:$8 sps:$4 sm:$0xff]   ;;  %v6721_v43 = vld [vmem:[%s5880_s14 + $0x3c] sm:$0x1] }
  0xcc   : > { %5509 = vmatpush3.bf16.msra.mxu1 %v5768_v3  ;;  %5414 = vmatprep.subr.bf16.mxu0 %v5769_v58  ;;  %v3655_v3 = vrot.slane %v3653_v54, 4  ;;  %v3646_v60 = vrot.slane %v3645_v26, 4  ;;  %v5787_v30 = vld [vmem:[%s6964_s1 + $0x2c8] sm:$0xff]   ;;  %v3704_v54 = vshll.u32 %v6717_v37, 16  ;;  %v3718_v61 = vshll.u32 %v6721_v43, 16  ;;  %v5799_v32 = vld [vmem:[%s6964_s1 + $0x2f0] sm:$0xff]  }
  0xcd   : > { %5510 = vmatprep.subr.bf16.mxu1 %v5770_v39  ;;  %v3938_v26 = vrot.slane %v6673_v8, 5  ;;  %v5802_v8 = vld [vmem:[%s6964_s1 + $0x3f8] sm:$0xff]  }
  0xce   : > { %5407 = vmatmul.mubr.bf16.gmra.mrb[12].mxu0 %v4595_v27  ;;  %v3659_v46 = vor.u32 %v3658_v36, %v3655_v3  ;;  %v6680_v27 = vld [vmem:[%s5880_s14 + $0x2c] sm:$0x1]  ;;  %v3651_v20 = vsel %vm5927_vm5, %v3646_v60, %v3650_v44  ;;  %v3934_v3 = vrot.slane %v6657_v51, 5  ;;  %v3714_v36 = vrot.slane %v3712_v40, 5  ;;  %v4796_v60 = vld [vmem:[%s5880_s14 + $0x48] sm:$0xf] }
  0xcf   : > { %5415 = vmatpush3.bf16.msra.mxu0 %v5769_v58  ;;  %5426 = vmatprep.mubr.bf16.mxu0 %v5783_v49  ;;  %v4773_v58 = vcombine.low %v3259_v47, %v3273_v25  ;;  %v3690_v17 = vshll.u32 %v6680_v27, 16  ;;  %v3709_v47 = vshrl.u32 %v4792_v42, 16  ;;  %v3700_v25 = vrot.slane %v3698_v53, 5 }
  0xd0   : > { %5511 = vmatpush3.bf16.msra.mxu1 %v5770_v39  ;;  %5416 = vmatprep.subr.bf16.mxu0 %v5771_v18  ;;  %v4786_v39 = vld [vmem:[%s5880_s14 + $0x20] sm:$0xf]  ;;  %v3660_v14 = vrot.slane %v3659_v46, 4  ;;  %v3942_v44 = vrot.slane %v6680_v27, 5 }
  0xd1   : > { %5512 = vmatprep.subr.bf16.mxu1 %v5772_v6  ;;  %5503 = vmatmul.mubr.bf16.gmra.mrb[12].mxu1 %v4773_v58  ;;  %v3667_v7 = vshrl.u32 %v4786_v39, 16  ;;  %v3670_v0 = vshll.u32 %v4786_v39, 16  ;;  %v3692_v12 = vrot.slane %v3690_v17, 5  ;;  %v3711_v58 = vrot.slane %v3709_v47, 4  ;;  %v5798_v46 = vld [vmem:[%s5880_s14 + $0x40] ss:$8 sps:$4 sm:$0xff]  }
  0xd2   : > { %v3706_v39 = vrot.slane %v3704_v54, 5  ;;  %v3737_v17 = vshrl.u32 %v4796_v60, 16 }
  0xd3   : > { %5417 = vmatpush3.bf16.msra.mxu0 %v5771_v18  ;;  %v3669_v15 = vrot.slane %v3667_v7, 4  ;;  %v3672_v16 = vrot.slane %v3670_v0, 5  ;;  %v5779_v18 = vld [vmem:[%s6964_s1 + $0x3b0] sm:$0xff]   ;;  %v3715_v7 = vor.u32 %v3714_v36, %v3711_v58  ;;  %v6738_v0 = vld [vmem:[%s5880_s14 + $0x44] sm:$0x1] }
  0xd4   : > { %5513 = vmatpush3.bf16.msra.mxu1 %v5772_v6  ;;  %5418 = vmatprep.subr.bf16.mxu0 %v5773_v22  ;;  %v3665_v6 = vsel %vm5927_vm5, %v3660_v14, %v3664_v56  ;;  %v3726_v14 = vshll.u32 %v4794_v48, 16  ;;  %v4827_v36 = vld [vmem:[%s5880_s14 + $0x18] sm:$0xe] }
  0xd5   : > { %5514 = vmatprep.subr.bf16.mxu1 %v5774_v45  ;;  %v3673_v9 = vor.u32 %v3672_v16, %v3669_v15  ;;  %v4814_v10 = vcombine.low %v3651_v20, %v3665_v6  ;;  %v3732_v15 = vshll.u32 %v6738_v0, 16  ;;  %v3716_v16 = vrot.slane %v3715_v7, 4  ;;  %v4644_v7 = vld [vmem:[%s5880_s14 + $0x20] sm:$0xf] }
  0xd6   : > { %v3746_v20 = vshll.u32 %v6742_v13, 16  ;;  %v3728_v6 = vrot.slane %v3726_v14, 5  ;;  %v4835_v14 = vrot.slane %v4827_v36, 9 }
  0xd7   : > { %5419 = vmatpush3.bf16.msra.mxu0 %v5773_v22  ;;  %v3674_v11 = vrot.slane %v3673_v9, 4  ;;  %5522 = vmatprep.mubr.bf16.mxu1 %v4814_v10  ;;  %v3688_v22 = vrot.slane %v3687_v21, 4  ;;  %v3946_v9 = vrot.slane %v6717_v37, 5  ;;  %v3734_v21 = vrot.slane %v3732_v15, 5  ;;  %v4645_v15 = vld [vmem:[%s5880_s14 + $0x24] sm:$0x1] }
  0xd8   : > { %5515 = vmatpush3.bf16.msra.mxu1 %v5774_v45  ;;  %5420 = vmatprep.subr.bf16.mxu0 %v5775_v2 }
  0xd9   : > { %5516 = vmatprep.subr.bf16.mxu1 %v5776_v55  ;;  %v3679_v49 = vsel %vm5927_vm5, %v3674_v11, %v3678_v19  ;;  %v3693_v45 = vsel %vm5927_vm5, %v3688_v22, %v3692_v12  ;;  %v5792_v19 = vld [vmem:[%s6964_s1 + $0x3d8] sm:$0xff]   ;;  %v3739_v11 = vrot.slane %v3737_v17, 4  ;;  %v5796_v17 = vld [vmem:[%s6964_s1 + $0x3e8] sm:$0xff]  }
  0xda   : > { %v4815_v50 = vcombine.low %v3679_v49, %v3693_v45  ;;  %v3748_v49 = vrot.slane %v3746_v20, 5  ;;  %v3950_v45 = vrot.slane %v6721_v43, 5  ;;  %v4647_v20 = vld [vmem:[%s5880_s14 + $0x2c] sm:$0x1] }
  0xdb   : > { %5421 = vmatpush3.bf16.msra.mxu0 %v5775_v2  ;;  %v3697_v2 = vrot.slane %v3695_v52, 4 }
  0xdc   : > { %5517 = vmatpush3.bf16.msra.mxu1 %v5776_v55  ;;  %5422 = vmatprep.subr.bf16.mxu0 %v5778_v59  ;;  %v5790_v55 = vld [vmem:[%s6964_s1 + $0x3d0] sm:$0xff]  }
  0xdd   : > { %5518 = vmatprep.subr.bf16.mxu1 %v5779_v18  ;;  %v3701_v56 = vor.u32 %v3700_v25, %v3697_v2 }
  0xdf   : > { %5423 = vmatpush3.bf16.msra.mxu0 %v5778_v59  ;;  %v3720_v59 = vrot.slane %v3718_v61, 5  ;;  %v3702_v63 = vrot.slane %v3701_v56, 4  ;;  %v2833_v61 = vshll.u32 %v4643_v34, 16  ;;  %v5795_v56 = vld [vmem:[%s6964_s1 + $0x2e8] sm:$0xff]  }
  0xe0   : > { %5519 = vmatpush3.bf16.msra.mxu1 %v5779_v18  ;;  %5424 = vmatprep.subr.bf16.mxu0 %v5781_v4  ;;  %v3740_v18 = vshll.u32 %v4796_v60, 16 }
  0xe1   : > { %5520 = vmatprep.subr.bf16.mxu1 %v5782_v28  ;;  %v3707_v1 = vsel %vm5927_vm5, %v3702_v63, %v3706_v39  ;;  %v3721_v10 = vsel %vm5927_vm5, %v3716_v16, %v3720_v59  ;;  %v2835_v48 = vrot.slane %v2833_v61, 5  ;;  %v4646_v16 = vld [vmem:[%s5880_s14 + $0x28] sm:$0xf]  ;;  %v5801_v61 = vld [vmem:[%s6964_s1 + $0x2f8] sm:$0xff]  }
  0xe2   : > { %v3742_v12 = vrot.slane %v3740_v18, 5  ;;  %v4816_v22 = vcombine.low %v3707_v1, %v3721_v10  ;;  %v2841_v1 = vshll.u32 %v4644_v7, 16  ;;  %v3935_v10 = vsel %vm5917_vm4, %v4835_v14, %v3934_v3 }
  0xe3   : > { %5425 = vmatpush3.bf16.msra.mxu0 %v5781_v4  ;;  %v3725_v4 = vrot.slane %v3723_v5, 4 }
  0xe4   : > { %5521 = vmatpush3.bf16.msra.mxu1 %v5782_v28  ;;  %5434 = vmatprep.subr.bf16.mxu0 %v5784_v29  ;;  %v5793_v28 = vld [vmem:[%s6964_s1 + $0x2e0] sm:$0xff]  }
  0xe5   : > { %5530 = vmatprep.subr.bf16.mxu1 %v5785_v33 }
  0xe6   : > { %5427 = vmatmul.mubr.bf16.vlgmr.msra.gmra.mrb[8].mxu0 %v5786_v31  ;;  %v3743_v31 = vor.u32 %v3742_v12, %v3739_v11  ;;  %v4828_v11 = vld [vmem:[%s5880_s14 + $0x20] sm:$0xe]  ;;  %v4829_v12 = vld [vmem:[%s5880_s14 + $0x28] sm:$0xe] }
  0xe7   : > { %5435 = vmatpush3.bf16.msra.mxu0 %v5784_v29  ;;  %5523 = vmatmul.mubr.bf16.vlgmr.msra.gmra.mrb[8].mxu1 %v4815_v50  ;;  %v3729_v29 = vor.u32 %v3728_v6, %v3725_v4  ;;  %v4641_v50 = vld [vmem:[%s5880_s14 + $0x14] sm:$0x1]  ;;  %v2847_v4 = vshll.u32 %v4645_v15, 16  ;;  %v4836_v34 = vrot.slane %v4828_v11, 9 }
  0xe8   : > { %5531 = vmatpush3.bf16.msra.mxu1 %v5785_v33  ;;  %5436 = vmatprep.subr.bf16.mxu0 %v5787_v30  ;;  %v5794_v33 = vld [vmem:[%s6964_s1 + $0x3e0] sm:$0xff]   ;;  %v2819_v53 = vshll.u32 %v4641_v50, 16  ;;  %v3744_v54 = vrot.slane %v3743_v31, 4  ;;  %v2843_v31 = vrot.slane %v2841_v1, 5  ;;  %v2855_v50 = vshll.u32 %v4646_v16, 16 }
  0xe9   : > { %5532 = vmatprep.subr.bf16.mxu1 %v5788_v23  ;;  %5430 = vmatprep.mubr.bf16.mxu0 %v5797_v24  ;;  %v3730_v24 = vrot.slane %v3729_v29, 4 }
  0xea   : > { %5526 = vmatprep.mubr.bf16.mxu1 %v4816_v22  ;;  %v2821_v58 = vrot.slane %v2819_v53, 5  ;;  %v3749_v39 = vsel %vm5927_vm5, %v3744_v54, %v3748_v49  ;;  %v2857_v53 = vrot.slane %v2855_v50, 5  ;;  %v4837_v54 = vrot.slane %v4829_v12, 9 }
  0xeb   : > { %5437 = vmatpush3.bf16.msra.mxu0 %v5787_v30  ;;  %v4640_v30 = vld [vmem:[%s5880_s14 + $0x10] sm:$0xf]  ;;  %v3735_v2 = vsel %vm5927_vm5, %v3730_v24, %v3734_v21  ;;  %v2852_v21 = vshrl.u32 %v4646_v16, 16  ;;  %v2861_v24 = vshll.u32 %v4647_v20, 16 }
  0xec   : > { %5533 = vmatpush3.bf16.msra.mxu1 %v5788_v23  ;;  %5438 = vmatprep.subr.bf16.mxu0 %v5789_v57  ;;  %v4642_v23 = vld [vmem:[%s5880_s14 + $0x18] sm:$0xf]  ;;  %v2810_v42 = vshrl.u32 %v4640_v30, 16  ;;  %v2813_v52 = vshll.u32 %v4640_v30, 16  ;;  %v4817_v60 = vcombine.low %v3735_v2, %v3749_v39  ;;  %v4648_v30 = vld [vmem:[%s5880_s14 + $0x30] sm:$0xf] }
  0xed   : > { %5534 = vmatprep.subr.bf16.mxu1 %v5790_v55  ;;  %v2824_v47 = vshrl.u32 %v4642_v23, 16  ;;  %v2827_v40 = vshll.u32 %v4642_v23, 16  ;;  %v2854_v3 = vrot.slane %v2852_v21, 4  ;;  %v2863_v2 = vrot.slane %v2861_v24, 5 }
  0xee   : > { %5431 = vmatmul.mubr.bf16.gmra.mrb[12].mxu0 %v5798_v46  ;;  %v2812_v25 = vrot.slane %v2810_v42, 4  ;;  %v4649_v42 = vld [vmem:[%s5880_s14 + $0x34] sm:$0x1] }
  0xef   : > { %5439 = vmatpush3.bf16.msra.mxu0 %v5789_v57  ;;  %v4826_v57 = vld [vmem:[%s5880_s14 + $0x10] sm:$0xe]  ;;  %v2826_v59 = vrot.slane %v2824_v47, 4  ;;  %v2829_v46 = vrot.slane %v2827_v40, 5  ;;  %5527 = vmatmul.mubr.bf16.gmra.mrb[12].mxu1 %v4817_v60  ;;  %v4650_v47 = vld [vmem:[%s5880_s14 + $0x38] sm:$0xf]  ;;  %v2858_v36 = vor.u32 %v2857_v53, %v2854_v3 }
  0xf0   : > { %5535 = vmatpush3.bf16.msra.mxu1 %v5790_v55  ;;  %5440 = vmatprep.subr.bf16.mxu0 %v5791_v62  ;;  %v2815_v55 = vrot.slane %v2813_v52, 5  ;;  %v4834_v5 = vrot.slane %v4826_v57, 9  ;;  %v2866_v40 = vshrl.u32 %v4648_v30, 16  ;;  %v2880_v60 = vshrl.u32 %v4650_v47, 16 }
  0xf1   : > { %5536 = vmatprep.subr.bf16.mxu1 %v5792_v19  ;;  %v2830_v18 = vor.u32 %v2829_v46, %v2826_v59  ;;  %v2875_v59 = vshll.u32 %v4649_v42, 16  ;;  %v4830_v46 = vld [vmem:[%s5880_s14 + $0x30] sm:$0xe]  ;;  %v2883_v14 = vshll.u32 %v4650_v47, 16 }
  0xf2   : > { %v2816_v63 = vor.u32 %v2815_v55, %v2812_v25  ;;  %v6814_v25 = vsel %vm5917_vm4, %v4836_v34, %v3938_v26  ;;  %v4651_v55 = vld [vmem:[%s5880_s14 + $0x3c] sm:$0x1]  ;;  %v2868_v39 = vrot.slane %v2866_v40, 4  ;;  %v3954_v34 = vrot.slane %v6738_v0, 5 }
  0xf3   : > { %5441 = vmatpush3.bf16.msra.mxu0 %v5791_v62  ;;  %v2838_v62 = vshrl.u32 %v4644_v7, 16  ;;  %v2831_v22 = vrot.slane %v2830_v18, 4  ;;  %v2889_v15 = vshll.u32 %v4651_v55, 16  ;;  %v4838_v18 = vrot.slane %v4830_v46, 9 }
  0xf4   : > { %5537 = vmatpush3.bf16.msra.mxu1 %v5792_v19  ;;  %5442 = vmatprep.subr.bf16.mxu0 %v5793_v28  ;;  %v2817_v6 = vrot.slane %v2816_v63, 4  ;;  %v3931_v19 = vsel %vm5917_vm4, %v4834_v5, %v3930_v41  ;;  %v2849_v41 = vrot.slane %v2847_v4, 5  ;;  %v4652_v63 = vld [vmem:[%s5880_s14 + $0x40] sm:$0xf]  ;;  %v2877_v5 = vrot.slane %v2875_v59, 5 }
  0xf5   : > { %5538 = vmatprep.subr.bf16.mxu1 %v5794_v33  ;;  %v4858_v29 = vcombine.low %v3931_v19, %v3935_v10  ;;  %v2840_v49 = vrot.slane %v2838_v62, 4  ;;  %v4653_v62 = vld [vmem:[%s5880_s14 + $0x44] sm:$0x1]  ;;  %v2885_v4 = vrot.slane %v2883_v14, 5  ;;  %v4654_v19 = vld [vmem:[%s5880_s14 + $0x48] sm:$0xf]  ;;  %v3947_v12 = vsel %vm5917_vm4, %v4838_v18, %v3946_v9 }
  0xf6   : > { %v2822_v51 = vsel %vm5927_vm5, %v2817_v6, %v2821_v58  ;;  %v2869_v58 = vshll.u32 %v4648_v30, 16  ;;  %v2891_v6 = vrot.slane %v2889_v15, 5  ;;  %v2894_v10 = vshrl.u32 %v4652_v63, 16 }
  0xf7   : > { %5443 = vmatpush3.bf16.msra.mxu0 %v5793_v28  ;;  %v5800_v28 = vld [vmem:[%s6964_s1 + $0x3f0] sm:$0xff]   ;;  %5546 = vmatprep.mubr.bf16.mxu1 %v4858_v29  ;;  %v2844_v23 = vor.u32 %v2843_v31, %v2840_v49  ;;  %v4655_v29 = vld [vmem:[%s5880_s14 + $0x4c] sm:$0x1]  ;;  %v4832_v49 = vld [vmem:[%s5880_s14 + $0x40] sm:$0xe]  ;;  %v2903_v3 = vshll.u32 %v4653_v62, 16 }
  0xf8   : > { %5539 = vmatpush3.bf16.msra.mxu1 %v5794_v33  ;;  %5444 = vmatprep.subr.bf16.mxu0 %v5795_v56  ;;  %v2836_v33 = vsel %vm5927_vm5, %v2831_v22, %v2835_v48  ;;  %v4831_v48 = vld [vmem:[%s5880_s14 + $0x38] sm:$0xe]  ;;  %v2871_v27 = vrot.slane %v2869_v58, 5  ;;  %v2908_v37 = vshrl.u32 %v4654_v19, 16  ;;  %v2911_v50 = vshll.u32 %v4654_v19, 16 }
  0xf9   : > { %5540 = vmatprep.subr.bf16.mxu1 %v5796_v17  ;;  %v4672_v52 = vcombine.low %v2822_v51, %v2836_v33  ;;  %v2845_v57 = vrot.slane %v2844_v23, 4  ;;  %v4839_v20 = vrot.slane %v4831_v48, 9  ;;  %v2897_v51 = vshll.u32 %v4652_v63, 16 }
  0xfa   : > { %v2872_v16 = vor.u32 %v2871_v27, %v2868_v39  ;;  %v2917_v33 = vshll.u32 %v4655_v29, 16  ;;  %v4840_v23 = vrot.slane %v4832_v49, 9  ;;  %v2913_v24 = vrot.slane %v2911_v50, 5 }
  0xfb   : > { %5445 = vmatpush3.bf16.msra.mxu0 %v5795_v56  ;;  %v3943_v56 = vsel %vm5917_vm4, %v4837_v54, %v3942_v44  ;;  %5450 = vmatprep.mubr.bf16.mxu0 %v4672_v52  ;;  %v2850_v26 = vsel %vm5927_vm5, %v2845_v57, %v2849_v41  ;;  %v2859_v44 = vrot.slane %v2858_v36, 4  ;;  %v3951_v22 = vsel %vm5917_vm4, %v4839_v20, %v3950_v45 }
  0xfc   : > { %5541 = vmatpush3.bf16.msra.mxu1 %v5796_v17  ;;  %5446 = vmatprep.subr.bf16.mxu0 %v5799_v32  ;;  %v4859_v7 = vcombine.low %v6814_v25, %v3943_v56  ;;  %v2882_v17 = vrot.slane %v2880_v60, 4  ;;  %v2873_v11 = vrot.slane %v2872_v16, 4  ;;  %v4860_v30 = vcombine.low %v3947_v12, %v3951_v22 }
  0xfd   : > { %5542 = vmatprep.subr.bf16.mxu1 %v5800_v28  ;;  %v2864_v1 = vsel %vm5927_vm5, %v2859_v44, %v2863_v2  ;;  %v2899_v43 = vrot.slane %v2897_v51, 5  ;;  %v2910_v45 = vrot.slane %v2908_v37, 4  ;;  %v2905_v53 = vrot.slane %v2903_v3, 5 }
  0xfe   : > { %v4673_v21 = vcombine.low %v2850_v26, %v2864_v1  ;;  %v2886_v31 = vor.u32 %v2885_v4, %v2882_v17  ;;  %v2878_v41 = vsel %vm5927_vm5, %v2873_v11, %v2877_v5  ;;  %v3958_v57 = vrot.slane %v6742_v13, 5  ;;  %v6862_v13 = vld [vmem:[%s6965_s2] ss:$0 sm:$0xff] }
  0xff   : > { %5447 = vmatpush3.bf16.msra.mxu0 %v5799_v32  ;;  %v2896_v32 = vrot.slane %v2894_v10, 4  ;;  %v2914_v40 = vor.u32 %v2913_v24, %v2910_v45  ;;  %v3955_v25 = vsel %vm5917_vm4, %v4840_v23, %v3954_v34 }
 0x100   : > { %5543 = vmatpush3.bf16.msra.mxu1 %v5800_v28  ;;  %5448 = vmatprep.subr.bf16.mxu0 %v5801_v61  ;;  %v4833_v28 = vld [vmem:[%s5880_s14 + $0x48] sm:$0xe]  ;;  %v2887_v9 = vrot.slane %v2886_v31, 4 }
 0x101   : > { %5544 = vmatprep.subr.bf16.mxu1 %v5802_v8  ;;  %v2900_v52 = vor.u32 %v2899_v43, %v2896_v32  ;;  %v4841_v54 = vrot.slane %v4833_v28, 9  ;;  %v2915_v0 = vrot.slane %v2914_v40, 4 }
 0x102   : > { %v2892_v42 = vsel %vm5927_vm5, %v2887_v9, %v2891_v6 }
 0x103   : > { %5449 = vmatpush3.bf16.msra.mxu0 %v5801_v61  ;;  %v4674_v47 = vcombine.low %v2878_v41, %v2892_v42  ;;  %v2919_v61 = vrot.slane %v2917_v33, 5  ;;  %v2901_v2 = vrot.slane %v2900_v52, 4  ;;  %v3959_v55 = vsel %vm5917_vm4, %v4841_v54, %v3958_v57 }
 0x104   : > { %5545 = vmatpush3.bf16.msra.mxu1 %v5802_v8  ;;  %v4861_v56 = vcombine.low %v3955_v25, %v3959_v55 }
 0x105   : > { %v2906_v58 = vsel %vm5927_vm5, %v2901_v2, %v2905_v53  ;;  %v2920_v36 = vsel %vm5927_vm5, %v2915_v0, %v2919_v61 }
 0x106   : > { %5451 = vmatmul.mubr.bf16.vlgmr.msra.gmra.mrb[8].mxu0 %v4673_v21  ;;  %v4675_v39 = vcombine.low %v2906_v58, %v2920_v36 }
 0x107   : > { %5547 = vmatmul.mubr.bf16.vlgmr.msra.gmra.mrb[8].mxu1 %v4859_v7  ;;  %5454 = vmatprep.mubr.bf16.mxu0 %v4674_v47 }
 0x108   : > { %5550 = vmatprep.mubr.bf16.mxu1 %v4860_v30 }
 0x10e   : > { %5455 = vmatmul.mubr.bf16.gmra.mrb[12].mxu0 %v4675_v39 }
 0x10f   : > { %5551 = vmatmul.mubr.bf16.gmra.mrb[12].mxu1 %v4861_v56 }
 0x159   : > { %v5260_v59 = vpop.f32.mrb[0].mxu0 }
 0x15a   : > { %v1091_v46 = vmul.f32 %v5260_v59, %v6862_v13  ;;  %v5356_v48 = vpop.f32.mrb[0].mxu1  ;;  %v1043_v38 = vpop.f32.mrb[1].mxu0 }
 0x15b   : > { %v2132_v8 = vmul.f32 %v5356_v48, %v6862_v13  ;;  %v1089_v26 = vmul.f32 %v6862_v13, %v1043_v38  ;;  %v2084_v7 = vpop.f32.mrb[1].mxu1  ;;  %v5261_v27 = vpop.f32.mrb[2].mxu0 }
 0x15c   : > { %v1106_v60 = vadd.f32 %v6867_v35, %v1091_v46  ;;  %v2130_v63 = vmul.f32 %v6862_v13, %v2084_v7  ;;  %v1092_v44 = vmul.f32 %v5261_v27, %v6862_v13  ;;  %v5357_v5 = vpop.f32.mrb[2].mxu1  ;;  %v1046_v14 = vpop.f32.mrb[3].mxu0 }
 0x15d   : > { %v2147_v15 = vadd.f32 %v6867_v35, %v2132_v8  ;;  %v1104_v16 = vadd.f32 %v6867_v35, %v1089_v26  ;;  %v2133_v17 = vmul.f32 %v5357_v5, %v6862_v13  ;;  %v1090_v18 = vmul.f32 %v6862_v13, %v1046_v14  ;;  %v2087_v20 = vpop.f32.mrb[3].mxu1 }
 0x15e   : > { %vm1114_vm6 = vcmp.ge.f32.partialorder %v1106_v60, 0.0  ;;  %v1122_v62 = vmul.f32 0.01, %v1106_v60  ;;  %v2145_v1 = vadd.f32 %v6867_v35, %v2130_v63  ;;  %v1107_v4 = vadd.f32 %v6867_v35, %v1092_v44 }
 0x15f   : > { %vm2155_vm7 = vcmp.ge.f32.partialorder %v2147_v15, 0.0  ;;  %v2163_v6 = vmul.f32 0.01, %v2147_v15  ;;  %vm1112_vm8 = vcmp.ge.f32.partialorder %v1104_v16, 0.0  ;;  %v1120_v19 = vmul.f32 0.01, %v1104_v16 }
 0x160   : > { %vm1115_vm9 = vcmp.ge.f32.partialorder %v1107_v4, 0.0  ;;  %v1130_v10 = vsel %vm1114_vm6, %v1106_v60, %v1122_v62  ;;  %vm2153_vm10 = vcmp.ge.f32.partialorder %v2145_v1, 0.0  ;;  %v1123_v21 = vmul.f32 0.01, %v1107_v4 }
 0x161   : > { %v2148_v11 = vadd.f32 %v6867_v35, %v2133_v17  ;;  %v2171_v12 = vsel %vm2155_vm7, %v2147_v15, %v2163_v6  ;;  %v2161_v22 = vmul.f32 0.01, %v2145_v1  ;;  %v1105_v29 = vadd.f32 %v6867_v35, %v1090_v18  ;;  %v5264_v28 = vpop.f32.mrb[4].mxu0 }
 0x162   : > { %v2131_v49 = vmul.f32 %v6862_v13, %v2087_v20  ;;  %v5360_v31 = vpop.f32.mrb[4].mxu1  ;;  %v1131_v30 = vsel %vm1115_vm9, %v1107_v4, %v1123_v21  ;;  %v1128_v43 = vsel %vm1112_vm8, %v1104_v16, %v1120_v19  ;;  %v1095_v23 = vmul.f32 %v5264_v28, %v6862_v13  ;;  %v1059_v45 = vpop.f32.mrb[5].mxu0 }
 0x163   : > { %vm2156_vm11 = vcmp.ge.f32.partialorder %v2148_v11, 0.0  ;;  %v2164_v32 = vmul.f32 0.01, %v2148_v11  ;;  %v2136_v51 = vmul.f32 %v5360_v31, %v6862_v13  ;;  %v2100_v41 = vpop.f32.mrb[5].mxu1  ;;  %v4891_v3 = vpack.c.bf16 %v1131_v30, %v1130_v10  ;;  %v5265_v54 = vpop.f32.mrb[6].mxu0 }
 0x164   : > { %vm1113_vm12 = vcmp.ge.f32.partialorder %v1105_v29, 0.0  ;;  %v1121_v37 = vmul.f32 0.01, %v1105_v29  ;;  %v2146_v50 = vadd.f32 %v6867_v35, %v2131_v49  ;;  %v5361_v9 = vpop.f32.mrb[6].mxu1  ;;  %v2134_v24 = vmul.f32 %v6862_v13, %v2100_v41  ;;  %v1062_v2 = vpop.f32.mrb[7].mxu0 }
 0x165   : > { %v2172_v33 = vsel %vm2156_vm11, %v2148_v11, %v2164_v32  ;;  %v2103_v34 = vpop.f32.mrb[7].mxu1  ;;  %4963 = vst [vmem:[%s6888_s29 + $0x8] sm:$0xff] %v4891_v3   ;;  %v2169_v47 = vsel %vm2153_vm10, %v2145_v1, %v2161_v22  ;;  %v1110_v61 = vadd.f32 %v6867_v35, %v1095_v23  ;;  %v2151_v57 = vadd.f32 %v6867_v35, %v2136_v51 }
 0x166   : > { %v4911_v42 = vpack.c.bf16 %v2172_v33, %v2171_v12  ;;  %v1129_v52 = vsel %vm1113_vm12, %v1105_v29, %v1121_v37  ;;  %vm2154_vm13 = vcmp.ge.f32.partialorder %v2146_v50, 0.0  ;;  %v2162_v53 = vmul.f32 0.01, %v2146_v50 }
 0x167   : > { %v4886_v40 = vpack.c.bf16 %v1129_v52, %v1128_v43  ;;  %v1093_v0 = vmul.f32 %v6862_v13, %v1059_v45  ;;  %v2149_v55 = vadd.f32 %v6867_v35, %v2134_v24  ;;  %v1096_v58 = vmul.f32 %v5265_v54, %v6862_v13 }
 0x168   : > { %4967 = vst [vmem:[%s6888_s29 + $0x28] sm:$0xff] %v4911_v42   ;;  %v2170_v25 = vsel %vm2154_vm13, %v2146_v50, %v2162_v53  ;;  %v1126_v56 = vmul.f32 0.01, %v1110_v61  ;;  %vm1118_vm14 = vcmp.ge.f32.partialorder %v1110_v61, 0.0  ;;  %v2137_v46 = vmul.f32 %v5361_v9, %v6862_v13 }
 0x169   : > { %4887 = vst [vmem:[%s6888_s29] sm:$0xff] %v4886_v40   ;;  %v4906_v36 = vpack.c.bf16 %v2170_v25, %v2169_v47  ;;  %v1108_v39 = vadd.f32 %v6867_v35, %v1093_v0  ;;  %v1111_v59 = vadd.f32 %v6867_v35, %v1096_v58  ;;  %v1094_v48 = vmul.f32 %v6862_v13, %v1062_v2 }
 0x16a   : > { %v2135_v38 = vmul.f32 %v6862_v13, %v2103_v34  ;;  %vm2159_vm15 = vcmp.ge.f32.partialorder %v2151_v57, 0.0  ;;  %v2167_v8 = vmul.f32 0.01, %v2151_v57  ;;  %v2165_v26 = vmul.f32 0.01, %v2149_v55 }
 0x16b   : > { %4966 = vst [vmem:[%s6888_s29 + $0x20] sm:$0xff] %v4906_v36   ;;  %vm1119_vm0 = vcmp.ge.f32.partialorder %v1111_v59, 0.0  ;;  %v1127_v7 = vmul.f32 0.01, %v1111_v59  ;;  %v2152_v27 = vadd.f32 %v6867_v35, %v2137_v46  ;;  %v1109_v60 = vadd.f32 %v6867_v35, %v1094_v48 }
 0x16c   : > { %v2150_v63 = vadd.f32 %v6867_v35, %v2135_v38  ;;  %v1134_v44 = vsel %vm1118_vm14, %v1110_v61, %v1126_v56  ;;  %vm1116_vm1 = vcmp.ge.f32.partialorder %v1108_v39, 0.0  ;;  %v1124_v5 = vmul.f32 0.01, %v1108_v39 }
 0x16d   : > { %vm2157_vm2 = vcmp.ge.f32.partialorder %v2149_v55, 0.0  ;;  %v1135_v14 = vsel %vm1119_vm0, %v1111_v59, %v1127_v7  ;;  %vm2160_vm3 = vcmp.ge.f32.partialorder %v2152_v27, 0.0  ;;  %v2168_v15 = vmul.f32 0.01, %v2152_v27 }
 0x16e   : > { %vm1117_vm4 = vcmp.ge.f32.partialorder %v1109_v60, 0.0  ;;  %v4901_v16 = vpack.c.bf16 %v1135_v14, %v1134_v44  ;;  %v1125_v17 = vmul.f32 0.01, %v1109_v60  ;;  %vm2158_vm5 = vcmp.ge.f32.partialorder %v2150_v63, 0.0 }
 0x16f   : > { %v2166_v18 = vmul.f32 0.01, %v2150_v63  ;;  %v2175_v20 = vsel %vm2159_vm15, %v2151_v57, %v2167_v8  ;;  %v2173_v62 = vsel %vm2157_vm2, %v2149_v55, %v2165_v26  ;;  %v2176_v1 = vsel %vm2160_vm3, %v2152_v27, %v2168_v15 }
 0x170   : > { %v1132_v4 = vsel %vm1116_vm1, %v1108_v39, %v1124_v5  ;;  %4965 = vst [vmem:[%s6888_s29 + $0x18] sm:$0xff] %v4901_v16   ;;  %v4921_v6 = vpack.c.bf16 %v2176_v1, %v2175_v20  ;;  %v1133_v19 = vsel %vm1117_vm4, %v1109_v60, %v1125_v17 }
 0x171   : > { %v2174_v10 = vsel %vm2158_vm5, %v2150_v63, %v2166_v18  ;;  %v4896_v21 = vpack.c.bf16 %v1133_v19, %v1132_v4 }
 0x172   : > { %v4916_v11 = vpack.c.bf16 %v2174_v10, %v2173_v62  ;;  %4969 = vst [vmem:[%s6888_s29 + $0x38] sm:$0xff] %v4921_v6  }
 0x173   : > { %4964 = vst [vmem:[%s6888_s29 + $0x10] sm:$0xff] %v4896_v21  }
 0x174   : > { %4968 = vst [vmem:[%s6888_s29 + $0x30] sm:$0xff] %v4916_v11  }
 0x1d9   : > { %v5452_v12 = vpop.f32.mrb[8].mxu0 }
 0x1da   : > { %v3084_v22 = vmul.f32 %v5452_v12, %v6862_v13  ;;  %v5548_v29 = vpop.f32.mrb[8].mxu1  ;;  %v3036_v49 = vpop.f32.mrb[9].mxu0 }
 0x1db   : > { %v4123_v31 = vmul.f32 %v5548_v29, %v6862_v13  ;;  %v3082_v30 = vmul.f32 %v6862_v13, %v3036_v49  ;;  %v4075_v32 = vpop.f32.mrb[9].mxu1  ;;  %v5453_v51 = vpop.f32.mrb[10].mxu0 }
 0x1dc   : > { %v3099_v41 = vadd.f32 %v6867_v35, %v3084_v22  ;;  %v4121_v3 = vmul.f32 %v6862_v13, %v4075_v32  ;;  %v3085_v37 = vmul.f32 %v5453_v51, %v6862_v13  ;;  %v5549_v50 = vpop.f32.mrb[10].mxu1  ;;  %v3039_v28 = vpop.f32.mrb[11].mxu0 }
 0x1dd   : > { %v4138_v9 = vadd.f32 %v6867_v35, %v4123_v31  ;;  %v3097_v43 = vadd.f32 %v6867_v35, %v3082_v30  ;;  %v4124_v33 = vmul.f32 %v5549_v50, %v6862_v13  ;;  %v3083_v23 = vmul.f32 %v6862_v13, %v3039_v28  ;;  %v4078_v45 = vpop.f32.mrb[11].mxu1 }
 0x1de   : > { %vm3107_vm6 = vcmp.ge.f32.partialorder %v3099_v41, 0.0  ;;  %v3115_v24 = vmul.f32 0.01, %v3099_v41  ;;  %v4136_v34 = vadd.f32 %v6867_v35, %v4121_v3  ;;  %v3100_v42 = vadd.f32 %v6867_v35, %v3085_v37 }
 0x1df   : > { %vm4146_vm7 = vcmp.ge.f32.partialorder %v4138_v9, 0.0  ;;  %v4154_v52 = vmul.f32 0.01, %v4138_v9  ;;  %vm3105_vm8 = vcmp.ge.f32.partialorder %v3097_v43, 0.0  ;;  %v3113_v53 = vmul.f32 0.01, %v3097_v43 }
 0x1e0   : > { %v3123_v54 = vsel %vm3107_vm6, %v3099_v41, %v3115_v24  ;;  %vm4144_vm9 = vcmp.ge.f32.partialorder %v4136_v34, 0.0  ;;  %vm3108_vm10 = vcmp.ge.f32.partialorder %v3100_v42, 0.0  ;;  %v4152_v40 = vmul.f32 0.01, %v4136_v34 }
 0x1e1   : > { %v4162_v47 = vsel %vm4146_vm7, %v4138_v9, %v4154_v52  ;;  %v3116_v61 = vmul.f32 0.01, %v3100_v42  ;;  %v4139_v57 = vadd.f32 %v6867_v35, %v4124_v33  ;;  %v5456_v2 = vpop.f32.mrb[12].mxu0  ;;  %v3121_v25 = vsel %vm3105_vm8, %v3097_v43, %v3113_v53 }
 0x1e2   : > { %v3098_v0 = vadd.f32 %v6867_v35, %v3083_v23  ;;  %v4122_v55 = vmul.f32 %v6862_v13, %v4078_v45  ;;  %v3088_v58 = vmul.f32 %v5456_v2, %v6862_v13  ;;  %v5552_v36 = vpop.f32.mrb[12].mxu1  ;;  %v3052_v56 = vpop.f32.mrb[13].mxu0  ;;  %v4160_v20 = vsel %vm4144_vm9, %v4136_v34, %v4152_v40 }
 0x1e3   : > { %v3124_v39 = vsel %vm3108_vm10, %v3100_v42, %v3116_v61  ;;  %vm4147_vm11 = vcmp.ge.f32.partialorder %v4139_v57, 0.0  ;;  %v4155_v59 = vmul.f32 0.01, %v4139_v57  ;;  %v4127_v46 = vmul.f32 %v5552_v36, %v6862_v13  ;;  %v4091_v48 = vpop.f32.mrb[13].mxu1  ;;  %v5457_v38 = vpop.f32.mrb[14].mxu0 }
 0x1e4   : > { %v4931_v8 = vpack.c.bf16 %v3124_v39, %v3123_v54  ;;  %vm3106_vm12 = vcmp.ge.f32.partialorder %v3098_v0, 0.0  ;;  %v3114_v26 = vmul.f32 0.01, %v3098_v0  ;;  %v4137_v7 = vadd.f32 %v6867_v35, %v4122_v55  ;;  %v5553_v27 = vpop.f32.mrb[14].mxu1  ;;  %v3055_v60 = vpop.f32.mrb[15].mxu0 }
 0x1e5   : > { %v4163_v63 = vsel %vm4147_vm11, %v4139_v57, %v4155_v59  ;;  %v3103_v44 = vadd.f32 %v6867_v35, %v3088_v58  ;;  %v4142_v5 = vadd.f32 %v6867_v35, %v4127_v46  ;;  %v3086_v14 = vmul.f32 %v6862_v13, %v3052_v56  ;;  %v4094_v15 = vpop.f32.mrb[15].mxu1 }
 0x1e6   : > { %4971 = vst [vmem:[%s6888_s29 + $0x48] sm:$0xff] %v4931_v8   ;;  %v4951_v16 = vpack.c.bf16 %v4163_v63, %v4162_v47  ;;  %v3122_v17 = vsel %vm3106_vm12, %v3098_v0, %v3114_v26  ;;  %vm4145_vm13 = vcmp.ge.f32.partialorder %v4137_v7, 0.0  ;;  %v4153_v18 = vmul.f32 0.01, %v4137_v7 }
 0x1e7   : > { %v4926_v62 = vpack.c.bf16 %v3122_v17, %v3121_v25  ;;  %vm3111_vm14 = vcmp.ge.f32.partialorder %v3103_v44, 0.0  ;;  %v3119_v4 = vmul.f32 0.01, %v3103_v44  ;;  %v4158_v6 = vmul.f32 0.01, %v4142_v5 }
 0x1e8   : > { %4975 = vst [vmem:[%s6888_s29 + $0x68] sm:$0xff] %v4951_v16   ;;  %v4161_v1 = vsel %vm4145_vm13, %v4137_v7, %v4153_v18  ;;  %v4125_v19 = vmul.f32 %v6862_v13, %v4091_v48  ;;  %vm4150_vm15 = vcmp.ge.f32.partialorder %v4142_v5, 0.0  ;;  %v3089_v21 = vmul.f32 %v5457_v38, %v6862_v13 }
 0x1e9   : > { %4970 = vst [vmem:[%s6888_s29 + $0x40] sm:$0xff] %v4926_v62   ;;  %v4946_v10 = vpack.c.bf16 %v4161_v1, %v4160_v20  ;;  %v4128_v11 = vmul.f32 %v5553_v27, %v6862_v13  ;;  %v3101_v12 = vadd.f32 %v6867_v35, %v3086_v14  ;;  %v3087_v31 = vmul.f32 %v6862_v13, %v3055_v60 }
 0x1ea   : > { %v4140_v22 = vadd.f32 %v6867_v35, %v4125_v19  ;;  %v3104_v29 = vadd.f32 %v6867_v35, %v3089_v21  ;;  %v4126_v30 = vmul.f32 %v6862_v13, %v4094_v15  ;;  %v3127_v32 = vsel %vm3111_vm14, %v3103_v44, %v3119_v4 }
 0x1eb   : > { %4974 = vst [vmem:[%s6888_s29 + $0x60] sm:$0xff] %v4946_v10   ;;  %v4143_v49 = vadd.f32 %v6867_v35, %v4128_v11  ;;  %v4166_v51 = vsel %vm4150_vm15, %v4142_v5, %v4158_v6  ;;  %vm3109_vm2 = vcmp.ge.f32.partialorder %v3101_v12, 0.0  ;;  %v3117_v37 = vmul.f32 0.01, %v3101_v12 }
 0x1ec   : > { %vm3112_vm0 = vcmp.ge.f32.partialorder %v3104_v29, 0.0  ;;  %v3120_v41 = vmul.f32 0.01, %v3104_v29  ;;  %v3102_v50 = vadd.f32 %v6867_v35, %v3087_v31  ;;  %v4141_v28 = vadd.f32 %v6867_v35, %v4126_v30 }
 0x1ed   : > { %vm4151_vm1 = vcmp.ge.f32.partialorder %v4143_v49, 0.0  ;;  %v4159_v3 = vmul.f32 0.01, %v4143_v49  ;;  %vm4148_vm3 = vcmp.ge.f32.partialorder %v4140_v22, 0.0  ;;  %v4156_v9 = vmul.f32 0.01, %v4140_v22 }
 0x1ee   : > { %v3128_v43 = vsel %vm3112_vm0, %v3104_v29, %v3120_v41  ;;  %vm3110_vm4 = vcmp.ge.f32.partialorder %v3102_v50, 0.0  ;;  %v3118_v45 = vmul.f32 0.01, %v3102_v50  ;;  %vm4149_vm5 = vcmp.ge.f32.partialorder %v4141_v28, 0.0 }
 0x1ef   : > { %v4167_v13 = vsel %vm4151_vm1, %v4143_v49, %v4159_v3  ;;  %v4941_v33 = vpack.c.bf16 %v3128_v43, %v3127_v32  ;;  %v4157_v24 = vmul.f32 0.01, %v4141_v28  ;;  %v3125_v34 = vsel %vm3109_vm2, %v3101_v12, %v3117_v37 }
 0x1f0   : > { %v4961_v23 = vpack.c.bf16 %v4167_v13, %v4166_v51  ;;  %v3126_v42 = vsel %vm3110_vm4, %v3102_v50, %v3118_v45  ;;  %v4164_v52 = vsel %vm4148_vm3, %v4140_v22, %v4156_v9 }
 0x1f1   : > { %4973 = vst [vmem:[%s6888_s29 + $0x58] sm:$0xff] %v4941_v33   ;;  %v4936_v53 = vpack.c.bf16 %v3126_v42, %v3125_v34  ;;  %v4165_v54 = vsel %vm4149_vm5, %v4141_v28, %v4157_v24 }
 0x1f2   : > { %4977 = vst [vmem:[%s6888_s29 + $0x78] sm:$0xff] %v4961_v23   ;;  %v4956_v35 = vpack.c.bf16 %v4165_v54, %v4164_v52 }
 0x1f3   : > { %4972 = vst [vmem:[%s6888_s29 + $0x50] sm:$0xff] %v4936_v53  }
 0x1f4   : > { %4976 = vst [vmem:[%s6888_s29 + $0x70] sm:$0xff] %v4956_v35  }
 0x1f5 PF: > { %s14_s15 = sadd.s32 1, %s5809_s15  }
 0x1f6   : > { %p11_p4 = scmp.ge.s32.totalorder %s14_s15, 4  }
 0x1f8   :  { %13 = sbr.rel (!%p11_p4) target bundleno = 1 (0x1), region = 86 }

// kernel: _lambda_.10
= control target key start
LH: loop header
LB: loop body
LE: loop exit
PB: predicated region body
PF: predicated region fallthrough
CT: control target
= control target key end

     0   :  { %s7572_s15 = smov 0   ;;  %s9847_s0 = inlined_call_operand.vmem [shape: bf16[2,18,18,128], index: 0, kind: input, shape index: {}]   ;;  %s9848_s1 = inlined_call_operand.vmem [shape: bf16[9,128,128], index: 1, kind: input, shape index: {}]   ;;  %s9849_s2 = inlined_call_operand.vmem [shape: f32[1,128], index: 2, kind: input, shape index: {}]   ;;  %s9850_s3 = inlined_call_operand.vmem [shape: f32[1,128], index: 3, kind: input, shape index: {}]   ;;  %s9851_s4 = inlined_call_operand.vmem [shape: bf16[2,16,16,128], index: 4, kind: output, shape index: {}]  }
   0x1 LB: > { %s5638_s16 = sadd.s32 4294967295, %s7545_s15   ;;  %p5642_p0 = scmp.ge.s32.totalorder %s7545_s15, 1  ;;  %s7545_s15 = sphi %s7572_s15, %s14_s15  }
   0x2   : > { %p162_p1 = scmp.lt.s32.totalorder %s7545_s15, 3 }
   0x4   : > { %p163_p2 = pnand %p5642_p0, %p162_p1 }
   0x6   : > { %166 = sbr.rel (%p163_p2) target bundleno = 597 (0x255), region = 36 }
   0xd   : > { %v7323_v0 = vld [vmem:[%s9848_s1 + $0x40] sm:$0xff]   ;;  %p188_p3 = scmp.lt.s32.totalorder %s5638_s16, 1  ;;  %v7325_v2 = vld [vmem:[%s9848_s1 + $0x48] sm:$0xff]   ;;  %v7327_v4 = vld [vmem:[%s9848_s1 + $0x50] sm:$0xff]   ;;  %vm263_vm0 = vsmask.f32 3328 }
   0xe   : > { %v7324_v1 = vld [vmem:[%s9848_s1 + $0x100] sm:$0xff]   ;;  %6610 = vmatprep.subr.bf16.mxu1 %v7323_v0  ;;  %v7326_v3 = vld [vmem:[%s9848_s1 + $0x108] sm:$0xff]   ;;  %v7328_v5 = vld [vmem:[%s9848_s1 + $0x110] sm:$0xff]   ;;  %vm264_vm1 = vsmask.f32 7440  ;;  %vm1293_vm3 = vcmask 1042432  }
   0xf   : > { %6802 = vmatprep.subr.bf16.mxu0 %v7324_v1  ;;  %6611 = vmatpush3.bf16.msra.mxu1 %v7323_v0  ;;  %s9925_s16 = smov (!%p188_p3, %s5638_s16), 1  ;;  %v7329_v6 = vld [vmem:[%s9848_s1 + $0x58] sm:$0xff]   ;;  %v7331_v8 = vld [vmem:[%s9848_s1 + $0x60] sm:$0xff]   ;;  %v7333_v10 = vld [vmem:[%s9848_s1 + $0x68] sm:$0xff]   ;;  %vm1294_vm4 = vcmask 1046532   ;;  %vm5278_vm6 = vcmask 1046528  }
  0x10   : > { %6803 = vmatpush3.bf16.msra.mxu0 %v7324_v1  ;;  %6612 = vmatprep.subr.bf16.mxu1 %v7325_v2  ;;  %v7330_v7 = vld [vmem:[%s9848_s1 + $0x118] sm:$0xff]   ;;  %s7314_s7 = smul.u32 216, %s9925_s16  ;;  %v7332_v9 = vld [vmem:[%s9848_s1 + $0x120] sm:$0xff]   ;;  %v7334_v11 = vld [vmem:[%s9848_s1 + $0x128] sm:$0xff]   ;;  %s6266_s22 = sshll.u32 %s9925_s16, 7 }
  0x11   : > { %6804 = vmatprep.subr.bf16.mxu0 %v7326_v3  ;;  %v7335_v25 = vld [vmem:[%s9848_s1 + $0x70] sm:$0xff]   ;;  %vm7644_vm2 = vmor %vm263_vm0, %vm264_vm1  ;;  %v7337_v44 = vld [vmem:[%s9848_s1 + $0x78] sm:$0xff]   ;;  %s9675_s24 = scalar_lea.vmem %s9851_s4, %s6266_s22 }
  0x12   : > { %s7616_s14 = scalar_lea.vmem %s9847_s0, %s7314_s7  ;;  %v7336_v30 = vld [vmem:[%s9848_s1 + $0x130] sm:$0xff]   ;;  %v7338_v47 = vld [vmem:[%s9848_s1 + $0x138] sm:$0xff]   ;;  %v7669_v62 = vld [vmem:[%s9848_s1] sm:$0xff]  }
  0x13   : > { %6613 = vmatpush3.bf16.msra.mxu1 %v7325_v2  ;;  %v199_v12 = vld [vmem:[%s7616_s14] sm:$0xf]  ;;  %v200_v13 = vld [vmem:[%s7616_s14 + $0x4] sm:$0xf]  ;;  %v247_v14 = vld [vmem:[%s7616_s14 + $0x8] sm:$0x1] }
  0x14   : > { %6805 = vmatpush3.bf16.msra.mxu0 %v7326_v3  ;;  %6614 = vmatprep.subr.bf16.mxu1 %v7327_v4  ;;  %v267_v15 = vshrl.u32 %v199_v12, 16  ;;  %v270_v16 = vshll.u32 %v199_v12, 16  ;;  %v276_v17 = vshll.u32 %v200_v13, 16  ;;  %v280_v18 = vshrl.u32 %v200_v13, 16  ;;  %v5838_v20 = vld [vmem:[%s7616_s14 + $0xc] sm:$0xf]  ;;  %vm7894_vm5 = vmor %vm1293_vm3, %vm1294_vm4 }
  0x15   : > { %6806 = vmatprep.subr.bf16.mxu0 %v7328_v5  ;;  %v286_v19 = vshll.u32 %v247_v14, 16  ;;  %v7629_v23 = vld [vmem:[%s7616_s14 + $0x10] sm:$0xf]  ;;  %v7632_v24 = vld [vmem:[%s7616_s14 + $0x14] sm:$0x1]  ;;  %v2166_v29 = vshrl.u32 %v5838_v20, 16 }
  0x16   : > { %v269_v21 = vrot.slane %v267_v15, 4  ;;  %v272_v22 = vrot.slane %v270_v16, 5  ;;  %v278_v26 = vrot.slane %v276_v17, 5  ;;  %v282_v27 = vrot.slane %v280_v18, 4  ;;  %v201_v39 = vld [vmem:[%s7616_s14 + $0xc] sm:$0xf] }
  0x17   : > { %6615 = vmatpush3.bf16.msra.mxu1 %v7327_v4  ;;  %v288_v28 = vrot.slane %v286_v19, 5  ;;  %v2169_v32 = vshll.u32 %v5838_v20, 16  ;;  %v2175_v33 = vshll.u32 %v7629_v23, 16  ;;  %v2179_v34 = vshrl.u32 %v7629_v23, 16  ;;  %v202_v46 = vld [vmem:[%s7616_s14 + $0x10] sm:$0xf] }
  0x18   : > { %6807 = vmatpush3.bf16.msra.mxu0 %v7328_v5  ;;  %6616 = vmatprep.subr.bf16.mxu1 %v7329_v6  ;;  %v273_v31 = vor.u32 %v272_v22, %v269_v21  ;;  %v283_v36 = vor.u32 %v282_v27, %v278_v26  ;;  %v2168_v37 = vrot.slane %v2166_v29, 4  ;;  %v2185_v38 = vshll.u32 %v7632_v24, 16  ;;  %v248_v52 = vld [vmem:[%s7616_s14 + $0x14] sm:$0x1]  ;;  %v5841_v56 = vld [vmem:[%s7616_s14 + $0x18] sm:$0xf] }
  0x19   : > { %6808 = vmatprep.subr.bf16.mxu0 %v7330_v7  ;;  %v2171_v41 = vrot.slane %v2169_v32, 5  ;;  %v2177_v42 = vrot.slane %v2175_v33, 5  ;;  %v2181_v43 = vrot.slane %v2179_v34, 4  ;;  %v291_v54 = vshrl.u32 %v201_v39, 16  ;;  %v7664_v57 = vld [vmem:[%s7616_s14 + $0x1c] sm:$0xf] }
  0x1a   : > { %v274_v40 = vrot.slane %v273_v31, 4  ;;  %v284_v45 = vrot.slane %v283_v36, 4  ;;  %v2187_v51 = vrot.slane %v2185_v38, 5  ;;  %v294_v55 = vshll.u32 %v201_v39, 16  ;;  %v203_v19 = vld [vmem:[%s7616_s14 + $0x18] sm:$0xf] }
  0x1b   : > { %6617 = vmatpush3.bf16.msra.mxu1 %v7329_v6  ;;  %v2172_v49 = vor.u32 %v2171_v41, %v2168_v37  ;;  %v2182_v50 = vor.u32 %v2181_v43, %v2177_v42  ;;  %v300_v61 = vshll.u32 %v202_v46, 16  ;;  %v293_v63 = vrot.slane %v291_v54, 4  ;;  %v7676_v6 = vld [vmem:[%s7616_s14 + $0x20] sm:$0x1]  ;;  %v5844_v39 = vld [vmem:[%s7616_s14 + $0x24] sm:$0xf] }
  0x1c   : > { %6809 = vmatpush3.bf16.msra.mxu0 %v7330_v7  ;;  %6618 = vmatprep.subr.bf16.mxu1 %v7331_v8  ;;  %v279_v48 = vsel %vm7644_vm2, %v274_v40, %v278_v26  ;;  %v289_v53 = vsel %vm7644_vm2, %v284_v45, %v288_v28  ;;  %v296_v0 = vrot.slane %v294_v55, 5  ;;  %v304_v1 = vshrl.u32 %v202_v46, 16  ;;  %v7681_v7 = vld [vmem:[%s9848_s1 + $0x140] sm:$0xff]   ;;  %v204_v26 = vld [vmem:[%s7616_s14 + $0x1c] sm:$0xf]  ;;  %v7342_v45 = vld [vmem:[%s9848_s1 + $0x8] sm:$0xff]  }
  0x1d   : > { %6810 = vmatprep.subr.bf16.mxu0 %v7332_v9  ;;  %v5662_v58 = vcombine.low %v279_v48, %v289_v53  ;;  %v2173_v59 = vrot.slane %v2172_v49, 4  ;;  %v2183_v60 = vrot.slane %v2182_v50, 4  ;;  %v310_v2 = vshll.u32 %v248_v52, 16  ;;  %v249_v32 = vld [vmem:[%s7616_s14 + $0x20] sm:$0x1]  ;;  %v7341_v46 = vld [vmem:[%s9848_s1 + $0x148] sm:$0xff]  }
  0x1e   : > { %v302_v5 = vrot.slane %v300_v61, 5  ;;  %v2193_v12 = vshll.u32 %v5841_v56, 16  ;;  %v2199_v13 = vshll.u32 %v7664_v57, 16  ;;  %v2203_v14 = vshrl.u32 %v7664_v57, 16  ;;  %v7515_v35 = vld [vmem:[%s7616_s14 + $0xc] sm:$0xf] }
  0x1f   : > { %6619 = vmatpush3.bf16.msra.mxu1 %v7331_v8  ;;  %6626 = vmatprep.mubr.bf16.mxu1 %v5662_v58  ;;  %v2178_v3 = vsel %vm7644_vm2, %v2173_v59, %v2177_v42  ;;  %v2188_v4 = vsel %vm7644_vm2, %v2183_v60, %v2187_v51  ;;  %v312_v17 = vrot.slane %v310_v2, 5  ;;  %v2209_v18 = vshll.u32 %v7676_v6, 16  ;;  %v7706_v51 = vld [vmem:[%s7616_s14 + $0x2c] sm:$0x1] }
  0x20   : > { %6811 = vmatpush3.bf16.msra.mxu0 %v7332_v9  ;;  %6620 = vmatprep.subr.bf16.mxu1 %v7333_v10  ;;  %v5902_v8 = vcombine.low %v2178_v3, %v2188_v4  ;;  %v297_v9 = vor.u32 %v296_v0, %v293_v63  ;;  %v2195_v21 = vrot.slane %v2193_v12, 5  ;;  %v2201_v22 = vrot.slane %v2199_v13, 5  ;;  %v7345_v63 = vld [vmem:[%s9848_s1 + $0x10] sm:$0xff]   ;;  %v250_v12 = vld [vmem:[%s7616_s14 + $0x2c] sm:$0x1] }
  0x21   : > { %6812 = vmatprep.subr.bf16.mxu0 %v7334_v11  ;;  %v2211_v29 = vrot.slane %v2209_v18, 5  ;;  %v315_v33 = vshrl.u32 %v203_v19, 16  ;;  %v318_v34 = vshll.u32 %v203_v19, 16  ;;  %v324_v37 = vshll.u32 %v204_v26, 16  ;;  %v7343_v18 = vld [vmem:[%s9848_s1 + $0x150] sm:$0xff]  }
  0x22   : > { %6818 = vmatprep.mubr.bf16.mxu0 %v5902_v8  ;;  %v298_v15 = vrot.slane %v297_v9, 4  ;;  %v328_v38 = vshrl.u32 %v204_v26, 16  ;;  %v334_v50 = vshll.u32 %v249_v32, 16  ;;  %v2214_v54 = vshrl.u32 %v5844_v39, 16  ;;  %v206_v8 = vld [vmem:[%s7616_s14 + $0x28] sm:$0xf] }
  0x23   : > { %6621 = vmatpush3.bf16.msra.mxu1 %v7333_v10  ;;  %v306_v10 = vrot.slane %v304_v1, 4  ;;  %v317_v43 = vrot.slane %v315_v33, 4  ;;  %v326_v48 = vrot.slane %v324_v37, 5  ;;  %v2217_v55 = vshll.u32 %v5844_v39, 16  ;;  %v7740_v32 = vld [vmem:[%s7616_s14 + $0x38] sm:$0x1] }
  0x24   : > { %6813 = vmatpush3.bf16.msra.mxu0 %v7334_v11  ;;  %6622 = vmatprep.subr.bf16.mxu1 %v7335_v25  ;;  %v2190_v11 = vshrl.u32 %v5841_v56, 16  ;;  %v303_v27 = vsel %vm7644_vm2, %v298_v15, %v302_v5  ;;  %v330_v49 = vrot.slane %v328_v38, 4  ;;  %v205_v56 = vld [vmem:[%s7616_s14 + $0x24] sm:$0xf]  ;;  %v336_v61 = vrot.slane %v334_v50, 5 }
  0x25   : > { %6814 = vmatprep.subr.bf16.mxu0 %v7336_v30  ;;  %v307_v16 = vor.u32 %v306_v10, %v302_v5  ;;  %v2216_v0 = vrot.slane %v2214_v54, 4  ;;  %v2219_v1 = vrot.slane %v2217_v55, 5  ;;  %v339_v13 = vshrl.u32 %v205_v56, 16  ;;  %v7351_v54 = vld [vmem:[%s9848_s1 + $0x20] sm:$0xff]  }
  0x26   : > { %v2192_v20 = vrot.slane %v2190_v11, 4  ;;  %v331_v60 = vor.u32 %v330_v49, %v326_v48  ;;  %v348_v26 = vshll.u32 %v206_v8, 16 }
  0x27   : > { %6623 = vmatpush3.bf16.msra.mxu1 %v7335_v25  ;;  %v2205_v25 = vrot.slane %v2203_v14, 4  ;;  %v308_v28 = vrot.slane %v307_v16, 4  ;;  %v2220_v9 = vor.u32 %v2219_v1, %v2216_v0 }
  0x28   : > { %6815 = vmatpush3.bf16.msra.mxu0 %v7336_v30  ;;  %6624 = vmatprep.subr.bf16.mxu1 %v7337_v44  ;;  %v2196_v30 = vor.u32 %v2195_v21, %v2192_v20  ;;  %v332_v5 = vrot.slane %v331_v60, 4  ;;  %v341_v21 = vrot.slane %v339_v13, 4  ;;  %v350_v38 = vrot.slane %v348_v26, 5  ;;  %v5850_v60 = vld [vmem:[%s7616_s14 + $0x3c] sm:$0xf] }
  0x29   : > { %6816 = vmatprep.subr.bf16.mxu0 %v7338_v47  ;;  %v2206_v31 = vor.u32 %v2205_v25, %v2201_v22  ;;  %v313_v36 = vsel %vm7644_vm2, %v308_v28, %v312_v17  ;;  %v5847_v17 = vld [vmem:[%s7616_s14 + $0x30] sm:$0xf]  ;;  %v2221_v19 = vrot.slane %v2220_v9, 4  ;;  %v342_v25 = vshll.u32 %v205_v56, 16 }
  0x2a   : > { %v5663_v40 = vcombine.low %v303_v27, %v313_v36  ;;  %v2197_v41 = vrot.slane %v2196_v30, 4  ;;  %v337_v15 = vsel %vm7644_vm2, %v332_v5, %v336_v61  ;;  %v352_v27 = vshrl.u32 %v206_v8, 16  ;;  %v7344_v36 = vld [vmem:[%s9848_s1 + $0x158] sm:$0xff]  }
  0x2b   : > { %6625 = vmatpush3.bf16.msra.mxu1 %v7337_v44  ;;  %v2207_v42 = vrot.slane %v2206_v31, 4  ;;  %v7697_v44 = vld [vmem:[%s7616_s14 + $0x28] sm:$0xf]  ;;  %v358_v28 = vshll.u32 %v250_v12, 16  ;;  %v2238_v33 = vshrl.u32 %v5847_v17, 16  ;;  %v344_v37 = vrot.slane %v342_v25, 5 }
  0x2c   : > { %6817 = vmatpush3.bf16.msra.mxu0 %v7338_v47  ;;  %6658 = vmatprep.subr.bf16.mxu1 %v7669_v62  ;;  %v320_v47 = vrot.slane %v318_v34, 5  ;;  %v2202_v52 = vsel %vm7644_vm2, %v2197_v41, %v2201_v22  ;;  %v2223_v2 = vshll.u32 %v7697_v44, 16  ;;  %v2227_v3 = vshrl.u32 %v7697_v44, 16  ;;  %v7348_v22 = vld [vmem:[%s9848_s1 + $0x18] sm:$0xff]   ;;  %v207_v41 = vld [vmem:[%s7616_s14 + $0x30] sm:$0xf] }
  0x2d   : > { %6850 = vmatprep.subr.bf16.mxu0 %v7681_v7  ;;  %v2212_v53 = vsel %vm7644_vm2, %v2207_v42, %v2211_v29  ;;  %v7735_v29 = vld [vmem:[%s7616_s14 + $0x34] sm:$0xf]  ;;  %v2241_v34 = vshll.u32 %v5847_v17, 16  ;;  %v354_v39 = vrot.slane %v352_v27, 4  ;;  %v363_v1 = vshrl.u32 %v207_v41, 16 }
  0x2e   : > { %6627 = vmatmul.mubr.bf16.vlgmr.msra.gmra.mrb[0].mxu1 %v5663_v40  ;;  %v5903_v58 = vcombine.low %v2202_v52, %v2212_v53  ;;  %v321_v59 = vor.u32 %v320_v47, %v317_v43  ;;  %v2225_v10 = vrot.slane %v2223_v2, 5  ;;  %v2229_v11 = vrot.slane %v2227_v3, 4  ;;  %v208_v52 = vld [vmem:[%s7616_s14 + $0x34] sm:$0xf]  ;;  %v7346_v53 = vld [vmem:[%s9848_s1 + $0x160] sm:$0xff]  }
  0x2f   : > { %6659 = vmatpush3.bf16.msra.mxu1 %v7669_v62  ;;  %v2233_v62 = vshll.u32 %v7706_v51, 16  ;;  %v360_v40 = vrot.slane %v358_v28, 5  ;;  %v2240_v43 = vrot.slane %v2238_v33, 4  ;;  %v355_v49 = vor.u32 %v354_v39, %v350_v38  ;;  %v7761_v2 = vld [vmem:[%s7616_s14 + $0x40] sm:$0xf] }
  0x30   : > { %6660 = vmatprep.subr.bf16.mxu1 %v7342_v45  ;;  %6819 = vmatmul.mubr.bf16.vlgmr.msra.gmra.mrb[0].mxu0 %v5903_v58  ;;  %v322_v4 = vrot.slane %v321_v59, 4  ;;  %v2230_v20 = vor.u32 %v2229_v11, %v2225_v10  ;;  %v2226_v30 = vsel %vm7644_vm2, %v2221_v19, %v2225_v10  ;;  %v2251_v50 = vshrl.u32 %v7735_v29, 16  ;;  %v251_v59 = vld [vmem:[%s7616_s14 + $0x38] sm:$0x1]  ;;  %v7347_v19 = vld [vmem:[%s9848_s1 + $0x168] sm:$0xff]  }
  0x31   : > { %6851 = vmatpush3.bf16.msra.mxu0 %v7681_v7  ;;  %v2235_v16 = vrot.slane %v2233_v62, 5  ;;  %v2257_v58 = vshll.u32 %v7740_v32, 16  ;;  %v366_v5 = vshll.u32 %v207_v41, 16  ;;  %v365_v10 = vrot.slane %v363_v1, 4 }
  0x32   : > { %6852 = vmatprep.subr.bf16.mxu0 %v7341_v46  ;;  %v327_v14 = vsel %vm7644_vm2, %v322_v4, %v326_v48  ;;  %v2231_v31 = vrot.slane %v2230_v20, 4  ;;  %v345_v48 = vor.u32 %v344_v37, %v341_v21  ;;  %v2253_v0 = vrot.slane %v2251_v50, 4 }
  0x33   : > { %6661 = vmatpush3.bf16.msra.mxu1 %v7342_v45  ;;  %v5664_v7 = vcombine.low %v327_v14, %v337_v15  ;;  %v2243_v45 = vrot.slane %v2241_v34, 5  ;;  %v2259_v4 = vrot.slane %v2257_v58, 5  ;;  %v368_v13 = vrot.slane %v366_v5, 5  ;;  %v7353_v15 = vld [vmem:[%s9848_s1 + $0x28] sm:$0xff]   ;;  %v7804_v5 = vld [vmem:[%s7616_s14 + $0x50] sm:$0x1] }
  0x34   : > { %6662 = vmatprep.subr.bf16.mxu1 %v7345_v63  ;;  %v2236_v42 = vsel %vm7644_vm2, %v2231_v31, %v2235_v16  ;;  %v346_v61 = vrot.slane %v345_v48, 4  ;;  %v372_v14 = vshll.u32 %v208_v52, 16  ;;  %v376_v17 = vshrl.u32 %v208_v52, 16  ;;  %v209_v31 = vld [vmem:[%s7616_s14 + $0x3c] sm:$0xf] }
  0x35   : > { %6853 = vmatpush3.bf16.msra.mxu0 %v7341_v46  ;;  %6630 = vmatprep.mubr.bf16.mxu1 %v5664_v7  ;;  %v2247_v46 = vshll.u32 %v7735_v29, 16  ;;  %v5904_v47 = vcombine.low %v2226_v30, %v2236_v42  ;;  %v2244_v55 = vor.u32 %v2243_v45, %v2240_v43  ;;  %v2262_v7 = vshrl.u32 %v5850_v60, 16  ;;  %v210_v43 = vld [vmem:[%s7616_s14 + $0x40] sm:$0xf]  ;;  %v7349_v45 = vld [vmem:[%s9848_s1 + $0x170] sm:$0xff]  }
  0x36   : > { %6854 = vmatprep.subr.bf16.mxu0 %v7343_v18  ;;  %v351_v62 = vsel %vm7644_vm2, %v346_v61, %v350_v38  ;;  %v369_v20 = vor.u32 %v368_v13, %v365_v10  ;;  %v374_v21 = vrot.slane %v372_v14, 5  ;;  %v2265_v25 = vshll.u32 %v5850_v60, 16  ;;  %v7355_v38 = vld [vmem:[%s9848_s1 + $0x30] sm:$0xff]   ;;  %v5853_v61 = vld [vmem:[%s7616_s14 + $0x48] sm:$0xf] }
  0x37   : > { %6663 = vmatpush3.bf16.msra.mxu1 %v7345_v63  ;;  %v2249_v56 = vrot.slane %v2247_v46, 5  ;;  %6822 = vmatprep.mubr.bf16.mxu0 %v5904_v47  ;;  %v356_v63 = vrot.slane %v355_v49, 4  ;;  %v2245_v3 = vrot.slane %v2244_v55, 4  ;;  %v2271_v26 = vshll.u32 %v7761_v2, 16  ;;  %v252_v47 = vld [vmem:[%s7616_s14 + $0x44] sm:$0x1] }
  0x38   : > { %6664 = vmatprep.subr.bf16.mxu1 %v7348_v22  ;;  %v378_v28 = vrot.slane %v376_v17, 4  ;;  %v2264_v30 = vrot.slane %v2262_v7, 4  ;;  %v370_v34 = vrot.slane %v369_v20, 4  ;;  %v2267_v37 = vrot.slane %v2265_v25, 5  ;;  %v7350_v55 = vld [vmem:[%s9848_s1 + $0x178] sm:$0xff]  }
  0x39   : > { %6855 = vmatpush3.bf16.msra.mxu0 %v7343_v18  ;;  %v361_v8 = vsel %vm7644_vm2, %v356_v63, %v360_v40  ;;  %v2254_v9 = vor.u32 %v2253_v0, %v2249_v56  ;;  %v2250_v12 = vsel %vm7644_vm2, %v2245_v3, %v2249_v56  ;;  %v382_v18 = vshll.u32 %v251_v59, 16 }
  0x3a   : > { %6856 = vmatprep.subr.bf16.mxu0 %v7344_v36  ;;  %v5665_v11 = vcombine.low %v351_v62, %v361_v8  ;;  %v379_v39 = vor.u32 %v378_v28, %v374_v21  ;;  %v2273_v40 = vrot.slane %v2271_v26, 5  ;;  %v2275_v41 = vshrl.u32 %v7761_v2, 16  ;;  %v212_v28 = vld [vmem:[%s7616_s14 + $0x4c] sm:$0xf] }
  0x3b   : > { %6665 = vmatpush3.bf16.msra.mxu1 %v7348_v22  ;;  %v2255_v16 = vrot.slane %v2254_v9, 4  ;;  %v7776_v22 = vld [vmem:[%s7616_s14 + $0x44] sm:$0x1]  ;;  %v2268_v46 = vor.u32 %v2267_v37, %v2264_v30  ;;  %v387_v48 = vshrl.u32 %v209_v31, 16  ;;  %v390_v49 = vshll.u32 %v209_v31, 16 }
  0x3c   : > { %6666 = vmatprep.subr.bf16.mxu1 %v7351_v54  ;;  %6631 = vmatmul.mubr.bf16.gmra.mrb[4].mxu1 %v5665_v11  ;;  %v2281_v42 = vshll.u32 %v7776_v22, 16  ;;  %v375_v50 = vsel %vm7644_vm2, %v370_v34, %v374_v21  ;;  %v380_v52 = vrot.slane %v379_v39, 4  ;;  %v396_v60 = vshll.u32 %v210_v43, 16  ;;  %v7357_v11 = vld [vmem:[%s9848_s1 + $0x38] sm:$0xff]  }
  0x3d   : > { %6857 = vmatpush3.bf16.msra.mxu0 %v7344_v36  ;;  %v2260_v27 = vsel %vm7644_vm2, %v2255_v16, %v2259_v4  ;;  %v384_v36 = vrot.slane %v382_v18, 5  ;;  %v2269_v56 = vrot.slane %v2268_v46, 4  ;;  %v389_v58 = vrot.slane %v387_v48, 4  ;;  %v7801_v4 = vld [vmem:[%s7616_s14 + $0x4c] sm:$0xf]  ;;  %v7814_v16 = vld [vmem:[%s9848_s1 + $0x180] sm:$0xff]  }
  0x3e   : > { %6858 = vmatprep.subr.bf16.mxu0 %v7346_v53  ;;  %v5905_v33 = vcombine.low %v2250_v12, %v2260_v27  ;;  %v392_v59 = vrot.slane %v390_v49, 5  ;;  %v400_v1 = vshrl.u32 %v210_v43, 16  ;;  %v406_v3 = vshll.u32 %v252_v47, 16  ;;  %v211_v27 = vld [vmem:[%s7616_s14 + $0x48] sm:$0xf] }
  0x3f   : > { %6667 = vmatpush3.bf16.msra.mxu1 %v7351_v54  ;;  %v2283_v54 = vrot.slane %v2281_v42, 5  ;;  %v385_v63 = vsel %vm7644_vm2, %v380_v52, %v384_v36  ;;  %v2274_v8 = vsel %vm7644_vm2, %v2269_v56, %v2273_v40  ;;  %v398_v10 = vrot.slane %v396_v60, 5  ;;  %v5856_v43 = vld [vmem:[%s7616_s14 + $0x54] sm:$0xf] }
  0x40   : > { %6668 = vmatprep.subr.bf16.mxu1 %v7353_v15  ;;  %6823 = vmatmul.mubr.bf16.gmra.mrb[4].mxu0 %v5905_v33  ;;  %v5666_v62 = vcombine.low %v375_v50, %v385_v63  ;;  %v393_v9 = vor.u32 %v392_v59, %v389_v58  ;;  %v402_v13 = vrot.slane %v400_v1, 4  ;;  %v408_v14 = vrot.slane %v406_v3, 5  ;;  %v7835_v50 = vld [vmem:[%s7616_s14 + $0x58] sm:$0xf] }
  0x41   : > { %6859 = vmatpush3.bf16.msra.mxu0 %v7346_v53  ;;  %v2277_v53 = vrot.slane %v2275_v41, 4  ;;  %v2289_v18 = vshll.u32 %v5853_v61, 16  ;;  %v2295_v7 = vshll.u32 %v7801_v4, 16  ;;  %v2305_v26 = vshll.u32 %v7804_v5, 16 }
  0x42   : > { %6860 = vmatprep.subr.bf16.mxu0 %v7347_v19  ;;  %6634 = vmatprep.mubr.bf16.mxu1 %v5666_v62  ;;  %v394_v17 = vrot.slane %v393_v9, 4  ;;  %v403_v21 = vor.u32 %v402_v13, %v398_v10  ;;  %v414_v41 = vshll.u32 %v211_v27, 16  ;;  %v420_v42 = vshll.u32 %v212_v28, 16 }
  0x43   : > { %6669 = vmatpush3.bf16.msra.mxu1 %v7353_v15  ;;  %v2278_v0 = vor.u32 %v2277_v53, %v2273_v40  ;;  %v2286_v15 = vshrl.u32 %v5853_v61, 16  ;;  %v2291_v31 = vrot.slane %v2289_v18, 5  ;;  %v2297_v33 = vrot.slane %v2295_v7, 5  ;;  %v7840_v61 = vld [vmem:[%s7616_s14 + $0x5c] sm:$0x1] }
  0x44   : > { %6670 = vmatprep.subr.bf16.mxu1 %v7355_v38  ;;  %v399_v34 = vsel %vm7644_vm2, %v394_v17, %v398_v10  ;;  %v404_v36 = vrot.slane %v403_v21, 4  ;;  %v411_v40 = vshrl.u32 %v211_v27, 16  ;;  %v2307_v48 = vrot.slane %v2305_v26, 5  ;;  %v254_v26 = vld [vmem:[%s7616_s14 + $0x5c] sm:$0x1] }
  0x45   : > { %6861 = vmatpush3.bf16.msra.mxu0 %v7347_v19  ;;  %v2279_v12 = vrot.slane %v2278_v0, 4  ;;  %v2299_v19 = vshrl.u32 %v7801_v4, 16  ;;  %v2288_v25 = vrot.slane %v2286_v15, 4  ;;  %v424_v49 = vshrl.u32 %v212_v28, 16 }
  0x46   : > { %6862 = vmatprep.subr.bf16.mxu0 %v7349_v45  ;;  %v409_v46 = vsel %vm7644_vm2, %v404_v36, %v408_v14  ;;  %v422_v58 = vrot.slane %v420_v42, 5  ;;  %v2310_v1 = vshrl.u32 %v5856_v43, 16  ;;  %v2313_v3 = vshll.u32 %v5856_v43, 16 }
  0x47   : > { %6671 = vmatpush3.bf16.msra.mxu1 %v7355_v38  ;;  %v2284_v20 = vsel %vm7644_vm2, %v2279_v12, %v2283_v54  ;;  %v2301_v37 = vrot.slane %v2299_v19, 4  ;;  %v253_v38 = vld [vmem:[%s7616_s14 + $0x50] sm:$0x1]  ;;  %v2292_v39 = vor.u32 %v2291_v31, %v2288_v25  ;;  %v5667_v52 = vcombine.low %v399_v34, %v409_v46  ;;  %v214_v25 = vld [vmem:[%s7616_s14 + $0x58] sm:$0xf] }
  0x48   : > { %6672 = vmatprep.subr.bf16.mxu1 %v7357_v11  ;;  %v5906_v30 = vcombine.low %v2274_v8, %v2284_v20  ;;  %v413_v54 = vrot.slane %v411_v40, 4  ;;  %v426_v59 = vrot.slane %v424_v49, 4  ;;  %v430_v60 = vshll.u32 %v253_v38, 16  ;;  %v7858_v34 = vld [vmem:[%s7616_s14 + $0x64] sm:$0xf] }
  0x49   : > { %6863 = vmatpush3.bf16.msra.mxu0 %v7349_v45  ;;  %v7830_v45 = vld [vmem:[%s9848_s1 + $0x80] sm:$0xff]   ;;  %v2302_v47 = vor.u32 %v2301_v37, %v2297_v33  ;;  %v2293_v53 = vrot.slane %v2292_v39, 4  ;;  %6635 = vmatmul.mubr.bf16.gmra.mrb[8].mxu1 %v5667_v52  ;;  %v2319_v10 = vshll.u32 %v7835_v50, 16  ;;  %v2312_v14 = vrot.slane %v2310_v1, 4 }
  0x4a   : > { %6864 = vmatprep.subr.bf16.mxu0 %v7350_v55  ;;  %6826 = vmatprep.mubr.bf16.mxu0 %v5906_v30  ;;  %v427_v8 = vor.u32 %v426_v59, %v422_v58  ;;  %v432_v9 = vrot.slane %v430_v60, 5  ;;  %v2315_v15 = vrot.slane %v2313_v3, 5  ;;  %v2323_v7 = vshrl.u32 %v7835_v50, 16 }
  0x4b   : > { %6673 = vmatpush3.bf16.msra.mxu1 %v7357_v11  ;;  %v2303_v56 = vrot.slane %v2302_v47, 4  ;;  %v2298_v63 = vsel %vm7644_vm2, %v2293_v53, %v2297_v33  ;;  %v213_v11 = vld [vmem:[%s7616_s14 + $0x54] sm:$0xf]  ;;  %v2321_v18 = vrot.slane %v2319_v10, 5  ;;  %v2329_v19 = vshll.u32 %v7840_v61, 16 }
  0x4c   : > { %6706 = vmatprep.subr.bf16.mxu1 %v7830_v45  ;;  %v428_v17 = vrot.slane %v427_v8, 4  ;;  %v2316_v21 = vor.u32 %v2315_v15, %v2312_v14  ;;  %v435_v27 = vshrl.u32 %v213_v11, 16  ;;  %v2325_v30 = vrot.slane %v2323_v7, 4  ;;  %v5859_v33 = vld [vmem:[%s7616_s14 + $0x60] sm:$0xf] }
  0x4d   : > { %6865 = vmatpush3.bf16.msra.mxu0 %v7350_v55  ;;  %v416_v55 = vrot.slane %v414_v41, 5  ;;  %v2308_v62 = vsel %vm7644_vm2, %v2303_v56, %v2307_v48  ;;  %v438_v31 = vshll.u32 %v213_v11, 16  ;;  %v2331_v38 = vrot.slane %v2329_v19, 5  ;;  %v7863_v48 = vld [vmem:[%s7616_s14 + $0x68] sm:$0x1] }
  0x4e   : > { %6898 = vmatprep.subr.bf16.mxu0 %v7814_v16  ;;  %v5907_v12 = vcombine.low %v2298_v63, %v2308_v62  ;;  %v433_v28 = vsel %vm7644_vm2, %v428_v17, %v432_v9  ;;  %v2317_v37 = vrot.slane %v2316_v21, 4  ;;  %v437_v39 = vrot.slane %v435_v27, 4  ;;  %v7870_v8 = vld [vmem:[%s7616_s14 + $0x60] sm:$0xf] }
  0x4f   : > { %v417_v0 = vor.u32 %v416_v55, %v413_v54  ;;  %v2326_v40 = vor.u32 %v2325_v30, %v2321_v18  ;;  %v440_v41 = vrot.slane %v438_v31, 5  ;;  %v444_v42 = vshll.u32 %v214_v25, 16 }
  0x50   : > { %6827 = vmatmul.mubr.bf16.gmra.mrb[8].mxu0 %v5907_v12  ;;  %v448_v43 = vshrl.u32 %v214_v25, 16  ;;  %v2322_v46 = vsel %vm7644_vm2, %v2317_v37, %v2321_v18  ;;  %v454_v47 = vshll.u32 %v254_v26, 16  ;;  %v2334_v49 = vshrl.u32 %v5859_v33, 16  ;;  %v255_v18 = vld [vmem:[%s7616_s14 + $0x68] sm:$0x1] }
  0x51   : > { %v418_v13 = vrot.slane %v417_v0, 4  ;;  %v2337_v52 = vshll.u32 %v5859_v33, 16  ;;  %v2327_v53 = vrot.slane %v2326_v40, 4  ;;  %v441_v54 = vor.u32 %v440_v41, %v437_v39  ;;  %v5926_v25 = vld [vmem:[%s7616_s14 + $0xc] sm:$0xe] }
  0x52   : > { %v446_v55 = vrot.slane %v444_v42, 5  ;;  %v450_v56 = vrot.slane %v448_v43, 4  ;;  %v2336_v59 = vrot.slane %v2334_v49, 4  ;;  %v2343_v63 = vshll.u32 %v7858_v34, 16  ;;  %v9292_v43 = vld [vmem:[%s7616_s14 + $0x88] sm:$0xf] }
  0x53   : > { %v423_v20 = vsel %vm7644_vm2, %v418_v13, %v422_v58  ;;  %v456_v58 = vrot.slane %v454_v47, 5  ;;  %v2339_v60 = vrot.slane %v2337_v52, 5  ;;  %v2332_v0 = vsel %vm7644_vm2, %v2327_v53, %v2331_v38  ;;  %v7874_v13 = vld [vmem:[%s7616_s14 + $0x64] sm:$0xf]  ;;  %v7889_v38 = vld [vmem:[%s7616_s14 + $0x6c] sm:$0xf] }
  0x54   : > { %v5668_v36 = vcombine.low %v423_v20, %v433_v28  ;;  %v442_v1 = vrot.slane %v441_v54, 4  ;;  %v451_v3 = vor.u32 %v450_v56, %v446_v55  ;;  %v2347_v62 = vshrl.u32 %v7858_v34, 16  ;;  %v7901_v53 = vld [vmem:[%s7616_s14 + $0x70] sm:$0xf] }
  0x55   : > { %v5908_v9 = vcombine.low %v2322_v46, %v2332_v0  ;;  %v2340_v10 = vor.u32 %v2339_v60, %v2336_v59  ;;  %v2345_v11 = vrot.slane %v2343_v63, 5  ;;  %v2353_v12 = vshll.u32 %v7863_v48, 16 }
  0x56   : > { %6638 = vmatprep.mubr.bf16.mxu1 %v5668_v36  ;;  %v447_v14 = vsel %vm7644_vm2, %v442_v1, %v446_v55  ;;  %v452_v15 = vrot.slane %v451_v3, 4  ;;  %v2349_v17 = vrot.slane %v2347_v62, 4  ;;  %v2947_v7 = vrot.slane %v7676_v6, 5 }
  0x57   : > { %6830 = vmatprep.mubr.bf16.mxu0 %v5908_v9  ;;  %v2341_v19 = vrot.slane %v2340_v10, 4  ;;  %v459_v20 = vshrl.u32 %v7870_v8, 16  ;;  %v462_v21 = vshll.u32 %v7870_v8, 16  ;;  %v2355_v28 = vrot.slane %v2353_v12, 5  ;;  %v5927_v9 = vld [vmem:[%s7616_s14 + $0x18] sm:$0xe] }
  0x58   : > { %v457_v26 = vsel %vm7644_vm2, %v452_v15, %v456_v58  ;;  %v2350_v27 = vor.u32 %v2349_v17, %v2345_v11  ;;  %v468_v30 = vshll.u32 %v7874_v13, 16  ;;  %v472_v41 = vshrl.u32 %v7874_v13, 16  ;;  %v256_v58 = vld [vmem:[%s7616_s14 + $0x74] sm:$0x1]  ;;  %v7918_v15 = vld [vmem:[%s7616_s14 + $0x78] sm:$0xf] }
  0x59   : > { %v5669_v31 = vcombine.low %v447_v14, %v457_v26  ;;  %v2346_v33 = vsel %vm7644_vm2, %v2341_v19, %v2345_v11  ;;  %v461_v36 = vrot.slane %v459_v20, 4  ;;  %v464_v37 = vrot.slane %v462_v21, 5  ;;  %v7921_v17 = vld [vmem:[%s7616_s14 + $0x7c] sm:$0xf] }
  0x5a   : > { %v2351_v39 = vrot.slane %v2350_v27, 4  ;;  %v470_v40 = vrot.slane %v468_v30, 5  ;;  %v478_v42 = vshll.u32 %v255_v18, 16  ;;  %v5942_v47 = vrot.slane %v5926_v25, 9 }
  0x5b   : > { %6639 = vmatmul.mubr.bf16.gmra.mrb[12].mxu1 %v5669_v31  ;;  %v465_v46 = vor.u32 %v464_v37, %v461_v36  ;;  %v2937_v49 = vrot.slane %v7629_v23, 5  ;;  %v2940_v52 = vrot.slane %v7632_v24, 5  ;;  %v474_v55 = vrot.slane %v472_v41, 4 }
  0x5c   : > { %v2356_v54 = vsel %vm7644_vm2, %v2351_v39, %v2355_v28  ;;  %v480_v56 = vrot.slane %v478_v42, 5  ;;  %v483_v59 = vshrl.u32 %v7889_v38, 16  ;;  %v486_v3 = vshll.u32 %v7889_v38, 16 }
  0x5d   : > { %v5909_v60 = vcombine.low %v2346_v33, %v2356_v54  ;;  %v466_v63 = vrot.slane %v465_v46, 4  ;;  %v2938_v23 = vsel %vm7894_vm5, %v5942_v47, %v2937_v49  ;;  %v2939_v0 = vrot.slane %v2937_v49, 4  ;;  %v257_v33 = vld [vmem:[%s7616_s14 + $0x80] sm:$0x1]  ;;  %v5928_v46 = vld [vmem:[%s7616_s14 + $0x24] sm:$0xe] }
  0x5e   : > { %v475_v1 = vor.u32 %v474_v55, %v470_v40  ;;  %v485_v24 = vrot.slane %v483_v59, 4  ;;  %v492_v62 = vshll.u32 %v7901_v53, 16  ;;  %v496_v12 = vshrl.u32 %v7901_v53, 16  ;;  %v7934_v54 = vld [vmem:[%s7616_s14 + $0x84] sm:$0xf] }
  0x5f   : > { %6831 = vmatmul.mubr.bf16.gmra.mrb[12].mxu0 %v5909_v60  ;;  %v471_v10 = vsel %vm7644_vm2, %v466_v63, %v470_v40  ;;  %v2941_v11 = vsel %vm7894_vm5, %v2939_v0, %v2940_v52  ;;  %v502_v14 = vshll.u32 %v256_v58, 16  ;;  %v488_v20 = vrot.slane %v486_v3, 5  ;;  %v7942_v60 = vld [vmem:[%s7616_s14 + $0x88] sm:$0xf] }
  0x60   : > { %v476_v18 = vrot.slane %v475_v1, 4  ;;  %v5974_v19 = vcombine.low %v2938_v23, %v2941_v11  ;;  %v494_v21 = vrot.slane %v492_v62, 5  ;;  %v498_v25 = vrot.slane %v496_v12, 4 }
  0x61   : > { %v504_v26 = vrot.slane %v502_v14, 5  ;;  %v5943_v27 = vrot.slane %v5927_v9, 9  ;;  %v2944_v28 = vrot.slane %v7664_v57, 5  ;;  %v489_v31 = vor.u32 %v488_v20, %v485_v24  ;;  %v7354_v24 = vld [vmem:[%s9848_s1 + $0x188] sm:$0xff]  }
  0x62   : > { %v481_v30 = vsel %vm7644_vm2, %v476_v18, %v480_v56  ;;  %6866 = vmatprep.mubr.bf16.mxu0 %v5974_v19  ;;  %v507_v36 = vshrl.u32 %v7918_v15, 16  ;;  %v510_v37 = vshll.u32 %v7918_v15, 16  ;;  %v499_v40 = vor.u32 %v498_v25, %v494_v21  ;;  %v258_v14 = vld [vmem:[%s7616_s14 + $0x8c] sm:$0x1]  ;;  %v5929_v25 = vld [vmem:[%s7616_s14 + $0x30] sm:$0xe] }
  0x63   : > { %v5670_v39 = vcombine.low %v471_v10, %v481_v30  ;;  %v2945_v41 = vsel %vm7894_vm5, %v5943_v27, %v2944_v28  ;;  %v2946_v42 = vrot.slane %v2944_v28, 4  ;;  %v490_v57 = vrot.slane %v489_v31, 4 }
  0x64   : > { %v509_v47 = vrot.slane %v507_v36, 4  ;;  %v512_v49 = vrot.slane %v510_v37, 5  ;;  %v516_v52 = vshll.u32 %v7921_v17, 16  ;;  %v500_v55 = vrot.slane %v499_v40, 4 }
  0x65   : > { %6642 = vmatprep.mubr.bf16.mxu1 %v5670_v39  ;;  %v2948_v56 = vsel %vm7894_vm5, %v2946_v42, %v2947_v7  ;;  %v520_v58 = vshrl.u32 %v7921_v17, 16  ;;  %v526_v59 = vshll.u32 %v257_v33, 16  ;;  %v495_v63 = vsel %vm7644_vm2, %v490_v57, %v494_v21 }
  0x66   : > { %v5975_v23 = vcombine.low %v2945_v41, %v2948_v56  ;;  %v513_v0 = vor.u32 %v512_v49, %v509_v47  ;;  %v518_v1 = vrot.slane %v516_v52, 5  ;;  %v505_v6 = vsel %vm7644_vm2, %v500_v55, %v504_v26  ;;  %v7356_v26 = vld [vmem:[%s9848_s1 + $0x190] sm:$0xff]   ;;  %v7358_v52 = vld [vmem:[%s9848_s1 + $0x198] sm:$0xff]  }
  0x67   : > { %v522_v7 = vrot.slane %v520_v58, 4  ;;  %v528_v3 = vrot.slane %v526_v59, 5  ;;  %v5944_v62 = vrot.slane %v5928_v46, 9  ;;  %v5671_v9 = vcombine.low %v495_v63, %v505_v6  ;;  %v7970_v41 = vld [vmem:[%s7616_s14 + $0x90] sm:$0xf] }
  0x68   : > { %6867 = vmatmul.mubr.bf16.vlgmr.msra.gmra.mrb[0].mxu0 %v5975_v23  ;;  %v514_v10 = vrot.slane %v513_v0, 4  ;;  %v2951_v11 = vrot.slane %v7697_v44, 5  ;;  %v2954_v12 = vrot.slane %v7706_v51, 5  ;;  %v531_v19 = vshrl.u32 %v7934_v54, 16  ;;  %v7976_v49 = vld [vmem:[%s7616_s14 + $0x94] sm:$0xf] }
  0x69   : > { %6899 = vmatpush3.bf16.msra.mxu0 %v7814_v16  ;;  %v523_v18 = vor.u32 %v522_v7, %v518_v1  ;;  %v534_v20 = vshll.u32 %v7934_v54, 16  ;;  %v540_v21 = vshll.u32 %v7942_v60, 16  ;;  %6643 = vmatmul.mubr.bf16.gmra.mrb[16].mxu1 %v5671_v9  ;;  %v544_v27 = vshrl.u32 %v7942_v60, 16  ;;  %v259_v63 = vld [vmem:[%s7616_s14 + $0x98] sm:$0x1] }
  0x6a   : > { %v519_v44 = vsel %vm7644_vm2, %v514_v10, %v518_v1  ;;  %v2952_v51 = vsel %vm7894_vm5, %v5944_v62, %v2951_v11  ;;  %v2953_v16 = vrot.slane %v2951_v11, 4  ;;  %6900 = vmatprep.subr.bf16.mxu0 %v7354_v24  ;;  %v533_v30 = vrot.slane %v531_v19, 4  ;;  %v7991_v62 = vld [vmem:[%s7616_s14 + $0x9c] sm:$0xf] }
  0x6b   : > { %v524_v28 = vrot.slane %v523_v18, 4  ;;  %v536_v31 = vrot.slane %v534_v20, 5  ;;  %v542_v33 = vrot.slane %v540_v21, 5  ;;  %v546_v37 = vrot.slane %v544_v27, 4  ;;  %v8000_v21 = vld [vmem:[%s7616_s14 + $0xa0] sm:$0xf] }
  0x6c   : > { %v2955_v36 = vsel %vm7894_vm5, %v2953_v16, %v2954_v12  ;;  %v550_v39 = vshll.u32 %v258_v14, 16  ;;  %v5945_v40 = vrot.slane %v5929_v25, 9  ;;  %v2958_v47 = vrot.slane %v7735_v29, 5  ;;  %v7362_v25 = vld [vmem:[%s9848_s1 + $0x1a0] sm:$0xff]  }
  0x6d   : > { %v529_v42 = vsel %vm7644_vm2, %v524_v28, %v528_v3  ;;  %v5976_v46 = vcombine.low %v2952_v51, %v2955_v36  ;;  %v537_v57 = vor.u32 %v536_v31, %v533_v30  ;;  %6901 = vmatpush3.bf16.msra.mxu0 %v7354_v24  ;;  %v547_v56 = vor.u32 %v546_v37, %v542_v33  ;;  %v5930_v24 = vld [vmem:[%s7616_s14 + $0x3c] sm:$0xe]  ;;  %v260_v28 = vld [vmem:[%s7616_s14 + $0xa4] sm:$0x1]  ;;  %v5931_v30 = vld [vmem:[%s7616_s14 + $0x48] sm:$0xe] }
  0x6e   : > { %v5672_v55 = vcombine.low %v519_v44, %v529_v42  ;;  %v552_v58 = vrot.slane %v550_v39, 5  ;;  %v2961_v59 = vrot.slane %v7740_v32, 5  ;;  %6902 = vmatprep.subr.bf16.mxu0 %v7356_v26  ;;  %v2959_v29 = vsel %vm7894_vm5, %v5945_v40, %v2958_v47 }
  0x6f   : > { %6870 = vmatprep.mubr.bf16.mxu0 %v5976_v46  ;;  %v538_v23 = vrot.slane %v537_v57, 4  ;;  %v2960_v0 = vrot.slane %v2958_v47, 4  ;;  %v555_v1 = vshrl.u32 %v7970_v41, 16  ;;  %v548_v6 = vrot.slane %v547_v56, 4 }
  0x70   : > { %6646 = vmatprep.mubr.bf16.mxu1 %v5672_v55  ;;  %v558_v7 = vshll.u32 %v7970_v41, 16  ;;  %v564_v3 = vshll.u32 %v7976_v49, 16  ;;  %v568_v32 = vshrl.u32 %v7976_v49, 16  ;;  %v574_v12 = vshll.u32 %v259_v63, 16 }
  0x71   : > { %v543_v9 = vsel %vm7644_vm2, %v538_v23, %v542_v33  ;;  %v2962_v10 = vsel %vm7894_vm5, %v2960_v0, %v2961_v59  ;;  %v557_v11 = vrot.slane %v555_v1, 4  ;;  %6903 = vmatpush3.bf16.msra.mxu0 %v7356_v26  ;;  %v553_v14 = vsel %vm7644_vm2, %v548_v6, %v552_v58  ;;  %v8023_v0 = vld [vmem:[%s7616_s14 + $0xa8] sm:$0xf] }
  0x72   : > { %v5977_v18 = vcombine.low %v2959_v29, %v2962_v10  ;;  %v560_v19 = vrot.slane %v558_v7, 5  ;;  %v566_v20 = vrot.slane %v564_v3, 5  ;;  %6904 = vmatprep.subr.bf16.mxu0 %v7358_v52  ;;  %v5673_v44 = vcombine.low %v543_v9, %v553_v14  ;;  %v8028_v3 = vld [vmem:[%s7616_s14 + $0xac] sm:$0xf]  ;;  %v5932_v14 = vld [vmem:[%s7616_s14 + $0x54] sm:$0xe] }
  0x73   : > { %v570_v51 = vrot.slane %v568_v32, 4  ;;  %v576_v16 = vrot.slane %v574_v12, 5  ;;  %v5946_v27 = vrot.slane %v5930_v24, 9  ;;  %v2965_v31 = vrot.slane %v7761_v2, 5  ;;  %v261_v12 = vld [vmem:[%s7616_s14 + $0xb0] sm:$0x1] }
  0x74   : > { %6871 = vmatmul.mubr.bf16.gmra.mrb[4].mxu0 %v5977_v18  ;;  %v561_v26 = vor.u32 %v560_v19, %v557_v11  ;;  %v2968_v33 = vrot.slane %v7776_v22, 5  ;;  %v579_v36 = vshrl.u32 %v7991_v62, 16  ;;  %6647 = vmatmul.mubr.bf16.gmra.mrb[20].mxu1 %v5673_v44  ;;  %v582_v39 = vshll.u32 %v7991_v62, 16  ;;  %v7366_v22 = vld [vmem:[%s9848_s1 + $0x1a8] sm:$0xff]   ;;  %v7370_v18 = vld [vmem:[%s9848_s1 + $0x1b0] sm:$0xff]  }
  0x75   : > { %v571_v37 = vor.u32 %v570_v51, %v566_v20  ;;  %v588_v40 = vshll.u32 %v8000_v21, 16  ;;  %v592_v42 = vshrl.u32 %v8000_v21, 16  ;;  %6905 = vmatpush3.bf16.msra.mxu0 %v7358_v52  ;;  %v2966_v57 = vsel %vm7894_vm5, %v5946_v27, %v2965_v31 }
  0x76   : > { %v562_v46 = vrot.slane %v561_v26, 4  ;;  %v2967_v47 = vrot.slane %v2965_v31, 4  ;;  %v581_v2 = vrot.slane %v579_v36, 4  ;;  %6906 = vmatprep.subr.bf16.mxu0 %v7362_v25  ;;  %v584_v56 = vrot.slane %v582_v39, 5  ;;  %v8048_v31 = vld [vmem:[%s7616_s14 + $0xb4] sm:$0xf] }
  0x77   : > { %v572_v55 = vrot.slane %v571_v37, 4  ;;  %v590_v58 = vrot.slane %v588_v40, 5  ;;  %v594_v59 = vrot.slane %v592_v42, 4  ;;  %v598_v23 = vshll.u32 %v260_v28, 16  ;;  %v8056_v42 = vld [vmem:[%s7616_s14 + $0xb8] sm:$0xf] }
  0x78   : > { %v567_v52 = vsel %vm7644_vm2, %v562_v46, %v566_v20  ;;  %v2969_v63 = vsel %vm7894_vm5, %v2967_v47, %v2968_v33  ;;  %v5947_v29 = vrot.slane %v5931_v30, 9  ;;  %v585_v6 = vor.u32 %v584_v56, %v581_v2  ;;  %v7374_v33 = vld [vmem:[%s9848_s1 + $0x1b8] sm:$0xff]  }
  0x79   : > { %v577_v1 = vsel %vm7644_vm2, %v572_v55, %v576_v16  ;;  %v5978_v24 = vcombine.low %v2966_v57, %v2969_v63  ;;  %v595_v7 = vor.u32 %v594_v59, %v590_v58  ;;  %6907 = vmatpush3.bf16.msra.mxu0 %v7362_v25  ;;  %v600_v9 = vrot.slane %v598_v23, 5  ;;  %v262_v55 = vld [vmem:[%s7616_s14 + $0xbc] sm:$0x1] }
  0x7a   : > { %v5674_v32 = vcombine.low %v567_v52, %v577_v1  ;;  %v2972_v10 = vrot.slane %v7801_v4, 5  ;;  %v2975_v11 = vrot.slane %v7804_v5, 5  ;;  %6908 = vmatprep.subr.bf16.mxu0 %v7366_v22  ;;  %v586_v19 = vrot.slane %v585_v6, 4 }
  0x7b   : > { %6874 = vmatprep.mubr.bf16.mxu0 %v5978_v24  ;;  %v596_v20 = vrot.slane %v595_v7, 4  ;;  %v603_v44 = vshrl.u32 %v8023_v0, 16  ;;  %v606_v25 = vshll.u32 %v8023_v0, 16  ;;  %v612_v51 = vshll.u32 %v8028_v3, 16  ;;  %v5934_v24 = vld [vmem:[%s7616_s14 + $0x6c] sm:$0xe] }
  0x7c   : > { %6650 = vmatprep.mubr.bf16.mxu1 %v5674_v32  ;;  %v2973_v4 = vsel %vm7894_vm5, %v5947_v29, %v2972_v10  ;;  %v2974_v5 = vrot.slane %v2972_v10, 4  ;;  %v616_v16 = vshrl.u32 %v8028_v3, 16  ;;  %v591_v27 = vsel %vm7644_vm2, %v586_v19, %v590_v58  ;;  %v5863_v10 = vld [vmem:[%s7616_s14 + $0x70] sm:$0xf]  ;;  %v8076_v19 = vld [vmem:[%s9848_s1 + $0x1c0] sm:$0xff]  }
  0x7d   : > { %v601_v28 = vsel %vm7644_vm2, %v596_v20, %v600_v9  ;;  %v605_v30 = vrot.slane %v603_v44, 4  ;;  %v608_v26 = vrot.slane %v606_v25, 5  ;;  %6909 = vmatpush3.bf16.msra.mxu0 %v7366_v22  ;;  %v614_v39 = vrot.slane %v612_v51, 5  ;;  %v5933_v22 = vld [vmem:[%s7616_s14 + $0x60] sm:$0xe] }
  0x7e   : > { %v5675_v36 = vcombine.low %v591_v27, %v601_v28  ;;  %v2976_v37 = vsel %vm7894_vm5, %v2974_v5, %v2975_v11  ;;  %v618_v40 = vrot.slane %v616_v16, 4  ;;  %6910 = vmatprep.subr.bf16.mxu0 %v7370_v18  ;;  %v622_v47 = vshll.u32 %v261_v12, 16 }
  0x7f   : > { %v5979_v46 = vcombine.low %v2973_v4, %v2976_v37  ;;  %v609_v57 = vor.u32 %v608_v26, %v605_v30  ;;  %v5948_v2 = vrot.slane %v5932_v14, 9  ;;  %v2979_v58 = vrot.slane %v7835_v50, 5  ;;  %v5864_v50 = vld [vmem:[%s7616_s14 + $0x74] sm:$0x1] }
  0x80   : > { %6651 = vmatmul.mubr.bf16.gmra.mrb[24].mxu1 %v5675_v36  ;;  %v619_v56 = vor.u32 %v618_v40, %v614_v39  ;;  %v2982_v59 = vrot.slane %v7840_v61, 5  ;;  %v627_v52 = vshrl.u32 %v8048_v31, 16  ;;  %v624_v23 = vrot.slane %v622_v47, 5 }
  0x81   : > { %6875 = vmatmul.mubr.bf16.gmra.mrb[8].mxu0 %v5979_v46  ;;  %v610_v63 = vrot.slane %v609_v57, 4  ;;  %v630_v29 = vshll.u32 %v8048_v31, 16  ;;  %v636_v1 = vshll.u32 %v8056_v42, 16  ;;  %v2980_v7 = vsel %vm7894_vm5, %v5948_v2, %v2979_v58  ;;  %v5935_v46 = vld [vmem:[%s7616_s14 + $0x78] sm:$0xe] }
  0x82   : > { %v620_v6 = vrot.slane %v619_v56, 4  ;;  %v2981_v32 = vrot.slane %v2979_v58, 4  ;;  %v629_v9 = vrot.slane %v627_v52, 4  ;;  %6911 = vmatpush3.bf16.msra.mxu0 %v7370_v18  ;;  %v640_v14 = vshrl.u32 %v8056_v42, 16  ;;  %v5869_v58 = vld [vmem:[%s7616_s14 + $0x88] sm:$0xf] }
  0x83   : > { %v615_v61 = vsel %vm7644_vm2, %v610_v63, %v614_v39  ;;  %v632_v11 = vrot.slane %v630_v29, 5  ;;  %v638_v12 = vrot.slane %v636_v1, 5  ;;  %6912 = vmatprep.subr.bf16.mxu0 %v7374_v33  ;;  %v646_v18 = vshll.u32 %v262_v55, 16  ;;  %v8102_v29 = vld [vmem:[%s7616_s14 + $0x4] sm:$0xf] }
  0x84   : > { %v625_v20 = vsel %vm7644_vm2, %v620_v6, %v624_v23  ;;  %v2983_v44 = vsel %vm7894_vm5, %v2981_v32, %v2982_v59  ;;  %v5949_v25 = vrot.slane %v5933_v22, 9  ;;  %v642_v16 = vrot.slane %v640_v14, 4  ;;  %v5870_v59 = vld [vmem:[%s7616_s14 + $0x8c] sm:$0x1]  ;;  %v7443_v23 = vld [vmem:[%s7616_s14] sm:$0xf] }
  0x85   : > { %v5676_v4 = vcombine.low %v615_v61, %v625_v20  ;;  %v5980_v5 = vcombine.low %v2980_v7, %v2983_v44  ;;  %v633_v51 = vor.u32 %v632_v11, %v629_v9  ;;  %v648_v27 = vrot.slane %v646_v18, 5  ;;  %v5936_v6 = vld [vmem:[%s7616_s14 + $0x84] sm:$0xe]  ;;  %v5938_v18 = vld [vmem:[%s7616_s14 + $0x9c] sm:$0xe] }
  0x86   : > { %v2986_v28 = vrot.slane %v7858_v34, 5  ;;  %v2989_v30 = vrot.slane %v7863_v48, 5  ;;  %v5950_v26 = vrot.slane %v5934_v24, 9  ;;  %6913 = vmatpush3.bf16.msra.mxu0 %v7374_v33  ;;  %v643_v37 = vor.u32 %v642_v16, %v638_v12  ;;  %v5866_v34 = vld [vmem:[%s7616_s14 + $0x7c] sm:$0xf] }
  0x87   : > { %6654 = vmatprep.mubr.bf16.mxu1 %v5676_v4  ;;  %6878 = vmatprep.mubr.bf16.mxu0 %v5980_v5  ;;  %v634_v36 = vrot.slane %v633_v51, 4  ;;  %v2993_v39 = vrot.slane %v5863_v10, 5  ;;  %v2996_v40 = vrot.slane %v5864_v50, 5  ;;  %v5867_v48 = vld [vmem:[%s7616_s14 + $0x80] sm:$0x1]  ;;  %v5686_v1 = vcombine.low %v7443_v23, %v8102_v29 }
  0x88   : > { %v2987_v57 = vsel %vm7894_vm5, %v5949_v25, %v2986_v28  ;;  %v2988_v47 = vrot.slane %v2986_v28, 4  ;;  %6946 = vmatprep.subr.bf16.mxu0 %v8076_v19  ;;  %v644_v2 = vrot.slane %v643_v37, 4  ;;  %v5951_v9 = vrot.slane %v5935_v46, 9  ;;  %v5872_v10 = vld [vmem:[%s7616_s14 + $0x94] sm:$0xf] }
  0x89   : > { %v639_v33 = vsel %vm7644_vm2, %v634_v36, %v638_v12  ;;  %v2994_v55 = vsel %vm7894_vm5, %v5950_v26, %v2993_v39  ;;  %v2995_v22 = vrot.slane %v2993_v39, 4  ;;  %v5873_v50 = vld [vmem:[%s7616_s14 + $0x98] sm:$0x1]  ;;  %v3000_v61 = vrot.slane %v5866_v34, 5  ;;  %v5937_v12 = vld [vmem:[%s7616_s14 + $0x90] sm:$0xe] }
  0x8a   : > { %v2990_v56 = vsel %vm7894_vm5, %v2988_v47, %v2989_v30  ;;  %v649_v52 = vsel %vm7644_vm2, %v644_v2, %v648_v27  ;;  %v3003_v11 = vrot.slane %v5867_v48, 5  ;;  %v5952_v14 = vrot.slane %v5936_v6, 9  ;;  %v5875_v5 = vld [vmem:[%s7616_s14 + $0xa0] sm:$0xf]  ;;  %v5876_v51 = vld [vmem:[%s7616_s14 + $0xa4] sm:$0x1] }
  0x8b   : > { %v5981_v63 = vcombine.low %v2987_v57, %v2990_v56  ;;  %v2997_v24 = vsel %vm7894_vm5, %v2995_v22, %v2996_v40  ;;  %v5677_v7 = vcombine.low %v639_v33, %v649_v52  ;;  %v3007_v20 = vrot.slane %v5869_v58, 5  ;;  %v5878_v37 = vld [vmem:[%s7616_s14 + $0xac] sm:$0xf]  ;;  %v8123_v40 = vld [vmem:[%s7616_s14 + $0x10] sm:$0xf] }
  0x8c   : > { %v5982_v32 = vcombine.low %v2994_v55, %v2997_v24  ;;  %v3010_v44 = vrot.slane %v5870_v59, 5  ;;  %v3001_v25 = vsel %vm7894_vm5, %v5951_v9, %v3000_v61  ;;  %v3002_v4 = vrot.slane %v3000_v61, 4  ;;  %v7445_v39 = vld [vmem:[%s7616_s14 + $0xc] sm:$0xf]  ;;  %v7447_v34 = vld [vmem:[%s7616_s14 + $0x18] sm:$0xf] }
  0x8d   : > { %6879 = vmatmul.mubr.bf16.gmra.mrb[12].mxu0 %v5981_v63  ;;  %6655 = vmatmul.mubr.bf16.gmra.mrb[28].mxu1 %v5677_v7  ;;  %v3008_v16 = vsel %vm7894_vm5, %v5952_v14, %v3007_v20  ;;  %v3009_v27 = vrot.slane %v3007_v20, 4  ;;  %v5953_v30 = vrot.slane %v5937_v12, 9  ;;  %v3014_v26 = vrot.slane %v5872_v10, 5  ;;  %v8130_v48 = vld [vmem:[%s7616_s14 + $0x1c] sm:$0xf]  ;;  %v7365_v56 = vld [vmem:[%s9848_s1 + $0x88] sm:$0xff]  }
  0x8e   : > { %6882 = vmatprep.mubr.bf16.mxu0 %v5982_v32  ;;  %6674 = vmatprep.mubr.bf16.mxu1 %v5686_v1  ;;  %v3004_v28 = vsel %vm7894_vm5, %v3002_v4, %v3003_v11  ;;  %v3017_v36 = vrot.slane %v5873_v50, 5  ;;  %v5687_v46 = vcombine.low %v7445_v39, %v8123_v40  ;;  %v5688_v33 = vcombine.low %v7447_v34, %v8130_v48  ;;  %v5939_v52 = vld [vmem:[%s7616_s14 + $0xa8] sm:$0xe]  ;;  %v5879_v63 = vld [vmem:[%s7616_s14 + $0xb0] sm:$0x1] }
  0x8f   : > { %v5983_v57 = vcombine.low %v3001_v25, %v3004_v28  ;;  %v3011_v47 = vsel %vm7894_vm5, %v3009_v27, %v3010_v44  ;;  %v3016_v55 = vrot.slane %v3014_v26, 4  ;;  %v5954_v22 = vrot.slane %v5938_v18, 9  ;;  %v5881_v23 = vld [vmem:[%s7616_s14 + $0xb8] sm:$0xf]  ;;  %v5882_v32 = vld [vmem:[%s7616_s14 + $0xbc] sm:$0x1] }
  0x90   : > { %v5984_v2 = vcombine.low %v3008_v16, %v3011_v47  ;;  %v3021_v58 = vrot.slane %v5875_v5, 5  ;;  %v3024_v59 = vrot.slane %v5876_v51, 5  ;;  %v3015_v1 = vsel %vm7894_vm5, %v5953_v30, %v3014_v26  ;;  %v5940_v10 = vld [vmem:[%s7616_s14 + $0xb4] sm:$0xe]  ;;  %v8155_v20 = vld [vmem:[%s7616_s14 + $0x28] sm:$0xf] }
  0x91   : > { %v3018_v24 = vsel %vm7894_vm5, %v3016_v55, %v3017_v36  ;;  %v3028_v7 = vrot.slane %v5878_v37, 5  ;;  %v7369_v61 = vld [vmem:[%s9848_s1 + $0x90] sm:$0xff]   ;;  %v3035_v11 = vrot.slane %v5881_v23, 5  ;;  %v5955_v14 = vrot.slane %v5939_v52, 9  ;;  %v5884_v26 = vld [vmem:[%s7616_s14 + $0xc4] sm:$0xf] }
  0x92   : > { %v3023_v6 = vrot.slane %v3021_v58, 4  ;;  %v3022_v9 = vsel %vm7894_vm5, %v5954_v22, %v3021_v58  ;;  %v5985_v12 = vcombine.low %v3015_v1, %v3018_v24  ;;  %v3031_v4 = vrot.slane %v5879_v63, 5  ;;  %v7451_v5 = vld [vmem:[%s7616_s14 + $0x30] sm:$0xf]  ;;  %v8160_v51 = vld [vmem:[%s7616_s14 + $0x34] sm:$0xf] }
  0x93   : > { %v3030_v25 = vrot.slane %v3028_v7, 4  ;;  %v5690_v16 = vcombine.low %v7451_v5, %v8160_v51  ;;  %v5956_v27 = vrot.slane %v5940_v10, 9  ;;  %v3037_v28 = vrot.slane %v3035_v11, 4  ;;  %v7373_v36 = vld [vmem:[%s9848_s1 + $0x98] sm:$0xff]   ;;  %v5885_v34 = vld [vmem:[%s7616_s14 + $0xc8] sm:$0x1] }
  0x94   : > { %v3025_v50 = vsel %vm7894_vm5, %v3023_v6, %v3024_v59  ;;  %v3038_v30 = vrot.slane %v5882_v32, 5  ;;  %v3029_v37 = vsel %vm7894_vm5, %v5955_v14, %v3028_v7  ;;  %v7453_v55 = vld [vmem:[%s7616_s14 + $0x3c] sm:$0xf]  ;;  %v8182_v22 = vld [vmem:[%s7616_s14 + $0x40] sm:$0xf]  ;;  %v3045_v23 = vrot.slane %v5885_v34, 5 }
  0x95   : > { %6883 = vmatmul.mubr.bf16.gmra.mrb[16].mxu0 %v5983_v57  ;;  %6675 = vmatmul.mubr.bf16.vlgmr.msra.gmra.mrb[0].mxu1 %v5687_v46  ;;  %v5986_v18 = vcombine.low %v3022_v9, %v3025_v50  ;;  %v3032_v39 = vsel %vm7894_vm5, %v3030_v25, %v3031_v4  ;;  %v3042_v46 = vrot.slane %v5884_v26, 5  ;;  %v3036_v57 = vsel %vm7894_vm5, %v5956_v27, %v3035_v11  ;;  %v7455_v1 = vld [vmem:[%s7616_s14 + $0x48] sm:$0xf]  ;;  %v8187_v24 = vld [vmem:[%s7616_s14 + $0x4c] sm:$0xf]  ;;  %v7390_v10 = vld [vmem:[%s9848_s1 + $0xb0] sm:$0xff]  }
  0x96   : > { %6886 = vmatprep.mubr.bf16.mxu0 %v5984_v2  ;;  %6707 = vmatpush3.bf16.msra.mxu1 %v7830_v45  ;;  %v7449_v45 = vld [vmem:[%s7616_s14 + $0x24] sm:$0xf]  ;;  %v3039_v47 = vsel %vm7894_vm5, %v3037_v28, %v3038_v30  ;;  %v5987_v58 = vcombine.low %v3029_v37, %v3032_v39  ;;  %v5692_v6 = vcombine.low %v7455_v1, %v8187_v24  ;;  %v7384_v7 = vld [vmem:[%s9848_s1 + $0xa8] sm:$0xff]   ;;  %v8202_v11 = vld [vmem:[%s7616_s14 + $0x58] sm:$0xf]  ;;  %v1298_v4 = vrot.slane %v8102_v29, 5 }
  0x97   : > { %6678 = vmatprep.mubr.bf16.mxu1 %v5688_v33  ;;  %6708 = vmatprep.subr.bf16.mxu1 %v7365_v56  ;;  %v5689_v44 = vcombine.low %v7449_v45, %v8155_v20  ;;  %v5941_v33 = vld [vmem:[%s7616_s14 + $0xc0] sm:$0xe]  ;;  %v5988_v59 = vcombine.low %v3036_v57, %v3039_v47  ;;  %v3044_v63 = vrot.slane %v3042_v46, 4  ;;  %v7376_v14 = vld [vmem:[%s7616_s14 + $0x18] sm:$0xff]   ;;  %v5694_v45 = vcombine.low %v7870_v8, %v7874_v13  ;;  %v1246_v25 = vld [vmem:[%s7616_s14 + $0xc] sm:$0xe] }
  0x98   : > { %v7378_v2 = vld [vmem:[%s9848_s1 + $0xa0] sm:$0xff]   ;;  %v5957_v52 = vrot.slane %v5941_v33, 9  ;;  %v1305_v8 = vrot.slane %v8123_v40, 5  ;;  %v1247_v13 = vld [vmem:[%s7616_s14 + $0x18] sm:$0xe]  ;;  %v1319_v28 = vrot.slane %v8155_v20, 5  ;;  %v5695_v40 = vcombine.low %v7889_v38, %v7901_v53 }
  0x99   : > { %v3046_v9 = vsel %vm7894_vm5, %v3044_v63, %v3045_v23  ;;  %v8219_v5 = vld [vmem:[%s9848_s1 + $0xc0] sm:$0xff]   ;;  %v7459_v30 = vld [vmem:[%s7616_s14 + $0x8] sm:$0x1]  ;;  %v5712_v57 = vrot.slane %v1247_v13, 9  ;;  %v5696_v47 = vcombine.low %v7918_v15, %v7921_v17  ;;  %v1300_v34 = vrot.slane %v1298_v4, 4 }
  0x9a   : > { %6709 = vmatpush3.bf16.msra.mxu1 %v7365_v56  ;;  %v5691_v56 = vcombine.low %v7453_v55, %v8182_v22  ;;  %v3043_v32 = vsel %vm7894_vm5, %v5957_v52, %v3042_v46  ;;  %v1248_v27 = vld [vmem:[%s7616_s14 + $0x24] sm:$0xe]  ;;  %v1301_v26 = vrot.slane %v7459_v30, 5  ;;  %v5711_v46 = vrot.slane %v1246_v25, 9  ;;  %v7461_v53 = vld [vmem:[%s7616_s14 + $0x20] sm:$0x1] }
  0x9b   : > { %6710 = vmatprep.subr.bf16.mxu1 %v7369_v61  ;;  %v5989_v50 = vcombine.low %v3043_v32, %v3046_v9  ;;  %v7379_v37 = vld [vmem:[%s7616_s14 + $0x24] sm:$0xff]   ;;  %v1307_v20 = vrot.slane %v1305_v8, 4  ;;  %v5713_v33 = vrot.slane %v1248_v27, 9  ;;  %v1315_v55 = vrot.slane %v7461_v53, 5  ;;  %v1249_v63 = vld [vmem:[%s7616_s14 + $0x30] sm:$0xe] }
  0x9c   : > { %v8245_v17 = vsel %vm7894_vm5, %v5711_v46, %v1305_v8  ;;  %v8257_v23 = vsel %vm7894_vm5, %v1300_v34, %v1301_v26  ;;  %v7388_v25 = vld [vmem:[%s7616_s14 + $0x48] sm:$0xff]   ;;  %v1340_v27 = vrot.slane %v8187_v24, 5  ;;  %v7463_v26 = vld [vmem:[%s7616_s14 + $0x38] sm:$0x1]  ;;  %v1347_v46 = vrot.slane %v8202_v11, 5 }
  0x9d   : > { %6887 = vmatmul.mubr.bf16.gmra.mrb[20].mxu0 %v5985_v12  ;;  %6679 = vmatmul.mubr.bf16.gmra.mrb[4].mxu1 %v5689_v44  ;;  %v7396_v44 = vld [vmem:[%s9848_s1 + $0xb8] sm:$0xff]   ;;  %v6073_v24 = vld [vmem:[%s7616_s14 + $0x24] sm:$0xf]  ;;  %v7465_v53 = vld [vmem:[%s7616_s14 + $0x50] sm:$0x1] }
  0x9e   : > { %6890 = vmatprep.mubr.bf16.mxu0 %v5986_v18  ;;  %6682 = vmatprep.mubr.bf16.mxu1 %v5690_v16  ;;  %v1245_v18 = vld [vmem:[%s7616_s14] sm:$0xe]  ;;  %v1312_v16 = vrot.slane %v8130_v48, 5  ;;  %v7382_v48 = vld [vmem:[%s7616_s14 + $0x30] sm:$0xff]  }
  0x9f   : > { %6711 = vmatpush3.bf16.msra.mxu1 %v7369_v61  ;;  %v7457_v61 = vld [vmem:[%s7616_s14 + $0x54] sm:$0xf]  ;;  %v5710_v39 = vrot.slane %v1245_v18, 9  ;;  %v8286_v18 = vld [vmem:[%s7616_s14 + $0x48] sm:$0xe] }
  0xa0   : > { %6712 = vmatprep.subr.bf16.mxu1 %v7373_v36  ;;  %v5693_v12 = vcombine.low %v7457_v61, %v8202_v11  ;;  %v1314_v38 = vrot.slane %v1312_v16, 4  ;;  %v8249_v52 = vsel %vm7894_vm5, %v5712_v57, %v1312_v16  ;;  %v5697_v61 = vcombine.low %v7934_v54, %v7942_v60 }
  0xa1   : > { %v8241_v15 = vsel %vm7894_vm5, %v5710_v39, %v1298_v4  ;;  %v5701_v54 = vcombine.low %v8048_v31, %v8056_v42  ;;  %v7398_v4 = vld [vmem:[%s9848_s1 + $0x1d8] sm:$0xff]  }
  0xa2   : > { %v8270_v32 = vsel %vm7894_vm5, %v1314_v38, %v1315_v55  ;;  %v5742_v60 = vcombine.low %v8241_v15, %v8257_v23  ;;  %v1342_v38 = vrot.slane %v1340_v27, 4  ;;  %v1343_v55 = vrot.slane %v7465_v53, 5  ;;  %v8465_v15 = vld [vmem:[%s9848_s1 + $0x200] sm:$0xff]  }
  0xa3   : > { %6713 = vmatpush3.bf16.msra.mxu1 %v7373_v36  ;;  %v7460_v36 = vld [vmem:[%s7616_s14 + $0x14] sm:$0x1]  ;;  %v5744_v13 = vcombine.low %v8249_v52, %v8270_v32 }
  0xa4   : > { %6714 = vmatprep.subr.bf16.mxu1 %v7378_v2  ;;  %v1308_v29 = vrot.slane %v7460_v36, 5  ;;  %v1329_v36 = vrot.slane %v7463_v26, 5  ;;  %v8376_v53 = vsel %vm7894_vm5, %v1342_v38, %v1343_v55  ;;  %v6077_v55 = vld [vmem:[%s7616_s14 + $0x34] sm:$0xf] }
  0xa5   : > { %6891 = vmatmul.mubr.bf16.gmra.mrb[24].mxu0 %v5987_v58  ;;  %6683 = vmatmul.mubr.bf16.gmra.mrb[8].mxu1 %v5691_v56  ;;  %v1321_v56 = vrot.slane %v1319_v28, 4  ;;  %v7462_v58 = vld [vmem:[%s7616_s14 + $0x2c] sm:$0x1]  ;;  %v7408_v52 = vld [vmem:[%s9848_s1 + $0xd0] sm:$0xff]  }
  0xa6   : > { %6894 = vmatprep.mubr.bf16.mxu0 %v5988_v59  ;;  %6686 = vmatprep.mubr.bf16.mxu1 %v5692_v6  ;;  %v1322_v59 = vrot.slane %v7462_v58, 5  ;;  %v8261_v1 = vsel %vm7894_vm5, %v1307_v20, %v1308_v29  ;;  %v8265_v6 = vsel %vm7894_vm5, %v5713_v33, %v1319_v28  ;;  %v6071_v28 = vld [vmem:[%s7616_s14 + $0x1c] sm:$0xf]  ;;  %v5716_v20 = vrot.slane %v8286_v18, 9 }
  0xa7   : > { %6715 = vmatpush3.bf16.msra.mxu1 %v7378_v2  ;;  %v7386_v2 = vld [vmem:[%s9848_s1 + $0x1c8] sm:$0xff]   ;;  %v5743_v8 = vcombine.low %v8245_v17, %v8261_v1  ;;  %v3814_v33 = vshll.u32 %v6071_v28, 16  ;;  %v3818_v11 = vshrl.u32 %v6071_v28, 16  ;;  %v8330_v58 = vld [vmem:[%s7616_s14 + $0x5c] sm:$0x1] }
  0xa8   : > { %6716 = vmatprep.subr.bf16.mxu1 %v7384_v7  ;;  %v8274_v9 = vsel %vm7894_vm5, %v1321_v56, %v1322_v59  ;;  %v1350_v59 = vrot.slane %v8330_v58, 5  ;;  %v7414_v58 = vld [vmem:[%s9848_s1 + $0x1f8] sm:$0xff]  }
  0xa9   : > { %v5745_v16 = vcombine.low %v8265_v6, %v8274_v9  ;;  %v8352_v28 = vrot.slane %v3814_v33, 5 }
  0xab   : > { %6717 = vmatpush3.bf16.msra.mxu1 %v7384_v7  ;;  %v1250_v7 = vld [vmem:[%s7616_s14 + $0x3c] sm:$0xe] }
  0xac   : > { %6718 = vmatprep.subr.bf16.mxu1 %v7390_v10 }
  0xad   : > { %6895 = vmatmul.mubr.bf16.gmra.mrb[28].mxu0 %v5989_v50  ;;  %6687 = vmatmul.mubr.bf16.gmra.mrb[12].mxu1 %v5693_v12  ;;  %v1333_v50 = vrot.slane %v8182_v22, 5  ;;  %v7385_v12 = vld [vmem:[%s7616_s14 + $0x3c] sm:$0xff]   ;;  %v6070_v22 = vld [vmem:[%s7616_s14 + $0x18] sm:$0xf] }
  0xae   : > { %6914 = vmatprep.mubr.bf16.mxu0 %v7376_v14  ;;  %6690 = vmatprep.mubr.bf16.mxu1 %v5694_v45  ;;  %v5698_v14 = vcombine.low %v7970_v41, %v7976_v49  ;;  %v5699_v45 = vcombine.low %v7991_v62, %v8000_v21  ;;  %v5715_v41 = vrot.slane %v1250_v7, 9  ;;  %v8296_v49 = vld [vmem:[%s7616_s14 + $0x54] sm:$0xe]  ;;  %v3805_v57 = vshrl.u32 %v6070_v22, 16  ;;  %v7394_v7 = vld [vmem:[%s7616_s14 + $0x60] sm:$0xff]  }
  0xaf   : > { %6719 = vmatpush3.bf16.msra.mxu1 %v7390_v10  ;;  %v1326_v10 = vrot.slane %v8160_v51, 5  ;;  %v5700_v51 = vcombine.low %v8023_v0, %v8028_v3  ;;  %v1335_v29 = vrot.slane %v1333_v50, 4  ;;  %v5717_v56 = vrot.slane %v8296_v49, 9  ;;  %v7406_v49 = vld [vmem:[%s9848_s1 + $0x1e8] sm:$0xff]  }
  0xb0   : > { %6720 = vmatprep.subr.bf16.mxu1 %v7396_v44  ;;  %v8323_v34 = vsel %vm7894_vm5, %v5715_v41, %v1333_v50  ;;  %v6072_v50 = vld [vmem:[%s7616_s14 + $0x20] sm:$0x1] }
  0xb1   : > { %v1328_v30 = vrot.slane %v1326_v10, 4  ;;  %v8371_v33 = vsel %vm7894_vm5, %v5717_v56, %v1347_v46 }
  0xb3   : > { %6721 = vmatpush3.bf16.msra.mxu1 %v7396_v44  ;;  %v5714_v44 = vrot.slane %v1249_v63, 9  ;;  %v6074_v63 = vld [vmem:[%s7616_s14 + $0x28] sm:$0xf] }
  0xb4   : > { %6754 = vmatprep.subr.bf16.mxu1 %v8219_v5  ;;  %v3838_v26 = vshll.u32 %v6074_v63, 16 }
  0xb5   : > { %6915 = vmatmul.mubr.bf16.vlgmr.msra.gmra.mrb[0].mxu0 %v7379_v37  ;;  %6691 = vmatmul.mubr.bf16.gmra.mrb[16].mxu1 %v5695_v40  ;;  %v7464_v37 = vld [vmem:[%s7616_s14 + $0x44] sm:$0x1]  ;;  %v8314_v39 = vsel %vm7894_vm5, %v5714_v44, %v1326_v10  ;;  %v8337_v10 = vsel %vm7894_vm5, %v1328_v30, %v1329_v36  ;;  %v3820_v30 = vrot.slane %v3818_v11, 4  ;;  %v3842_v36 = vshrl.u32 %v6074_v63, 16 }
  0xb6   : > { %6947 = vmatpush3.bf16.msra.mxu0 %v8076_v19  ;;  %6694 = vmatprep.mubr.bf16.mxu1 %v5696_v47  ;;  %v7392_v19 = vld [vmem:[%s9848_s1 + $0x1d0] sm:$0xff]   ;;  %v1336_v40 = vrot.slane %v7464_v37, 5  ;;  %v3808_v47 = vshll.u32 %v6070_v22, 16  ;;  %v8345_v44 = vld [vmem:[%s7616_s14 + $0x64] sm:$0xf]  ;;  %v8358_v37 = vsel %vm7894_vm5, %v5716_v20, %v1340_v27  ;;  %v8386_v56 = vrot.slane %v3838_v26, 5 }
  0xb7   : > { %6918 = vmatprep.mubr.bf16.mxu0 %v7382_v48  ;;  %6948 = vmatprep.subr.bf16.mxu0 %v7386_v2  ;;  %v7402_v48 = vld [vmem:[%s9848_s1 + $0x1e0] sm:$0xff]   ;;  %v1354_v18 = vrot.slane %v8345_v44, 5  ;;  %v6076_v20 = vld [vmem:[%s7616_s14 + $0x30] sm:$0xf]  ;;  %v3844_v38 = vrot.slane %v3842_v36, 4  ;;  %v3862_v26 = vshll.u32 %v6077_v55, 16 }
  0xb8   : > { %v3810_v41 = vrot.slane %v3808_v47, 5  ;;  %v1253_v22 = vld [vmem:[%s7616_s14 + $0x60] sm:$0xe]  ;;  %v8364_v47 = vld [vmem:[%s7616_s14 + $0x70] sm:$0xf]  ;;  %v3853_v21 = vshrl.u32 %v6076_v20, 16 }
  0xb9   : > { %v5718_v63 = vrot.slane %v1253_v22, 9  ;;  %v3866_v36 = vshrl.u32 %v6077_v55, 16 }
  0xba   : > { %6949 = vmatpush3.bf16.msra.mxu0 %v7386_v2  ;;  %v7391_v2 = vld [vmem:[%s7616_s14 + $0x54] sm:$0xff]  }
  0xbb   : > { %6950 = vmatprep.subr.bf16.mxu0 %v7392_v19 }
  0xbd   : > { %6919 = vmatmul.mubr.bf16.gmra.mrb[4].mxu0 %v7385_v12  ;;  %6695 = vmatmul.mubr.bf16.gmra.mrb[20].mxu1 %v5697_v61  ;;  %v3829_v61 = vshrl.u32 %v6073_v24, 16  ;;  %v3832_v12 = vshll.u32 %v6073_v24, 16  ;;  %v1361_v24 = vrot.slane %v8364_v47, 5  ;;  %v7469_v47 = vld [vmem:[%s7616_s14 + $0x68] sm:$0x1] }
  0xbe   : > { %6922 = vmatprep.mubr.bf16.mxu0 %v7388_v25  ;;  %6698 = vmatprep.mubr.bf16.mxu1 %v5698_v14  ;;  %v1349_v14 = vrot.slane %v1347_v46, 4  ;;  %v3807_v25 = vrot.slane %v3805_v57, 4  ;;  %v8361_v57 = vld [vmem:[%s7616_s14 + $0x6c] sm:$0xe] }
  0xbf   : > { %6951 = vmatpush3.bf16.msra.mxu0 %v7392_v19  ;;  %v8341_v19 = vsel %vm7894_vm5, %v1335_v29, %v1336_v40  ;;  %v3824_v40 = vshll.u32 %v6072_v50, 16  ;;  %v3831_v11 = vrot.slane %v3829_v61, 4  ;;  %v3834_v27 = vrot.slane %v3832_v12, 5  ;;  %v6075_v29 = vld [vmem:[%s7616_s14 + $0x2c] sm:$0x1]  ;;  %v7410_v12 = vld [vmem:[%s9848_s1 + $0x1f0] sm:$0xff]  }
  0xc0   : > { %6952 = vmatprep.subr.bf16.mxu0 %v7398_v4  ;;  %v1356_v50 = vrot.slane %v1354_v18, 4  ;;  %v3811_v46 = vor.u32 %v3810_v41, %v3807_v25  ;;  %v5719_v62 = vrot.slane %v8361_v57, 9  ;;  %v1363_v25 = vrot.slane %v1361_v24, 4  ;;  %v7470_v41 = vld [vmem:[%s7616_s14 + $0x74] sm:$0x1] }
  0xc1   : > { %v8392_v61 = vrot.slane %v3824_v40, 5  ;;  %v1364_v0 = vrot.slane %v7470_v41, 5  ;;  %v3835_v3 = vor.u32 %v3834_v27, %v3831_v11  ;;  %v8406_v22 = vsel %vm7894_vm5, %v1349_v14, %v1350_v59  ;;  %v7399_v40 = vld [vmem:[%s7616_s14 + $0x78] sm:$0xff]   ;;  %v7472_v41 = vld [vmem:[%s7616_s14 + $0x80] sm:$0x1] }
  0xc2   : > { %v3812_v57 = vrot.slane %v3811_v46, 4  ;;  %v3845_v11 = vor.u32 %v3844_v38, %v8386_v56  ;;  %v8419_v59 = vsel %vm7894_vm5, %v5718_v63, %v1354_v18  ;;  %v3855_v46 = vrot.slane %v3853_v21, 4  ;;  %v6080_v21 = vld [vmem:[%s7616_s14 + $0x40] sm:$0xf] }
  0xc3   : > { %6953 = vmatpush3.bf16.msra.mxu0 %v7398_v4  ;;  %v1357_v4 = vrot.slane %v7469_v47, 5  ;;  %v6078_v47 = vld [vmem:[%s7616_s14 + $0x38] sm:$0x1]  ;;  %v1371_v44 = vrot.slane %v7472_v41, 5  ;;  %v8434_v18 = vsel %vm7894_vm5, %v5719_v62, %v1361_v24  ;;  %v8440_v63 = vrot.slane %v3862_v26, 5 }
  0xc4   : > { %6954 = vmatprep.subr.bf16.mxu0 %v7402_v48  ;;  %v3817_v24 = vsel %vm7644_vm2, %v3812_v57, %v8352_v28  ;;  %v3872_v23 = vshll.u32 %v6078_v47, 16  ;;  %v3890_v57 = vshrl.u32 %v6080_v21, 16  ;;  %v6082_v41 = vld [vmem:[%s7616_s14 + $0x48] sm:$0xf] }
  0xc5   : > { %6923 = vmatmul.mubr.bf16.gmra.mrb[8].mxu0 %v7391_v2  ;;  %6699 = vmatmul.mubr.bf16.gmra.mrb[24].mxu1 %v5699_v45  ;;  %v3821_v2 = vor.u32 %v3820_v30, %v8352_v28  ;;  %v3856_v45 = vshll.u32 %v6076_v20, 16  ;;  %v1255_v30 = vld [vmem:[%s7616_s14 + $0x78] sm:$0xe]  ;;  %v8423_v14 = vsel %vm7894_vm5, %v1356_v50, %v1357_v4  ;;  %v8438_v4 = vsel %vm7894_vm5, %v1363_v25, %v1364_v0  ;;  %v7473_v28 = vld [vmem:[%s7616_s14 + $0x88] sm:$0xf] }
  0xc6   : > { %6926 = vmatprep.mubr.bf16.mxu0 %v7394_v7  ;;  %6702 = vmatprep.mubr.bf16.mxu1 %v5700_v51  ;;  %v7397_v7 = vld [vmem:[%s7616_s14 + $0x6c] sm:$0xff]   ;;  %v3848_v51 = vshll.u32 %v6075_v29, 16  ;;  %v7471_v29 = vld [vmem:[%s7616_s14 + $0x7c] sm:$0xf]  ;;  %v5720_v55 = vrot.slane %v1255_v30, 9  ;;  %v3868_v50 = vrot.slane %v3866_v36, 4 }
  0xc7   : > { %6955 = vmatpush3.bf16.msra.mxu0 %v7402_v48  ;;  %v5748_v48 = vcombine.low %v8358_v37, %v8376_v53  ;;  %v3822_v20 = vrot.slane %v3821_v2, 4  ;;  %v1368_v27 = vrot.slane %v7471_v29, 5  ;;  %v3858_v2 = vrot.slane %v3856_v45, 5  ;;  %v6079_v29 = vld [vmem:[%s7616_s14 + $0x3c] sm:$0xf] }
  0xc8   : > { %6956 = vmatprep.subr.bf16.mxu0 %v7406_v49  ;;  %v8428_v38 = vrot.slane %v3848_v51, 5  ;;  %v3846_v45 = vrot.slane %v3845_v11, 4  ;;  %v1375_v25 = vrot.slane %v7473_v28, 5  ;;  %v3880_v0 = vshll.u32 %v6079_v29, 16  ;;  %v7403_v51 = vld [vmem:[%s7616_s14 + $0x90] sm:$0xff]  }
  0xc9   : > { %v3827_v62 = vsel %vm7644_vm2, %v3822_v20, %v8392_v61  ;;  %v3869_v26 = vor.u32 %v3868_v50, %v8440_v63  ;;  %v6081_v36 = vld [vmem:[%s7616_s14 + $0x44] sm:$0x1]  ;;  %v7404_v20 = vld [vmem:[%s9848_s1 + $0xc8] sm:$0xff]   ;;  %v6088_v61 = vld [vmem:[%s7616_s14 + $0x60] sm:$0xf] }
  0xca   : > { %v8470_v30 = vcombine.low %v3817_v24, %v3827_v62  ;;  %v3851_v47 = vsel %vm7644_vm2, %v3846_v45, %v8428_v38  ;;  %v8497_v38 = vrot.slane %v3872_v23, 5  ;;  %v3896_v24 = vshll.u32 %v6081_v36, 16  ;;  %v1257_v62 = vld [vmem:[%s7616_s14 + $0x90] sm:$0xe]  ;;  %v8506_v28 = vld [vmem:[%s7616_s14 + $0x4c] sm:$0xf] }
  0xcb   : > { %6957 = vmatpush3.bf16.msra.mxu0 %v7406_v49  ;;  %v8426_v49 = vrot.slane %v3835_v3, 4  ;;  %v7401_v3 = vld [vmem:[%s7616_s14 + $0x84] sm:$0xff]   ;;  %v3892_v45 = vrot.slane %v3890_v57, 4  ;;  %v5722_v57 = vrot.slane %v1257_v62, 9 }
  0xcc   : > { %6958 = vmatprep.subr.bf16.mxu0 %v7410_v12  ;;  %v7407_v36 = vld [vmem:[%s7616_s14 + $0xa8] sm:$0xff]  }
  0xcd   : > { %6927 = vmatmul.mubr.bf16.gmra.mrb[12].mxu0 %v7397_v7  ;;  %6703 = vmatmul.mubr.bf16.gmra.mrb[28].mxu1 %v5701_v54  ;;  %v1370_v7 = vrot.slane %v1368_v27, 4  ;;  %v3859_v54 = vor.u32 %v3858_v2, %v3855_v46  ;;  %v3841_v11 = vsel %vm7644_vm2, %v8426_v49, %v8386_v56  ;;  %v8486_v46 = vsel %vm7894_vm5, %v5720_v55, %v1368_v27  ;;  %v7474_v49 = vld [vmem:[%s7616_s14 + $0x8c] sm:$0x1] }
  0xce   : > { %6930 = vmatprep.mubr.bf16.mxu0 %v7399_v40  ;;  %6722 = vmatprep.mubr.bf16.mxu1 %v5742_v60  ;;  %v1256_v60 = vld [vmem:[%s7616_s14 + $0x84] sm:$0xe]  ;;  %v3886_v40 = vshll.u32 %v6080_v21, 16  ;;  %v1377_v56 = vrot.slane %v1375_v25, 4  ;;  %v1378_v21 = vrot.slane %v7474_v49, 5  ;;  %v3882_v55 = vrot.slane %v3880_v0, 5 }
  0xcf   : > { %6959 = vmatpush3.bf16.msra.mxu0 %v7410_v12  ;;  %v3877_v12 = vshrl.u32 %v6079_v29, 16  ;;  %v8490_v2 = vsel %vm7894_vm5, %v1370_v7, %v1371_v44  ;;  %v8493_v29 = vrot.slane %v3859_v54, 4  ;;  %v5721_v50 = vrot.slane %v1256_v60, 9  ;;  %v7475_v7 = vld [vmem:[%s7616_s14 + $0x94] sm:$0xf] }
  0xd0   : > { %6960 = vmatprep.subr.bf16.mxu0 %v7414_v58  ;;  %v8500_v44 = vrot.slane %v3869_v26, 4  ;;  %v1382_v54 = vrot.slane %v7475_v7, 5  ;;  %v8511_v23 = vcombine.low %v3841_v11, %v3851_v47  ;;  %v3904_v0 = vshll.u32 %v6082_v41, 16  ;;  %v7476_v47 = vld [vmem:[%s7616_s14 + $0x98] sm:$0x1] }
  0xd1   : > { %v3879_v27 = vrot.slane %v3877_v12, 4  ;;  %v3901_v12 = vshrl.u32 %v6082_v41, 16  ;;  %v3865_v17 = vsel %vm7644_vm2, %v8493_v29, %v8440_v63  ;;  %v8526_v1 = vsel %vm7894_vm5, %v5721_v50, %v1375_v25  ;;  %v8547_v50 = vld [vmem:[%s7616_s14 + $0x50] sm:$0x1] }
  0xd2   : > { %v3910_v25 = vshll.u32 %v8506_v28, 16  ;;  %v3914_v26 = vshrl.u32 %v8506_v28, 16  ;;  %v1384_v11 = vrot.slane %v1382_v54, 4  ;;  %v1385_v41 = vrot.slane %v7476_v47, 5 }
  0xd3   : > { %6961 = vmatpush3.bf16.msra.mxu0 %v7414_v58  ;;  %v8502_v58 = vrot.slane %v3886_v40, 5  ;;  %v3883_v32 = vor.u32 %v3882_v55, %v3879_v27  ;;  %v8552_v49 = vrot.slane %v3901_v12, 4  ;;  %v8557_v27 = vld [vmem:[%s7616_s14 + $0x9c] sm:$0xe]  ;;  %v3875_v62 = vsel %vm7644_vm2, %v8500_v44, %v8497_v38 }
  0xd4   : > { %6994 = vmatprep.subr.bf16.mxu0 %v8465_v15  ;;  %v8567_v47 = vrot.slane %v3910_v25, 5  ;;  %v3916_v60 = vrot.slane %v3914_v26, 4  ;;  %v8573_v44 = vsel %vm7894_vm5, %v5722_v57, %v1382_v54  ;;  %v8581_v25 = vld [vmem:[%s7616_s14 + $0x5c] sm:$0x1]  ;;  %v5723_v54 = vrot.slane %v8557_v27, 9 }
  0xd5   : > { %6931 = vmatmul.mubr.bf16.gmra.mrb[16].mxu0 %v7401_v3  ;;  %6723 = vmatmul.mubr.bf16.vlgmr.msra.gmra.mrb[0].mxu1 %v5743_v8  ;;  %v7405_v3 = vld [vmem:[%s7616_s14 + $0x9c] sm:$0xff]   ;;  %v8530_v8 = vsel %vm7894_vm5, %v1377_v56, %v1378_v21  ;;  %v3893_v40 = vor.u32 %v3892_v45, %v8502_v58  ;;  %v8554_v21 = vrot.slane %v3904_v0, 5  ;;  %v3884_v0 = vrot.slane %v3883_v32, 4  ;;  %v8590_v57 = vld [vmem:[%s7616_s14 + $0x64] sm:$0xf] }
  0xd6   : > { %6934 = vmatprep.mubr.bf16.mxu0 %v7403_v51  ;;  %6755 = vmatpush3.bf16.msra.mxu1 %v8219_v5  ;;  %v6085_v5 = vld [vmem:[%s7616_s14 + $0x54] sm:$0xf]  ;;  %v8534_v51 = vld [vmem:[%s7616_s14 + $0x58] sm:$0xf]  ;;  %v8577_v45 = vsel %vm7894_vm5, %v1384_v11, %v1385_v41  ;;  %v3920_v32 = vshll.u32 %v8547_v50, 16  ;;  %v9874_v11 = vcombine.low %v8314_v39, %v8337_v10 }
  0xd7   : > { %6726 = vmatprep.mubr.bf16.mxu1 %v5744_v13  ;;  %6756 = vmatprep.subr.bf16.mxu1 %v7404_v20  ;;  %v8539_v13 = vrot.slane %v3896_v24, 5  ;;  %v7412_v56 = vld [vmem:[%s9848_s1 + $0xd8] sm:$0xff]   ;;  %v3925_v55 = vshrl.u32 %v6085_v5, 16  ;;  %v3928_v24 = vshll.u32 %v6085_v5, 16  ;;  %v3934_v7 = vshll.u32 %v8534_v51, 16 }
  0xd8   : > { %v3938_v12 = vshrl.u32 %v8534_v51, 16  ;;  %v3894_v38 = vrot.slane %v3893_v40, 4  ;;  %v7409_v41 = vld [vmem:[%s7616_s14 + $0xb4] sm:$0xff]   ;;  %v7478_v10 = vld [vmem:[%s7616_s14 + $0xa4] sm:$0x1]  ;;  %v8630_v42 = vrot.slane %v3920_v32, 5 }
  0xd9   : > { %v3927_v26 = vrot.slane %v3925_v55, 4  ;;  %v3930_v40 = vrot.slane %v3928_v24, 5  ;;  %v8596_v6 = vrot.slane %v3934_v7, 5  ;;  %v1392_v27 = vrot.slane %v7478_v10, 5  ;;  %v7417_v10 = vld [vmem:[%s9848_s1 + $0xe8] sm:$0xff]  }
  0xda   : > { %6757 = vmatpush3.bf16.msra.mxu1 %v7404_v20  ;;  %v7477_v20 = vld [vmem:[%s7616_s14 + $0xa0] sm:$0xf]  ;;  %v3940_v9 = vrot.slane %v3938_v12, 4  ;;  %v3889_v55 = vsel %vm7644_vm2, %v3884_v0, %v8502_v58  ;;  %v3958_v24 = vshll.u32 %v8590_v57, 16  ;;  %v3962_v7 = vshrl.u32 %v8590_v57, 16 }
  0xdb   : > { %6758 = vmatprep.subr.bf16.mxu1 %v7408_v52  ;;  %v1389_v5 = vrot.slane %v7477_v20, 5  ;;  %v8618_v12 = vcombine.low %v3865_v17, %v3875_v62  ;;  %v3931_v0 = vor.u32 %v3930_v40, %v3927_v26  ;;  %v1259_v20 = vld [vmem:[%s7616_s14 + $0xa8] sm:$0xe]  ;;  %v6091_v62 = vld [vmem:[%s7616_s14 + $0x6c] sm:$0xf] }
  0xdc   : > { %v3941_v63 = vor.u32 %v3940_v9, %v8596_v6  ;;  %v8645_v32 = vld [vmem:[%s7616_s14 + $0x70] sm:$0xf] }
  0xdd   : > { %6935 = vmatmul.mubr.bf16.gmra.mrb[20].mxu0 %v7405_v3  ;;  %6727 = vmatmul.mubr.bf16.gmra.mrb[4].mxu1 %v5745_v16  ;;  %v3907_v3 = vor.u32 %v8554_v21, %v8552_v49  ;;  %v3949_v16 = vshrl.u32 %v6088_v61, 16  ;;  %v7415_v49 = vld [vmem:[%s9848_s1 + $0xe0] sm:$0xff]   ;;  %v3917_v21 = vor.u32 %v3916_v60, %v8567_v47  ;;  %v1391_v39 = vrot.slane %v1389_v5, 4  ;;  %9876 = vst [vmem:[#allocation3_spill] sm:$0xff] %v8645_v32 }
  0xde   : > { %6938 = vmatprep.mubr.bf16.mxu0 %v7407_v36  ;;  %6730 = vmatprep.mubr.bf16.mxu1 %v9874_v11  ;;  %v3952_v36 = vshll.u32 %v6088_v61, 16  ;;  %v3899_v61 = vsel %vm7644_vm2, %v3894_v38, %v8539_v13  ;;  %v7411_v60 = vld [vmem:[%s7616_s14 + $0xc0] sm:$0xff]   ;;  %v7479_v13 = vld [vmem:[%s7616_s14 + $0xac] sm:$0xf]  ;;  %v8625_v11 = vld [vmem:[%s7616_s14 + $0x68] sm:$0x1] }
  0xdf   : > { %6759 = vmatpush3.bf16.msra.mxu1 %v7408_v52  ;;  %v3944_v52 = vshll.u32 %v8581_v25, 16  ;;  %v1396_v38 = vrot.slane %v7479_v13, 5  ;;  %9875 = vst [vmem:[#allocation2_spill] sm:$0xff] %v8625_v11  ;;  %v3951_v29 = vrot.slane %v3949_v16, 4  ;;  %v8634_v26 = vcombine.low %v3889_v55, %v3899_v61  ;;  %v7480_v55 = vld [vmem:[%s7616_s14 + $0xb0] sm:$0x1] }
  0xe0   : > { %6760 = vmatprep.subr.bf16.mxu1 %v7412_v56  ;;  %v3954_v17 = vrot.slane %v3952_v36, 5  ;;  %v8636_v40 = vrot.slane %v3907_v3, 4  ;;  %v8638_v13 = vrot.slane %v3917_v21, 4  ;;  %v8649_v9 = vsel %vm7894_vm5, %v1391_v39, %v1392_v27  ;;  %v8662_v39 = vld [vmem:[%s7616_s14 + $0x74] sm:$0x1] }
  0xe1   : > { %v8651_v16 = vrot.slane %v3944_v52, 5  ;;  %v8653_v36 = vrot.slane %v3958_v24, 5  ;;  %v3964_v3 = vrot.slane %v3962_v7, 4  ;;  %v9877_v21 = vcombine.low %v8323_v34, %v8341_v19  ;;  %9878 = vst [vmem:[#allocation4_spill] sm:$0xff] %v8662_v39  ;;  %v7419_v34 = vld [vmem:[%s9848_s1 + $0xf0] sm:$0xff]  }
  0xe2   : > { %v1399_v61 = vrot.slane %v7480_v55, 5  ;;  %v3942_v19 = vrot.slane %v3941_v63, 4  ;;  %v3955_v27 = vor.u32 %v3954_v17, %v3951_v29  ;;  %v3968_v52 = vshll.u32 %v8625_v11, 16  ;;  %v8672_v24 = vld [vmem:[%s7616_s14 + $0xb4] sm:$0xe] }
  0xe3   : > { %6761 = vmatpush3.bf16.msra.mxu1 %v7412_v56  ;;  %v8642_v56 = vsel %vm7894_vm5, %v5723_v54, %v1389_v5  ;;  %v8658_v5 = vrot.slane %v3931_v0, 4  ;;  %v5724_v54 = vrot.slane %v1259_v20, 9  ;;  %v8675_v7 = vld [vmem:[%s7616_s14 + $0xb8] sm:$0xf]  ;;  %v3913_v37 = vsel %vm7644_vm2, %v8636_v40, %v8567_v47  ;;  %v7413_v0 = vld [vmem:[%s7616_s14 + $0xcc] sm:$0xff]  }
  0xe4   : > { %6762 = vmatprep.subr.bf16.mxu1 %v7415_v49  ;;  %v3923_v53 = vsel %vm7644_vm2, %v8638_v13, %v8630_v42  ;;  %v3965_v20 = vor.u32 %v3964_v3, %v8653_v36  ;;  %v3982_v63 = vshll.u32 %v8645_v32, 16  ;;  %v3986_v29 = vshrl.u32 %v8645_v32, 16  ;;  %v6094_v47 = vld [vmem:[%s7616_s14 + $0x78] sm:$0xf]  ;;  %v8693_v40 = vld [vmem:[%s7616_s14 + $0x7c] sm:$0xf] }
  0xe5   : > { %6939 = vmatmul.mubr.bf16.gmra.mrb[24].mxu0 %v7409_v41  ;;  %6731 = vmatmul.mubr.bf16.gmra.mrb[8].mxu1 %v9877_v21  ;;  %v1398_v41 = vrot.slane %v1396_v38, 4  ;;  %v3992_v17 = vshll.u32 %v8662_v39, 16  ;;  %9879 = vst [vmem:[#allocation5_spill] sm:$0xff] %v8693_v40  ;;  %v3937_v42 = vsel %vm7644_vm2, %v8658_v5, %v8596_v6  ;;  %v5725_v13 = vrot.slane %v8672_v24, 9  ;;  %v7421_v3 = vld [vmem:[%s9848_s1 + $0xf8] sm:$0xff]  }
  0xe6   : > { %6942 = vmatprep.mubr.bf16.mxu0 %v7411_v60  ;;  %6734 = vmatprep.mubr.bf16.mxu1 %v5748_v48  ;;  %v9852_v60 = vrot.slane %v8675_v7, 5  ;;  %v3973_v48 = vshrl.u32 %v6091_v62, 16  ;;  %v6097_v55 = vld [vmem:[%s7616_s14 + $0x84] sm:$0xf]  ;;  %v8710_v58 = vrot.slane %v3955_v27, 4  ;;  %v8712_v21 = vrot.slane %v3968_v52, 5 }
  0xe7   : > { %6763 = vmatpush3.bf16.msra.mxu1 %v7415_v49  ;;  %v3976_v49 = vshll.u32 %v6091_v62, 16  ;;  %v8703_v62 = vsel %vm7894_vm5, %v5724_v54, %v1396_v38  ;;  %v8719_v5 = vld [vmem:[%s7616_s14 + $0xbc] sm:$0x1]  ;;  %v8723_v54 = vld [vmem:[%s7616_s14 + $0x88] sm:$0xf]  ;;  %v3947_v24 = vsel %vm7644_vm2, %v3942_v19, %v8651_v16  ;;  %v8733_v31 = vrot.slane %v3965_v20, 4 }
  0xe8   : > { %6764 = vmatprep.subr.bf16.mxu1 %v7417_v10  ;;  %v8716_v6 = vrot.slane %v9852_v60, 4  ;;  %9880 = vst [vmem:[#allocation6_spill] sm:$0xff] %v8723_v54  ;;  %v3975_v27 = vrot.slane %v3973_v48, 4  ;;  %v6100_v60 = vld [vmem:[%s7616_s14 + $0x90] sm:$0xf]  ;;  %v8735_v39 = vrot.slane %v3982_v63, 5  ;;  %v9881_v16 = vcombine.low %v8371_v33, %v8406_v22 }
  0xe9   : > { %v3978_v52 = vrot.slane %v3976_v49, 5  ;;  %v8737_v38 = vrot.slane %v3986_v29, 4  ;;  %v8739_v32 = vrot.slane %v3992_v17, 5  ;;  %v4006_v19 = vshll.u32 %v8693_v40, 16  ;;  %v8748_v49 = vld [vmem:[%s7616_s14 + $0x94] sm:$0xf] }
  0xea   : > { %v4010_v48 = vshrl.u32 %v8693_v40, 16  ;;  %9882 = vst [vmem:[#allocation7_spill] sm:$0xff] %v8748_v49  ;;  %v4021_v20 = vshrl.u32 %v6097_v55, 16  ;;  %v4024_v33 = vshll.u32 %v6097_v55, 16  ;;  %v4030_v22 = vshll.u32 %v8723_v54, 16 }
  0xeb   : > { %6765 = vmatpush3.bf16.msra.mxu1 %v7417_v10  ;;  %v8730_v10 = vsel %vm7894_vm5, %v1398_v41, %v1399_v61  ;;  %v3997_v41 = vshrl.u32 %v6094_v47, 16  ;;  %v4000_v61 = vshll.u32 %v6094_v47, 16  ;;  %v8755_v63 = vcombine.low %v3913_v37, %v3923_v53  ;;  %v7418_v37 = vld [vmem:[%s9848_s1 + $0x208] sm:$0xff]   ;;  %v8778_v11 = vld [vmem:[%s7616_s14 + $0x98] sm:$0x1] }
  0xec   : > { %6766 = vmatprep.subr.bf16.mxu1 %v7419_v34  ;;  %v8757_v29 = vcombine.low %v3937_v42, %v3947_v24  ;;  %v3979_v47 = vor.u32 %v3978_v52, %v3975_v27  ;;  %v4054_v55 = vshll.u32 %v8748_v49, 16  ;;  %v8770_v24 = vrot.slane %v4006_v19, 5  ;;  %v8773_v27 = vld [vmem:[%s7616_s14 + $0x8c] sm:$0x1] }
  0xed   : > { %6943 = vmatmul.mubr.bf16.gmra.mrb[28].mxu0 %v7413_v0  ;;  %6735 = vmatmul.mubr.bf16.gmra.mrb[12].mxu1 %v9881_v16  ;;  %v9883_v0 = vcombine.low %v8419_v59, %v8423_v14  ;;  %v6103_v16 = vld [vmem:[%s7616_s14 + $0x9c] sm:$0xf]  ;;  %v8763_v59 = vld [vmem:[%s7616_s14 + $0x80] sm:$0x1]  ;;  %v4045_v14 = vshrl.u32 %v6100_v60, 16  ;;  %v3999_v53 = vrot.slane %v3997_v41, 4 }
  0xee   : > { %6962 = vmatprep.mubr.bf16.mxu0 %v8470_v30  ;;  %v4034_v30 = vshrl.u32 %v8723_v54, 16  ;;  %v4002_v42 = vrot.slane %v4000_v61, 5  ;;  %v4012_v17 = vrot.slane %v4010_v48, 4  ;;  %v4023_v52 = vrot.slane %v4021_v20, 4 }
  0xef   : > { %6738 = vmatprep.mubr.bf16.mxu1 %v9883_v0  ;;  %6767 = vmatpush3.bf16.msra.mxu1 %v7419_v34  ;;  %v4048_v34 = vshll.u32 %v6100_v60, 16  ;;  %v4058_v0 = vshrl.u32 %v8748_v49, 16  ;;  %v4026_v54 = vrot.slane %v4024_v33, 5  ;;  %v8775_v60 = vrot.slane %v4030_v22, 5 }
  0xf0   : > { %6768 = vmatprep.subr.bf16.mxu1 %v7421_v3  ;;  %v4036_v40 = vrot.slane %v4034_v30, 4  ;;  %v9884_v49 = vrot.slane %v8675_v7, 5  ;;  %v3989_v61 = vor.u32 %v8737_v38, %v8735_v39  ;;  %v4069_v19 = vshrl.u32 %v6103_v16, 16 }
  0xf1   : > { %v4072_v48 = vshll.u32 %v6103_v16, 16  ;;  %v4047_v20 = vrot.slane %v4045_v14, 4  ;;  %v4050_v7 = vrot.slane %v4048_v34, 5  ;;  %v8795_v33 = vrot.slane %v4054_v55, 5 }
  0xf2   : > { %v8784_v41 = vsel %vm7894_vm5, %v5725_v13, %v9884_v49  ;;  %v4060_v13 = vrot.slane %v4058_v0, 4  ;;  %v8798_v49 = vld [vmem:[%s7616_s14 + $0xa0] sm:$0xf]  ;;  %v9885_v38 = vcombine.low %v8434_v18, %v8438_v4  ;;  %v8808_v30 = vrot.slane %v3979_v47, 4  ;;  %v7420_v18 = vld [vmem:[%s9848_s1 + $0x210] sm:$0xff]  }
  0xf3   : > { %6769 = vmatpush3.bf16.msra.mxu1 %v7421_v3  ;;  %v8791_v3 = vld [vmem:[%s9848_s1 + $0x100] sm:$0xff]   ;;  %v4016_v16 = vshll.u32 %v8763_v59, 16  ;;  %v9886_v14 = vcombine.low %v8486_v46, %v8490_v2  ;;  %v4013_v4 = vor.u32 %v4012_v17, %v8770_v24  ;;  %v4037_v47 = vor.u32 %v4036_v40, %v8775_v60 }
  0xf4   : > { %7042 = vmatprep.subr.bf16.mxu1 %v8791_v3  ;;  %v4040_v34 = vshll.u32 %v8773_v27, 16  ;;  %v3990_v55 = vrot.slane %v3989_v61, 4  ;;  %v4064_v46 = vshll.u32 %v8778_v11, 16  ;;  %v4071_v2 = vrot.slane %v4069_v19, 4 }
  0xf5   : > { %6963 = vmatmul.mubr.bf16.vlgmr.msra.gmra.mrb[0].mxu0 %v8511_v23  ;;  %6739 = vmatmul.mubr.bf16.gmra.mrb[16].mxu1 %v9885_v38  ;;  %v4003_v23 = vor.u32 %v4002_v42, %v3999_v53  ;;  %v4074_v0 = vrot.slane %v4072_v48, 5  ;;  %v4051_v53 = vor.u32 %v4050_v7, %v4047_v20  ;;  %v4078_v42 = vshll.u32 %v8798_v49, 16  ;;  %v8838_v20 = vld [vmem:[%s7616_s14 + $0xa4] sm:$0x1] }
  0xf6   : > { %6995 = vmatpush3.bf16.msra.mxu0 %v8465_v15  ;;  %6742 = vmatprep.mubr.bf16.mxu1 %v9886_v14  ;;  %v4027_v15 = vor.u32 %v4026_v54, %v4023_v52  ;;  %v4082_v17 = vshrl.u32 %v8798_v49, 16  ;;  %v6106_v54 = vld [vmem:[%s7616_s14 + $0xa8] sm:$0xf]  ;;  %v3971_v40 = vsel %vm7644_vm2, %v8733_v31, %v8712_v21  ;;  %v9887_v52 = vrot.slane %v8719_v5, 5  ;;  %v8841_v14 = vld [vmem:[%s7616_s14 + $0xac] sm:$0xf] }
  0xf7   : > { %6966 = vmatprep.mubr.bf16.mxu0 %v8618_v12  ;;  %6996 = vmatprep.subr.bf16.mxu0 %v7418_v37  ;;  %v4061_v12 = vor.u32 %v4060_v13, %v8795_v33  ;;  %v4004_v19 = vrot.slane %v4003_v23, 4  ;;  %v4018_v48 = vrot.slane %v4016_v16, 5  ;;  %v4014_v7 = vrot.slane %v4013_v4, 4  ;;  %v7422_v31 = vld [vmem:[%s9848_s1 + $0x218] sm:$0xff]  }
  0xf8   : > { %v8835_v61 = vsel %vm7894_vm5, %v8716_v6, %v9887_v52  ;;  %v4028_v13 = vrot.slane %v4027_v15, 4  ;;  %v4042_v38 = vrot.slane %v4040_v34, 5  ;;  %v4066_v21 = vrot.slane %v4064_v46, 5  ;;  %v8861_v34 = vld [vmem:[%s7616_s14 + $0xb0] sm:$0x1] }
  0xf9   : > { %v4075_v5 = vor.u32 %v4074_v0, %v4071_v2  ;;  %v4093_v6 = vshrl.u32 %v6106_v54, 16  ;;  %v4096_v52 = vshll.u32 %v6106_v54, 16  ;;  %v4052_v23 = vrot.slane %v4051_v53, 4 }
  0xfa   : > { %6997 = vmatpush3.bf16.msra.mxu0 %v7418_v37  ;;  %v4038_v37 = vrot.slane %v4037_v47, 4  ;;  %v4062_v16 = vrot.slane %v4061_v12, 4  ;;  %v8847_v22 = vrot.slane %v4078_v42, 5  ;;  %v4084_v4 = vrot.slane %v4082_v17, 4  ;;  %v8896_v12 = vld [vmem:[%s7616_s14 + $0xb4] sm:$0xf] }
  0xfb   : > { %6998 = vmatprep.subr.bf16.mxu0 %v7420_v18  ;;  %v9888_v15 = vcombine.low %v8526_v1, %v8530_v8  ;;  %v3985_v47 = vsel %vm7644_vm2, %v8808_v30, %v8735_v39  ;;  %v4102_v46 = vshll.u32 %v8841_v14, 16  ;;  %v4106_v2 = vshrl.u32 %v8841_v14, 16 }
  0xfc   : > { %v9889_v1 = vcombine.low %v8573_v44, %v8577_v45  ;;  %v4009_v8 = vsel %vm7644_vm2, %v4004_v19, %v8770_v24  ;;  %v4019_v39 = vsel %vm7644_vm2, %v4014_v7, %v4018_v48  ;;  %v4043_v45 = vsel %vm7644_vm2, %v4038_v37, %v4042_v38  ;;  %v7425_v44 = vld [vmem:[%s9848_s1 + $0x220] sm:$0xff]   ;;  %v6162_v48 = vld [vmem:[%s7616_s14 + $0x48] sm:$0xe] }
  0xfd   : > { %6967 = vmatmul.mubr.bf16.gmra.mrb[4].mxu0 %v8634_v26  ;;  %6743 = vmatmul.mubr.bf16.gmra.mrb[20].mxu1 %v9888_v15  ;;  %v3995_v26 = vsel %vm7644_vm2, %v3990_v55, %v8739_v32  ;;  %v4033_v32 = vsel %vm7644_vm2, %v4028_v13, %v8775_v60  ;;  %v8882_v30 = vrot.slane %v4075_v5, 4  ;;  %v8884_v24 = vrot.slane %v4093_v6, 4  ;;  %v8932_v6 = vld [vmem:[%s7616_s14 + $0xc0] sm:$0xf] }
  0xfe   : > { %6970 = vmatprep.mubr.bf16.mxu0 %v8755_v63  ;;  %6746 = vmatprep.mubr.bf16.mxu1 %v9889_v1  ;;  %v4088_v63 = vshll.u32 %v8838_v20, 16  ;;  %v4057_v60 = vsel %vm7644_vm2, %v4052_v23, %v8795_v33  ;;  %v4067_v55 = vsel %vm7644_vm2, %v4062_v16, %v4066_v21  ;;  %v4085_v0 = vor.u32 %v4084_v4, %v8847_v22 }
  0xff   : > { %6999 = vmatpush3.bf16.msra.mxu0 %v7420_v18  ;;  %v8886_v18 = vrot.slane %v4096_v52, 5  ;;  %v4112_v53 = vshll.u32 %v8861_v34, 16  ;;  %v9890_v42 = vsel %vm7644_vm2, %v8710_v58, %v8653_v36  ;;  %v5757_v54 = vcombine.low %v8784_v41, %v8835_v61  ;;  %v8917_v58 = vld [vmem:[%s7616_s14 + $0xb8] sm:$0xf]  ;;  %v6163_v52 = vld [vmem:[%s7616_s14 + $0x54] sm:$0xe] }
 0x100   : > { %7000 = vmatprep.subr.bf16.mxu0 %v7422_v31  ;;  %v6140_v17 = vcombine.low %v9890_v42, %v3971_v40  ;;  %v8905_v33 = vrot.slane %v4102_v46, 5  ;;  %v8907_v19 = vrot.slane %v4106_v2, 4  ;;  %v6141_v7 = vcombine.low %v3985_v47, %v3995_v26  ;;  %v6164_v47 = vld [vmem:[%s7616_s14 + $0x60] sm:$0xe]  ;;  %v7423_v42 = vld [vmem:[%s7616_s14 + $0xc] sm:$0xff]  }
 0x101   : > { %v8910_v13 = vcombine.low %v4009_v8, %v4019_v39  ;;  %v8912_v37 = vcombine.low %v4033_v32, %v4043_v45  ;;  %v8914_v38 = vrot.slane %v4088_v63, 5  ;;  %v8919_v36 = vcombine.low %v4057_v60, %v4067_v55  ;;  %v6165_v63 = vld [vmem:[%s7616_s14 + $0x6c] sm:$0xe]  ;;  %v7431_v45 = vld [vmem:[%s9848_s1 + $0x230] sm:$0xff]   ;;  %v9893_v60 = vld [vmem:[#allocation2_spill] sm:$0xff] }
 0x102   : > { %v4081_v40 = vsel %vm7644_vm2, %v8882_v30, %v8847_v22  ;;  %v4099_v21 = vor.u32 %v8886_v18, %v8884_v24  ;;  %v4117_v5 = vshrl.u32 %v8896_v12, 16  ;;  %v8936_v23 = vrot.slane %v4085_v0, 4 }
 0x103   : > { %7001 = vmatpush3.bf16.msra.mxu0 %v7422_v31  ;;  %v7428_v31 = vld [vmem:[%s9848_s1 + $0x228] sm:$0xff]   ;;  %v8938_v16 = vrot.slane %v4112_v53, 5  ;;  %v4120_v4 = vshll.u32 %v8896_v12, 16  ;;  %v6178_v15 = vrot.slane %v6162_v48, 9  ;;  %v9891_v26 = vcombine.low %v8642_v56, %v8649_v9 }
 0x104   : > { %7002 = vmatprep.subr.bf16.mxu0 %v7425_v44  ;;  %v4109_v46 = vor.u32 %v8907_v19, %v8905_v33  ;;  %v4126_v2 = vshll.u32 %v8917_v58, 16  ;;  %v4604_v1 = vrot.slane %v8506_v28, 5  ;;  %v9892_v8 = vcombine.low %v8703_v62, %v8730_v10  ;;  %v9894_v53 = vld [vmem:[#allocation3_spill] sm:$0xff] }
 0x105   : > { %6971 = vmatmul.mubr.bf16.gmra.mrb[8].mxu0 %v8757_v29  ;;  %6747 = vmatmul.mubr.bf16.gmra.mrb[24].mxu1 %v9891_v26  ;;  %v4130_v29 = vshrl.u32 %v8917_v58, 16  ;;  %v4607_v39 = vrot.slane %v8547_v50, 5  ;;  %v6179_v32 = vrot.slane %v6163_v52, 9  ;;  %v4611_v56 = vrot.slane %v8534_v51, 5  ;;  %v9895_v26 = vld [vmem:[#allocation4_spill] sm:$0xff] }
 0x106   : > { %6974 = vmatprep.mubr.bf16.mxu0 %v6140_v17  ;;  %6750 = vmatprep.mubr.bf16.mxu1 %v9892_v8  ;;  %v4614_v9 = vrot.slane %v8581_v25, 5  ;;  %v4141_v28 = vshrl.u32 %v8932_v6, 16  ;;  %v8963_v62 = vsel %vm7894_vm5, %v6178_v15, %v4604_v1  ;;  %v4606_v10 = vrot.slane %v4604_v1, 4 }
 0x107   : > { %7003 = vmatpush3.bf16.msra.mxu0 %v7425_v44  ;;  %v6180_v50 = vrot.slane %v6164_v47, 9  ;;  %v4144_v51 = vshll.u32 %v8932_v6, 16  ;;  %v8968_v25 = vsel %vm7894_vm5, %v6179_v32, %v4611_v56  ;;  %v4613_v44 = vrot.slane %v4611_v56, 4  ;;  %v8989_v6 = vld [vmem:[%s7616_s14 + $0xc4] sm:$0xf] }
 0x108   : > { %7004 = vmatprep.subr.bf16.mxu0 %v7428_v31  ;;  %v4618_v24 = vrot.slane %v8590_v57, 5  ;;  %v8973_v18 = vsel %vm7894_vm5, %v4606_v10, %v4607_v39  ;;  %v4621_v55 = vrot.slane %v9893_v60, 5  ;;  %v6181_v0 = vrot.slane %v6165_v63, 9  ;;  %v9015_v10 = vld [vmem:[%s7616_s14 + $0xbc] sm:$0x1] }
 0x109   : > { %v4625_v12 = vrot.slane %v9894_v53, 5  ;;  %v6210_v17 = vcombine.low %v8963_v62, %v8973_v18  ;;  %v8982_v19 = vsel %vm7894_vm5, %v4613_v44, %v4614_v9  ;;  %v4628_v1 = vrot.slane %v9895_v26, 5  ;;  %v6166_v9 = vld [vmem:[%s7616_s14 + $0x78] sm:$0xe] }
 0x10a   : > { %v8986_v57 = vsel %vm7894_vm5, %v6180_v50, %v4618_v24  ;;  %v4620_v48 = vrot.slane %v4618_v24, 4  ;;  %v6211_v52 = vcombine.low %v8968_v25, %v8982_v19  ;;  %v9001_v8 = vrot.slane %v4099_v21, 4  ;;  %v9896_v50 = vld [vmem:[#allocation5_spill] sm:$0xff]  ;;  %v6167_v24 = vld [vmem:[%s7616_s14 + $0x84] sm:$0xe] }
 0x10b   : > { %7005 = vmatpush3.bf16.msra.mxu0 %v7428_v31  ;;  %v7434_v31 = vld [vmem:[%s9848_s1 + $0x238] sm:$0xff]   ;;  %v8998_v15 = vsel %vm7894_vm5, %v6181_v0, %v4625_v12  ;;  %v4627_v47 = vrot.slane %v4625_v12, 4  ;;  %v9003_v39 = vrot.slane %v4117_v5, 4  ;;  %v4122_v32 = vrot.slane %v4120_v4, 5  ;;  %v6115_v12 = vld [vmem:[%s7616_s14 + $0xcc] sm:$0xf] }
 0x10c   : > { %7006 = vmatprep.subr.bf16.mxu0 %v7431_v45  ;;  %v9007_v56 = vsel %vm7894_vm5, %v4620_v48, %v4621_v55  ;;  %v4110_v63 = vrot.slane %v4109_v46, 4  ;;  %v4132_v4 = vrot.slane %v4130_v29, 4  ;;  %v4150_v41 = vshll.u32 %v8989_v6, 16  ;;  %v7424_v55 = vld [vmem:[%s7616_s14 + $0x18] sm:$0xff]  }
 0x10d   : > { %6975 = vmatmul.mubr.bf16.gmra.mrb[12].mxu0 %v6141_v7  ;;  %6751 = vmatmul.mubr.bf16.gmra.mrb[28].mxu1 %v5757_v54  ;;  %v9017_v7 = vrot.slane %v4126_v2, 5  ;;  %v6212_v21 = vcombine.low %v8986_v57, %v9007_v56  ;;  %v9023_v5 = vsel %vm7894_vm5, %v4627_v47, %v4628_v1  ;;  %v4154_v61 = vshrl.u32 %v8989_v6, 16 }
 0x10e   : > { %6978 = vmatprep.mubr.bf16.mxu0 %v8910_v13  ;;  %6770 = vmatprep.mubr.bf16.mxu1 %v7423_v42  ;;  %v6213_v54 = vcombine.low %v8998_v15, %v9023_v5  ;;  %v4143_v13 = vrot.slane %v4141_v28, 4  ;;  %v4146_v46 = vrot.slane %v4144_v51, 5  ;;  %v6182_v2 = vrot.slane %v6166_v9, 9  ;;  %v9041_v51 = vld [vmem:[%s7616_s14 + $0xc8] sm:$0x1] }
 0x10f   : > { %7007 = vmatpush3.bf16.msra.mxu0 %v7431_v45  ;;  %v4632_v44 = vrot.slane %v9896_v50, 5  ;;  %v4091_v29 = vsel %vm7644_vm2, %v8936_v23, %v8914_v38  ;;  %v4105_v45 = vsel %vm7644_vm2, %v9001_v8, %v8905_v33  ;;  %v4136_v28 = vshll.u32 %v9015_v10, 16  ;;  %v7426_v33 = vld [vmem:[%s7616_s14 + $0x24] sm:$0xff]  }
 0x110   : > { %7008 = vmatprep.subr.bf16.mxu0 %v7434_v31  ;;  %v4635_v60 = vrot.slane %v8763_v59, 5  ;;  %v4115_v0 = vsel %vm7644_vm2, %v4110_v63, %v8938_v16  ;;  %v4123_v53 = vor.u32 %v4122_v32, %v9003_v39  ;;  %v4133_v42 = vor.u32 %v4132_v4, %v9017_v7  ;;  %v9059_v59 = vld [vmem:[%s7616_s14 + $0xd0] sm:$0xf]  ;;  %v9897_v39 = vld [vmem:[#allocation6_spill] sm:$0xff] }
 0x111   : > { %v9052_v38 = vsel %vm7894_vm5, %v6182_v2, %v4632_v44  ;;  %v4634_v23 = vrot.slane %v4632_v44, 4  ;;  %v9056_v48 = vrot.slane %v4150_v41, 5  ;;  %v4156_v47 = vrot.slane %v4154_v61, 4 }
 0x112   : > { %v6183_v26 = vrot.slane %v6167_v24, 9  ;;  %v4147_v1 = vor.u32 %v4146_v46, %v4143_v13  ;;  %v4160_v16 = vshll.u32 %v9041_v51, 16  ;;  %v4639_v32 = vrot.slane %v9897_v39, 5  ;;  %v7484_v46 = vld [vmem:[%s9848_s1 + $0x108] sm:$0xff]   ;;  %v6168_v24 = vld [vmem:[%s7616_s14 + $0x90] sm:$0xe] }
 0x113   : > { %7009 = vmatpush3.bf16.msra.mxu0 %v7434_v31  ;;  %v9064_v8 = vsel %vm7894_vm5, %v4634_v23, %v4635_v60  ;;  %v4165_v9 = vshrl.u32 %v6115_v12, 16  ;;  %v4168_v63 = vshll.u32 %v6115_v12, 16  ;;  %v4642_v41 = vrot.slane %v8773_v27, 5  ;;  %v7427_v60 = vld [vmem:[%s7616_s14 + $0x30] sm:$0xff]  }
 0x114   : > { %v4174_v31 = vshll.u32 %v9059_v59, 16  ;;  %v4178_v61 = vshrl.u32 %v9059_v59, 16  ;;  %v9076_v13 = vsel %vm7894_vm5, %v6183_v26, %v4639_v32  ;;  %v6145_v27 = vcombine.low %v4081_v40, %v4091_v29  ;;  %v9097_v29 = vld [vmem:[%s7616_s14 + $0xd4] sm:$0x1] }
 0x115   : > { %6979 = vmatmul.mubr.bf16.gmra.mrb[16].mxu0 %v8912_v37  ;;  %6771 = vmatmul.mubr.bf16.vlgmr.msra.gmra.mrb[0].mxu1 %v7424_v55  ;;  %v4641_v37 = vrot.slane %v4639_v32, 4  ;;  %v6146_v2 = vcombine.low %v4105_v45, %v4115_v0  ;;  %v4124_v50 = vrot.slane %v4123_v53, 4  ;;  %v4138_v44 = vrot.slane %v4136_v28, 5  ;;  %v7429_v28 = vld [vmem:[%s7616_s14 + $0x3c] sm:$0xff]  }
 0x116   : > { %6982 = vmatprep.mubr.bf16.mxu0 %v8919_v36  ;;  %7050 = vmatpush3.bf16.msra.mxu1 %v8791_v3  ;;  %v4157_v36 = vor.u32 %v4156_v47, %v9056_v48  ;;  %v4134_v55 = vrot.slane %v4133_v42, 4  ;;  %v4148_v22 = vrot.slane %v4147_v1, 4  ;;  %v4162_v30 = vrot.slane %v4160_v16, 5  ;;  %v9898_v47 = vld [vmem:[#allocation7_spill] sm:$0xff]  ;;  %v7485_v1 = vld [vmem:[%s9848_s1 + $0x110] sm:$0xff]  }
 0x117   : > { %6774 = vmatprep.mubr.bf16.mxu1 %v7426_v33  ;;  %7043 = vmatprep.subr.bf16.mxu1 %v7484_v46  ;;  %v9090_v3 = vsel %vm7894_vm5, %v4641_v37, %v4642_v41  ;;  %v4167_v12 = vrot.slane %v4165_v9, 4  ;;  %v4170_v23 = vrot.slane %v4168_v63, 5  ;;  %v9099_v45 = vrot.slane %v4174_v31, 5  ;;  %v6158_v31 = vld [vmem:[%s7616_s14 + $0x18] sm:$0xe] }
 0x118   : > { %v4180_v0 = vrot.slane %v4178_v61, 4  ;;  %v4158_v53 = vrot.slane %v4157_v36, 4  ;;  %v6184_v33 = vrot.slane %v6168_v24, 9  ;;  %v4646_v42 = vrot.slane %v9898_v47, 5  ;;  %v6169_v61 = vld [vmem:[%s7616_s14 + $0x9c] sm:$0xe] }
 0x119   : > { %v4649_v26 = vrot.slane %v8778_v11, 5  ;;  %v4129_v16 = vsel %vm7644_vm2, %v4124_v50, %v9017_v7  ;;  %v4139_v39 = vsel %vm7644_vm2, %v4134_v55, %v4138_v44  ;;  %v4184_v32 = vshll.u32 %v9097_v29, 16  ;;  %v7487_v50 = vld [vmem:[%s9848_s1 + $0x118] sm:$0xff]  }
 0x11a   : > { %7051 = vmatpush3.bf16.msra.mxu1 %v7484_v46  ;;  %v9115_v9 = vsel %vm7894_vm5, %v6184_v33, %v4646_v42  ;;  %v4648_v11 = vrot.slane %v4646_v42, 4  ;;  %v4171_v63 = vor.u32 %v4170_v23, %v4167_v12  ;;  %v4181_v41 = vor.u32 %v4180_v0, %v9099_v45  ;;  %v7488_v33 = vld [vmem:[%s7616_s14 + $0x20] sm:$0x1] }
 0x11b   : > { %7044 = vmatprep.subr.bf16.mxu1 %v7485_v1  ;;  %v4153_v7 = vsel %vm7644_vm2, %v4148_v22, %v9056_v48  ;;  %v4163_v37 = vsel %vm7644_vm2, %v4158_v53, %v4162_v30  ;;  %v4186_v44 = vrot.slane %v4184_v32, 5  ;;  %v6174_v24 = vrot.slane %v6158_v31, 9  ;;  %v7430_v22 = vld [vmem:[%s7616_s14 + $0x48] sm:$0xff]   ;;  %v9310_v48 = vld [vmem:[%s7616_s14 + $0x94] sm:$0xf] }
 0x11c   : > { %v9128_v46 = vsel %vm7894_vm5, %v4648_v11, %v4649_v26  ;;  %v4653_v55 = vrot.slane %v8798_v49, 5  ;;  %v6148_v30 = vcombine.low %v4153_v7, %v4163_v37  ;;  %v4172_v12 = vrot.slane %v4171_v63, 4  ;;  %v7489_v49 = vld [vmem:[%s9848_s1 + $0x120] sm:$0xff]   ;;  %v7491_v37 = vld [vmem:[%s7616_s14 + $0x34] sm:$0xf] }
 0x11d   : > { %6983 = vmatmul.mubr.bf16.gmra.mrb[20].mxu0 %v6145_v27  ;;  %6775 = vmatmul.mubr.bf16.gmra.mrb[4].mxu1 %v7427_v60  ;;  %v7486_v27 = vld [vmem:[%s7616_s14 + $0x1c] sm:$0xf]  ;;  %v6185_v60 = vrot.slane %v6169_v61, 9  ;;  %v4182_v23 = vrot.slane %v4181_v41, 4  ;;  %v4656_v0 = vrot.slane %v8838_v20, 5  ;;  %v4579_v47 = vrot.slane %v7488_v33, 5 }
 0x11e   : > { %6986 = vmatprep.mubr.bf16.mxu0 %v6146_v2  ;;  %6778 = vmatprep.mubr.bf16.mxu1 %v7429_v28  ;;  %v4576_v36 = vrot.slane %v7486_v27, 5  ;;  %v6147_v2 = vcombine.low %v4129_v16, %v4139_v39  ;;  %v7432_v28 = vld [vmem:[%s7616_s14 + $0x54] sm:$0xff]   ;;  %v4655_v26 = vrot.slane %v4653_v55, 4  ;;  %v7490_v20 = vld [vmem:[%s7616_s14 + $0x28] sm:$0xf]  ;;  %v4177_v32 = vsel %vm7644_vm2, %v4172_v12, %v9099_v45 }
 0x11f   : > { %7052 = vmatpush3.bf16.msra.mxu1 %v7485_v1  ;;  %v9142_v42 = vsel %vm7894_vm5, %v6185_v60, %v4653_v55  ;;  %v6170_v1 = vld [vmem:[%s7616_s14 + $0xa8] sm:$0xe]  ;;  %v4583_v16 = vrot.slane %v7490_v20, 5  ;;  %v4187_v11 = vsel %vm7644_vm2, %v4182_v23, %v4186_v44  ;;  %v6159_v7 = vld [vmem:[%s7616_s14 + $0x24] sm:$0xe]  ;;  %v4590_v45 = vrot.slane %v7491_v37, 5 }
 0x120   : > { %7045 = vmatprep.subr.bf16.mxu1 %v7487_v50  ;;  %v4578_v53 = vrot.slane %v4576_v36, 4  ;;  %v9151_v39 = vsel %vm7894_vm5, %v4655_v26, %v4656_v0  ;;  %v6186_v41 = vrot.slane %v6170_v1, 9  ;;  %v4577_v31 = vsel %vm7894_vm5, %v6174_v24, %v4576_v36  ;;  %v7433_v55 = vld [vmem:[%s7616_s14 + $0x60] sm:$0xff]   ;;  %v7493_v12 = vld [vmem:[%s7616_s14 + $0x2c] sm:$0x1]  ;;  %v7496_v20 = vld [vmem:[%s9848_s1 + $0x130] sm:$0xff]  }
 0x121   : > { %v4660_v27 = vrot.slane %v8841_v14, 5  ;;  %v4663_v36 = vrot.slane %v8861_v34, 5  ;;  %v6149_v44 = vcombine.low %v4177_v32, %v4187_v11  ;;  %v4585_v14 = vrot.slane %v4583_v16, 4  ;;  %v6171_v0 = vld [vmem:[%s7616_s14 + $0xb4] sm:$0xe] }
 0x122   : > { %v4580_v61 = vsel %vm7894_vm5, %v4578_v53, %v4579_v47  ;;  %v4586_v23 = vrot.slane %v7493_v12, 5  ;;  %v4592_v33 = vrot.slane %v4590_v45, 4  ;;  %v7494_v47 = vld [vmem:[%s7616_s14 + $0x38] sm:$0x1]  ;;  %v7495_v1 = vld [vmem:[%s7616_s14 + $0x40] sm:$0xf] }
 0x123   : > { %7053 = vmatpush3.bf16.msra.mxu1 %v7487_v50  ;;  %v7492_v50 = vld [vmem:[%s9848_s1 + $0x128] sm:$0xff]   ;;  %v9174_v24 = vsel %vm7894_vm5, %v6186_v41, %v4660_v27  ;;  %v4662_v60 = vrot.slane %v4660_v27, 4  ;;  %v4593_v34 = vrot.slane %v7494_v47, 5  ;;  %v6161_v11 = vld [vmem:[%s7616_s14 + $0x3c] sm:$0xe]  ;;  %v6187_v41 = vrot.slane %v6171_v0, 9 }
 0x124   : > { %7046 = vmatprep.subr.bf16.mxu1 %v7489_v49  ;;  %v4670_v37 = vrot.slane %v9015_v10, 5  ;;  %v7497_v10 = vld [vmem:[%s7616_s14 + $0x44] sm:$0x1]  ;;  %v9217_v12 = vld [vmem:[%s7616_s14 + $0x6c] sm:$0xf] }
 0x125   : > { %6987 = vmatmul.mubr.bf16.gmra.mrb[24].mxu0 %v6147_v2  ;;  %6779 = vmatmul.mubr.bf16.gmra.mrb[8].mxu1 %v7430_v22  ;;  %v6160_v2 = vld [vmem:[%s7616_s14 + $0x30] sm:$0xe]  ;;  %v6206_v22 = vcombine.low %v4577_v31, %v4580_v61  ;;  %v9183_v26 = vsel %vm7894_vm5, %v4662_v60, %v4663_v36  ;;  %v4667_v31 = vrot.slane %v8917_v58, 5  ;;  %v6177_v36 = vrot.slane %v6161_v11, 9  ;;  %v9231_v11 = vld [vmem:[%s7616_s14 + $0x78] sm:$0xf] }
 0x126   : > { %6990 = vmatprep.mubr.bf16.mxu0 %v6148_v30  ;;  %6782 = vmatprep.mubr.bf16.mxu1 %v7432_v28  ;;  %v6175_v30 = vrot.slane %v6159_v7, 9  ;;  %v7435_v28 = vld [vmem:[%s7616_s14 + $0x6c] sm:$0xff]   ;;  %v6176_v53 = vrot.slane %v6160_v2, 9  ;;  %v4587_v7 = vsel %vm7894_vm5, %v4585_v14, %v4586_v23  ;;  %v4594_v2 = vsel %vm7894_vm5, %v4592_v33, %v4593_v34  ;;  %v7441_v23 = vld [vmem:[%s7616_s14 + $0xb4] sm:$0xff]  }
 0x127   : > { %7054 = vmatpush3.bf16.msra.mxu1 %v7489_v49  ;;  %v4597_v49 = vrot.slane %v7495_v1, 5  ;;  %v9204_v58 = vsel %vm7894_vm5, %v6187_v41, %v4667_v31  ;;  %v4600_v60 = vrot.slane %v7497_v10, 5  ;;  %v4677_v34 = vrot.slane %v9041_v51, 5 }
 0x128   : > { %7047 = vmatprep.subr.bf16.mxu1 %v7492_v50  ;;  %v4584_v61 = vsel %vm7894_vm5, %v6175_v30, %v4583_v16  ;;  %v4591_v27 = vsel %vm7894_vm5, %v6176_v53, %v4590_v45  ;;  %v4669_v16 = vrot.slane %v4667_v31, 4  ;;  %v7498_v45 = vld [vmem:[%s9848_s1 + $0x138] sm:$0xff]   ;;  %v4674_v53 = vrot.slane %v8989_v6, 5 }
 0x129   : > { %v7436_v30 = vld [vmem:[%s7616_s14 + $0x78] sm:$0xff]   ;;  %v6208_v14 = vcombine.low %v4591_v27, %v4594_v2  ;;  %v4598_v33 = vsel %vm7894_vm5, %v6177_v36, %v4597_v49  ;;  %v2358_v1 = vshrl.u32 %v9217_v12, 16  ;;  %v2385_v36 = vshll.u32 %v9231_v11, 16 }
 0x12a   : > { %v4676_v6 = vrot.slane %v4674_v53, 4 }
 0x12b   : > { %7055 = vmatpush3.bf16.msra.mxu1 %v7492_v50  ;;  %v6172_v50 = vld [vmem:[%s7616_s14 + $0xc0] sm:$0xe]  ;;  %v2360_v10 = vrot.slane %v2358_v1, 4 }
 0x12c   : > { %7048 = vmatprep.subr.bf16.mxu1 %v7496_v20  ;;  %v6188_v0 = vrot.slane %v6172_v50, 9  ;;  %v9250_v2 = vsel %vm7894_vm5, %v4676_v6, %v4677_v34  ;;  %v2382_v50 = vshrl.u32 %v9231_v11, 16  ;;  %v2387_v6 = vrot.slane %v2385_v36, 5  ;;  %v9302_v36 = vld [vmem:[%s7616_s14 + $0x9c] sm:$0xf] }
 0x12d   : > { %6991 = vmatmul.mubr.bf16.gmra.mrb[28].mxu0 %v6149_v44  ;;  %6783 = vmatmul.mubr.bf16.gmra.mrb[12].mxu1 %v7433_v55  ;;  %v4599_v44 = vrot.slane %v4597_v49, 4  ;;  %v6207_v55 = vcombine.low %v4584_v61, %v4587_v7  ;;  %v9238_v49 = vld [vmem:[%s7616_s14 + $0x70] sm:$0xf]  ;;  %v6173_v61 = vld [vmem:[%s7616_s14 + $0xcc] sm:$0xe]  ;;  %9899 = vst [vmem:[#allocation2_spill] sm:$0xff] %v9302_v36 }
 0x12e   : > { %7010 = vmatprep.mubr.bf16.mxu0 %v6206_v22  ;;  %6786 = vmatprep.mubr.bf16.mxu1 %v7435_v28  ;;  %v9213_v22 = vsel %vm7894_vm5, %v4669_v16, %v4670_v37  ;;  %v7437_v28 = vld [vmem:[%s7616_s14 + $0x84] sm:$0xff]   ;;  %v9235_v41 = vsel %vm7894_vm5, %v6188_v0, %v4674_v53  ;;  %v2367_v31 = vshll.u32 %v9238_v49, 16  ;;  %v2371_v51 = vshrl.u32 %v9238_v49, 16  ;;  %v9244_v7 = vld [vmem:[%s7616_s14 + $0x7c] sm:$0xf] }
 0x12f   : > { %7056 = vmatpush3.bf16.msra.mxu1 %v7496_v20  ;;  %v4601_v47 = vsel %vm7894_vm5, %v4599_v44, %v4600_v60  ;;  %v2361_v20 = vshll.u32 %v9217_v12, 16  ;;  %v2391_v37 = vshll.u32 %v9244_v7, 16  ;;  %v2395_v27 = vshrl.u32 %v9244_v7, 16  ;;  %v7439_v53 = vld [vmem:[%s7616_s14 + $0x9c] sm:$0xff]  }
 0x130   : > { %7049 = vmatprep.subr.bf16.mxu1 %v7498_v45  ;;  %v6209_v16 = vcombine.low %v4598_v33, %v4601_v47  ;;  %v2373_v0 = vrot.slane %v2371_v51, 4  ;;  %v9263_v33 = vld [vmem:[%s7616_s14 + $0x84] sm:$0xf]  ;;  %v9276_v51 = vld [vmem:[%s7616_s14 + $0x74] sm:$0x1] }
 0x131   : > { %v2363_v60 = vrot.slane %v2361_v20, 5  ;;  %v2397_v1 = vrot.slane %v2395_v27, 4  ;;  %v2384_v20 = vrot.slane %v2382_v50, 4  ;;  %v2377_v44 = vshll.u32 %v9276_v51, 16 }
 0x132   : > { %v2409_v50 = vshll.u32 %v9263_v33, 16 }
 0x133   : > { %7057 = vmatpush3.bf16.msra.mxu1 %v7498_v45  ;;  %v6189_v45 = vrot.slane %v6173_v61, 9  ;;  %v9272_v61 = vld [vmem:[%s7616_s14 + $0x80] sm:$0x1]  ;;  %v2388_v62 = vor.u32 %v2387_v6, %v2384_v20 }
 0x135   : > { %7011 = vmatmul.mubr.bf16.vlgmr.msra.gmra.mrb[0].mxu0 %v6207_v55  ;;  %6787 = vmatmul.mubr.bf16.gmra.mrb[16].mxu1 %v7436_v30  ;;  %v4681_v55 = vrot.slane %v9059_v59, 5  ;;  %v7438_v30 = vld [vmem:[%s7616_s14 + $0x90] sm:$0xff]   ;;  %v9269_v59 = vrot.slane %v2391_v37, 5  ;;  %v2389_v6 = vrot.slane %v2388_v62, 4 }
 0x136   : > { %7014 = vmatprep.mubr.bf16.mxu0 %v6208_v14  ;;  %6790 = vmatprep.mubr.bf16.mxu1 %v7437_v28  ;;  %v9258_v14 = vrot.slane %v2367_v31, 5  ;;  %v4684_v28 = vrot.slane %v9097_v29, 5  ;;  %v2401_v31 = vshll.u32 %v9272_v61, 16  ;;  %v2364_v29 = vor.u32 %v2363_v60, %v2360_v10 }
 0x137   : > { %v9267_v47 = vsel %vm7894_vm5, %v6189_v45, %v4681_v55  ;;  %v4683_v34 = vrot.slane %v4681_v55, 4  ;;  %v2415_v10 = vshll.u32 %v9292_v43, 16  ;;  %v2419_v60 = vshrl.u32 %v9292_v43, 16  ;;  %v7440_v55 = vld [vmem:[%s7616_s14 + $0xa8] sm:$0xff]  }
 0x138   : > { %v2374_v37 = vor.u32 %v2373_v0, %v9258_v14  ;;  %v2398_v18 = vor.u32 %v2397_v1, %v9269_v59  ;;  %v2403_v45 = vrot.slane %v2401_v31, 5  ;;  %v2365_v0 = vrot.slane %v2364_v29, 4 }
 0x139   : > { %v9281_v27 = vsel %vm7894_vm5, %v4683_v34, %v4684_v28  ;;  %v9305_v32 = vrot.slane %v2415_v10, 5  ;;  %v2421_v63 = vrot.slane %v2419_v60, 4  ;;  %v2443_v29 = vshrl.u32 %v9310_v48, 16 }
 0x13a   : > { %v2375_v28 = vrot.slane %v2374_v37, 4  ;;  %v2399_v31 = vrot.slane %v2398_v18, 4  ;;  %v2454_v37 = vshrl.u32 %v9302_v36, 16  ;;  %v2370_v25 = vsel %vm7644_vm2, %v2365_v0, %v9258_v14 }
 0x13b   : > { %v2394_v56 = vsel %vm7644_vm2, %v2389_v6, %v9269_v59  ;;  %v9348_v6 = vld [vmem:[%s7616_s14 + $0x98] sm:$0x1] }
 0x13c   : > { %v2456_v0 = vrot.slane %v2454_v37, 4 }
 0x13d   : > { %7015 = vmatmul.mubr.bf16.gmra.mrb[4].mxu0 %v6209_v16  ;;  %6791 = vmatmul.mubr.bf16.gmra.mrb[20].mxu1 %v7438_v30  ;;  %v2406_v16 = vshrl.u32 %v9263_v33, 16  ;;  %v2379_v30 = vrot.slane %v2377_v44, 5  ;;  %v2439_v44 = vshll.u32 %v9310_v48, 16 }
 0x13e   : > { %7018 = vmatprep.mubr.bf16.mxu0 %v6210_v17  ;;  %6794 = vmatprep.mubr.bf16.mxu1 %v7439_v53  ;;  %v9298_v17 = vld [vmem:[%s7616_s14 + $0x90] sm:$0xf]  ;;  %v2411_v53 = vrot.slane %v2409_v50, 5  ;;  %v9320_v50 = vld [vmem:[%s7616_s14 + $0xa0] sm:$0xf] }
 0x13f   : > { %v2408_v34 = vrot.slane %v2406_v16, 4  ;;  %v2430_v20 = vshrl.u32 %v9298_v17, 16  ;;  %v2433_v1 = vshll.u32 %v9298_v17, 16  ;;  %v2457_v16 = vshll.u32 %v9302_v36, 16  ;;  %9900 = vst [vmem:[#allocation3_spill] sm:$0xff] %v9320_v50 }
 0x140   : > { %v2463_v10 = vshll.u32 %v9320_v50, 16  ;;  %v2467_v60 = vshrl.u32 %v9320_v50, 16  ;;  %v2380_v19 = vsel %vm7644_vm2, %v2375_v28, %v2379_v30  ;;  %v9342_v14 = vrot.slane %v2439_v44, 5  ;;  %v9389_v36 = vld [vmem:[%s7616_s14 + $0xc0] sm:$0xf] }
 0x141   : > { %v2412_v18 = vor.u32 %v2411_v53, %v2408_v34  ;;  %v2432_v40 = vrot.slane %v2430_v20, 4  ;;  %v2435_v57 = vrot.slane %v2433_v1, 5  ;;  %v2445_v30 = vrot.slane %v2443_v29, 4  ;;  %v7442_v34 = vld [vmem:[%s7616_s14 + $0xc0] sm:$0xff]   ;;  %9904 = vst [vmem:[#allocation6_spill] sm:$0xff] %v9389_v36 }
 0x142   : > { %v2459_v28 = vrot.slane %v2457_v16, 5  ;;  %v5910_v53 = vcombine.low %v2370_v25, %v2380_v19  ;;  %v9902_v25 = vcombine.low %v9052_v38, %v9064_v8 }
 0x143   : > { %v2413_v1 = vrot.slane %v2412_v18, 4  ;;  %v2436_v59 = vor.u32 %v2435_v57, %v2432_v40  ;;  %v2446_v29 = vor.u32 %v2445_v30, %v9342_v14 }
 0x144   : > { %v2460_v37 = vor.u32 %v2459_v28, %v2456_v0 }
 0x145   : > { %7019 = vmatmul.mubr.bf16.gmra.mrb[8].mxu0 %v6211_v52  ;;  %6795 = vmatmul.mubr.bf16.gmra.mrb[24].mxu1 %v7440_v55  ;;  %v9333_v52 = vld [vmem:[%s7616_s14 + $0x8c] sm:$0x1]  ;;  %v2422_v55 = vor.u32 %v2421_v63, %v9305_v32  ;;  %v2469_v63 = vrot.slane %v2467_v60, 4  ;;  %v9364_v60 = vld [vmem:[%s7616_s14 + $0xb4] sm:$0xf]  ;;  %v2418_v18 = vsel %vm7644_vm2, %v2413_v1, %v9305_v32  ;;  %v2437_v38 = vrot.slane %v2436_v59, 4 }
 0x146   : > { %7022 = vmatprep.mubr.bf16.mxu0 %v6212_v21  ;;  %v2425_v62 = vshll.u32 %v9333_v52, 16  ;;  %6798 = vmatprep.mubr.bf16.mxu1 %v7441_v23  ;;  %v2404_v21 = vsel %vm7644_vm2, %v2399_v31, %v2403_v45  ;;  %v9344_v23 = vrot.slane %v2463_v10, 5  ;;  %v2449_v45 = vshll.u32 %v9348_v6, 16  ;;  %v9352_v31 = vld [vmem:[%s7616_s14 + $0xa8] sm:$0xf]  ;;  %9901 = vst [vmem:[#allocation4_spill] sm:$0xff] %v9364_v60 }
 0x147   : > { %v2423_v4 = vrot.slane %v2422_v55, 4  ;;  %v5911_v44 = vcombine.low %v2394_v56, %v2404_v21  ;;  %v9360_v10 = vld [vmem:[%s7616_s14 + $0xa4] sm:$0x1]  ;;  %v2478_v15 = vshrl.u32 %v9352_v31, 16  ;;  %v2481_v5 = vshll.u32 %v9352_v31, 16 }
 0x148   : > { %v2427_v20 = vrot.slane %v2425_v62, 5  ;;  %v2470_v16 = vor.u32 %v2469_v63, %v9344_v23  ;;  %v2473_v40 = vshll.u32 %v9360_v10, 16  ;;  %v2451_v8 = vrot.slane %v2449_v45, 5  ;;  %v9384_v21 = vld [vmem:[%s7616_s14 + $0xb8] sm:$0xf] }
 0x149   : > { %v2502_v57 = vshrl.u32 %v9364_v60, 16  ;;  %v2505_v56 = vshll.u32 %v9364_v60, 16  ;;  %9903 = vst [vmem:[#allocation5_spill] sm:$0xff] %v9384_v21  ;;  %v2511_v30 = vshll.u32 %v9384_v21, 16  ;;  %v2515_v0 = vshrl.u32 %v9384_v21, 16 }
 0x14a   : > { %v2428_v55 = vsel %vm7644_vm2, %v2423_v4, %v2427_v20  ;;  %v2447_v28 = vrot.slane %v2446_v29, 4  ;;  %v2461_v63 = vrot.slane %v2460_v37, 4  ;;  %v2475_v32 = vrot.slane %v2473_v40, 5 }
 0x14b   : > { %v2483_v1 = vrot.slane %v2481_v5, 5  ;;  %v5912_v59 = vcombine.low %v2418_v18, %v2428_v55  ;;  %v2504_v45 = vrot.slane %v2502_v57, 4  ;;  %v2513_v60 = vrot.slane %v2511_v30, 5  ;;  %v9408_v5 = vld [vmem:[%s7616_s14 + $0xb0] sm:$0x1] }
 0x14c   : > { %v2517_v50 = vrot.slane %v2515_v0, 4  ;;  %v9905_v21 = vcombine.low %v9076_v13, %v9090_v3  ;;  %v2442_v29 = vsel %vm7644_vm2, %v2437_v38, %v9342_v14  ;;  %v2452_v37 = vsel %vm7644_vm2, %v2447_v28, %v2451_v8  ;;  %v9419_v55 = vld [vmem:[%s7616_s14 + $0xbc] sm:$0x1] }
 0x14d   : > { %7023 = vmatmul.mubr.bf16.gmra.mrb[12].mxu0 %v6213_v54  ;;  %6799 = vmatmul.mubr.bf16.gmra.mrb[28].mxu1 %v7442_v34  ;;  %v9372_v54 = vld [vmem:[%s7616_s14 + $0xac] sm:$0xf]  ;;  %v2471_v34 = vrot.slane %v2470_v16, 4  ;;  %v2466_v16 = vsel %vm7644_vm2, %v2461_v63, %v9344_v23  ;;  %v9906_v40 = vcombine.low %v9115_v9, %v9128_v46  ;;  %v2497_v14 = vshll.u32 %v9408_v5, 16  ;;  %9908 = vst [vmem:[#allocation8_spill] sm:$0xff] %v9419_v55 }
 0x14e   : > { %7026 = vmatprep.mubr.bf16.mxu0 %v9902_v25  ;;  %v2487_v19 = vshll.u32 %v9372_v54, 16  ;;  %v2491_v62 = vshrl.u32 %v9372_v54, 16  ;;  %6834 = vmatprep.mubr.bf16.mxu1 %v5910_v53  ;;  %v2480_v53 = vrot.slane %v2478_v15, 4  ;;  %v2507_v25 = vrot.slane %v2505_v56, 5 }
 0x14f   : > { %v2476_v13 = vsel %vm7644_vm2, %v2471_v34, %v2475_v32  ;;  %v2529_v23 = vshll.u32 %v9389_v36, 16  ;;  %v2518_v18 = vor.u32 %v2517_v50, %v2513_v60  ;;  %v2521_v38 = vshll.u32 %v9419_v55, 16 }
 0x150   : > { %v2489_v4 = vrot.slane %v2487_v19, 5  ;;  %v2493_v20 = vrot.slane %v2491_v62, 4  ;;  %v2484_v3 = vor.u32 %v2483_v1, %v2480_v53  ;;  %v2526_v19 = vshrl.u32 %v9389_v36, 16  ;;  %v9414_v62 = vld [vmem:[%s7616_s14 + $0xc4] sm:$0xf] }
 0x151   : > { %9907 = vst [vmem:[#allocation7_spill] sm:$0xff] %v9414_v62  ;;  %v2539_v9 = vshrl.u32 %v9414_v62, 16  ;;  %v2508_v46 = vor.u32 %v2507_v25, %v2504_v45  ;;  %v5913_v8 = vcombine.low %v2442_v29, %v2452_v37  ;;  %v5914_v57 = vcombine.low %v2466_v16, %v2476_v13  ;;  %v9433_v37 = vld [vmem:[%s7616_s14 + $0xc8] sm:$0x1] }
 0x152   : > { %v2494_v15 = vor.u32 %v2493_v20, %v2489_v4  ;;  %v2485_v56 = vrot.slane %v2484_v3, 4  ;;  %v2499_v30 = vrot.slane %v2497_v14, 5  ;;  %v2528_v0 = vrot.slane %v2526_v19, 4 }
 0x153   : > { %v2531_v28 = vrot.slane %v2529_v23, 5  ;;  %v2541_v34 = vrot.slane %v2539_v9, 4  ;;  %v2509_v32 = vrot.slane %v2508_v46, 4  ;;  %v2519_v53 = vrot.slane %v2518_v18, 4  ;;  %v7516_v46 = vld [vmem:[%s7616_s14 + $0x10] sm:$0xf] }
 0x154   : > { %v2523_v1 = vrot.slane %v2521_v38, 5  ;;  %v9909_v50 = vcombine.low %v9142_v42, %v9151_v39  ;;  %v9910_v20 = vcombine.low %v9174_v24, %v9183_v26  ;;  %v2545_v16 = vshll.u32 %v9433_v37, 16  ;;  %v7517_v18 = vld [vmem:[%s7616_s14 + $0x14] sm:$0x1] }
 0x155   : > { %7027 = vmatmul.mubr.bf16.gmra.mrb[16].mxu0 %v9905_v21  ;;  %6835 = vmatmul.mubr.bf16.vlgmr.msra.gmra.mrb[16].mxu1 %v5911_v44  ;;  %v2535_v44 = vshll.u32 %v9414_v62, 16  ;;  %v2495_v21 = vrot.slane %v2494_v15, 4  ;;  %v2532_v25 = vor.u32 %v2531_v28, %v2528_v0  ;;  %v2514_v42 = vsel %vm7644_vm2, %v2509_v32, %v2513_v60 }
 0x156   : > { %7030 = vmatprep.mubr.bf16.mxu0 %v9906_v40  ;;  %6838 = vmatprep.mubr.bf16.mxu1 %v5912_v59  ;;  %v2490_v59 = vsel %vm7644_vm2, %v2485_v56, %v2489_v4  ;;  %v2524_v39 = vsel %vm7644_vm2, %v2519_v53, %v2523_v1  ;;  %v2547_v13 = vrot.slane %v2545_v16, 5  ;;  %v9911_v3 = vcombine.low %v9204_v58, %v9213_v22  ;;  %v7519_v56 = vld [vmem:[%s7616_s14 + $0x2c] sm:$0x1]  ;;  %v7522_v1 = vld [vmem:[%s7616_s14 + $0x50] sm:$0x1] }
 0x157   : > { %v2537_v63 = vrot.slane %v2535_v44, 5  ;;  %v2500_v45 = vsel %vm7644_vm2, %v2495_v21, %v2499_v30  ;;  %v5916_v26 = vcombine.low %v2514_v42, %v2524_v39  ;;  %v2533_v40 = vrot.slane %v2532_v25, 4  ;;  %v7520_v30 = vld [vmem:[%s7616_s14 + $0x38] sm:$0x1]  ;;  %v7524_v25 = vld [vmem:[%s7616_s14 + $0x68] sm:$0x1] }
 0x158   : > { %v5915_v24 = vcombine.low %v2490_v59, %v2500_v45  ;;  %v9912_v15 = vcombine.low %v9235_v41, %v9250_v2  ;;  %v9913_v58 = vcombine.low %v9267_v47, %v9281_v27  ;;  %v5182_v44 = vunpack.c.l.bf16 %v7515_v35 }
 0x159   : > { %v2542_v29 = vor.u32 %v2541_v34, %v2537_v63  ;;  %v2538_v60 = vsel %vm7644_vm2, %v2533_v40, %v2537_v63  ;;  %v5183_v47 = vunpack.c.l.bf16 %v7516_v46  ;;  %v5184_v38 = vunpack.c.l.bf16 %v7517_v18  ;;  %v7521_v63 = vld [vmem:[%s7616_s14 + $0x44] sm:$0x1]  ;;  %v7527_v18 = vld [vmem:[%s7616_s14 + $0x30] sm:$0xf] }
 0x15a   : > { %v5190_v21 = vunpack.c.l.bf16 %v7519_v56  ;;  %v5193_v0 = vunpack.c.l.bf16 %v7520_v30  ;;  %v5196_v34 = vunpack.c.l.bf16 %v7521_v63  ;;  %v9476_v53 = vrot.slane %v5182_v44, 1  ;;  %v7529_v56 = vld [vmem:[%s7616_s14 + $0x24] sm:$0xf]  ;;  %v7530_v30 = vld [vmem:[%s7616_s14 + $0x28] sm:$0xf] }
 0x15b   : > { %v2543_v4 = vrot.slane %v2542_v29, 4  ;;  %v9480_v45 = vrot.slane %v5183_v47, 1  ;;  %v5205_v29 = vunpack.c.l.bf16 %v7524_v25  ;;  %v5208_v16 = vunpack.c.l.bf16 %v9276_v51  ;;  %v7531_v25 = vld [vmem:[%s7616_s14 + $0x48] sm:$0xf] }
 0x15c   : > { %v5211_v42 = vunpack.c.l.bf16 %v9272_v61  ;;  %v9485_v39 = vrot.slane %v5184_v38, 1  ;;  %v9491_v40 = vrot.slane %v5193_v0, 1  ;;  %v5191_v38 = vunpack.c.l.bf16 %v7527_v18 }
 0x15d   : > { %7031 = vmatmul.mubr.bf16.gmra.mrb[20].mxu0 %v9909_v50  ;;  %6839 = vmatmul.mubr.bf16.gmra.mrb[20].mxu1 %v5913_v8  ;;  %v2548_v14 = vsel %vm7644_vm2, %v2543_v4, %v2547_v13  ;;  %v7518_v8 = vld [vmem:[%s7616_s14 + $0x20] sm:$0x1]  ;;  %v5199_v50 = vunpack.c.l.bf16 %v7522_v1  ;;  %v9493_v4 = vrot.slane %v5196_v34, 1  ;;  %v5214_v13 = vunpack.c.l.bf16 %v9333_v52 }
 0x15e   : > { %7034 = vmatprep.mubr.bf16.mxu0 %v9910_v20  ;;  %6842 = vmatprep.mubr.bf16.mxu1 %v5914_v57  ;;  %v5917_v19 = vcombine.low %v2538_v60, %v2548_v14  ;;  %v5187_v57 = vunpack.c.l.bf16 %v7518_v8  ;;  %v7523_v20 = vld [vmem:[%s7616_s14 + $0x5c] sm:$0x1]  ;;  %v7525_v14 = vld [vmem:[%s7616_s14 + $0x18] sm:$0xf]  ;;  %v9506_v44 = vrot.slane %v5205_v29, 1  ;;  %v9508_v52 = vrot.slane %v5208_v16, 1 }
 0x15f   : > { %v5202_v59 = vunpack.c.l.bf16 %v7523_v20  ;;  %v9498_v51 = vrot.slane %v5199_v50, 1  ;;  %v7528_v8 = vld [vmem:[%s7616_s14 + $0x34] sm:$0xf]  ;;  %v5189_v0 = vunpack.c.l.bf16 %v7530_v30  ;;  %v9521_v63 = vrot.slane %v5214_v13, 1  ;;  %v7532_v16 = vld [vmem:[%s7616_s14 + $0x4c] sm:$0xf] }
 0x160   : > { %v5229_v1 = vunpack.c.l.bf16 %v9433_v37  ;;  %v5197_v29 = vunpack.c.l.bf16 %v7531_v25  ;;  %v7533_v13 = vld [vmem:[%s7616_s14 + $0x3c] sm:$0xf]  ;;  %v5294_v18 = vrot.slane %v5191_v38, 1  ;;  %v7535_v30 = vld [vmem:[%s7616_s14 + $0x60] sm:$0xf]  ;;  %v9549_v38 = vsel %vm5278_vm6, %v9476_v53, %v9480_v45 }
 0x161   : > { %v9500_v61 = vrot.slane %v5202_v59, 1  ;;  %v5203_v25 = vunpack.c.l.bf16 %v7535_v30  ;;  %v9564_v53 = vsel %vm5278_vm6, %v9480_v45, %v9485_v39  ;;  %v5210_v39 = vunpack.c.l.bf16 %v9244_v7 }
 0x165   : > { %7035 = vmatmul.mubr.bf16.gmra.mrb[24].mxu0 %v9911_v3  ;;  %6843 = vmatmul.mubr.bf16.gmra.mrb[24].mxu1 %v5915_v24  ;;  %v9487_v24 = vrot.slane %v5187_v57, 1  ;;  %v5217_v3 = vunpack.c.l.bf16 %v9348_v6  ;;  %v9510_v6 = vrot.slane %v5211_v42, 1  ;;  %v5192_v57 = vunpack.c.l.bf16 %v7528_v8 }
 0x166   : > { %7038 = vmatprep.mubr.bf16.mxu0 %v9912_v15  ;;  %6846 = vmatprep.mubr.bf16.mxu1 %v5916_v26  ;;  %v9489_v26 = vrot.slane %v5190_v21, 1  ;;  %v5220_v15 = vunpack.c.l.bf16 %v9360_v10  ;;  %v5223_v10 = vunpack.c.l.bf16 %v9408_v5  ;;  %v5188_v21 = vunpack.c.l.bf16 %v7529_v56 }
 0x167   : > { %v9523_v34 = vrot.slane %v5217_v3, 1  ;;  %v5198_v42 = vunpack.c.l.bf16 %v7532_v16  ;;  %v5194_v3 = vunpack.c.l.bf16 %v7533_v13  ;;  %v5295_v8 = vrot.slane %v5192_v57, 1  ;;  %v7536_v16 = vld [vmem:[%s7616_s14 + $0x64] sm:$0xf] }
 0x168   : > { %v9525_v5 = vrot.slane %v5220_v15, 1  ;;  %v5289_v37 = vrot.slane %v5188_v21, 1  ;;  %v5290_v56 = vrot.slane %v5189_v0, 1  ;;  %v5304_v57 = vrot.slane %v5197_v29, 1 }
 0x169   : > { %v5305_v21 = vrot.slane %v5198_v42, 1  ;;  %v9567_v29 = vsel %vm5278_vm6, %v5294_v18, %v5295_v8  ;;  %v5206_v18 = vunpack.c.l.bf16 %v9217_v12  ;;  %v5215_v12 = vunpack.c.l.bf16 %v9298_v17 }
 0x16a   : > { %v9570_v42 = vsel %vm5278_vm6, %v5289_v37, %v5290_v56  ;;  %v9581_v45 = vsel %vm5278_vm6, %v5290_v56, %v9489_v26  ;;  %v5207_v37 = vunpack.c.l.bf16 %v9238_v49  ;;  %v5216_v49 = vunpack.c.l.bf16 %v9310_v48  ;;  %v9605_v56 = vld [vmem:[%s9849_s2] ss:$0 sm:$0xff] }
 0x16b   : > { %v5325_v17 = vrot.slane %v5210_v39, 1 }
 0x16c   : > { %v5320_v48 = vrot.slane %v5207_v37, 1  ;;  %v5334_v37 = vrot.slane %v5215_v12, 1 }
 0x16d   : > { %7039 = vmatmul.mubr.bf16.gmra.mrb[28].mxu0 %v9913_v58  ;;  %6847 = vmatmul.mubr.bf16.gmra.mrb[28].mxu1 %v5917_v19  ;;  %v5185_v19 = vunpack.c.l.bf16 %v7525_v14  ;;  %v7526_v58 = vld [vmem:[%s7616_s14 + $0x1c] sm:$0xf]  ;;  %v9532_v14 = vrot.slane %v5223_v10, 1  ;;  %v5204_v10 = vunpack.c.l.bf16 %v7536_v16 }
 0x16e   : > { %v5186_v35 = vunpack.c.l.bf16 %v7526_v58  ;;  %v7534_v58 = vld [vmem:[%s7616_s14 + $0x40] sm:$0xf] }
 0x16f   : > { %v5284_v20 = vrot.slane %v5185_v19, 1  ;;  %v5195_v15 = vunpack.c.l.bf16 %v7534_v58  ;;  %v7537_v19 = vld [vmem:[%s7616_s14 + $0x54] sm:$0xf] }
 0x170   : > { %v5285_v59 = vrot.slane %v5186_v35, 1  ;;  %v9537_v35 = vrot.slane %v5229_v1, 1  ;;  %v5299_v1 = vrot.slane %v5194_v3, 1  ;;  %v5200_v30 = vunpack.c.l.bf16 %v7537_v19 }
 0x171   : > { %v5300_v58 = vrot.slane %v5195_v15, 1  ;;  %v9576_v15 = vsel %vm5278_vm6, %v5295_v8, %v9491_v40  ;;  %v5314_v19 = vrot.slane %v5203_v25, 1 }
 0x172   : > { %9914 = vst [vmem:[#allocation9_spill] sm:$0xff] %v9537_v35  ;;  %v9544_v13 = vsel %vm5278_vm6, %v5284_v20, %v5285_v59  ;;  %v7538_v35 = vld [vmem:[%s7616_s14 + $0x58] sm:$0xf]  ;;  %v9559_v20 = vsel %vm5278_vm6, %v5285_v59, %v9487_v24  ;;  %v5315_v24 = vrot.slane %v5204_v10, 1  ;;  %v5209_v59 = vunpack.c.l.bf16 %v9231_v11 }
 0x173   : > { %v5201_v16 = vunpack.c.l.bf16 %v7538_v35  ;;  %v9587_v35 = vsel %vm5278_vm6, %v5304_v57, %v5305_v21  ;;  %v9590_v40 = vsel %vm5278_vm6, %v5299_v1, %v5300_v58  ;;  %v5309_v8 = vrot.slane %v5200_v30, 1  ;;  %v9616_v30 = vld [vmem:[%s9850_s3] ss:$0 sm:$0xff] }
 0x174   : > { %v9594_v11 = vsel %vm5278_vm6, %v5305_v21, %v9498_v51  ;;  %v9598_v26 = vsel %vm5278_vm6, %v5300_v58, %v9493_v4  ;;  %v9608_v10 = vsel %vm5278_vm6, %v5314_v19, %v5315_v24  ;;  %v5324_v57 = vrot.slane %v5209_v59, 1 }
 0x175   : > { %v5310_v25 = vrot.slane %v5201_v16, 1  ;;  %v5212_v51 = vunpack.c.l.bf16 %v9263_v33  ;;  %v5213_v21 = vunpack.c.l.bf16 %v9292_v43  ;;  %v5319_v58 = vrot.slane %v5206_v18, 1 }
 0x176   : > { %v9624_v33 = vsel %vm5278_vm6, %v5315_v24, %v9506_v44 }
 0x177   : > { %v9620_v59 = vsel %vm5278_vm6, %v5309_v8, %v5310_v25  ;;  %v9628_v43 = vsel %vm5278_vm6, %v5310_v25, %v9500_v61  ;;  %v9634_v36 = vrot.slane %v5213_v21, 1  ;;  %v9639_v61 = vsel %vm5278_vm6, %v5324_v57, %v5325_v17 }
 0x178   : > { %v9642_v25 = vsel %vm5278_vm6, %v5319_v58, %v5320_v48 }
 0x1e8   : > { %v9453_v22 = vpop.f32.mrb[0].mxu1 }
 0x1e9   : > { %v9455_v41 = vpop.f32.mrb[1].mxu1 }
 0x1ea   : > { %v9457_v2 = vpop.f32.mrb[2].mxu1 }
 0x1eb   : > { %v9459_v23 = vpop.f32.mrb[3].mxu1 }
 0x1f0   : > { %v9462_v9 = vpop.f32.mrb[4].mxu1 }
 0x1f1   : > { %v9465_v27 = vpop.f32.mrb[5].mxu1 }
 0x1f2   : > { %v9471_v28 = vpop.f32.mrb[6].mxu1 }
 0x1f3   : > { %v9474_v32 = vpop.f32.mrb[7].mxu1 }
 0x1f8   : > { %v9502_v60 = vpop.f32.mrb[8].mxu1 }
 0x1f9   : > { %v9513_v46 = vpop.f32.mrb[9].mxu1 }
 0x1fa   : > { %v9515_v47 = vpop.f32.mrb[10].mxu1 }
 0x1fb   : > { %v9528_v50 = vpop.f32.mrb[11].mxu1 }
 0x200   : > { %v9541_v62 = vpop.f32.mrb[12].mxu1 }
 0x201   : > { %v9551_v0 = vpop.f32.mrb[13].mxu1 }
 0x202   : > { %v9555_v55 = vpop.f32.mrb[14].mxu1 }
 0x203   : > { %v9572_v3 = vpop.f32.mrb[15].mxu1 }
 0x208   : > { %v7012_v7 = vpop.f32.mrb[0].mxu0 }
 0x209   : > { %v7058_v4 = vadd.f32 %v7012_v7, %v9453_v22  ;;  %v4849_v1 = vpop.f32.mrb[1].mxu0  ;;  %v5335_v7 = vrot.slane %v5216_v49, 1  ;;  %v9652_v49 = vsel %vm5278_vm6, %v5320_v48, %v9508_v52 }
 0x20a   : > { %v7059_v16 = vadd.f32 %v4849_v1, %v9455_v41  ;;  %v7013_v19 = vpop.f32.mrb[2].mxu0  ;;  %v5329_v1 = vrot.slane %v5212_v51, 1 }
 0x20b   : > { %v5017_v22 = vmul.f32 %v7058_v4, %v9605_v56  ;;  %v7060_v39 = vadd.f32 %v7013_v19, %v9457_v2  ;;  %v4852_v18 = vpop.f32.mrb[3].mxu0  ;;  %v9656_v21 = vsel %vm5278_vm6, %v5334_v37, %v5335_v7 }
 0x20c   : > { %v5015_v41 = vmul.f32 %v7059_v16, %v9605_v56  ;;  %v7061_v8 = vadd.f32 %v4852_v18, %v9459_v23  ;;  %v9648_v23 = vsel %vm5278_vm6, %v5325_v17, %v9510_v6  ;;  %v9661_v6 = vsel %vm5278_vm6, %v5329_v1, %v9634_v36 }
 0x20d   : > { %v5056_v44 = vadd.f32 %v9616_v30, %v5017_v22  ;;  %v5018_v24 = vmul.f32 %v7060_v39, %v9605_v56 }
 0x20e   : > { %v5054_v2 = vadd.f32 %v9616_v30, %v5015_v41  ;;  %v5016_v12 = vmul.f32 %v7061_v8, %v9605_v56 }
 0x20f   : > { %vm5088_vm7 = vcmp.ge.f32.partialorder %v5056_v44, 0.0  ;;  %v5120_v51 = vmul.f32 0.01, %v5056_v44  ;;  %v5057_v57 = vadd.f32 %v9616_v30, %v5018_v24 }
 0x210   : > { %vm5086_vm8 = vcmp.ge.f32.partialorder %v5054_v2, 0.0  ;;  %v5118_v4 = vmul.f32 0.01, %v5054_v2  ;;  %v5055_v58 = vadd.f32 %v9616_v30, %v5016_v12  ;;  %v7016_v16 = vpop.f32.mrb[4].mxu0 }
 0x211   : > { %v5152_v17 = vsel %vm5088_vm7, %v5056_v44, %v5120_v51  ;;  %vm5089_vm9 = vcmp.ge.f32.partialorder %v5057_v57, 0.0  ;;  %v5121_v52 = vmul.f32 0.01, %v5057_v57  ;;  %v7062_v48 = vadd.f32 %v7016_v16, %v9462_v9  ;;  %v4865_v19 = vpop.f32.mrb[5].mxu0 }
 0x212   : > { %v5393_v22 = vadd.f32 %v9544_v13, %v5152_v17  ;;  %v5150_v39 = vsel %vm5086_vm8, %v5054_v2, %v5118_v4  ;;  %vm5087_vm10 = vcmp.ge.f32.partialorder %v5055_v58, 0.0  ;;  %v5119_v18 = vmul.f32 0.01, %v5055_v58  ;;  %v7017_v37 = vpop.f32.mrb[6].mxu0 }
 0x213   : > { %v5391_v41 = vadd.f32 %v9549_v38, %v5150_v39  ;;  %v5153_v8 = vsel %vm5089_vm9, %v5057_v57, %v5121_v52  ;;  %v5021_v24 = vmul.f32 %v7062_v48, %v9605_v56  ;;  %v7063_v1 = vadd.f32 %v4865_v19, %v9465_v27  ;;  %v4868_v44 = vpop.f32.mrb[7].mxu0 }
 0x214   : > { %v5394_v12 = vadd.f32 %v9559_v20, %v5153_v8  ;;  %v5151_v51 = vsel %vm5087_vm10, %v5055_v58, %v5119_v18  ;;  %v7064_v9 = vadd.f32 %v7017_v37, %v9471_v28  ;;  %v7065_v13 = vadd.f32 %v4868_v44, %v9474_v32  ;;  %v9916_v8 = vld [vmem:[#allocation3_spill] sm:$0xff] }
 0x215   : > { %v5392_v38 = vadd.f32 %v9564_v53, %v5151_v51  ;;  %v5060_v2 = vadd.f32 %v9616_v30, %v5021_v24  ;;  %v5019_v27 = vmul.f32 %v7063_v1, %v9605_v56  ;;  %v9682_v20 = vsel %vm5278_vm6, %v5335_v7, %v9523_v34  ;;  %v9915_v7 = vld [vmem:[#allocation2_spill] sm:$0xff] }
 0x216   : > { %v6307_v28 = vpack.c.bf16 %v5394_v12, %v5393_v22  ;;  %v5022_v32 = vmul.f32 %v7064_v9, %v9605_v56  ;;  %v5020_v57 = vmul.f32 %v7065_v13, %v9605_v56  ;;  %v5221_v4 = vunpack.c.l.bf16 %v9352_v31 }
 0x217   : > { %v6302_v58 = vpack.c.bf16 %v5392_v38, %v5391_v41  ;;  %vm5092_vm11 = vcmp.ge.f32.partialorder %v5060_v2, 0.0  ;;  %v5124_v16 = vmul.f32 0.01, %v5060_v2  ;;  %v5058_v53 = vadd.f32 %v9616_v30, %v5019_v27 }
 0x218   : > { %6379 = vst [vmem:[%s9675_s24 + $0x8] sm:$0xff] %v6307_v28   ;;  %v5061_v17 = vadd.f32 %v9616_v30, %v5022_v32  ;;  %v5059_v52 = vadd.f32 %v9616_v30, %v5020_v57  ;;  %v7020_v48 = vpop.f32.mrb[8].mxu0  ;;  %v5222_v34 = vunpack.c.l.bf16 %v9372_v54  ;;  %v5218_v19 = vunpack.c.l.bf16 %v9915_v7 }
 0x219   : > { %6303 = vst [vmem:[%s9675_s24] sm:$0xff] %v6302_v58   ;;  %v5156_v22 = vsel %vm5092_vm11, %v5060_v2, %v5124_v16  ;;  %vm5090_vm12 = vcmp.ge.f32.partialorder %v5058_v53, 0.0  ;;  %v5122_v39 = vmul.f32 0.01, %v5058_v53  ;;  %v7066_v31 = vadd.f32 %v7020_v48, %v9502_v60  ;;  %v4881_v18 = vpop.f32.mrb[9].mxu0 }
 0x21a   : > { %vm5093_vm13 = vcmp.ge.f32.partialorder %v5061_v17, 0.0  ;;  %v5125_v37 = vmul.f32 0.01, %v5061_v17  ;;  %vm5091_vm14 = vcmp.ge.f32.partialorder %v5059_v52, 0.0  ;;  %v7021_v41 = vpop.f32.mrb[10].mxu0  ;;  %v5219_v24 = vunpack.c.l.bf16 %v9916_v8 }
 0x21b   : > { %v5154_v1 = vsel %vm5090_vm12, %v5058_v53, %v5122_v39  ;;  %v5123_v44 = vmul.f32 0.01, %v5059_v52  ;;  %v5025_v12 = vmul.f32 %v7066_v31, %v9605_v56  ;;  %v7067_v54 = vadd.f32 %v4881_v18, %v9513_v46  ;;  %v4884_v51 = vpop.f32.mrb[11].mxu0 }
 0x21c   : > { %v5397_v9 = vadd.f32 %v9567_v29, %v5156_v22  ;;  %v5157_v13 = vsel %vm5093_vm13, %v5061_v17, %v5125_v37  ;;  %v7068_v38 = vadd.f32 %v7021_v41, %v9515_v47  ;;  %v7069_v60 = vadd.f32 %v4884_v51, %v9528_v50 }
 0x21d   : > { %v5398_v2 = vadd.f32 %v9576_v15, %v5157_v13  ;;  %v5155_v27 = vsel %vm5091_vm14, %v5059_v52, %v5123_v44  ;;  %v5064_v28 = vadd.f32 %v9616_v30, %v5025_v12  ;;  %v5023_v32 = vmul.f32 %v7067_v54, %v9605_v56 }
 0x21e   : > { %v5395_v57 = vadd.f32 %v9570_v42, %v5154_v1  ;;  %v5396_v46 = vadd.f32 %v9581_v45, %v5155_v27  ;;  %v5026_v58 = vmul.f32 %v7068_v38, %v9605_v56  ;;  %v5024_v29 = vmul.f32 %v7069_v60, %v9605_v56 }
 0x21f   : > { %v6317_v47 = vpack.c.bf16 %v5398_v2, %v5397_v9  ;;  %vm5096_vm15 = vcmp.ge.f32.partialorder %v5064_v28, 0.0  ;;  %v5128_v50 = vmul.f32 0.01, %v5064_v28  ;;  %v5062_v15 = vadd.f32 %v9616_v30, %v5023_v32 }
 0x220   : > { %v6312_v16 = vpack.c.bf16 %v5396_v46, %v5395_v57  ;;  %v5065_v53 = vadd.f32 %v9616_v30, %v5026_v58  ;;  %v5063_v17 = vadd.f32 %v9616_v30, %v5024_v29  ;;  %v7024_v52 = vpop.f32.mrb[12].mxu0  ;;  %v9711_v48 = vrot.slane %v5221_v4, 1 }
 0x221   : > { %6381 = vst [vmem:[%s9675_s24 + $0x18] sm:$0xff] %v6317_v47   ;;  %v5160_v42 = vsel %vm5096_vm15, %v5064_v28, %v5128_v50  ;;  %vm5094_vm0 = vcmp.ge.f32.partialorder %v5062_v15, 0.0  ;;  %v5126_v45 = vmul.f32 0.01, %v5062_v15  ;;  %v7070_v22 = vadd.f32 %v7024_v52, %v9541_v62  ;;  %v4897_v39 = vpop.f32.mrb[13].mxu0 }
 0x222   : > { %6380 = vst [vmem:[%s9675_s24 + $0x10] sm:$0xff] %v6312_v16   ;;  %vm5097_vm1 = vcmp.ge.f32.partialorder %v5065_v53, 0.0  ;;  %v5129_v31 = vmul.f32 0.01, %v5065_v53  ;;  %vm5095_vm2 = vcmp.ge.f32.partialorder %v5063_v17, 0.0  ;;  %v7025_v18 = vpop.f32.mrb[14].mxu0  ;;  %v7071_v4 = vadd.f32 %v4897_v39, %v9551_v0 }
 0x223   : > { %v9716_v37 = vrot.slane %v5222_v34, 1  ;;  %v5158_v41 = vsel %vm5094_vm0, %v5062_v15, %v5126_v45  ;;  %v5127_v1 = vmul.f32 0.01, %v5063_v17  ;;  %v5029_v44 = vmul.f32 %v7070_v22, %v9605_v56  ;;  %v4900_v12 = vpop.f32.mrb[15].mxu0 }
 0x224   : > { %v5401_v54 = vadd.f32 %v9587_v35, %v5160_v42  ;;  %v5161_v51 = vsel %vm5097_vm1, %v5065_v53, %v5129_v31  ;;  %v7072_v62 = vadd.f32 %v7025_v18, %v9555_v55  ;;  %v7073_v9 = vadd.f32 %v4900_v12, %v9572_v3 }
 0x225   : > { %v5402_v13 = vadd.f32 %v9594_v11, %v5161_v51  ;;  %v5159_v38 = vsel %vm5095_vm2, %v5063_v17, %v5127_v1  ;;  %v5068_v34 = vadd.f32 %v9616_v30, %v5029_v44  ;;  %v5027_v60 = vmul.f32 %v7071_v4, %v9605_v56 }
 0x226   : > { %v5399_v2 = vadd.f32 %v9590_v40, %v5158_v41  ;;  %v5400_v0 = vadd.f32 %v9598_v26, %v5159_v38  ;;  %v5030_v27 = vmul.f32 %v7072_v62, %v9605_v56  ;;  %v5028_v35 = vmul.f32 %v7073_v9, %v9605_v56 }
 0x227   : > { %v6327_v28 = vpack.c.bf16 %v5402_v13, %v5401_v54  ;;  %vm5100_vm3 = vcmp.ge.f32.partialorder %v5068_v34, 0.0  ;;  %v5132_v55 = vmul.f32 0.01, %v5068_v34  ;;  %v5066_v3 = vadd.f32 %v9616_v30, %v5027_v60 }
 0x228   : > { %v6322_v11 = vpack.c.bf16 %v5400_v0, %v5399_v2  ;;  %v5069_v32 = vadd.f32 %v9616_v30, %v5030_v27  ;;  %v5067_v57 = vadd.f32 %v9616_v30, %v5028_v35  ;;  %v7028_v46 = vpop.f32.mrb[16].mxu0  ;;  %v5339_v40 = vrot.slane %v5218_v19, 1  ;;  %v6836_v29 = vpop.f32.mrb[16].mxu1 }
 0x229   : > { %6383 = vst [vmem:[%s9675_s24 + $0x28] sm:$0xff] %v6327_v28   ;;  %v5164_v26 = vsel %vm5100_vm3, %v5068_v34, %v5132_v55  ;;  %vm5098_vm4 = vcmp.ge.f32.partialorder %v5066_v3, 0.0  ;;  %v5130_v58 = vmul.f32 0.01, %v5066_v3  ;;  %v4913_v47 = vpop.f32.mrb[17].mxu0  ;;  %v5340_v50 = vrot.slane %v5219_v24, 1 }
 0x22a   : > { %6382 = vst [vmem:[%s9675_s24 + $0x20] sm:$0xff] %v6322_v11   ;;  %vm5101_vm5 = vcmp.ge.f32.partialorder %v5069_v32, 0.0  ;;  %v5133_v15 = vmul.f32 0.01, %v5069_v32  ;;  %vm5099_vm7 = vcmp.ge.f32.partialorder %v5067_v57, 0.0  ;;  %v2776_v16 = vpop.f32.mrb[17].mxu1  ;;  %v9742_v7 = vsel %vm5278_vm6, %v9634_v36, %v9521_v63 }
 0x22b   : > { %v7029_v53 = vpop.f32.mrb[18].mxu0  ;;  %v5162_v19 = vsel %vm5098_vm4, %v5066_v3, %v5130_v58  ;;  %v5131_v17 = vmul.f32 0.01, %v5067_v57  ;;  %v7074_v52 = vadd.f32 %v7028_v46, %v6836_v29  ;;  %v7075_v42 = vadd.f32 %v4913_v47, %v2776_v16  ;;  %v6837_v45 = vpop.f32.mrb[18].mxu1  ;;  %v9917_v3 = vld [vmem:[#allocation6_spill] sm:$0xff] }
 0x22c   : > { %v4916_v22 = vpop.f32.mrb[19].mxu0  ;;  %v5405_v8 = vadd.f32 %v9608_v10, %v5164_v26  ;;  %v5165_v24 = vsel %vm5101_vm5, %v5069_v32, %v5133_v15  ;;  %v7076_v39 = vadd.f32 %v7029_v53, %v6837_v45  ;;  %v2779_v31 = vpop.f32.mrb[19].mxu1  ;;  %v9748_v18 = vsel %vm5278_vm6, %v9711_v48, %v9716_v37  ;;  %v9918_v32 = vld [vmem:[#allocation7_spill] sm:$0xff] }
 0x22d   : > { %v5406_v41 = vadd.f32 %v9624_v33, %v5165_v24  ;;  %v5163_v36 = vsel %vm5099_vm7, %v5067_v57, %v5131_v17  ;;  %v5033_v63 = vmul.f32 %v7074_v52, %v9605_v56  ;;  %v5031_v1 = vmul.f32 %v7075_v42, %v9605_v56  ;;  %v9919_v17 = vld [vmem:[#allocation4_spill] sm:$0xff]  ;;  %v9920_v42 = vld [vmem:[#allocation5_spill] sm:$0xff] }
 0x22e   : > { %v5403_v44 = vadd.f32 %v9620_v59, %v5162_v19  ;;  %v5404_v10 = vadd.f32 %v9628_v43, %v5163_v36  ;;  %v5034_v4 = vmul.f32 %v7076_v39, %v9605_v56  ;;  %v7077_v12 = vadd.f32 %v4916_v22, %v2779_v31 }
 0x22f   : > { %v6337_v54 = vpack.c.bf16 %v5406_v41, %v5405_v8  ;;  %v5072_v48 = vadd.f32 %v9616_v30, %v5033_v63  ;;  %v5070_v33 = vadd.f32 %v9616_v30, %v5031_v1  ;;  %v9760_v51 = vsel %vm5278_vm6, %v5339_v40, %v5340_v50 }
 0x230   : > { %v6332_v62 = vpack.c.bf16 %v5404_v10, %v5403_v44  ;;  %v5073_v9 = vadd.f32 %v9616_v30, %v5034_v4  ;;  %v5032_v13 = vmul.f32 %v7077_v12, %v9605_v56  ;;  %v7032_v59 = vpop.f32.mrb[20].mxu0  ;;  %v9767_v43 = vsel %vm5278_vm6, %v9716_v37, %v9532_v14  ;;  %v6840_v0 = vpop.f32.mrb[20].mxu1 }
 0x231   : > { %6385 = vst [vmem:[%s9675_s24 + $0x38] sm:$0xff] %v6337_v54   ;;  %vm5104_vm8 = vcmp.ge.f32.partialorder %v5072_v48, 0.0  ;;  %v5136_v38 = vmul.f32 0.01, %v5072_v48  ;;  %vm5102_vm9 = vcmp.ge.f32.partialorder %v5070_v33, 0.0  ;;  %v4929_v27 = vpop.f32.mrb[21].mxu0  ;;  %v9774_v35 = vsel %vm5278_vm6, %v5340_v50, %v9525_v5 }
 0x232   : > { %v5134_v34 = vmul.f32 0.01, %v5070_v33  ;;  %6384 = vst [vmem:[%s9675_s24 + $0x30] sm:$0xff] %v6332_v62   ;;  %vm5105_vm10 = vcmp.ge.f32.partialorder %v5073_v9, 0.0  ;;  %v5137_v60 = vmul.f32 0.01, %v5073_v9  ;;  %v5071_v2 = vadd.f32 %v9616_v30, %v5032_v13 }
 0x233   : > { %v5168_v28 = vsel %vm5104_vm8, %v5072_v48, %v5136_v38  ;;  %v7078_v55 = vadd.f32 %v7032_v59, %v6840_v0  ;;  %v2792_v14 = vpop.f32.mrb[21].mxu1  ;;  %v7033_v37 = vpop.f32.mrb[22].mxu0  ;;  %v5227_v11 = vunpack.c.l.bf16 %v9917_v3  ;;  %v5228_v57 = vunpack.c.l.bf16 %v9918_v32 }
 0x234   : > { %v5409_v46 = vadd.f32 %v9639_v61, %v5168_v28  ;;  %v5166_v40 = vsel %vm5102_vm9, %v5070_v33, %v5134_v34  ;;  %v5169_v26 = vsel %vm5105_vm10, %v5073_v9, %v5137_v60  ;;  %vm5103_vm11 = vcmp.ge.f32.partialorder %v5071_v2, 0.0  ;;  %v6841_v58 = vpop.f32.mrb[22].mxu1  ;;  %v4932_v29 = vpop.f32.mrb[23].mxu0 }
 0x235   : > { %v5410_v47 = vadd.f32 %v9648_v23, %v5169_v26  ;;  %v5135_v5 = vmul.f32 0.01, %v5071_v2  ;;  %v5037_v50 = vmul.f32 %v7078_v55, %v9605_v56  ;;  %v7079_v15 = vadd.f32 %v4929_v27, %v2792_v14  ;;  %v2795_v16 = vpop.f32.mrb[23].mxu1 }
 0x236   : > { %v7080_v53 = vadd.f32 %v7033_v37, %v6841_v58  ;;  %v7081_v19 = vadd.f32 %v4932_v29, %v2795_v16  ;;  %v5224_v52 = vunpack.c.l.bf16 %v9919_v17  ;;  %v5225_v61 = vunpack.c.l.bf16 %v9920_v42 }
 0x237   : > { %v6347_v45 = vpack.c.bf16 %v5410_v47, %v5409_v46  ;;  %v5167_v22 = vsel %vm5103_vm11, %v5071_v2, %v5135_v5  ;;  %v5076_v8 = vadd.f32 %v9616_v30, %v5037_v50  ;;  %v5035_v24 = vmul.f32 %v7079_v15, %v9605_v56 }
 0x238   : > { %v5407_v23 = vadd.f32 %v9642_v25, %v5166_v40  ;;  %v5408_v39 = vadd.f32 %v9652_v49, %v5167_v22  ;;  %v5038_v31 = vmul.f32 %v7080_v53, %v9605_v56  ;;  %v5036_v41 = vmul.f32 %v7081_v19, %v9605_v56  ;;  %v7036_v36 = vpop.f32.mrb[24].mxu0  ;;  %v6844_v44 = vpop.f32.mrb[24].mxu1 }
 0x239   : > { %6387 = vst [vmem:[%s9675_s24 + $0x48] sm:$0xff] %v6347_v45   ;;  %vm5108_vm12 = vcmp.ge.f32.partialorder %v5076_v8, 0.0  ;;  %v5140_v63 = vmul.f32 0.01, %v5076_v8  ;;  %v5074_v1 = vadd.f32 %v9616_v30, %v5035_v24  ;;  %v4945_v10 = vpop.f32.mrb[25].mxu0  ;;  %v9792_v4 = vrot.slane %v5227_v11, 1 }
 0x23a   : > { %v6342_v12 = vpack.c.bf16 %v5408_v39, %v5407_v23  ;;  %v5077_v25 = vadd.f32 %v9616_v30, %v5038_v31  ;;  %v5075_v49 = vadd.f32 %v9616_v30, %v5036_v41  ;;  %v7082_v54 = vadd.f32 %v7036_v36, %v6844_v44  ;;  %v2808_v48 = vpop.f32.mrb[25].mxu1  ;;  %v7037_v33 = vpop.f32.mrb[26].mxu0 }
 0x23b   : > { %v5172_v62 = vsel %vm5108_vm12, %v5076_v8, %v5140_v63  ;;  %vm5106_vm13 = vcmp.ge.f32.partialorder %v5074_v1, 0.0  ;;  %v5138_v9 = vmul.f32 0.01, %v5074_v1  ;;  %v7083_v13 = vadd.f32 %v4945_v10, %v2808_v48  ;;  %v6845_v59 = vpop.f32.mrb[26].mxu1  ;;  %v4948_v38 = vpop.f32.mrb[27].mxu0 }
 0x23c   : > { %6386 = vst [vmem:[%s9675_s24 + $0x40] sm:$0xff] %v6342_v12   ;;  %vm5109_vm14 = vcmp.ge.f32.partialorder %v5077_v25, 0.0  ;;  %v5141_v34 = vmul.f32 0.01, %v5077_v25  ;;  %vm5107_vm15 = vcmp.ge.f32.partialorder %v5075_v49, 0.0  ;;  %v2811_v60 = vpop.f32.mrb[27].mxu1  ;;  %v5041_v28 = vmul.f32 %v7082_v54, %v9605_v56 }
 0x23d   : > { %v9797_v2 = vrot.slane %v5228_v57, 1  ;;  %v5170_v0 = vsel %vm5106_vm13, %v5074_v1, %v5138_v9  ;;  %v5139_v27 = vmul.f32 0.01, %v5075_v49  ;;  %v5039_v55 = vmul.f32 %v7083_v13, %v9605_v56  ;;  %v9921_v13 = vld [vmem:[#allocation8_spill] sm:$0xff] }
 0x23e   : > { %v5413_v14 = vadd.f32 %v9656_v21, %v5172_v62  ;;  %v5173_v37 = vsel %vm5109_vm14, %v5077_v25, %v5141_v34  ;;  %v7084_v3 = vadd.f32 %v7037_v33, %v6845_v59  ;;  %v7085_v11 = vadd.f32 %v4948_v38, %v2811_v60 }
 0x23f   : > { %v5414_v32 = vadd.f32 %v9682_v20, %v5173_v37  ;;  %v5171_v46 = vsel %vm5107_vm15, %v5075_v49, %v5139_v27  ;;  %v5080_v40 = vadd.f32 %v9616_v30, %v5041_v28  ;;  %v5078_v26 = vadd.f32 %v9616_v30, %v5039_v55 }
 0x240   : > { %v5411_v57 = vadd.f32 %v9661_v6, %v5170_v0  ;;  %v5412_v58 = vadd.f32 %v9742_v7, %v5171_v46  ;;  %v5042_v29 = vmul.f32 %v7084_v3, %v9605_v56  ;;  %v5040_v47 = vmul.f32 %v7085_v11, %v9605_v56  ;;  %v7040_v21 = vpop.f32.mrb[28].mxu0  ;;  %v6848_v20 = vpop.f32.mrb[28].mxu1 }
 0x241   : > { %v6357_v5 = vpack.c.bf16 %v5414_v32, %v5413_v14  ;;  %vm5112_vm0 = vcmp.ge.f32.partialorder %v5080_v40, 0.0  ;;  %v5144_v50 = vmul.f32 0.01, %v5080_v40  ;;  %vm5110_vm1 = vcmp.ge.f32.partialorder %v5078_v26, 0.0  ;;  %v4961_v15 = vpop.f32.mrb[29].mxu0  ;;  %v2824_v7 = vpop.f32.mrb[29].mxu1 }
 0x242   : > { %v6352_v16 = vpack.c.bf16 %v5412_v58, %v5411_v57  ;;  %v5142_v53 = vmul.f32 0.01, %v5078_v26  ;;  %v5081_v19 = vadd.f32 %v9616_v30, %v5042_v29  ;;  %v5079_v6 = vadd.f32 %v9616_v30, %v5040_v47  ;;  %v7041_v45 = vpop.f32.mrb[30].mxu0  ;;  %v6849_v39 = vpop.f32.mrb[30].mxu1  ;;  %v9923_v14 = vld [vmem:[#allocation9_spill] sm:$0xff] }
 0x243   : > { %6389 = vst [vmem:[%s9675_s24 + $0x58] sm:$0xff] %v6357_v5   ;;  %v5176_v22 = vsel %vm5112_vm0, %v5080_v40, %v5144_v50  ;;  %v7086_v8 = vadd.f32 %v7040_v21, %v6848_v20  ;;  %v7087_v24 = vadd.f32 %v4961_v15, %v2824_v7  ;;  %v5349_v23 = vrot.slane %v5224_v52, 1  ;;  %v4964_v31 = vpop.f32.mrb[31].mxu0  ;;  %v2827_v1 = vpop.f32.mrb[31].mxu1 }
 0x244   : > { %6388 = vst [vmem:[%s9675_s24 + $0x50] sm:$0xff] %v6352_v16   ;;  %v5174_v41 = vsel %vm5110_vm1, %v5078_v26, %v5142_v53  ;;  %vm5113_vm2 = vcmp.ge.f32.partialorder %v5081_v19, 0.0  ;;  %v5145_v36 = vmul.f32 0.01, %v5081_v19  ;;  %v5350_v63 = vrot.slane %v5225_v61, 1 }
 0x245   : > { %v5417_v44 = vadd.f32 %v9748_v18, %v5176_v22  ;;  %vm5111_vm3 = vcmp.ge.f32.partialorder %v5079_v6, 0.0  ;;  %v5143_v10 = vmul.f32 0.01, %v5079_v6  ;;  %v5045_v12 = vmul.f32 %v7086_v8, %v9605_v56 }
 0x246   : > { %v5177_v25 = vsel %vm5113_vm2, %v5081_v19, %v5145_v36  ;;  %v5043_v17 = vmul.f32 %v7087_v24, %v9605_v56  ;;  %v7088_v52 = vadd.f32 %v7041_v45, %v6849_v39  ;;  %v7089_v49 = vadd.f32 %v4964_v31, %v2827_v1 }
 0x247   : > { %v5415_v54 = vadd.f32 %v9760_v51, %v5174_v41  ;;  %v5418_v48 = vadd.f32 %v9767_v43, %v5177_v25  ;;  %v5175_v33 = vsel %vm5111_vm3, %v5079_v6, %v5143_v10  ;;  %v5084_v42 = vadd.f32 %v9616_v30, %v5045_v12 }
 0x248   : > { %v5416_v61 = vadd.f32 %v9774_v35, %v5175_v33  ;;  %v5082_v18 = vadd.f32 %v9616_v30, %v5043_v17  ;;  %v5046_v62 = vmul.f32 %v7088_v52, %v9605_v56  ;;  %v5044_v9 = vmul.f32 %v7089_v49, %v9605_v56 }
 0x249   : > { %v9922_v59 = vunpack.c.l.bf16 %v9921_v13  ;;  %v6367_v34 = vpack.c.bf16 %v5418_v48, %v5417_v44  ;;  %vm5116_vm4 = vcmp.ge.f32.partialorder %v5084_v42, 0.0  ;;  %v5148_v51 = vmul.f32 0.01, %v5084_v42 }
 0x24a   : > { %v6362_v60 = vpack.c.bf16 %v5416_v61, %v5415_v54  ;;  %vm5114_vm5 = vcmp.ge.f32.partialorder %v5082_v18, 0.0  ;;  %v5146_v43 = vmul.f32 0.01, %v5082_v18  ;;  %v5085_v0 = vadd.f32 %v9616_v30, %v5046_v62 }
 0x24b   : > { %v5352_v38 = vrot.slane %v9922_v59, 1  ;;  %6391 = vst [vmem:[%s9675_s24 + $0x68] sm:$0xff] %v6367_v34   ;;  %v5356_v35 = vsel %vm5278_vm6, %v9792_v4, %v9797_v2  ;;  %v5351_v27 = vsel %vm5278_vm6, %v5349_v23, %v5350_v63  ;;  %v5083_v56 = vadd.f32 %v9616_v30, %v5044_v9 }
 0x24c   : > { %6390 = vst [vmem:[%s9675_s24 + $0x60] sm:$0xff] %v6362_v60   ;;  %v5180_v28 = vsel %vm5116_vm4, %v5084_v42, %v5148_v51  ;;  %vm5117_vm7 = vcmp.ge.f32.partialorder %v5085_v0, 0.0  ;;  %v5149_v55 = vmul.f32 0.01, %v5085_v0  ;;  %v5358_v37 = vsel %vm5278_vm6, %v9797_v2, %v9923_v14 }
 0x24d   : > { %v5178_v3 = vsel %vm5114_vm5, %v5082_v18, %v5146_v43  ;;  %vm5115_vm8 = vcmp.ge.f32.partialorder %v5083_v56, 0.0  ;;  %v5147_v11 = vmul.f32 0.01, %v5083_v56  ;;  %v5353_v32 = vsel %vm5278_vm6, %v5350_v63, %v5352_v38 }
 0x24e   : > { %v5181_v4 = vsel %vm5117_vm7, %v5085_v0, %v5149_v55  ;;  %v5421_v46 = vadd.f32 %v5356_v35, %v5180_v28  ;;  %v5419_v30 = vadd.f32 %v5351_v27, %v5178_v3 }
 0x24f   : > { %v5422_v40 = vadd.f32 %v5358_v37, %v5181_v4  ;;  %v5179_v26 = vsel %vm5115_vm8, %v5083_v56, %v5147_v11 }
 0x250   : > { %v5420_v57 = vadd.f32 %v5353_v32, %v5179_v26 }
 0x251   : > { %v6377_v58 = vpack.c.bf16 %v5422_v40, %v5421_v46 }
 0x252   : > { %v6372_v29 = vpack.c.bf16 %v5420_v57, %v5419_v30 }
 0x253   : > { %6393 = vst [vmem:[%s9675_s24 + $0x78] sm:$0xff] %v6377_v58  }
 0x254   : > { %6392 = vst [vmem:[%s9675_s24 + $0x70] sm:$0xff] %v6372_v29  }
 0x255 PF: > { %s14_s15 = sadd.s32 1, %s7545_s15  }
 0x256   : > { %p11_p4 = scmp.ge.s32.totalorder %s14_s15, 4  }
 0x258   :  { %13 = sbr.rel (!%p11_p4) target bundleno = 1 (0x1), region = 76 }

</bundles_post_ra>
